<compile_context>
chip_gen: v6e
topology: v6e:2x2x1
jax: 0.10.0
libtpu: 0.0.40
codegen_flags: <defaults>
</compile_context>

<pallas_src>
from functools import partial

import numpy as np
import jax
import jax.numpy as jnp
from jax import lax
from jax.experimental import pallas as pl
from jax.experimental.pallas import tpu as pltpu

# ----------------------------- configuration --------------------------------
TEMPERATURE = 0.1
LENGTHS = (3, 5)             # images per street (static, like `length`)
N_IMAGES = sum(LENGTHS)      # images per street-batch (= per forward call)
C, H, W = 3, 16, 16          # C*H*W == 768 == sv_encoder output dim
ENC_DIM = C * H * W
PROJ_HID = 256
PROJ_OUT = 256


# ----------------------------- fused Pallas kernel ---------------------------
def fused_image_model_kernel(x_ref, we_ref, be_ref, w1_ref, b1_ref,
                             w2_ref, b2_ref, o_ref, *, lengths, temperature):
    """encoder (Linear 768->768) + projector MLP + street-mean + InfoNCE.

    Processes S = M // N independent street-batches per grid step so the MXU
    sees M rows at once.  Weights arrive in bf16; activations are cast to bf16
    only at the MXU inputs, accumulation and all elementwise math stay f32
    (v5e has no bf16 VPU/EUP).
    """
    n = sum(lengths)                       # images per street-batch
    m = x_ref.shape[0]                     # rows handled this grid step
    s = m // n                             # street-batches this grid step
    n2 = 2 * n
    inv_t = jnp.float32(1.0 / temperature)

    # ---- sv_encoder stand-in + projector_sv: one big matmul chain ----------
    x = x_ref[...]                                                   # (M,768) f32
    h = jnp.dot(x.astype(jnp.bfloat16), we_ref[...],
                preferred_element_type=jnp.float32) + be_ref[...]    # (M,768) f32
    h1 = jnp.maximum(
        jnp.dot(h.astype(jnp.bfloat16), w1_ref[...],
                preferred_element_type=jnp.float32) + b1_ref[...], 0.0)
    f = jnp.dot(h1.astype(jnp.bfloat16), w2_ref[...],
                preferred_element_type=jnp.float32) + b2_ref[...]    # (M,256) f32

    d = f.shape[1]
    f3 = f.reshape(s, n, d)                                          # (S,N,D)

    # ---- per-street mean + repeat_interleave (exact f32, masks only) -------
    ridx = lax.broadcasted_iota(jnp.int32, (s, n, d), 1)             # row-in-batch
    ctx3 = jnp.zeros_like(f3)
    off = 0
    for ln in lengths:                                               # static loop
        msk = (ridx >= off) & (ridx < off + ln)
        seg_mean = jnp.sum(jnp.where(msk, f3, 0.0), axis=1,
                           keepdims=True) * jnp.float32(1.0 / ln)    # (S,1,D) f32
        ctx3 = jnp.where(msk, jnp.broadcast_to(seg_mean, f3.shape), ctx3)
        off += ln

    # ---- InfoNCE (batched over the S street-batches) ------------------------
    # F.normalize(p=2, dim=1): v / max(||v||,1e-12) == v * rsqrt(max(||v||^2,1e-24))
    eps2 = jnp.float32(1e-24)
    f_n = f3 * lax.rsqrt(jnp.maximum(jnp.sum(f3 * f3, axis=2, keepdims=True), eps2))
    c_n = ctx3 * lax.rsqrt(jnp.maximum(jnp.sum(ctx3 * ctx3, axis=2, keepdims=True), eps2))

    reps = jnp.concatenate([f_n, c_n], axis=1)                       # (S,2N,D)
    # cosine-sim of unit rows; kept f32 (exp(sim/T) with T=0.1 amplifies error).
    sim = jnp.einsum('bqd,bkd->bqk', reps, reps,
                     preferred_element_type=jnp.float32)             # (S,2N,2N)

    # positives[i] = sim[i, (i+N) mod 2N]; sim is symmetric, so
    # sum_i positives_i == 2 * sum_r f_n[r].c_n[r]  (no mask/diag needed).
    pos = jnp.sum(f_n * c_n, axis=2)                                 # (S,N)

    # denominator_i = sum_{j != i} exp(sim[i,j]/T)
    # NOTE: no log-sum-exp shift needed: sim in [-1,1], T=0.1 -> exp <= e^10.
    r2 = lax.broadcasted_iota(jnp.int32, (s, n2, n2), 1)
    c2 = lax.broadcasted_iota(jnp.int32, (s, n2, n2), 2)
    denom = jnp.sum(jnp.where(r2 != c2, jnp.exp(sim * inv_t), 0.0),
                    axis=2)                                          # (S,2N)

    # sum_i [-log(exp(pos_i/T)/denom_i)] = sum log(denom) - (1/T) sum pos
    loss_b = (jnp.sum(jnp.log(denom), axis=1, keepdims=True)
              - 2.0 * inv_t * jnp.sum(pos, axis=1, keepdims=True)) / jnp.float32(n2)
    o_ref[...] = loss_b                                              # (S,1)


# ----------------------------- wrappers ----------------------------------------
def _pick_streets_per_step(n_batches):
    # keep the (8,128) sublane rule on block shapes: sps % 8 == 0 or sps == B
    for cand in (16, 8):
        if n_batches % cand == 0:
            return cand
    return n_batches


def image_model_forward_batched(sv_bnchw, lengths, params, streets_per_step=None):
    """Batched ImageModel.forward: (B, N, C, H, W) -> (B,) InfoNCE losses.

    One pallas_call; the grid iterates over groups of `streets_per_step`
    street-batches while the bf16 weights keep a constant block index and thus
    stay VMEM-resident across grid steps.
    """
    lengths = tuple(int(l) for l in lengths)
    n = sum(lengths)
    b = sv_bnchw.shape[0]
    if streets_per_step is None:
        streets_per_step = _pick_streets_per_step(b)
    assert b % streets_per_step == 0, "B must be divisible by streets_per_step"
    n_steps = b // streets_per_step
    m = streets_per_step * n                      # MXU row dim per grid step

    x_flat = sv_bnchw.reshape(b * n, -1).astype(jnp.float32)   # glue: flatten NCHW
    we, be, w1, b1, w2, b2 = params

    # bf16 weights: halves the dominant HBM traffic; MXU-native on v5e/v6e/v7x.
    we_b = we.astype(jnp.bfloat16)
    w1_b = w1.astype(jnp.bfloat16)
    w2_b = w2.astype(jnp.bfloat16)

    # constant block index across the grid -> fetched once, kept in VMEM
    resident = lambda shape: pl.BlockSpec(shape, lambda g: (0,) * len(shape))
    kernel = partial(fused_image_model_kernel,
                     lengths=lengths, temperature=TEMPERATURE)

    out = pl.pallas_call(
        kernel,
        out_shape=jax.ShapeDtypeStruct((b, 1), jnp.float32),
        grid=(n_steps,),
        in_specs=[
            pl.BlockSpec((m, ENC_DIM), lambda g: (g, 0)),            # activations stream
            resident((ENC_DIM, ENC_DIM)), resident((1, ENC_DIM)),
            resident((ENC_DIM, PROJ_HID)), resident((1, PROJ_HID)),
            resident((PROJ_HID, PROJ_OUT)), resident((1, PROJ_OUT)),
        ],
        out_specs=pl.BlockSpec((streets_per_step, 1), lambda g: (g, 0)),
        compiler_params=pltpu.CompilerParams(
            # batch axis is fully independent -> megacore-shardable on v7x
            dimension_semantics=("parallel",)),
    )(x_flat, we_b, be, w1_b, b1, w2_b, b2)
    return out[:, 0]


def image_model_forward(sv_nchw, lengths, params):
    """Equivalent of ImageModel.forward(sv, length) -> context_loss (scalar)."""
    return image_model_forward_batched(sv_nchw[None], lengths, params,
                                       streets_per_step=1)[0]


# ----------------------------- reference (pure JAX, f32) ----------------------
def reference_forward(sv_nchw, lengths, params):
    we, be, w1, b1, w2, b2 = params
    x = sv_nchw.reshape(sv_nchw.shape[0], -1).astype(jnp.float32)
    h = x @ we + be
    f = jnp.maximum(h @ w1 + b1, 0.0) @ w2 + b2
    means, off = [], 0
    for ln in lengths:
        means.append(jnp.mean(f[off:off + ln], axis=0))
        off += ln
    ctx = jnp.concatenate(
        [jnp.tile(m[None], (ln, 1)) for m, ln in zip(means, lengths)], axis=0)
    f_n = f / jnp.maximum(jnp.linalg.norm(f, axis=1, keepdims=True), 1e-12)
    c_n = ctx / jnp.maximum(jnp.linalg.norm(ctx, axis=1, keepdims=True), 1e-12)
    reps = jnp.concatenate([f_n, c_n], axis=0)
    sim = reps @ reps.T
    n = f.shape[0]
    pos = jnp.concatenate([jnp.diagonal(sim, n), jnp.diagonal(sim, -n)])
    mask = 1.0 - jnp.eye(2 * n)
    denom = jnp.sum(mask * jnp.exp(sim / TEMPERATURE), axis=1)
    return jnp.sum(-jnp.log(jnp.exp(pos / TEMPERATURE) / denom)) / (2 * n)


# ----------------------------- main -------------------------------------------
if __name__ == "__main__":
    key = jax.random.PRNGKey(0)
    k_x, k_we, k_w1, k_w2 = jax.random.split(key, 4)

    # deterministic synthetic parameters (no checkpoint)
    we = jax.random.normal(k_we, (ENC_DIM, ENC_DIM), jnp.float32) * 0.02
    be = jnp.zeros((1, ENC_DIM), jnp.float32)
    w1 = jax.random.normal(k_w1, (ENC_DIM, PROJ_HID), jnp.float32) * 0.02
    b1 = jnp.zeros((1, PROJ_HID), jnp.float32)
    w2 = jax.random.normal(k_w2, (PROJ_HID, PROJ_OUT), jnp.float32) * 0.02
    b2 = jnp.zeros((1, PROJ_OUT), jnp.float32)
    params = (we, be, w1, b1, w2, b2)

    # B independent street-view batches (each = one ImageModel.forward call),
    # NCHW like PyTorch.  Batched into a single pallas_call so the bf16 weights
    # are fetched once and each grid step feeds 16*8 = 128 rows to the MXU.
    B = 32
    sv = jax.random.normal(k_x, (B, N_IMAGES, C, H, W), jnp.float32)

    losses = jax.block_until_ready(
        image_model_forward_batched(sv, LENGTHS, params, streets_per_step=16))

    ref_fn = jax.jit(lambda s: reference_forward(s, LENGTHS, params))
    ref = jax.block_until_ready(jnp.stack([ref_fn(sv[i]) for i in range(B)]))

    np.testing.assert_allclose(np.asarray(losses), np.asarray(ref),
                               rtol=5e-2, atol=5e-2)
    assert np.all(np.isfinite(np.asarray(losses)))

    # single-batch path == original ImageModel.forward(sv, length) semantics
    loss0 = jax.block_until_ready(image_model_forward(sv[0], LENGTHS, params))
    np.testing.assert_allclose(np.asarray(loss0), np.asarray(ref[0]),
                               rtol=5e-2, atol=5e-2)

    print("KERNEL_OK")
</pallas_src>

<mosaic_0001>
module attributes {stable_mosaic.version = 11 : i64} {
  func.func @fused_image_model_kernel(%arg0: i32, %arg1: memref<128x768xf32, #tpu.memory_space<vmem>>, %arg2: memref<768x768xbf16, #tpu.memory_space<vmem>>, %arg3: memref<1x768xf32, #tpu.memory_space<vmem>>, %arg4: memref<768x256xbf16, #tpu.memory_space<vmem>>, %arg5: memref<1x256xf32, #tpu.memory_space<vmem>>, %arg6: memref<256x256xbf16, #tpu.memory_space<vmem>>, %arg7: memref<1x256xf32, #tpu.memory_space<vmem>>, %arg8: memref<16x1xf32, #tpu.memory_space<vmem>>) attributes {dimension_semantics = [#tpu.dimension_semantics<parallel>], iteration_bounds = array<i64: 2>, scalar_prefetch = 0 : i64, scratch_operands = 0 : i64, tpu.core_type = #tpu.core_type<tc>, window_params = [{transform_indices = @transform_0, window_bounds = array<i64: 128, 768>}, {pipeline_mode = #tpu.pipeline_mode<synchronous>, transform_indices = @transform_1, window_bounds = array<i64: 768, 768>}, {pipeline_mode = #tpu.pipeline_mode<synchronous>, transform_indices = @transform_2, window_bounds = array<i64: 1, 768>}, {pipeline_mode = #tpu.pipeline_mode<synchronous>, transform_indices = @transform_3, window_bounds = array<i64: 768, 256>}, {pipeline_mode = #tpu.pipeline_mode<synchronous>, transform_indices = @transform_4, window_bounds = array<i64: 1, 256>}, {pipeline_mode = #tpu.pipeline_mode<synchronous>, transform_indices = @transform_5, window_bounds = array<i64: 256, 256>}, {pipeline_mode = #tpu.pipeline_mode<synchronous>, transform_indices = @transform_6, window_bounds = array<i64: 1, 256>}, {transform_indices = @transform_7, window_bounds = array<i64: 16, 1>}]} {
    %c0 = arith.constant 0 : index
    %c0_0 = arith.constant 0 : index
    %0 = vector.load %arg1[%c0, %c0_0] : memref<128x768xf32, #tpu.memory_space<vmem>>, vector<128x768xf32>
    %1 = arith.truncf %0 : vector<128x768xf32> to vector<128x768xbf16>
    %c0_1 = arith.constant 0 : index
    %c0_2 = arith.constant 0 : index
    %2 = vector.load %arg2[%c0_1, %c0_2] : memref<768x768xbf16, #tpu.memory_space<vmem>>, vector<768x768xbf16>
    %cst = arith.constant dense<0.000000e+00> : vector<128x768xf32>
    %3 = tpu.matmul %1, %2, %cst {dimension_numbers = #tpu.dot_dimension_numbers<[1], [0], [0], [1], [0, 0, 1, 1], [], []>} : vector<128x768xbf16>, vector<768x768xbf16>, vector<128x768xf32> -> vector<128x768xf32>
    %c0_3 = arith.constant 0 : index
    %c0_4 = arith.constant 0 : index
    %4 = vector.load %arg3[%c0_3, %c0_4] : memref<1x768xf32, #tpu.memory_space<vmem>>, vector<1x768xf32>
    %5 = vector.broadcast %4 : vector<1x768xf32> to vector<128x768xf32>
    %6 = arith.addf %3, %5 : vector<128x768xf32>
    %7 = arith.truncf %6 : vector<128x768xf32> to vector<128x768xbf16>
    %c0_5 = arith.constant 0 : index
    %c0_6 = arith.constant 0 : index
    %8 = vector.load %arg4[%c0_5, %c0_6] : memref<768x256xbf16, #tpu.memory_space<vmem>>, vector<768x256xbf16>
    %cst_7 = arith.constant dense<0.000000e+00> : vector<128x256xf32>
    %9 = tpu.matmul %7, %8, %cst_7 {dimension_numbers = #tpu.dot_dimension_numbers<[1], [0], [0], [1], [0, 0, 1, 1], [], []>} : vector<128x768xbf16>, vector<768x256xbf16>, vector<128x256xf32> -> vector<128x256xf32>
    %c0_8 = arith.constant 0 : index
    %c0_9 = arith.constant 0 : index
    %10 = vector.load %arg5[%c0_8, %c0_9] : memref<1x256xf32, #tpu.memory_space<vmem>>, vector<1x256xf32>
    %11 = vector.broadcast %10 : vector<1x256xf32> to vector<128x256xf32>
    %12 = arith.addf %9, %11 : vector<128x256xf32>
    %cst_10 = arith.constant 0.000000e+00 : f32
    %13 = vector.broadcast %cst_10 : f32 to vector<128x256xf32>
    %14 = arith.maximumf %12, %13 : vector<128x256xf32>
    %15 = arith.truncf %14 : vector<128x256xf32> to vector<128x256xbf16>
    %c0_11 = arith.constant 0 : index
    %c0_12 = arith.constant 0 : index
    %16 = vector.load %arg6[%c0_11, %c0_12] : memref<256x256xbf16, #tpu.memory_space<vmem>>, vector<256x256xbf16>
    %cst_13 = arith.constant dense<0.000000e+00> : vector<128x256xf32>
    %17 = tpu.matmul %15, %16, %cst_13 {dimension_numbers = #tpu.dot_dimension_numbers<[1], [0], [0], [1], [0, 0, 1, 1], [], []>} : vector<128x256xbf16>, vector<256x256xbf16>, vector<128x256xf32> -> vector<128x256xf32>
    %c0_14 = arith.constant 0 : index
    %c0_15 = arith.constant 0 : index
    %18 = vector.load %arg7[%c0_14, %c0_15] : memref<1x256xf32, #tpu.memory_space<vmem>>, vector<1x256xf32>
    %19 = vector.broadcast %18 : vector<1x256xf32> to vector<128x256xf32>
    %20 = arith.addf %17, %19 : vector<128x256xf32>
    %21 = vector.shape_cast %20 : vector<128x256xf32> to vector<16x8x256xf32>
    %22 = tpu.iota {dimensions = array<i32: 1>} : vector<16x8x256xi32>
    %cst_16 = arith.constant 0.000000e+00 : f32
    %23 = vector.broadcast %cst_16 : f32 to vector<16x8x256xf32>
    %c0_i32 = arith.constant 0 : i32
    %24 = vector.broadcast %c0_i32 : i32 to vector<16x8x256xi32>
    %25 = arith.cmpi sge, %22, %24 : vector<16x8x256xi32>
    %c3_i32 = arith.constant 3 : i32
    %26 = vector.broadcast %c3_i32 : i32 to vector<16x8x256xi32>
    %27 = arith.cmpi slt, %22, %26 : vector<16x8x256xi32>
    %28 = arith.andi %25, %27 : vector<16x8x256xi1>
    %cst_17 = arith.constant 0.000000e+00 : f32
    %29 = vector.broadcast %cst_17 : f32 to vector<16x8x256xf32>
    %30 = arith.select %28, %21, %29 : vector<16x8x256xi1>, vector<16x8x256xf32>
    %cst_18 = arith.constant dense<0.000000e+00> : vector<16x256xf32>
    %31 = vector.multi_reduction <add>, %30, %cst_18 [1] : vector<16x8x256xf32> to vector<16x256xf32>
    %32 = vector.shape_cast %31 : vector<16x256xf32> to vector<16x1x256xf32>
    %cst_19 = arith.constant 0.333333343 : f32
    %33 = vector.broadcast %cst_19 : f32 to vector<16x1x256xf32>
    %34 = arith.mulf %32, %33 : vector<16x1x256xf32>
    %35 = vector.shape_cast %34 : vector<16x1x256xf32> to vector<16x1x256xf32>
    %36 = vector.broadcast %35 : vector<16x1x256xf32> to vector<16x8x256xf32>
    %37 = arith.select %28, %36, %23 : vector<16x8x256xi1>, vector<16x8x256xf32>
    %c3_i32_20 = arith.constant 3 : i32
    %38 = vector.broadcast %c3_i32_20 : i32 to vector<16x8x256xi32>
    %39 = arith.cmpi sge, %22, %38 : vector<16x8x256xi32>
    %c8_i32 = arith.constant 8 : i32
    %40 = vector.broadcast %c8_i32 : i32 to vector<16x8x256xi32>
    %41 = arith.cmpi slt, %22, %40 : vector<16x8x256xi32>
    %42 = arith.andi %39, %41 : vector<16x8x256xi1>
    %cst_21 = arith.constant 0.000000e+00 : f32
    %43 = vector.broadcast %cst_21 : f32 to vector<16x8x256xf32>
    %44 = arith.select %42, %21, %43 : vector<16x8x256xi1>, vector<16x8x256xf32>
    %cst_22 = arith.constant dense<0.000000e+00> : vector<16x256xf32>
    %45 = vector.multi_reduction <add>, %44, %cst_22 [1] : vector<16x8x256xf32> to vector<16x256xf32>
    %46 = vector.shape_cast %45 : vector<16x256xf32> to vector<16x1x256xf32>
    %cst_23 = arith.constant 2.000000e-01 : f32
    %47 = vector.broadcast %cst_23 : f32 to vector<16x1x256xf32>
    %48 = arith.mulf %46, %47 : vector<16x1x256xf32>
    %49 = vector.shape_cast %48 : vector<16x1x256xf32> to vector<16x1x256xf32>
    %50 = vector.broadcast %49 : vector<16x1x256xf32> to vector<16x8x256xf32>
    %51 = arith.select %42, %50, %37 : vector<16x8x256xi1>, vector<16x8x256xf32>
    %52 = arith.mulf %21, %21 : vector<16x8x256xf32>
    %cst_24 = arith.constant dense<0.000000e+00> : vector<16x8xf32>
    %53 = vector.multi_reduction <add>, %52, %cst_24 [2] : vector<16x8x256xf32> to vector<16x8xf32>
    %54 = vector.shape_cast %53 : vector<16x8xf32> to vector<16x8x1xf32>
    %cst_25 = arith.constant 1.000000e-24 : f32
    %55 = vector.broadcast %cst_25 : f32 to vector<16x8x1xf32>
    %56 = arith.maximumf %54, %55 : vector<16x8x1xf32>
    %57 = math.rsqrt %56 : vector<16x8x1xf32>
    %58 = vector.broadcast %57 : vector<16x8x1xf32> to vector<16x8x256xf32>
    %59 = arith.mulf %21, %58 : vector<16x8x256xf32>
    %60 = arith.mulf %51, %51 : vector<16x8x256xf32>
    %cst_26 = arith.constant dense<0.000000e+00> : vector<16x8xf32>
    %61 = vector.multi_reduction <add>, %60, %cst_26 [2] : vector<16x8x256xf32> to vector<16x8xf32>
    %62 = vector.shape_cast %61 : vector<16x8xf32> to vector<16x8x1xf32>
    %cst_27 = arith.constant 1.000000e-24 : f32
    %63 = vector.broadcast %cst_27 : f32 to vector<16x8x1xf32>
    %64 = arith.maximumf %62, %63 : vector<16x8x1xf32>
    %65 = math.rsqrt %64 : vector<16x8x1xf32>
    %66 = vector.broadcast %65 : vector<16x8x1xf32> to vector<16x8x256xf32>
    %67 = arith.mulf %51, %66 : vector<16x8x256xf32>
    %68 = tpu.concatenate %59, %67 in 1 : vector<16x8x256xf32>, vector<16x8x256xf32> -> vector<16x16x256xf32>
    "tpu.trace_start"() <{level = 10 : i32, message = "bqd,bkd->bqk"}> : () -> ()
    %cst_28 = arith.constant dense<0.000000e+00> : vector<16x16x16xf32>
    %69 = tpu.matmul %68, %68, %cst_28 {dimension_numbers = #tpu.dot_dimension_numbers<[2], [2], [1], [1], [0, 0, 0, 1, 1, 1], [0], [0]>} : vector<16x16x256xf32>, vector<16x16x256xf32>, vector<16x16x16xf32> -> vector<16x16x16xf32>
    "tpu.trace_stop"() : () -> ()
    %70 = arith.mulf %59, %67 : vector<16x8x256xf32>
    %cst_29 = arith.constant dense<0.000000e+00> : vector<16x8xf32>
    %71 = vector.multi_reduction <add>, %70, %cst_29 [2] : vector<16x8x256xf32> to vector<16x8xf32>
    %72 = tpu.iota {dimensions = array<i32: 1>} : vector<16x16x16xi32>
    %73 = tpu.iota {dimensions = array<i32: 2>} : vector<16x16x16xi32>
    %74 = arith.cmpi ne, %72, %73 : vector<16x16x16xi32>
    %cst_30 = arith.constant 1.000000e+01 : f32
    %75 = vector.broadcast %cst_30 : f32 to vector<16x16x16xf32>
    %76 = arith.mulf %69, %75 : vector<16x16x16xf32>
    %77 = math.exp %76 : vector<16x16x16xf32>
    %cst_31 = arith.constant 0.000000e+00 : f32
    %78 = vector.broadcast %cst_31 : f32 to vector<16x16x16xf32>
    %79 = arith.select %74, %77, %78 : vector<16x16x16xi1>, vector<16x16x16xf32>
    %cst_32 = arith.constant dense<0.000000e+00> : vector<16x16xf32>
    %80 = vector.multi_reduction <add>, %79, %cst_32 [2] : vector<16x16x16xf32> to vector<16x16xf32>
    %81 = math.log %80 : vector<16x16xf32>
    %cst_33 = arith.constant dense<0.000000e+00> : vector<16xf32>
    %82 = vector.multi_reduction <add>, %81, %cst_33 [1] : vector<16x16xf32> to vector<16xf32>
    %83 = vector.shape_cast %82 : vector<16xf32> to vector<16x1xf32>
    %cst_34 = arith.constant 2.000000e+00 : f32
    %cst_35 = arith.constant 1.000000e+01 : f32
    %84 = arith.mulf %cst_34, %cst_35 : f32
    %cst_36 = arith.constant dense<0.000000e+00> : vector<16xf32>
    %85 = vector.multi_reduction <add>, %71, %cst_36 [1] : vector<16x8xf32> to vector<16xf32>
    %86 = vector.shape_cast %85 : vector<16xf32> to vector<16x1xf32>
    %87 = vector.broadcast %84 : f32 to vector<16x1xf32>
    %88 = arith.mulf %87, %86 : vector<16x1xf32>
    %89 = arith.subf %83, %88 : vector<16x1xf32>
    %cst_37 = arith.constant 1.600000e+01 : f32
    %90 = vector.broadcast %cst_37 : f32 to vector<16x1xf32>
    %91 = arith.divf %89, %90 : vector<16x1xf32>
    %c0_38 = arith.constant 0 : index
    %c0_39 = arith.constant 0 : index
    %92 = vector.load %arg8[%c0_38, %c0_39] : memref<16x1xf32, #tpu.memory_space<vmem>>, vector<16x1xf32>
    tpu.vector_store %arg8[%c0_38, %c0_39], %91 {strides = array<i32>} : memref<16x1xf32, #tpu.memory_space<vmem>>, vector<16x1xf32>,
    return
  }
  func.func @transform_0(%arg0: i32) -> (i32, i32) {
    %c0_i32 = arith.constant 0 : i32
    %c0_i32_0 = arith.constant 0 : i32
    return %arg0, %c0_i32 : i32, i32
  }
  func.func @transform_1(%arg0: i32) -> (i32, i32) {
    %c0_i32 = arith.constant 0 : i32
    %c0_i32_0 = arith.constant 0 : i32
    %c0_i32_1 = arith.constant 0 : i32
    return %c0_i32, %c0_i32_0 : i32, i32
  }
  func.func @transform_2(%arg0: i32) -> (i32, i32) {
    %c0_i32 = arith.constant 0 : i32
    %c0_i32_0 = arith.constant 0 : i32
    %c0_i32_1 = arith.constant 0 : i32
    return %c0_i32, %c0_i32_0 : i32, i32
  }
  func.func @transform_3(%arg0: i32) -> (i32, i32) {
    %c0_i32 = arith.constant 0 : i32
    %c0_i32_0 = arith.constant 0 : i32
    %c0_i32_1 = arith.constant 0 : i32
    return %c0_i32, %c0_i32_0 : i32, i32
  }
  func.func @transform_4(%arg0: i32) -> (i32, i32) {
    %c0_i32 = arith.constant 0 : i32
    %c0_i32_0 = arith.constant 0 : i32
    %c0_i32_1 = arith.constant 0 : i32
    return %c0_i32, %c0_i32_0 : i32, i32
  }
  func.func @transform_5(%arg0: i32) -> (i32, i32) {
    %c0_i32 = arith.constant 0 : i32
    %c0_i32_0 = arith.constant 0 : i32
    %c0_i32_1 = arith.constant 0 : i32
    return %c0_i32, %c0_i32_0 : i32, i32
  }
  func.func @transform_6(%arg0: i32) -> (i32, i32) {
    %c0_i32 = arith.constant 0 : i32
    %c0_i32_0 = arith.constant 0 : i32
    %c0_i32_1 = arith.constant 0 : i32
    return %c0_i32, %c0_i32_0 : i32, i32
  }
  func.func @transform_7(%arg0: i32) -> (i32, i32) {
    %c0_i32 = arith.constant 0 : i32
    %c0_i32_0 = arith.constant 0 : i32
    return %arg0, %c0_i32 : i32, i32
  }
}

</mosaic_0001>

<bundles_post_ra>
// kernel: tpu_custom_call.1
= control target key start
LH: loop header
LB: loop body
LE: loop exit
PB: predicated region body
PF: predicated region fallthrough
CT: control target
= control target key end

     0   :  { %12 = vsyncpa [#allocation3], 0  ;;  %s11731_s0 = inlined_call_operand.hbm [shape: f32[256,768], index: 0, kind: input, shape index: {}]   ;;  %s11732_s1 = inlined_call_operand.hbm [shape: bf16[768,768], index: 1, kind: input, shape index: {}]   ;;  %s11733_s2 = inlined_call_operand.hbm [shape: f32[1,768], index: 2, kind: input, shape index: {}]   ;;  %s11734_s3 = inlined_call_operand.hbm [shape: bf16[768,256], index: 3, kind: input, shape index: {}]   ;;  %s11735_s4 = inlined_call_operand.hbm [shape: f32[1,256], index: 4, kind: input, shape index: {}]   ;;  %s11736_s5 = inlined_call_operand.hbm [shape: bf16[256,256], index: 5, kind: input, shape index: {}]   ;;  %s11737_s6 = inlined_call_operand.hbm [shape: f32[1,256], index: 6, kind: input, shape index: {}]   ;;  %s11738_s7 = inlined_call_operand.vmem [shape: f32[32,1], index: 7, kind: output, shape index: {}]  }
   0x1   :  { %14 = vsyncpa [#allocation3 + $0x1], 0 }
   0x2   :  { %15 = vsyncpa [#allocation5], 0 }
   0x3   :  { %16 = vsyncpa [#allocation8], 0 }
   0x4   :  { %17 = vsyncpa [#allocation11], 0  ;;  %s9185_s24 = smov 0   ;;  %s9187_s25 = smov 0  }
   0x5   :  { %s9189_s26 = smov 0   ;;  %s9191_s27 = smov 0  }
   0x6 LB: > { %s9132_s28 = smov [#allocation4]   ;;  %s7534_s30 = sadd.s32 4294967295, %s9130_s27   ;;  %s9130_s27 = sphi %s9191_s27, %s12008_s27   ;;  %s9126_s26 = sphi %s9189_s26, %s12007_s26   ;;  %s9122_s25 = sphi %s9187_s25, %s12006_s25   ;;  %s9118_s24 = sphi %s9185_s24, %s12005_s24  }
   0x7   : > { %s218_s29 = sshll.u32 %s9132_s28, 4  ;;  %p7536_p0 = scmp.ge.s32.totalorder %s9130_s27, 1  ;;  %s219_s29 = int_to_ptr.vmem [resolvable:$true] %s218_s29 }
   0x8   : > { %p9209_p1 = scmp.eq.s32.totalorder %s7534_s30, 0  ;;  %p206_p2 = scmp.lt.s32.totalorder %s9130_s27, 3 }
   0x9   : > { %s9133_s10 = smov [#allocation7]   ;;  %s9134_s13 = smov [#allocation10]  }
   0xa   : > { %s11796_s8 = scalar_select %p9209_p1, 1, 0 }
   0xb   : > { %p9214_p3 = pnand %p7536_p0, %p206_p2  ;;  %s242_s11 = sshll.u32 %s9133_s10, 4  ;;  %s9226_s11 = int_to_ptr.vmem [resolvable:$true] %s242_s11 }
   0xc   : > { %s9228_s14 = sshll.u32 %s9134_s13, 4  ;;  %s8911_s16 = scalar_lea.vmem %s219_s29, 36864  ;;  %s267_s14 = int_to_ptr.vmem [resolvable:$true] %s9228_s14 }
   0xd   : > { %s11797_s9 = scalar_select %p9214_p3, 1, 0 }
   0xe   : > { %p8003_p4 = pneg %p9214_p3  ;;  %p8912_p7 = scmp.ne.s32.totalorder %s219_s29, %s8911_s16 }
   0xf   : > { %p8919_p10 = scmp.lt.s32.totalorder %s219_s29, %s219_s29  ;;  %p8920_p11 = scmp.lt.s32.totalorder %s8911_s16, %s8911_s16 }
  0x10   : > { %p9222_p5 = pnand %p8003_p4, %p9209_p1 }
  0x11   : > { %p8921_p12 = por %p8920_p11, %p8919_p10 }
  0x12   : > { %p9232_p6 = pneg %p9222_p5 }
  0x14   : > { %p8914_p8 = pnand %p8912_p7, %p9232_p6 }
  0x16   : > { %p8915_p9 = pneg %p8914_p8 }
  0x18   : > { %p8922_p13 = pnand %p8921_p12, %p8915_p9 }
  0x1a   : > { %8925 = shalt.err (!%p8922_p13)
}
  0x1b   : > { %s9135_s17 = smov 384   ;;  %s9136_s18 = smov 24  }
  0x1c   : > { %8006 = dma.hbm_to_vmem [thread:$0]  (!%p9222_p5), %s11732_s1, 36864, %s219_s29, [#allocation5], %s9135_s17, %s9135_s17, %s9136_s18  }
  0x1d   : > { %s8937_s21 = scalar_lea.vmem %s9226_s11, 12288  ;;  %p8945_p7 = scmp.lt.s32.totalorder %s9226_s11, %s9226_s11 }
  0x1e   : > { %p8938_p0 = scmp.ne.s32.totalorder %s9226_s11, %s8937_s21  ;;  %p8946_p8 = scmp.lt.s32.totalorder %s8937_s21, %s8937_s21 }
  0x20   : > { %p8940_p2 = pnand %p8938_p0, %p9232_p6  ;;  %p8947_p9 = por %p8946_p8, %p8945_p7 }
  0x22   : > { %p8941_p4 = pneg %p8940_p2 }
  0x24   : > { %p8948_p10 = pnand %p8947_p9, %p8941_p4 }
  0x26   : > { %8951 = shalt.err (!%p8948_p10)
}
  0x27   : > { %s9137_s22 = smov 128   ;;  %s9138_s23 = smov 8  }
  0x28   : > { %8012 = dma.hbm_to_vmem [thread:$0]  (!%p9222_p5), %s11734_s3, 12288, %s9226_s11, [#allocation8], %s9137_s22, %s9137_s22, %s9138_s23  }
  0x29   : > { %s8963_s10 = scalar_lea.vmem %s267_s14, 4096  ;;  %p8971_p0 = scmp.lt.s32.totalorder %s267_s14, %s267_s14 }
  0x2a   : > { %p8964_p11 = scmp.ne.s32.totalorder %s267_s14, %s8963_s10  ;;  %p8972_p2 = scmp.lt.s32.totalorder %s8963_s10, %s8963_s10 }
  0x2c   : > { %p8966_p12 = pnand %p8964_p11, %p9232_p6  ;;  %p8973_p4 = por %p8972_p2, %p8971_p0 }
  0x2e   : > { %p8967_p13 = pneg %p8966_p12 }
  0x30   : > { %p8974_p7 = pnand %p8973_p4, %p8967_p13 }
  0x32   : > { %8977 = shalt.err (!%p8974_p7)
}
  0x33   : > { %8018 = dma.hbm_to_vmem [thread:$0]  (!%p9222_p5), %s11736_s5, 4096, %s267_s14, [#allocation11], %s9137_s22, %s9137_s22, %s9138_s23  }
  0x34   : > { %s9139_s17 = smov [#allocation6]   ;;  %s9140_s18 = smov [#allocation9]  }
  0x35   : > { %s232_s11 = sshll.u32 %s9139_s17, 4  ;;  %s256_s19 = sshll.u32 %s9140_s18, 4  ;;  %s233_s11 = int_to_ptr.vmem [resolvable:$true] %s232_s11  ;;  %s257_s19 = int_to_ptr.vmem [resolvable:$true] %s256_s19 }
  0x36   : > { %s8989_s20 = scalar_lea.vmem %s233_s11, 96  ;;  %p8997_p11 = scmp.lt.s32.totalorder %s233_s11, %s233_s11 }
  0x37   : > { %p8990_p8 = scmp.ne.s32.totalorder %s233_s11, %s8989_s20  ;;  %p8998_p12 = scmp.lt.s32.totalorder %s8989_s20, %s8989_s20 }
  0x39   : > { %p8992_p9 = pnand %p8990_p8, %p9232_p6  ;;  %p8999_p13 = por %p8998_p12, %p8997_p11 }
  0x3b   : > { %p8993_p10 = pneg %p8992_p9 }
  0x3d   : > { %p9000_p0 = pnand %p8999_p13, %p8993_p10 }
  0x3f   : > { %9003 = shalt.err (!%p9000_p0)
}
  0x40   : > { %8009 = dma.hbm_to_vmem [thread:$0]  (!%p9222_p5), %s11733_s2, 96, %s233_s11, [#allocation5]  }
  0x41   : > { %s9015_s14 = scalar_lea.vmem %s257_s19, 32  ;;  %p9023_p8 = scmp.lt.s32.totalorder %s257_s19, %s257_s19 }
  0x42   : > { %p9016_p2 = scmp.ne.s32.totalorder %s257_s19, %s9015_s14  ;;  %p9024_p9 = scmp.lt.s32.totalorder %s9015_s14, %s9015_s14 }
  0x44   : > { %p9018_p4 = pnand %p9016_p2, %p9232_p6  ;;  %p9025_p3 = por %p9024_p9, %p9023_p8 }
  0x46   : > { %p9019_p7 = pneg %p9018_p4 }
  0x48   : > { %p9026_p1 = pnand %p9025_p3, %p9019_p7 }
  0x4a   : > { %9029 = shalt.err (!%p9026_p1)
}
  0x4b   : > { %8015 = dma.hbm_to_vmem [thread:$0]  (!%p9222_p5), %s11735_s4, 32, %s257_s19, [#allocation8]  }
  0x4c   : > { %s9141_s29 = smov [#allocation12]  }
  0x4d   : > { %s280_s10 = sshll.u32 %s9141_s29, 4  ;;  %s281_s10 = int_to_ptr.vmem [resolvable:$true] %s280_s10 }
  0x4e   : > { %s9041_s13 = scalar_lea.vmem %s281_s10, 32  ;;  %p9049_p13 = scmp.lt.s32.totalorder %s281_s10, %s281_s10 }
  0x4f   : > { %p9042_p10 = scmp.ne.s32.totalorder %s281_s10, %s9041_s13  ;;  %p9050_p0 = scmp.lt.s32.totalorder %s9041_s13, %s9041_s13 }
  0x51   : > { %p9044_p11 = pnand %p9042_p10, %p9232_p6  ;;  %p9051_p2 = por %p9050_p0, %p9049_p13 }
  0x53   : > { %p9045_p12 = pneg %p9044_p11 }
  0x55   : > { %p9052_p3 = pnand %p9051_p2, %p9045_p12 }
  0x57   : > { %9055 = shalt.err (!%p9052_p3)
}
  0x58   : > { %8021 = dma.hbm_to_vmem [thread:$0]  (!%p9222_p5), %s11737_s6, 32, %s281_s10, [#allocation11]  }
  0x59   : > { %s9285_s15 = sadd.s32 1, %s9130_s27   ;;  %s30_s12 = sadd.s32 1, %s9126_s26 }
  0x5a   : > { %s27_s11 = ssub.s32 %s9130_s27, %s9285_s15  ;;  %p37_p1 = scmp.ne.s32.totalorder %s9126_s26, %s9122_s25 }
  0x5b   : > { %p28_p6 = scmp.eq.s32.totalorder %s27_s11, 0  ;;  %p38_p4 = scmp.eq.s32.totalorder %s9130_s27, 0 }
  0x5c   : > { %p43_p7 = scmp.ne.s32.totalorder %s9122_s25, %s9118_s24  ;;  %p8032_p8 = scmp.lt.s32.totalorder %s9130_s27, 2 }
  0x5d   : > { %s9297_s18 = scalar_select %p28_p6, %s9126_s26, %s30_s12  }
  0x5e   : > { %p39_p9 = por %p38_p4, %p37_p1  ;;  %p11800_p10 = scmp.ne.s32.totalorder %s11796_s8, 0 }
  0x5f   : > { %s291_s20 = sand.u32 1, %s9126_s26   ;;  %s7975_s21 = smul.u32 12288, %s9130_s27 }
  0x60   : > { %p9301_p11 = por %p11800_p10, %p43_p7  ;;  %s7974_s28 = smul.u32 768, %s291_s20 }
  0x61   : > { %s9310_s23 = scalar_lea.hbm %s11731_s0, %s7975_s21  ;;  %p9312_p5 = pnand %p8032_p8, %p39_p9 }
  0x62   : > { %s11801_s19 = scalar_select %p9301_p11, 1, 0 }
  0x63   : > { %s295_s29 = scalar_lea.vmem [#allocation2], %s7974_s28  ;;  %s9318_s13 = scalar_lea.sflag [#allocation3], %s291_s20 }
  0x64   : > { %s303_s10 = sshll.u32 %s295_s29, 4  ;;  %s9056_s16 = scalar_lea.hbm %s9310_s23, 12288  ;;  %s9316_s10 = int_to_ptr.vmem [resolvable:$true] %s303_s10 }
  0x65   : > { %p9057_p12 = scmp.ne.s32.totalorder %s9310_s23, %s9056_s16  ;;  %p9058_p13 = pneg %p9312_p5 }
  0x66   : > { %s9061_s11 = scalar_lea.hbm %s11731_s0, 24576  ;;  %p9062_p3 = scmp.lt.s32.totalorder %s9310_s23, %s11731_s0 }
  0x67   : > { %p9059_p0 = pnand %p9058_p13, %p9057_p12  ;;  %p9063_p1 = scmp.lt.s32.totalorder %s9061_s11, %s9056_s16 }
  0x69   : > { %p9060_p2 = pneg %p9059_p0  ;;  %p9064_p6 = por %p9063_p1, %p9062_p3 }
  0x6b   : > { %p9065_p4 = pnand %p9064_p6, %p9060_p2 }
  0x6d   : > { %9068 = shalt.err (!%p9065_p4)
}
  0x6e   : > { %s9069_s20 = scalar_lea.vmem %s9316_s10, 12288  ;;  %s9142_s28 = smov [#allocation2]  }
  0x6f   : > { %p9070_p7 = scmp.ne.s32.totalorder %s9316_s10, %s9069_s20  ;;  %s9074_s22 = sshll.u32 %s9142_s28, 4  ;;  %s9075_s22 = int_to_ptr.vmem [resolvable:$false] %s9074_s22 }
  0x70   : > { %s9076_s29 = scalar_lea.vmem %s9075_s22, 24576  ;;  %p9077_p10 = scmp.lt.s32.totalorder %s9316_s10, %s9075_s22 }
  0x71   : > { %p9072_p8 = pnand %p9070_p7, %p9058_p13  ;;  %p9078_p12 = scmp.lt.s32.totalorder %s9076_s29, %s9069_s20 }
  0x73   : > { %p9073_p9 = pneg %p9072_p8  ;;  %p9079_p0 = por %p9078_p12, %p9077_p10 }
  0x75   : > { %p9080_p11 = pnand %p9079_p0, %p9073_p9 }
  0x77   : > { %9083 = shalt.err (!%p9080_p11)
}
  0x78   : > { %s9143_s16 = smov 768   ;;  %s9144_s17 = smov 48  }
  0x79   : > { %8025 = dma.hbm_to_vmem [thread:$0]  (!%p9312_p5), %s9310_s23, 12288, %s9316_s10, %s9318_s13, %s9143_s16, %s9143_s16, %s9144_s17  }
  0x7a   : > { %p11803_p13 = scmp.ne.s32.totalorder %s11797_s9, 0 }
  0x7c   : > { %315 = sbr.rel (%p11803_p13) target bundleno = 1948 (0x79c), region = 48 }
  0x81   : > { %s317_s12 = sand.u32 1, %s9122_s25   ;;  %p11804_p2 = scmp.ne.s32.totalorder %s11801_s19, 0 }
  0x82   : > { %s7976_s11 = smul.u32 768, %s317_s12  ;;  %s318_s21 = scalar_lea.sflag [#allocation3], %s317_s12 }
  0x84   : > { %s9342_s14 = scalar_lea.vmem [#allocation2], %s7976_s11 }
  0x85   : > { %9101 = dma.done.wait (%p11804_p2), %s318_s21, 12288  }
  0x86   : > { %9103 = vsyncadd (%p11804_p2), %s318_s21, 4294955008  ;;  %p11805_p11 = scmp.ne.s32.totalorder %s11796_s8, 0 }
  0x88   : > { %9105 = dma.done.wait (%p11805_p11), [#allocation5], 36960  }
  0x89   : > { %9107 = vsyncadd (%p11805_p11), [#allocation5], 4294930336 }
  0x8a   : > { %9109 = dma.done.wait (%p11805_p11), [#allocation8], 12320  }
  0x8b   : > { %9111 = vsyncadd (%p11805_p11), [#allocation8], 4294954976 }
  0x8c   : > { %9113 = dma.done.wait (%p11805_p11), [#allocation11], 4128  }
  0x8d   : > { %9115 = vsyncadd (%p11805_p11), [#allocation11], 4294963168  ;;  %v8083_v0 = vld [vmem:[#allocation4 + $0x154] ss:$24 sps:$4 sm:$0xff]   ;;  %v8085_v1 = vld [vmem:[#allocation4 + $0x150] ss:$24 sps:$4 sm:$0xff]  }
  0x8e   : > { %2287 = vmatprep.subr.bf16.mxu0 %v8083_v0  ;;  %v8086_v2 = vld [vmem:[#allocation4 + $0x454] ss:$24 sps:$4 sm:$0xff]   ;;  %v8088_v3 = vld [vmem:[#allocation4 + $0x450] ss:$24 sps:$4 sm:$0xff]   ;;  %v8089_v4 = vld [vmem:[#allocation4 + $0x124] ss:$24 sps:$4 sm:$0xff]  }
  0x8f   : > { %2288 = vmatpush1.bf16.msra.mxu0 %v8085_v1  ;;  %v8091_v5 = vld [vmem:[#allocation4 + $0x120] ss:$24 sps:$4 sm:$0xff]   ;;  %2400 = vmatprep.subr.bf16.mxu1 %v8086_v2  ;;  %v8092_v6 = vld [vmem:[#allocation4 + $0x424] ss:$24 sps:$4 sm:$0xff]   ;;  %v8095_v8 = vld [vmem:[#allocation4 + $0xf4] ss:$24 sps:$4 sm:$0xff]  }
  0x90   : > { %2401 = vmatpush1.bf16.msra.mxu1 %v8088_v3  ;;  %2289 = vmatprep.subr.bf16.mxu0 %v8089_v4  ;;  %v8094_v7 = vld [vmem:[#allocation4 + $0x420] ss:$24 sps:$4 sm:$0xff]   ;;  %v8097_v9 = vld [vmem:[#allocation4 + $0xf0] ss:$24 sps:$4 sm:$0xff]   ;;  %v8098_v10 = vld [vmem:[#allocation4 + $0x3f4] ss:$24 sps:$4 sm:$0xff]  }
  0x91   : > { %2402 = vmatprep.subr.bf16.mxu1 %v8092_v6  ;;  %v8101_v11 = vld [vmem:[#allocation4 + $0xc4] ss:$24 sps:$4 sm:$0xff]   ;;  %v8100_v12 = vld [vmem:[#allocation4 + $0x3f0] ss:$24 sps:$4 sm:$0xff]   ;;  %v8103_v14 = vld [vmem:[#allocation4 + $0xc0] ss:$24 sps:$4 sm:$0xff]  }
  0x92   : > { %v8104_v13 = vld [vmem:[#allocation4 + $0x3c4] ss:$24 sps:$4 sm:$0xff]   ;;  %v8107_v15 = vld [vmem:[#allocation4 + $0x94] ss:$24 sps:$4 sm:$0xff]   ;;  %v8106_v16 = vld [vmem:[#allocation4 + $0x3c0] ss:$24 sps:$4 sm:$0xff]  }
  0x93   : > { %2290 = vmatpush1.bf16.msra.mxu0 %v8091_v5  ;;  %v8110_v17 = vld [vmem:[#allocation4 + $0x394] ss:$24 sps:$4 sm:$0xff]   ;;  %v8109_v18 = vld [vmem:[#allocation4 + $0x90] ss:$24 sps:$4 sm:$0xff]   ;;  %v8113_v19 = vld [vmem:[#allocation4 + $0x64] ss:$24 sps:$4 sm:$0xff]  }
  0x94   : > { %2291 = vmatprep.subr.bf16.mxu0 %v8095_v8  ;;  %2403 = vmatpush1.bf16.msra.mxu1 %v8094_v7  ;;  %v8112_v20 = vld [vmem:[#allocation4 + $0x390] ss:$24 sps:$4 sm:$0xff]   ;;  %v8116_v21 = vld [vmem:[#allocation4 + $0x364] ss:$24 sps:$4 sm:$0xff]   ;;  %v8115_v22 = vld [vmem:[#allocation4 + $0x60] ss:$24 sps:$4 sm:$0xff]  }
  0x95   : > { %2404 = vmatprep.subr.bf16.mxu1 %v8098_v10  ;;  %v8119_v23 = vld [vmem:[#allocation4 + $0x34] ss:$24 sps:$4 sm:$0xff]   ;;  %v8118_v24 = vld [vmem:[#allocation4 + $0x360] ss:$24 sps:$4 sm:$0xff]   ;;  %v8121_v26 = vld [vmem:[#allocation4 + $0x30] ss:$24 sps:$4 sm:$0xff]  }
  0x96   : > { %v8122_v25 = vld [vmem:[#allocation4 + $0x334] ss:$24 sps:$4 sm:$0xff]   ;;  %v8125_v27 = vld [vmem:[#allocation4 + $0x4] ss:$24 sps:$4 sm:$0xff]   ;;  %v8124_v28 = vld [vmem:[#allocation4 + $0x330] ss:$24 sps:$4 sm:$0xff]  }
  0x97   : > { %2292 = vmatpush1.bf16.msra.mxu0 %v8097_v9  ;;  %v8128_v29 = vld [vmem:[#allocation4 + $0x304] ss:$24 sps:$4 sm:$0xff]   ;;  %v8127_v30 = vld [vmem:[#allocation4] ss:$24 sps:$4 sm:$0xff]   ;;  %v8131_v31 = vld [vmem:[#allocation4 + $0x2d4] ss:$24 sps:$4 sm:$0xff]  }
  0x98   : > { %2293 = vmatprep.subr.bf16.mxu0 %v8101_v11  ;;  %2405 = vmatpush1.bf16.msra.mxu1 %v8100_v12  ;;  %v8130_v32 = vld [vmem:[#allocation4 + $0x300] ss:$24 sps:$4 sm:$0xff]   ;;  %v8134_v33 = vld [vmem:[#allocation4 + $0x5d4] ss:$24 sps:$4 sm:$0xff]   ;;  %v8133_v34 = vld [vmem:[#allocation4 + $0x2d0] ss:$24 sps:$4 sm:$0xff]  }
  0x99   : > { %2406 = vmatprep.subr.bf16.mxu1 %v8104_v13  ;;  %v8137_v35 = vld [vmem:[#allocation4 + $0x2a4] ss:$24 sps:$4 sm:$0xff]   ;;  %v8136_v36 = vld [vmem:[#allocation4 + $0x5d0] ss:$24 sps:$4 sm:$0xff]   ;;  %v8139_v38 = vld [vmem:[#allocation4 + $0x2a0] ss:$24 sps:$4 sm:$0xff]  }
  0x9a   : > { %v8140_v37 = vld [vmem:[#allocation4 + $0x5a4] ss:$24 sps:$4 sm:$0xff]   ;;  %v8143_v39 = vld [vmem:[#allocation4 + $0x274] ss:$24 sps:$4 sm:$0xff]   ;;  %v8142_v40 = vld [vmem:[#allocation4 + $0x5a0] ss:$24 sps:$4 sm:$0xff]  }
  0x9b   : > { %2294 = vmatpush1.bf16.msra.mxu0 %v8103_v14  ;;  %v8146_v41 = vld [vmem:[#allocation4 + $0x574] ss:$24 sps:$4 sm:$0xff]   ;;  %v8145_v42 = vld [vmem:[#allocation4 + $0x270] ss:$24 sps:$4 sm:$0xff]   ;;  %v8149_v43 = vld [vmem:[#allocation4 + $0x244] ss:$24 sps:$4 sm:$0xff]  }
  0x9c   : > { %2295 = vmatprep.subr.bf16.mxu0 %v8107_v15  ;;  %2407 = vmatpush1.bf16.msra.mxu1 %v8106_v16  ;;  %v8148_v44 = vld [vmem:[#allocation4 + $0x570] ss:$24 sps:$4 sm:$0xff]   ;;  %v8152_v45 = vld [vmem:[#allocation4 + $0x544] ss:$24 sps:$4 sm:$0xff]   ;;  %v8151_v48 = vld [vmem:[#allocation4 + $0x240] ss:$24 sps:$4 sm:$0xff]  }
  0x9d   : > { %2408 = vmatprep.subr.bf16.mxu1 %v8110_v17  ;;  %v384_v46 = vld [vmem:[%s9342_s14 + $0x8] sm:$0xff]  ;;  %v390_v47 = vld [vmem:[%s9342_s14 + $0x38] sm:$0xff]  ;;  %v383_v5 = vld [vmem:[%s9342_s14] sm:$0xff]  ;;  %vm7268_vm2 = vcmask 1041409   ;;  %vm7270_vm3 = vcmask 1042434   ;;  %vm7272_vm4 = vcmask 1043459  }
  0x9e   : > { %v9362_v49 = vpack.c.bf16 %v390_v47, %v384_v46  ;;  %v8155_v50 = vld [vmem:[#allocation4 + $0x214] ss:$24 sps:$4 sm:$0xff]   ;;  %v8154_v51 = vld [vmem:[#allocation4 + $0x540] ss:$24 sps:$4 sm:$0xff]   ;;  %v8157_v56 = vld [vmem:[#allocation4 + $0x210] ss:$24 sps:$4 sm:$0xff]  }
  0x9f   : > { %2296 = vmatpush1.bf16.msra.mxu0 %v8109_v18  ;;  %v386_v52 = vld [vmem:[%s9342_s14 + $0x18] sm:$0xff]  ;;  %v392_v53 = vld [vmem:[%s9342_s14 + $0x48] sm:$0xff]  ;;  %v389_v7 = vld [vmem:[%s9342_s14 + $0x30] sm:$0xff]  ;;  %vm7274_vm5 = vcmask 1044484   ;;  %vm6929_vm7 = vcmask 130048   ;;  %vm7131_vm9 = vcmask 130112  }
  0xa0   : > { %2297 = vmatprep.subr.bf16.mxu0 %v8113_v19  ;;  %2409 = vmatpush1.bf16.msra.mxu1 %v8112_v20  ;;  %v8158_v54 = vld [vmem:[#allocation4 + $0x514] ss:$24 sps:$4 sm:$0xff]   ;;  %v9367_v55 = vpack.c.bf16 %v392_v53, %v386_v52  ;;  %v8161_v57 = vld [vmem:[#allocation4 + $0x1e4] ss:$24 sps:$4 sm:$0xff]   ;;  %v8160_v58 = vld [vmem:[#allocation4 + $0x510] ss:$24 sps:$4 sm:$0xff]   ;;  %v9376_v14 = vpack.c.bf16 %v389_v7, %v383_v5 }
  0xa1   : > { %2410 = vmatprep.subr.bf16.mxu1 %v8116_v21  ;;  %2319 = vmatprep.mubr.bf16.mxu0 %v9362_v49  ;;  %v8164_v59 = vld [vmem:[#allocation4 + $0x4e4] ss:$24 sps:$4 sm:$0xff]   ;;  %v8163_v60 = vld [vmem:[#allocation4 + $0x1e0] ss:$24 sps:$4 sm:$0xff]   ;;  %v8167_v61 = vld [vmem:[#allocation4 + $0x1b4] ss:$24 sps:$4 sm:$0xff]  }
  0xa2   : > { %2432 = vmatprep.mubr.bf16.mxu1 %v9367_v55  ;;  %v8166_v62 = vld [vmem:[#allocation4 + $0x4e0] ss:$24 sps:$4 sm:$0xff]   ;;  %v8170_v63 = vld [vmem:[#allocation4 + $0x4b4] ss:$24 sps:$4 sm:$0xff]   ;;  %v8169_v0 = vld [vmem:[#allocation4 + $0x1b0] ss:$24 sps:$4 sm:$0xff]  }
  0xa3   : > { %2298 = vmatpush1.bf16.msra.mxu0 %v8115_v22  ;;  %v8173_v1 = vld [vmem:[#allocation4 + $0x184] ss:$24 sps:$4 sm:$0xff]   ;;  %v8172_v2 = vld [vmem:[#allocation4 + $0x4b0] ss:$24 sps:$4 sm:$0xff]   ;;  %v8175_v3 = vld [vmem:[#allocation4 + $0x180] ss:$24 sps:$4 sm:$0xff]  }
  0xa4   : > { %2299 = vmatprep.subr.bf16.mxu0 %v8119_v23  ;;  %2411 = vmatpush1.bf16.msra.mxu1 %v8118_v24  ;;  %v8176_v4 = vld [vmem:[#allocation4 + $0x484] ss:$24 sps:$4 sm:$0xff]   ;;  %v8178_v6 = vld [vmem:[#allocation4 + $0x480] ss:$24 sps:$4 sm:$0xff]   ;;  %v8181_v8 = vld [vmem:[#allocation4 + $0x754] ss:$24 sps:$4 sm:$0xff]  }
  0xa5   : > { %2412 = vmatprep.subr.bf16.mxu1 %v8122_v25  ;;  %v396_v9 = vld [vmem:[%s9342_s14 + $0x68] sm:$0xff]  ;;  %v402_v10 = vld [vmem:[%s9342_s14 + $0x98] sm:$0xff]  ;;  %v385_v11 = vld [vmem:[%s9342_s14 + $0x10] sm:$0xff]  ;;  %vm7276_vm10 = vcmask 1045509   ;;  %vm7278_vm11 = vcmask 1046534   ;;  %vm7280_vm12 = vcmask 1047559  }
  0xa6   : > { %v391_v12 = vld [vmem:[%s9342_s14 + $0x40] sm:$0xff]  ;;  %v8184_v13 = vld [vmem:[#allocation4 + $0x15c] ss:$24 sps:$4 sm:$0xff]   ;;  %v404_v16 = vld [vmem:[%s9342_s14 + $0xa8] sm:$0xff]  ;;  %v9380_v18 = vpack.c.bf16 %v402_v10, %v396_v9  ;;  %vm7393_vm13 = vcmask 64512   ;;  %s7554_s8 = sshll.u32 %s7534_s30, 1 }
  0xa7   : > { %2300 = vmatpush1.bf16.msra.mxu0 %v8121_v26  ;;  %v398_v15 = vld [vmem:[%s9342_s14 + $0x78] sm:$0xff]  ;;  %v8179_v17 = vld [vmem:[#allocation4 + $0x750] ss:$24 sps:$4 sm:$0xff]   ;;  %v9382_v19 = vpack.c.bf16 %v391_v12, %v385_v11  ;;  %v8190_v24 = vld [vmem:[#allocation4 + $0x12c] ss:$24 sps:$4 sm:$0xff]   ;;  %p378_p5 = scmp.lt.s32.totalorder %s7554_s8, 3 }
  0xa8   : > { %2301 = vmatprep.subr.bf16.mxu0 %v8125_v27  ;;  %2413 = vmatpush1.bf16.msra.mxu1 %v8124_v28  ;;  %v8187_v20 = vld [vmem:[#allocation4 + $0x724] ss:$24 sps:$4 sm:$0xff]   ;;  %v8182_v21 = vld [vmem:[#allocation4 + $0x158] ss:$24 sps:$4 sm:$0xff]   ;;  %v9384_v22 = vpack.c.bf16 %v404_v16, %v398_v15  ;;  %v8188_v26 = vld [vmem:[#allocation4 + $0x128] ss:$24 sps:$4 sm:$0xff]  }
  0xa9   : > { %2414 = vmatprep.subr.bf16.mxu1 %v8128_v29  ;;  %v8185_v23 = vld [vmem:[#allocation4 + $0x720] ss:$24 sps:$4 sm:$0xff]   ;;  %v401_v27 = vld [vmem:[%s9342_s14 + $0x90] sm:$0xff]  ;;  %v408_v29 = vld [vmem:[%s9342_s14 + $0xc8] sm:$0xff]  ;;  %s12010_s8 = smov (!%p378_p5, %s7554_s8), 3  ;;  %vm7407_vm14 = vcmask 7168  }
  0xaa   : > { %v395_v25 = vld [vmem:[%s9342_s14 + $0x60] sm:$0xff]  ;;  %v8193_v28 = vld [vmem:[#allocation4 + $0x6f4] ss:$24 sps:$4 sm:$0xff]   ;;  %v8215_v16 = vld [vmem:[#allocation4 + $0x630] ss:$24 sps:$4 sm:$0xff]   ;;  %s7555_s9 = sshll.u32 %s12010_s8, 3 }
  0xab   : > { %2302 = vmatpush1.bf16.msra.mxu0 %v8127_v30  ;;  %v414_v30 = vld [vmem:[%s9342_s14 + $0xf8] sm:$0xff]  ;;  %v8200_v46 = vld [vmem:[#allocation4 + $0xc8] ss:$24 sps:$4 sm:$0xff]   ;;  %v413_v47 = vld [vmem:[%s9342_s14 + $0xf0] sm:$0xff]  ;;  %s381_s24 = scalar_lea.vmem %s11738_s7, %s7555_s9 }
  0xac   : > { %2303 = vmatprep.subr.bf16.mxu0 %v8131_v31  ;;  %2415 = vmatpush1.bf16.msra.mxu1 %v8130_v32  ;;  %v397_v31 = vld [vmem:[%s9342_s14 + $0x70] sm:$0xff]  ;;  %v403_v32 = vld [vmem:[%s9342_s14 + $0xa0] sm:$0xff]  ;;  %v432_v7 = vld [vmem:[%s9342_s14 + $0x188] sm:$0xff] }
  0xad   : > { %2416 = vmatprep.subr.bf16.mxu1 %v8134_v33  ;;  %v8196_v33 = vld [vmem:[#allocation4 + $0xfc] ss:$24 sps:$4 sm:$0xff]   ;;  %v415_v53 = vld [vmem:[%s9342_s14 + $0x100] sm:$0xff]  ;;  %v440_v15 = vld [vmem:[%s9342_s14 + $0x1c8] sm:$0xff] }
  0xae   : > { %v409_v52 = vld [vmem:[%s9342_s14 + $0xd0] sm:$0xff]  ;;  %v427_v10 = vld [vmem:[%s9342_s14 + $0x160] sm:$0xff] }
  0xaf   : > { %2304 = vmatpush2.bf16.msra.mxu0 %v8133_v34  ;;  %v9396_v34 = vpack.c.bf16 %v401_v27, %v395_v25  ;;  %v425_v5 = vld [vmem:[%s9342_s14 + $0x150] sm:$0xff]  ;;  %v8221_v25 = vld [vmem:[#allocation4 + $0x600] ss:$24 sps:$4 sm:$0xff]  }
  0xb0   : > { %2305 = vmatprep.subr.bf16.mxu0 %v8137_v35  ;;  %2417 = vmatpush2.bf16.msra.mxu1 %v8136_v36  ;;  %v410_v35 = vld [vmem:[%s9342_s14 + $0xd8] sm:$0xff]  ;;  %v416_v36 = vld [vmem:[%s9342_s14 + $0x108] sm:$0xff]  ;;  %v421_v9 = vld [vmem:[%s9342_s14 + $0x130] sm:$0xff] }
  0xb1   : > { %2418 = vmatprep.subr.bf16.mxu1 %v8140_v37  ;;  %v8191_v37 = vld [vmem:[#allocation4 + $0x6f0] ss:$24 sps:$4 sm:$0xff]   ;;  %v8220_v11 = vld [vmem:[#allocation4 + $0x3c] ss:$24 sps:$4 sm:$0xff]   ;;  %v431_v27 = vld [vmem:[%s9342_s14 + $0x180] sm:$0xff] }
  0xb3   : > { %2306 = vmatpush2.bf16.msra.mxu0 %v8139_v38  ;;  %v9400_v38 = vpack.c.bf16 %v414_v30, %v408_v29  ;;  %v437_v29 = vld [vmem:[%s9342_s14 + $0x1b0] sm:$0xff] }
  0xb4   : > { %2307 = vmatprep.subr.bf16.mxu0 %v8143_v39  ;;  %2419 = vmatpush2.bf16.msra.mxu1 %v8142_v40  ;;  %v9402_v39 = vpack.c.bf16 %v403_v32, %v397_v31  ;;  %v8199_v40 = vld [vmem:[#allocation4 + $0x6c4] ss:$24 sps:$4 sm:$0xff]   ;;  %v8229_v30 = vld [vmem:[#allocation4 + $0x8d4] ss:$24 sps:$4 sm:$0xff]  }
  0xb5   : > { %2420 = vmatprep.subr.bf16.mxu1 %v8146_v41  ;;  %v8194_v41 = vld [vmem:[#allocation4 + $0xf8] ss:$24 sps:$4 sm:$0xff]   ;;  %v444_v31 = vld [vmem:[%s9342_s14 + $0x1e8] sm:$0xff] }
  0xb6   : > { %v450_v32 = vld [vmem:[%s9342_s14 + $0x218] sm:$0xff] }
  0xb7   : > { %2308 = vmatpush2.bf16.msra.mxu0 %v8145_v42  ;;  %v9404_v42 = vpack.c.bf16 %v416_v36, %v410_v35  ;;  %v439_v35 = vld [vmem:[%s9342_s14 + $0x1c0] sm:$0xff]  ;;  %v8232_v36 = vld [vmem:[#allocation4 + $0x2dc] ss:$24 sps:$4 sm:$0xff]  }
  0xb8   : > { %2309 = vmatprep.subr.bf16.mxu0 %v8149_v43  ;;  %2421 = vmatpush2.bf16.msra.mxu1 %v8148_v44  ;;  %v8197_v43 = vld [vmem:[#allocation4 + $0x6c0] ss:$24 sps:$4 sm:$0xff]   ;;  %v8202_v44 = vld [vmem:[#allocation4 + $0xcc] ss:$24 sps:$4 sm:$0xff]  }
  0xb9   : > { %2422 = vmatprep.subr.bf16.mxu1 %v8152_v45  ;;  %v407_v45 = vld [vmem:[%s9342_s14 + $0xc0] sm:$0xff] }
  0xbb   : > { %2310 = vmatpush2.bf16.msra.mxu0 %v8151_v48  ;;  %v8205_v48 = vld [vmem:[#allocation4 + $0x694] ss:$24 sps:$4 sm:$0xff]  }
  0xbc   : > { %2311 = vmatprep.subr.bf16.mxu0 %v8155_v50  ;;  %2423 = vmatpush2.bf16.msra.mxu1 %v8154_v51  ;;  %v420_v50 = vld [vmem:[%s9342_s14 + $0x128] sm:$0xff]  ;;  %v426_v51 = vld [vmem:[%s9342_s14 + $0x158] sm:$0xff] }
  0xbd   : > { %2424 = vmatprep.subr.bf16.mxu1 %v8158_v54  ;;  %v8208_v54 = vld [vmem:[#allocation4 + $0x9c] ss:$24 sps:$4 sm:$0xff]  }
  0xbf   : > { %2312 = vmatpush2.bf16.msra.mxu0 %v8157_v56  ;;  %v9416_v56 = vpack.c.bf16 %v413_v47, %v407_v45  ;;  %v8230_v47 = vld [vmem:[#allocation4 + $0x2d8] ss:$24 sps:$4 sm:$0xff]  }
  0xc0   : > { %2313 = vmatprep.subr.bf16.mxu0 %v8161_v57  ;;  %2425 = vmatpush2.bf16.msra.mxu1 %v8160_v58  ;;  %v422_v57 = vld [vmem:[%s9342_s14 + $0x138] sm:$0xff]  ;;  %v428_v58 = vld [vmem:[%s9342_s14 + $0x168] sm:$0xff] }
  0xc1   : > { %2426 = vmatprep.subr.bf16.mxu1 %v8164_v59  ;;  %v8203_v59 = vld [vmem:[#allocation4 + $0x690] ss:$24 sps:$4 sm:$0xff]  }
  0xc3   : > { %2314 = vmatpush2.bf16.msra.mxu0 %v8163_v60  ;;  %v9420_v60 = vpack.c.bf16 %v426_v51, %v420_v50  ;;  %v8233_v50 = vld [vmem:[#allocation4 + $0x8a0] ss:$24 sps:$4 sm:$0xff]   ;;  %v8238_v51 = vld [vmem:[#allocation4 + $0x2ac] ss:$24 sps:$4 sm:$0xff]  }
  0xc4   : > { %2315 = vmatprep.subr.bf16.mxu0 %v8167_v61  ;;  %2427 = vmatpush2.bf16.msra.mxu1 %v8166_v62  ;;  %v9422_v61 = vpack.c.bf16 %v415_v53, %v409_v52  ;;  %v8211_v62 = vld [vmem:[#allocation4 + $0x664] ss:$24 sps:$4 sm:$0xff]   ;;  %v8236_v53 = vld [vmem:[#allocation4 + $0x2a8] ss:$24 sps:$4 sm:$0xff]  }
  0xc5   : > { %2428 = vmatprep.subr.bf16.mxu1 %v8170_v63  ;;  %v8206_v63 = vld [vmem:[#allocation4 + $0x98] ss:$24 sps:$4 sm:$0xff]   ;;  %v443_v52 = vld [vmem:[%s9342_s14 + $0x1e0] sm:$0xff] }
  0xc7   : > { %2316 = vmatpush2.bf16.msra.mxu0 %v8169_v0  ;;  %v9424_v0 = vpack.c.bf16 %v428_v58, %v422_v57  ;;  %v8241_v57 = vld [vmem:[#allocation4 + $0x874] ss:$24 sps:$4 sm:$0xff]  }
  0xc8   : > { %2317 = vmatprep.subr.bf16.mxu0 %v8173_v1  ;;  %2429 = vmatpush2.bf16.msra.mxu1 %v8172_v2  ;;  %v8209_v1 = vld [vmem:[#allocation4 + $0x660] ss:$24 sps:$4 sm:$0xff]   ;;  %v8214_v2 = vld [vmem:[#allocation4 + $0x6c] ss:$24 sps:$4 sm:$0xff]  }
  0xc9   : > { %2430 = vmatprep.subr.bf16.mxu1 %v8176_v4  ;;  %v8212_v4 = vld [vmem:[#allocation4 + $0x68] ss:$24 sps:$4 sm:$0xff]  }
  0xca   : > { %v456_v58 = vld [vmem:[%s9342_s14 + $0x248] sm:$0xff] }
  0xcb   : > { %2318 = vmatpush2.bf16.msra.mxu0 %v8175_v3  ;;  %v419_v3 = vld [vmem:[%s9342_s14 + $0x120] sm:$0xff] }
  0xcc   : > { %2513 = vmatprep.subr.bf16.mxu0 %v8181_v8  ;;  %2431 = vmatpush2.bf16.msra.mxu1 %v8178_v6  ;;  %v8217_v6 = vld [vmem:[#allocation4 + $0x634] ss:$24 sps:$4 sm:$0xff]   ;;  %v438_v8 = vld [vmem:[%s9342_s14 + $0x1b8] sm:$0xff]  ;;  %v9436_v12 = vpack.c.bf16 %v425_v5, %v419_v3  ;;  %v8239_v5 = vld [vmem:[#allocation4 + $0x870] ss:$24 sps:$4 sm:$0xff]  }
  0xcd   : > { %2626 = vmatprep.subr.bf16.mxu1 %v8184_v13  ;;  %v434_v13 = vld [vmem:[%s9342_s14 + $0x198] sm:$0xff] }
  0xce   : > { %2320 = vmatmul.mubr.bf16.vlgmr.msra.gmra.mxu0 %v9376_v14  ;;  %v458_v3 = vld [vmem:[%s9342_s14 + $0x258] sm:$0xff] }
  0xcf   : > { %2514 = vmatpush1.bf16.msra.mxu0 %v8179_v17  ;;  %2329 = vmatprep.mubr.bf16.mxu0 %v9380_v18  ;;  %v9440_v17 = vpack.c.bf16 %v438_v8, %v432_v7 }
  0xd0   : > { %2433 = vmatmul.mubr.bf16.vlgmr.msra.gmra.mxu1 %v9382_v19  ;;  %2515 = vmatprep.subr.bf16.mxu0 %v8187_v20  ;;  %v9442_v20 = vpack.c.bf16 %v427_v10, %v421_v9  ;;  %v8247_v9 = vld [vmem:[#allocation4 + $0x844] ss:$24 sps:$4 sm:$0xff]   ;;  %v8245_v10 = vld [vmem:[#allocation4 + $0x840] ss:$24 sps:$4 sm:$0xff]  }
  0xd1   : > { %2627 = vmatpush1.bf16.msra.mxu1 %v8182_v21  ;;  %2442 = vmatprep.mubr.bf16.mxu1 %v9384_v22  ;;  %v8223_v21 = vld [vmem:[#allocation4 + $0x604] ss:$24 sps:$4 sm:$0xff]  }
  0xd2   : > { %2628 = vmatprep.subr.bf16.mxu1 %v8190_v24  ;;  %v9444_v24 = vpack.c.bf16 %v440_v15, %v434_v13  ;;  %v455_v15 = vld [vmem:[%s9342_s14 + $0x240] sm:$0xff] }
  0xd3   : > { %2516 = vmatpush1.bf16.msra.mxu0 %v8185_v23  ;;  %v8218_v23 = vld [vmem:[#allocation4 + $0x38] ss:$24 sps:$4 sm:$0xff]  }
  0xd4   : > { %2517 = vmatprep.subr.bf16.mxu0 %v8193_v28  ;;  %v8224_v28 = vld [vmem:[#allocation4 + $0x8] ss:$24 sps:$4 sm:$0xff]  }
  0xd5   : > { %2629 = vmatpush1.bf16.msra.mxu1 %v8188_v26  ;;  %v8226_v26 = vld [vmem:[#allocation4 + $0xc] ss:$24 sps:$4 sm:$0xff]  }
  0xd6   : > { %2330 = vmatmul.mubr.bf16.gmra.mxu0 %v9396_v34  ;;  %2630 = vmatprep.subr.bf16.mxu1 %v8196_v33  ;;  %v433_v33 = vld [vmem:[%s9342_s14 + $0x190] sm:$0xff] }
  0xd7   : > { %2518 = vmatpush1.bf16.msra.mxu0 %v8191_v37  ;;  %2339 = vmatprep.mubr.bf16.mxu0 %v9400_v38  ;;  %v9456_v37 = vpack.c.bf16 %v437_v29, %v431_v27  ;;  %v9462_v45 = vpack.c.bf16 %v439_v35, %v433_v33  ;;  %v468_v27 = vld [vmem:[%s9342_s14 + $0x2a8] sm:$0xff]  ;;  %v8256_v29 = vld [vmem:[#allocation4 + $0x21c] ss:$24 sps:$4 sm:$0xff]   ;;  %v8254_v35 = vld [vmem:[#allocation4 + $0x218] ss:$24 sps:$4 sm:$0xff]  }
  0xd8   : > { %2443 = vmatmul.mubr.bf16.gmra.mxu1 %v9402_v39  ;;  %2519 = vmatprep.subr.bf16.mxu0 %v8199_v40  ;;  %v446_v40 = vld [vmem:[%s9342_s14 + $0x1f8] sm:$0xff]  ;;  %v8251_v33 = vld [vmem:[#allocation4 + $0x810] ss:$24 sps:$4 sm:$0xff]  }
  0xd9   : > { %2631 = vmatpush1.bf16.msra.mxu1 %v8194_v41  ;;  %2452 = vmatprep.mubr.bf16.mxu1 %v9404_v42  ;;  %v452_v41 = vld [vmem:[%s9342_s14 + $0x228] sm:$0xff] }
  0xda   : > { %2632 = vmatprep.subr.bf16.mxu1 %v8202_v44  ;;  %v9460_v44 = vpack.c.bf16 %v450_v32, %v444_v31  ;;  %v470_v31 = vld [vmem:[%s9342_s14 + $0x2b8] sm:$0xff]  ;;  %v476_v32 = vld [vmem:[%s9342_s14 + $0x2e8] sm:$0xff] }
  0xdb   : > { %2520 = vmatpush1.bf16.msra.mxu0 %v8197_v43  ;;  %v8227_v43 = vld [vmem:[#allocation4 + $0x8d0] ss:$24 sps:$4 sm:$0xff]  }
  0xdc   : > { %2521 = vmatprep.subr.bf16.mxu0 %v8205_v48  ;;  %v9464_v48 = vpack.c.bf16 %v452_v41, %v446_v40  ;;  %v8259_v41 = vld [vmem:[#allocation4 + $0x7e4] ss:$24 sps:$4 sm:$0xff]  }
  0xdd   : > { %2633 = vmatpush1.bf16.msra.mxu1 %v8200_v46  ;;  %v8235_v46 = vld [vmem:[#allocation4 + $0x8a4] ss:$24 sps:$4 sm:$0xff]  }
  0xde   : > { %2340 = vmatmul.mubr.bf16.gmra.mxu0 %v9416_v56  ;;  %2634 = vmatprep.subr.bf16.mxu1 %v8208_v54  ;;  %v449_v54 = vld [vmem:[%s9342_s14 + $0x210] sm:$0xff] }
  0xdf   : > { %2522 = vmatpush1.bf16.msra.mxu0 %v8203_v59  ;;  %2349 = vmatprep.mubr.bf16.mxu0 %v9420_v60  ;;  %v462_v59 = vld [vmem:[%s9342_s14 + $0x278] sm:$0xff] }
  0xe0   : > { %2453 = vmatmul.mubr.bf16.gmra.mxu1 %v9422_v61  ;;  %2523 = vmatprep.subr.bf16.mxu0 %v8211_v62  ;;  %v445_v62 = vld [vmem:[%s9342_s14 + $0x1f0] sm:$0xff]  ;;  %v9480_v7 = vpack.c.bf16 %v462_v59, %v456_v58  ;;  %v394_v58 = vld [vmem:[%s9342_s14 + $0x58] sm:$0xff]  ;;  %v475_v59 = vld [vmem:[%s9342_s14 + $0x2e0] sm:$0xff] }
  0xe1   : > { %2635 = vmatpush1.bf16.msra.mxu1 %v8206_v63  ;;  %2462 = vmatprep.mubr.bf16.mxu1 %v9424_v0  ;;  %v451_v63 = vld [vmem:[%s9342_s14 + $0x220] sm:$0xff] }
  0xe2   : > { %2636 = vmatprep.subr.bf16.mxu1 %v8214_v2  ;;  %v9476_v2 = vpack.c.bf16 %v449_v54, %v443_v52  ;;  %v9482_v8 = vpack.c.bf16 %v451_v63, %v445_v62  ;;  %v8265_v52 = vld [vmem:[#allocation4 + $0x7b4] ss:$24 sps:$4 sm:$0xff]  }
  0xe3   : > { %2524 = vmatpush1.bf16.msra.mxu0 %v8209_v1  ;;  %v8244_v1 = vld [vmem:[#allocation4 + $0x27c] ss:$24 sps:$4 sm:$0xff]  }
  0xe4   : > { %2525 = vmatprep.subr.bf16.mxu0 %v8217_v6  ;;  %v8242_v6 = vld [vmem:[#allocation4 + $0x278] ss:$24 sps:$4 sm:$0xff]   ;;  %v8268_v63 = vld [vmem:[#allocation4 + $0x1bc] ss:$24 sps:$4 sm:$0xff]  }
  0xe5   : > { %2637 = vmatpush1.bf16.msra.mxu1 %v8212_v4  ;;  %v464_v4 = vld [vmem:[%s9342_s14 + $0x288] sm:$0xff]  ;;  %v469_v54 = vld [vmem:[%s9342_s14 + $0x2b0] sm:$0xff] }
  0xe6   : > { %2350 = vmatmul.mubr.bf16.gmra.mxu0 %v9436_v12  ;;  %2638 = vmatprep.subr.bf16.mxu1 %v8220_v11  ;;  %v8250_v11 = vld [vmem:[#allocation4 + $0x24c] ss:$24 sps:$4 sm:$0xff]   ;;  %v9484_v13 = vpack.c.bf16 %v464_v4, %v458_v3  ;;  %v9520_v4 = vpack.c.bf16 %v475_v59, %v469_v54  ;;  %v8292_v54 = vld [vmem:[#allocation4 + $0x6fc] ss:$24 sps:$4 sm:$0xff]  }
  0xe7   : > { %2526 = vmatpush1.bf16.msra.mxu0 %v8215_v16  ;;  %2359 = vmatprep.mubr.bf16.mxu0 %v9440_v17  ;;  %v461_v16 = vld [vmem:[%s9342_s14 + $0x270] sm:$0xff]  ;;  %v8295_v59 = vld [vmem:[#allocation4 + $0x3cc] ss:$24 sps:$4 sm:$0xff]  }
  0xe8   : > { %2463 = vmatmul.mubr.bf16.gmra.mxu1 %v9442_v20  ;;  %2527 = vmatprep.subr.bf16.mxu0 %v8223_v21  ;;  %v8253_v21 = vld [vmem:[#allocation4 + $0x814] ss:$24 sps:$4 sm:$0xff]  }
  0xe9   : > { %2639 = vmatpush1.bf16.msra.mxu1 %v8218_v23  ;;  %2472 = vmatprep.mubr.bf16.mxu1 %v9444_v24  ;;  %v8248_v23 = vld [vmem:[#allocation4 + $0x248] ss:$24 sps:$4 sm:$0xff]  }
  0xea   : > { %2640 = vmatprep.subr.bf16.mxu1 %v8226_v26  ;;  %v463_v26 = vld [vmem:[%s9342_s14 + $0x280] sm:$0xff] }
  0xeb   : > { %2528 = vmatpush1.bf16.msra.mxu0 %v8221_v25  ;;  %v457_v25 = vld [vmem:[%s9342_s14 + $0x250] sm:$0xff] }
  0xec   : > { %2529 = vmatprep.subr.bf16.mxu0 %v8229_v30  ;;  %v9496_v30 = vpack.c.bf16 %v461_v16, %v455_v15  ;;  %v9502_v40 = vpack.c.bf16 %v463_v26, %v457_v25  ;;  %v393_v15 = vld [vmem:[%s9342_s14 + $0x50] sm:$0xff]  ;;  %v8272_v25 = vld [vmem:[#allocation4 + $0x188] ss:$24 sps:$4 sm:$0xff]  }
  0xed   : > { %2641 = vmatpush1.bf16.msra.mxu1 %v8224_v28  ;;  %v474_v28 = vld [vmem:[%s9342_s14 + $0x2d8] sm:$0xff] }
  0xee   : > { %2360 = vmatmul.mubr.bf16.gmra.mxu0 %v9456_v37  ;;  %2642 = vmatprep.subr.bf16.mxu1 %v8232_v36  ;;  %v9500_v36 = vpack.c.bf16 %v474_v28, %v468_v27  ;;  %v8277_v16 = vld [vmem:[#allocation4 + $0x45c] ss:$24 sps:$4 sm:$0xff]   ;;  %v8275_v28 = vld [vmem:[#allocation4 + $0x458] ss:$24 sps:$4 sm:$0xff]  }
  0xef   : > { %2530 = vmatpush2.bf16.msra.mxu0 %v8227_v43  ;;  %2369 = vmatprep.mubr.bf16.mxu0 %v9460_v44  ;;  %v8257_v43 = vld [vmem:[#allocation4 + $0x7e0] ss:$24 sps:$4 sm:$0xff]   ;;  %v8280_v27 = vld [vmem:[#allocation4 + $0x75c] ss:$24 sps:$4 sm:$0xff]  }
  0xf0   : > { %2473 = vmatmul.mubr.bf16.gmra.mxu1 %v9462_v45  ;;  %2531 = vmatprep.subr.bf16.mxu0 %v8235_v46  ;;  %v8262_v46 = vld [vmem:[#allocation4 + $0x1ec] ss:$24 sps:$4 sm:$0xff]  }
  0xf1   : > { %2643 = vmatpush2.bf16.msra.mxu1 %v8230_v47  ;;  %2482 = vmatprep.mubr.bf16.mxu1 %v9464_v48  ;;  %v467_v47 = vld [vmem:[%s9342_s14 + $0x2a0] sm:$0xff] }
  0xf2   : > { %2644 = vmatprep.subr.bf16.mxu1 %v8238_v51  ;;  %v473_v51 = vld [vmem:[%s9342_s14 + $0x2d0] sm:$0xff] }
  0xf3   : > { %2532 = vmatpush2.bf16.msra.mxu0 %v8233_v50  ;;  %v9505_v50 = vpack.c.bf16 %v476_v32, %v470_v31  ;;  %v9516_v62 = vpack.c.bf16 %v473_v51, %v467_v47  ;;  %v8283_v32 = vld [vmem:[#allocation4 + $0x42c] ss:$24 sps:$4 sm:$0xff]   ;;  %v418_v51 = vld [vmem:[%s9342_s14 + $0x118] sm:$0xff] }
  0xf4   : > { %2533 = vmatprep.subr.bf16.mxu0 %v8241_v57  ;;  %v388_v57 = vld [vmem:[%s9342_s14 + $0x28] sm:$0xff] }
  0xf5   : > { %2645 = vmatpush2.bf16.msra.mxu1 %v8236_v53  ;;  %v8260_v53 = vld [vmem:[#allocation4 + $0x1e8] ss:$24 sps:$4 sm:$0xff]   ;;  %v9518_v3 = vpack.c.bf16 %v394_v58, %v388_v57  ;;  %v8287_v57 = vld [vmem:[#allocation4 + $0x3f8] ss:$24 sps:$4 sm:$0xff]  }
  0xf6   : > { %2370 = vmatmul.mubr.bf16.gmra.mxu0 %v9476_v2  ;;  %2646 = vmatprep.subr.bf16.mxu1 %v8244_v1  ;;  %v8263_v1 = vld [vmem:[#allocation4 + $0x7b0] ss:$24 sps:$4 sm:$0xff]  }
  0xf7   : > { %2534 = vmatpush2.bf16.msra.mxu0 %v8239_v5  ;;  %2379 = vmatprep.mubr.bf16.mxu0 %v9480_v7  ;;  %v8266_v5 = vld [vmem:[#allocation4 + $0x1b8] ss:$24 sps:$4 sm:$0xff]   ;;  %v412_v47 = vld [vmem:[%s9342_s14 + $0xe8] sm:$0xff] }
  0xf8   : > { %2483 = vmatmul.mubr.bf16.gmra.mxu1 %v9482_v8  ;;  %2535 = vmatprep.subr.bf16.mxu0 %v8247_v9  ;;  %v8269_v9 = vld [vmem:[#allocation4 + $0x780] ss:$24 sps:$4 sm:$0xff]   ;;  %v9544_v58 = vpack.c.bf16 %v418_v51, %v412_v47 }
  0xf9   : > { %2647 = vmatpush2.bf16.msra.mxu1 %v8242_v6  ;;  %2492 = vmatprep.mubr.bf16.mxu1 %v9484_v13  ;;  %v8271_v6 = vld [vmem:[#allocation4 + $0x784] ss:$24 sps:$4 sm:$0xff]   ;;  %v8308_v51 = vld [vmem:[#allocation4 + $0x668] ss:$24 sps:$4 sm:$0xff]  }
  0xfa   : > { %2648 = vmatprep.subr.bf16.mxu1 %v8250_v11  ;;  %v387_v11 = vld [vmem:[%s9342_s14 + $0x20] sm:$0xff]  ;;  %v442_v47 = vld [vmem:[%s9342_s14 + $0x1d8] sm:$0xff] }
  0xfb   : > { %2536 = vmatpush2.bf16.msra.mxu0 %v8245_v10  ;;  %v8274_v10 = vld [vmem:[#allocation4 + $0x18c] ss:$24 sps:$4 sm:$0xff]   ;;  %v9530_v26 = vpack.c.bf16 %v393_v15, %v387_v11  ;;  %v430_v15 = vld [vmem:[%s9342_s14 + $0x178] sm:$0xff] }
  0xfc   : > { %2537 = vmatprep.subr.bf16.mxu0 %v8253_v21  ;;  %v400_v21 = vld [vmem:[%s9342_s14 + $0x88] sm:$0xff] }
  0xfd   : > { %2649 = vmatpush2.bf16.msra.mxu1 %v8248_v23  ;;  %v406_v23 = vld [vmem:[%s9342_s14 + $0xb8] sm:$0xff]  ;;  %v424_v11 = vld [vmem:[%s9342_s14 + $0x148] sm:$0xff] }
  0xfe   : > { %2380 = vmatmul.mubr.bf16.gmra.mxu0 %v9496_v30  ;;  %2650 = vmatprep.subr.bf16.mxu1 %v8256_v29  ;;  %v8278_v29 = vld [vmem:[#allocation4 + $0x758] ss:$24 sps:$4 sm:$0xff]   ;;  %v9532_v31 = vpack.c.bf16 %v406_v23, %v400_v21  ;;  %v8304_v23 = vld [vmem:[#allocation4 + $0x69c] ss:$24 sps:$4 sm:$0xff]  }
  0xff   : > { %2538 = vmatpush2.bf16.msra.mxu0 %v8251_v33  ;;  %2389 = vmatprep.mubr.bf16.mxu0 %v9500_v36  ;;  %v8281_v33 = vld [vmem:[#allocation4 + $0x428] ss:$24 sps:$4 sm:$0xff]  }
 0x100   : > { %2493 = vmatmul.mubr.bf16.gmra.mxu1 %v9502_v40  ;;  %2539 = vmatprep.subr.bf16.mxu0 %v8259_v41  ;;  %v399_v41 = vld [vmem:[%s9342_s14 + $0x80] sm:$0xff] }
 0x101   : > { %2651 = vmatpush2.bf16.msra.mxu1 %v8254_v35  ;;  %2502 = vmatprep.mubr.bf16.mxu1 %v9505_v50  ;;  %v8286_v35 = vld [vmem:[#allocation4 + $0x72c] ss:$24 sps:$4 sm:$0xff]  }
 0x102   : > { %2652 = vmatprep.subr.bf16.mxu1 %v8262_v46  ;;  %v8289_v46 = vld [vmem:[#allocation4 + $0x3fc] ss:$24 sps:$4 sm:$0xff]  }
 0x103   : > { %2540 = vmatpush2.bf16.msra.mxu0 %v8257_v43  ;;  %v405_v43 = vld [vmem:[%s9342_s14 + $0xb0] sm:$0xff] }
 0x104   : > { %2541 = vmatprep.subr.bf16.mxu0 %v8265_v52  ;;  %v8284_v52 = vld [vmem:[#allocation4 + $0x728] ss:$24 sps:$4 sm:$0xff]  }
 0x105   : > { %2653 = vmatpush2.bf16.msra.mxu1 %v8260_v53  ;;  %v9542_v53 = vpack.c.bf16 %v405_v43, %v399_v41  ;;  %v429_v41 = vld [vmem:[%s9342_s14 + $0x170] sm:$0xff] }
 0x106   : > { %2390 = vmatmul.mubr.bf16.gmra.mxu0 %v9516_v62  ;;  %2654 = vmatprep.subr.bf16.mxu1 %v8268_v63  ;;  %v8290_v63 = vld [vmem:[#allocation4 + $0x6f8] ss:$24 sps:$4 sm:$0xff]   ;;  %v8313_v43 = vld [vmem:[#allocation4 + $0x33c] ss:$24 sps:$4 sm:$0xff]  }
 0x107   : > { %2542 = vmatpush2.bf16.msra.mxu0 %v8263_v1  ;;  %2545 = vmatprep.mubr.bf16.mxu0 %v9518_v3  ;;  %v8293_v1 = vld [vmem:[#allocation4 + $0x3c8] ss:$24 sps:$4 sm:$0xff]  }
 0x108   : > { %2503 = vmatmul.mubr.bf16.gmra.mxu1 %v9520_v4  ;;  %2543 = vmatprep.subr.bf16.mxu0 %v8271_v6  ;;  %v411_v6 = vld [vmem:[%s9342_s14 + $0xe0] sm:$0xff] }
 0x109   : > { %2655 = vmatpush2.bf16.msra.mxu1 %v8266_v5  ;;  %2658 = vmatprep.mubr.bf16.mxu1 %v9362_v49  ;;  %v8298_v5 = vld [vmem:[#allocation4 + $0x6cc] ss:$24 sps:$4 sm:$0xff]  }
 0x10a   : > { %2656 = vmatprep.subr.bf16.mxu1 %v8274_v10  ;;  %v8301_v10 = vld [vmem:[#allocation4 + $0x39c] ss:$24 sps:$4 sm:$0xff]  }
 0x10b   : > { %2544 = vmatpush2.bf16.msra.mxu0 %v8269_v9  ;;  %v417_v9 = vld [vmem:[%s9342_s14 + $0x110] sm:$0xff] }
 0x10c   : > { %2739 = vmatprep.subr.bf16.mxu0 %v8277_v16  ;;  %v8296_v16 = vld [vmem:[#allocation4 + $0x6c8] ss:$24 sps:$4 sm:$0xff]   ;;  %v9554_v21 = vpack.c.bf16 %v417_v9, %v411_v6  ;;  %v8322_v6 = vld [vmem:[#allocation4 + $0x60c] ss:$24 sps:$4 sm:$0xff]  }
 0x10d   : > { %2657 = vmatpush2.bf16.msra.mxu1 %v8272_v25  ;;  %v8299_v25 = vld [vmem:[#allocation4 + $0x398] ss:$24 sps:$4 sm:$0xff]   ;;  %v435_v9 = vld [vmem:[%s9342_s14 + $0x1a0] sm:$0xff] }
 0x10e   : > { %2546 = vmatmul.mubr.bf16.vlgmr.msra.gmra.mxu0 %v9530_v26  ;;  %2852 = vmatprep.subr.bf16.mxu1 %v8280_v27  ;;  %v9556_v27 = vpack.c.bf16 %v430_v15, %v424_v11  ;;  %v8325_v11 = vld [vmem:[#allocation4 + $0x5dc] ss:$24 sps:$4 sm:$0xff]   ;;  %v448_v15 = vld [vmem:[%s9342_s14 + $0x208] sm:$0xff] }
 0x10f   : > { %2740 = vmatpush1.bf16.msra.mxu0 %v8275_v28  ;;  %2555 = vmatprep.mubr.bf16.mxu0 %v9532_v31  ;;  %v8307_v28 = vld [vmem:[#allocation4 + $0x36c] ss:$24 sps:$4 sm:$0xff]  }
 0x110   : > { %2659 = vmatmul.mubr.bf16.vlgmr.msra.gmra.mxu1 %v9376_v14  ;;  %2741 = vmatprep.subr.bf16.mxu0 %v8283_v32  ;;  %v8305_v32 = vld [vmem:[#allocation4 + $0x368] ss:$24 sps:$4 sm:$0xff]  }
 0x111   : > { %2853 = vmatpush1.bf16.msra.mxu1 %v8278_v29  ;;  %2668 = vmatprep.mubr.bf16.mxu1 %v9380_v18  ;;  %v8302_v29 = vld [vmem:[#allocation4 + $0x698] ss:$24 sps:$4 sm:$0xff]  }
 0x112   : > { %2854 = vmatprep.subr.bf16.mxu1 %v8286_v35  ;;  %v423_v35 = vld [vmem:[%s9342_s14 + $0x140] sm:$0xff] }
 0x113   : > { %2742 = vmatpush1.bf16.msra.mxu0 %v8281_v33  ;;  %v8310_v33 = vld [vmem:[#allocation4 + $0x66c] ss:$24 sps:$4 sm:$0xff]  }
 0x114   : > { %2743 = vmatprep.subr.bf16.mxu0 %v8289_v46  ;;  %v436_v46 = vld [vmem:[%s9342_s14 + $0x1a8] sm:$0xff] }
 0x115   : > { %2855 = vmatpush1.bf16.msra.mxu1 %v8284_v52  ;;  %v9566_v52 = vpack.c.bf16 %v429_v41, %v423_v35  ;;  %v8331_v35 = vld [vmem:[#allocation4 + $0x5ac] ss:$24 sps:$4 sm:$0xff]   ;;  %v8329_v41 = vld [vmem:[#allocation4 + $0x5a8] ss:$24 sps:$4 sm:$0xff]  }
 0x116   : > { %2556 = vmatmul.mubr.bf16.gmra.mxu0 %v9542_v53  ;;  %2856 = vmatprep.subr.bf16.mxu1 %v8292_v54  ;;  %v8316_v54 = vld [vmem:[#allocation4 + $0x63c] ss:$24 sps:$4 sm:$0xff]  }
 0x117   : > { %2744 = vmatpush1.bf16.msra.mxu0 %v8287_v57  ;;  %2565 = vmatprep.mubr.bf16.mxu0 %v9544_v58  ;;  %v8311_v57 = vld [vmem:[#allocation4 + $0x338] ss:$24 sps:$4 sm:$0xff]  }
 0x118   : > { %2669 = vmatmul.mubr.bf16.gmra.mxu1 %v9396_v34  ;;  %2745 = vmatprep.subr.bf16.mxu0 %v8295_v59  ;;  %v9568_v59 = vpack.c.bf16 %v442_v47, %v436_v46  ;;  %v447_v46 = vld [vmem:[%s9342_s14 + $0x200] sm:$0xff]  ;;  %v453_v47 = vld [vmem:[%s9342_s14 + $0x230] sm:$0xff] }
 0x119   : > { %2857 = vmatpush1.bf16.msra.mxu1 %v8290_v63  ;;  %2678 = vmatprep.mubr.bf16.mxu1 %v9400_v38  ;;  %v8319_v63 = vld [vmem:[#allocation4 + $0x30c] ss:$24 sps:$4 sm:$0xff]  }
 0x11a   : > { %2858 = vmatprep.subr.bf16.mxu1 %v8298_v5  ;;  %v8317_v5 = vld [vmem:[#allocation4 + $0x308] ss:$24 sps:$4 sm:$0xff]  }
 0x11b   : > { %2746 = vmatpush1.bf16.msra.mxu0 %v8293_v1  ;;  %v8314_v1 = vld [vmem:[#allocation4 + $0x638] ss:$24 sps:$4 sm:$0xff]  }
 0x11c   : > { %2747 = vmatprep.subr.bf16.mxu0 %v8301_v10  ;;  %v441_v10 = vld [vmem:[%s9342_s14 + $0x1d0] sm:$0xff] }
 0x11d   : > { %2859 = vmatpush1.bf16.msra.mxu1 %v8296_v16  ;;  %v454_v16 = vld [vmem:[%s9342_s14 + $0x238] sm:$0xff] }
 0x11e   : > { %2566 = vmatmul.mubr.bf16.gmra.mxu0 %v9554_v21  ;;  %2860 = vmatprep.subr.bf16.mxu1 %v8304_v23  ;;  %v8320_v23 = vld [vmem:[#allocation4 + $0x608] ss:$24 sps:$4 sm:$0xff]  }
 0x11f   : > { %2748 = vmatpush1.bf16.msra.mxu0 %v8299_v25  ;;  %2575 = vmatprep.mubr.bf16.mxu0 %v9556_v27  ;;  %v9578_v25 = vpack.c.bf16 %v441_v10, %v435_v9  ;;  %v8338_v9 = vld [vmem:[#allocation4 + $0x878] ss:$24 sps:$4 sm:$0xff]  }
 0x120   : > { %2679 = vmatmul.mubr.bf16.gmra.mxu1 %v9416_v56  ;;  %2749 = vmatprep.subr.bf16.mxu0 %v8307_v28  ;;  %v8328_v28 = vld [vmem:[#allocation4 + $0x8dc] ss:$24 sps:$4 sm:$0xff]  }
 0x121   : > { %2861 = vmatpush1.bf16.msra.mxu1 %v8302_v29  ;;  %2688 = vmatprep.mubr.bf16.mxu1 %v9420_v60  ;;  %v8323_v29 = vld [vmem:[#allocation4 + $0x5d8] ss:$24 sps:$4 sm:$0xff]  }
 0x122   : > { %2862 = vmatprep.subr.bf16.mxu1 %v8310_v33  ;;  %v9580_v33 = vpack.c.bf16 %v454_v16, %v448_v15  ;;  %v8341_v15 = vld [vmem:[#allocation4 + $0x548] ss:$24 sps:$4 sm:$0xff]   ;;  %v8346_v16 = vld [vmem:[#allocation4 + $0x84c] ss:$24 sps:$4 sm:$0xff]  }
 0x123   : > { %2750 = vmatpush1.bf16.msra.mxu0 %v8305_v32  ;;  %v8326_v32 = vld [vmem:[#allocation4 + $0x8d8] ss:$24 sps:$4 sm:$0xff]  }
 0x124   : > { %2751 = vmatprep.subr.bf16.mxu0 %v8313_v43  ;;  %11806 = vst [vmem:[#allocation17_spill] sm:$0xff] %v9580_v33  ;;  %v8334_v43 = vld [vmem:[#allocation4 + $0x8ac] ss:$24 sps:$4 sm:$0xff]  }
 0x125   : > { %2863 = vmatpush1.bf16.msra.mxu1 %v8308_v51  ;;  %v8337_v51 = vld [vmem:[#allocation4 + $0x57c] ss:$24 sps:$4 sm:$0xff]  }
 0x126   : > { %2576 = vmatmul.mubr.bf16.gmra.mxu0 %v9566_v52  ;;  %2864 = vmatprep.subr.bf16.mxu1 %v8316_v54  ;;  %v460_v54 = vld [vmem:[%s9342_s14 + $0x268] sm:$0xff] }
 0x127   : > { %2752 = vmatpush1.bf16.msra.mxu0 %v8311_v57  ;;  %2585 = vmatprep.mubr.bf16.mxu0 %v9568_v59  ;;  %v466_v57 = vld [vmem:[%s9342_s14 + $0x298] sm:$0xff] }
 0x128   : > { %2689 = vmatmul.mubr.bf16.gmra.mxu1 %v9436_v12  ;;  %2753 = vmatprep.subr.bf16.mxu0 %v8319_v63  ;;  %v8332_v63 = vld [vmem:[#allocation4 + $0x8a8] ss:$24 sps:$4 sm:$0xff]   ;;  %v9592_v10 = vpack.c.bf16 %v466_v57, %v460_v54  ;;  %v8355_v54 = vld [vmem:[#allocation4 + $0x4ec] ss:$24 sps:$4 sm:$0xff]   ;;  %v8350_v57 = vld [vmem:[#allocation4 + $0x818] ss:$24 sps:$4 sm:$0xff]  }
 0x129   : > { %2865 = vmatpush1.bf16.msra.mxu1 %v8314_v1  ;;  %2698 = vmatprep.mubr.bf16.mxu1 %v9440_v17  ;;  %v9590_v1 = vpack.c.bf16 %v453_v47, %v447_v46  ;;  %v8352_v46 = vld [vmem:[#allocation4 + $0x81c] ss:$24 sps:$4 sm:$0xff]   ;;  %v8347_v47 = vld [vmem:[#allocation4 + $0x518] ss:$24 sps:$4 sm:$0xff]  }
 0x12a   : > { %2866 = vmatprep.subr.bf16.mxu1 %v8322_v6  ;;  %v8335_v6 = vld [vmem:[#allocation4 + $0x578] ss:$24 sps:$4 sm:$0xff]   ;;  %11808 = vst [vmem:[#allocation19_spill] sm:$0xff] %v9592_v10 }
 0x12b   : > { %2754 = vmatpush1.bf16.msra.mxu0 %v8317_v5  ;;  %11807 = vst [vmem:[#allocation18_spill] sm:$0xff] %v9590_v1  ;;  %v8340_v5 = vld [vmem:[#allocation4 + $0x87c] ss:$24 sps:$4 sm:$0xff]  }
 0x12c   : > { %2755 = vmatprep.subr.bf16.mxu0 %v8325_v11  ;;  %v8343_v11 = vld [vmem:[#allocation4 + $0x54c] ss:$24 sps:$4 sm:$0xff]  }
 0x12d   : > { %2867 = vmatpush1.bf16.msra.mxu1 %v8320_v23  ;;  %v459_v23 = vld [vmem:[%s9342_s14 + $0x260] sm:$0xff] }
 0x12e   : > { %2586 = vmatmul.mubr.bf16.gmra.mxu0 %v9578_v25  ;;  %2868 = vmatprep.subr.bf16.mxu1 %v8328_v28  ;;  %v465_v28 = vld [vmem:[%s9342_s14 + $0x290] sm:$0xff] }
 0x12f   : > { %2756 = vmatpush2.bf16.msra.mxu0 %v8323_v29  ;;  %2595 = vmatprep.mubr.bf16.mxu0 %v9580_v33  ;;  %v8349_v29 = vld [vmem:[#allocation4 + $0x51c] ss:$24 sps:$4 sm:$0xff]  }
 0x130   : > { %2699 = vmatmul.mubr.bf16.gmra.mxu1 %v9456_v37  ;;  %2757 = vmatprep.subr.bf16.mxu0 %v8331_v35  ;;  %v478_v35 = vld [vmem:[%s9342_s14 + $0x2f8] sm:$0xff] }
 0x131   : > { %2869 = vmatpush2.bf16.msra.mxu1 %v8326_v32  ;;  %2708 = vmatprep.mubr.bf16.mxu1 %v9460_v44  ;;  %v472_v32 = vld [vmem:[%s9342_s14 + $0x2c8] sm:$0xff] }
 0x132   : > { %2870 = vmatprep.subr.bf16.mxu1 %v8334_v43  ;;  %v9602_v43 = vpack.c.bf16 %v465_v28, %v459_v23  ;;  %v8364_v23 = vld [vmem:[#allocation4 + $0x7bc] ss:$24 sps:$4 sm:$0xff]   ;;  %v8359_v28 = vld [vmem:[#allocation4 + $0x4b8] ss:$24 sps:$4 sm:$0xff]  }
 0x133   : > { %2758 = vmatpush2.bf16.msra.mxu0 %v8329_v41  ;;  %v8344_v41 = vld [vmem:[#allocation4 + $0x848] ss:$24 sps:$4 sm:$0xff]  }
 0x134   : > { %2759 = vmatprep.subr.bf16.mxu0 %v8337_v51  ;;  %11809 = vst [vmem:[#allocation20_spill] sm:$0xff] %v9602_v43  ;;  %v9604_v51 = vpack.c.bf16 %v478_v35, %v472_v32  ;;  %v8362_v32 = vld [vmem:[#allocation4 + $0x7b8] ss:$24 sps:$4 sm:$0xff]   ;;  %v8370_v35 = vld [vmem:[#allocation4 + $0x78c] ss:$24 sps:$4 sm:$0xff]  }
 0x135   : > { %2871 = vmatpush2.bf16.msra.mxu1 %v8332_v63  ;;  %v8353_v63 = vld [vmem:[#allocation4 + $0x4e8] ss:$24 sps:$4 sm:$0xff]  }
 0x136   : > { %2596 = vmatmul.mubr.bf16.gmra.mxu0 %v9590_v1  ;;  %2872 = vmatprep.subr.bf16.mxu1 %v8340_v5  ;;  %11810 = vst [vmem:[#allocation21_spill] sm:$0xff] %v9604_v51  ;;  %v8358_v5 = vld [vmem:[#allocation4 + $0x7ec] ss:$24 sps:$4 sm:$0xff]  }
 0x137   : > { %2760 = vmatpush2.bf16.msra.mxu0 %v8335_v6  ;;  %2605 = vmatprep.mubr.bf16.mxu0 %v9592_v10  ;;  %v471_v6 = vld [vmem:[%s9342_s14 + $0x2c0] sm:$0xff] }
 0x138   : > { %2709 = vmatmul.mubr.bf16.gmra.mxu1 %v9476_v2  ;;  %2761 = vmatprep.subr.bf16.mxu0 %v8343_v11  ;;  %v8361_v11 = vld [vmem:[#allocation4 + $0x4bc] ss:$24 sps:$4 sm:$0xff]  }
 0x139   : > { %2873 = vmatpush2.bf16.msra.mxu1 %v8338_v9  ;;  %2718 = vmatprep.mubr.bf16.mxu1 %v9480_v7  ;;  %v477_v9 = vld [vmem:[%s9342_s14 + $0x2f0] sm:$0xff] }
 0x13a   : > { %2874 = vmatprep.subr.bf16.mxu1 %v8346_v16  ;;  %v9612_v16 = vpack.c.bf16 %v477_v9, %v471_v6  ;;  %v8382_v6 = vld [vmem:[#allocation4 + $0x434] ss:$24 sps:$4 sm:$0xff]   ;;  %v8377_v9 = vld [vmem:[#allocation4 + $0x130] ss:$24 sps:$4 sm:$0xff]  }
 0x13b   : > { %2762 = vmatpush2.bf16.msra.mxu0 %v8341_v15  ;;  %v8356_v15 = vld [vmem:[#allocation4 + $0x7e8] ss:$24 sps:$4 sm:$0xff]  }
 0x13c   : > { %2763 = vmatprep.subr.bf16.mxu0 %v8349_v29  ;;  %11811 = vst [vmem:[#allocation22_spill] sm:$0xff] %v9612_v16  ;;  %v8367_v29 = vld [vmem:[#allocation4 + $0x48c] ss:$24 sps:$4 sm:$0xff]  }
 0x13d   : > { %2875 = vmatpush2.bf16.msra.mxu1 %v8344_v41  ;;  %v8365_v41 = vld [vmem:[#allocation4 + $0x488] ss:$24 sps:$4 sm:$0xff]  }
 0x13e   : > { %2606 = vmatmul.mubr.bf16.gmra.mxu0 %v9602_v43  ;;  %2876 = vmatprep.subr.bf16.mxu1 %v8352_v46  ;;  %v8373_v46 = vld [vmem:[#allocation4 + $0x164] ss:$24 sps:$4 sm:$0xff]  }
 0x13f   : > { %2764 = vmatpush2.bf16.msra.mxu0 %v8347_v47  ;;  %2615 = vmatprep.mubr.bf16.mxu0 %v9604_v51  ;;  %v8368_v47 = vld [vmem:[#allocation4 + $0x788] ss:$24 sps:$4 sm:$0xff]  }
 0x140   : > { %2719 = vmatmul.mubr.bf16.gmra.mxu1 %v9496_v30  ;;  %2765 = vmatprep.subr.bf16.mxu0 %v8355_v54  ;;  %v8376_v54 = vld [vmem:[#allocation4 + $0x464] ss:$24 sps:$4 sm:$0xff]  }
 0x141   : > { %2877 = vmatpush2.bf16.msra.mxu1 %v8350_v57  ;;  %2728 = vmatprep.mubr.bf16.mxu1 %v9500_v36  ;;  %v8371_v57 = vld [vmem:[#allocation4 + $0x160] ss:$24 sps:$4 sm:$0xff]  }
 0x142   : > { %2878 = vmatprep.subr.bf16.mxu1 %v8358_v5  ;;  %v8374_v5 = vld [vmem:[#allocation4 + $0x460] ss:$24 sps:$4 sm:$0xff]  }
 0x143   : > { %2766 = vmatpush2.bf16.msra.mxu0 %v8353_v63  ;;  %v8379_v63 = vld [vmem:[#allocation4 + $0x134] ss:$24 sps:$4 sm:$0xff]  }
 0x144   : > { %2767 = vmatprep.subr.bf16.mxu0 %v8361_v11  ;;  %v8385_v11 = vld [vmem:[#allocation4 + $0x104] ss:$24 sps:$4 sm:$0xff]  }
 0x145   : > { %2879 = vmatpush2.bf16.msra.mxu1 %v8356_v15  ;;  %v8380_v15 = vld [vmem:[#allocation4 + $0x430] ss:$24 sps:$4 sm:$0xff]  }
 0x146   : > { %2616 = vmatmul.mubr.bf16.gmra.mxu0 %v9612_v16  ;;  %2880 = vmatprep.subr.bf16.mxu1 %v8364_v23  ;;  %v8388_v23 = vld [vmem:[#allocation4 + $0x404] ss:$24 sps:$4 sm:$0xff]  }
 0x147   : > { %2768 = vmatpush2.bf16.msra.mxu0 %v8359_v28  ;;  %2771 = vmatprep.mubr.bf16.mxu0 %v9367_v55  ;;  %v8383_v28 = vld [vmem:[#allocation4 + $0x100] ss:$24 sps:$4 sm:$0xff]  }
 0x148   : > { %2729 = vmatmul.mubr.bf16.gmra.mxu1 %v9516_v62  ;;  %2769 = vmatprep.subr.bf16.mxu0 %v8367_v29  ;;  %v8391_v29 = vld [vmem:[#allocation4 + $0xd4] ss:$24 sps:$4 sm:$0xff]  }
 0x149   : > { %2881 = vmatpush2.bf16.msra.mxu1 %v8362_v32  ;;  %2884 = vmatprep.mubr.bf16.mxu1 %v9518_v3  ;;  %v8386_v32 = vld [vmem:[#allocation4 + $0x400] ss:$24 sps:$4 sm:$0xff]  }
 0x14a   : > { %2882 = vmatprep.subr.bf16.mxu1 %v8370_v35  ;;  %v8394_v35 = vld [vmem:[#allocation4 + $0x3d4] ss:$24 sps:$4 sm:$0xff]  }
 0x14b   : > { %2770 = vmatpush2.bf16.msra.mxu0 %v8365_v41  ;;  %v8389_v41 = vld [vmem:[#allocation4 + $0xd0] ss:$24 sps:$4 sm:$0xff]  }
 0x14c   : > { %2965 = vmatprep.subr.bf16.mxu0 %v8373_v46  ;;  %v8397_v46 = vld [vmem:[#allocation4 + $0xa4] ss:$24 sps:$4 sm:$0xff]  }
 0x14d   : > { %2883 = vmatpush2.bf16.msra.mxu1 %v8368_v47  ;;  %v8392_v47 = vld [vmem:[#allocation4 + $0x3d0] ss:$24 sps:$4 sm:$0xff]  }
 0x14e   : > { %2772 = vmatmul.mubr.bf16.vlgmr.msra.gmra.mxu0 %v9382_v19  ;;  %3078 = vmatprep.subr.bf16.mxu1 %v8376_v54  ;;  %v8400_v54 = vld [vmem:[#allocation4 + $0x3a4] ss:$24 sps:$4 sm:$0xff]  }
 0x14f   : > { %2966 = vmatpush1.bf16.msra.mxu0 %v8371_v57  ;;  %2781 = vmatprep.mubr.bf16.mxu0 %v9384_v22  ;;  %v8395_v57 = vld [vmem:[#allocation4 + $0xa0] ss:$24 sps:$4 sm:$0xff]  }
 0x150   : > { %2885 = vmatmul.mubr.bf16.vlgmr.msra.gmra.mxu1 %v9530_v26  ;;  %2967 = vmatprep.subr.bf16.mxu0 %v8379_v63  ;;  %v8403_v63 = vld [vmem:[#allocation4 + $0x74] ss:$24 sps:$4 sm:$0xff]  }
 0x151   : > { %3079 = vmatpush1.bf16.msra.mxu1 %v8374_v5  ;;  %2894 = vmatprep.mubr.bf16.mxu1 %v9532_v31  ;;  %v8398_v5 = vld [vmem:[#allocation4 + $0x3a0] ss:$24 sps:$4 sm:$0xff]  }
 0x152   : > { %3080 = vmatprep.subr.bf16.mxu1 %v8382_v6  ;;  %v8406_v6 = vld [vmem:[#allocation4 + $0x374] ss:$24 sps:$4 sm:$0xff]  }
 0x153   : > { %2968 = vmatpush1.bf16.msra.mxu0 %v8377_v9  ;;  %v8401_v9 = vld [vmem:[#allocation4 + $0x70] ss:$24 sps:$4 sm:$0xff]  }
 0x154   : > { %2969 = vmatprep.subr.bf16.mxu0 %v8385_v11  ;;  %v8409_v11 = vld [vmem:[#allocation4 + $0x44] ss:$24 sps:$4 sm:$0xff]  }
 0x155   : > { %3081 = vmatpush1.bf16.msra.mxu1 %v8380_v15  ;;  %v8404_v15 = vld [vmem:[#allocation4 + $0x370] ss:$24 sps:$4 sm:$0xff]  }
 0x156   : > { %2782 = vmatmul.mubr.bf16.gmra.mxu0 %v9402_v39  ;;  %3082 = vmatprep.subr.bf16.mxu1 %v8388_v23  ;;  %v8412_v23 = vld [vmem:[#allocation4 + $0x344] ss:$24 sps:$4 sm:$0xff]  }
 0x157   : > { %2970 = vmatpush1.bf16.msra.mxu0 %v8383_v28  ;;  %2791 = vmatprep.mubr.bf16.mxu0 %v9404_v42  ;;  %v8407_v28 = vld [vmem:[#allocation4 + $0x40] ss:$24 sps:$4 sm:$0xff]  }
 0x158   : > { %2895 = vmatmul.mubr.bf16.gmra.mxu1 %v9542_v53  ;;  %2971 = vmatprep.subr.bf16.mxu0 %v8391_v29  ;;  %v8415_v29 = vld [vmem:[#allocation4 + $0x14] ss:$24 sps:$4 sm:$0xff]  }
 0x159   : > { %3083 = vmatpush1.bf16.msra.mxu1 %v8386_v32  ;;  %2904 = vmatprep.mubr.bf16.mxu1 %v9544_v58  ;;  %v8410_v32 = vld [vmem:[#allocation4 + $0x340] ss:$24 sps:$4 sm:$0xff]  }
 0x15a   : > { %3084 = vmatprep.subr.bf16.mxu1 %v8394_v35  ;;  %v8418_v35 = vld [vmem:[#allocation4 + $0x314] ss:$24 sps:$4 sm:$0xff]  }
 0x15b   : > { %2972 = vmatpush1.bf16.msra.mxu0 %v8389_v41  ;;  %v8413_v41 = vld [vmem:[#allocation4 + $0x10] ss:$24 sps:$4 sm:$0xff]  }
 0x15c   : > { %2973 = vmatprep.subr.bf16.mxu0 %v8397_v46  ;;  %v8421_v46 = vld [vmem:[#allocation4 + $0x2e4] ss:$24 sps:$4 sm:$0xff]  }
 0x15d   : > { %3085 = vmatpush1.bf16.msra.mxu1 %v8392_v47  ;;  %v8416_v47 = vld [vmem:[#allocation4 + $0x310] ss:$24 sps:$4 sm:$0xff]  }
 0x15e   : > { %2792 = vmatmul.mubr.bf16.gmra.mxu0 %v9422_v61  ;;  %3086 = vmatprep.subr.bf16.mxu1 %v8400_v54  ;;  %v8424_v54 = vld [vmem:[#allocation4 + $0x5e4] ss:$24 sps:$4 sm:$0xff]  }
 0x15f   : > { %2974 = vmatpush1.bf16.msra.mxu0 %v8395_v57  ;;  %2801 = vmatprep.mubr.bf16.mxu0 %v9424_v0  ;;  %v8419_v57 = vld [vmem:[#allocation4 + $0x2e0] ss:$24 sps:$4 sm:$0xff]  }
 0x160   : > { %2905 = vmatmul.mubr.bf16.gmra.mxu1 %v9554_v21  ;;  %2975 = vmatprep.subr.bf16.mxu0 %v8403_v63  ;;  %v8427_v63 = vld [vmem:[#allocation4 + $0x2b4] ss:$24 sps:$4 sm:$0xff]  }
 0x161   : > { %3087 = vmatpush1.bf16.msra.mxu1 %v8398_v5  ;;  %2914 = vmatprep.mubr.bf16.mxu1 %v9556_v27  ;;  %v8422_v5 = vld [vmem:[#allocation4 + $0x5e0] ss:$24 sps:$4 sm:$0xff]  }
 0x162   : > { %3088 = vmatprep.subr.bf16.mxu1 %v8406_v6  ;;  %v8430_v6 = vld [vmem:[#allocation4 + $0x5b4] ss:$24 sps:$4 sm:$0xff]  }
 0x163   : > { %2976 = vmatpush1.bf16.msra.mxu0 %v8401_v9  ;;  %v8425_v9 = vld [vmem:[#allocation4 + $0x2b0] ss:$24 sps:$4 sm:$0xff]  }
 0x164   : > { %2977 = vmatprep.subr.bf16.mxu0 %v8409_v11  ;;  %v8433_v11 = vld [vmem:[#allocation4 + $0x284] ss:$24 sps:$4 sm:$0xff]  }
 0x165   : > { %3089 = vmatpush1.bf16.msra.mxu1 %v8404_v15  ;;  %v8428_v15 = vld [vmem:[#allocation4 + $0x5b0] ss:$24 sps:$4 sm:$0xff]  }
 0x166   : > { %2802 = vmatmul.mubr.bf16.gmra.mxu0 %v9442_v20  ;;  %3090 = vmatprep.subr.bf16.mxu1 %v8412_v23  ;;  %v8436_v23 = vld [vmem:[#allocation4 + $0x584] ss:$24 sps:$4 sm:$0xff]  }
 0x167   : > { %2978 = vmatpush1.bf16.msra.mxu0 %v8407_v28  ;;  %2811 = vmatprep.mubr.bf16.mxu0 %v9444_v24  ;;  %v8431_v28 = vld [vmem:[#allocation4 + $0x280] ss:$24 sps:$4 sm:$0xff]  }
 0x168   : > { %2915 = vmatmul.mubr.bf16.gmra.mxu1 %v9566_v52  ;;  %2979 = vmatprep.subr.bf16.mxu0 %v8415_v29  ;;  %v8439_v29 = vld [vmem:[#allocation4 + $0x254] ss:$24 sps:$4 sm:$0xff]  }
 0x169   : > { %3091 = vmatpush1.bf16.msra.mxu1 %v8410_v32  ;;  %2924 = vmatprep.mubr.bf16.mxu1 %v9568_v59  ;;  %v8434_v32 = vld [vmem:[#allocation4 + $0x580] ss:$24 sps:$4 sm:$0xff]  }
 0x16a   : > { %3092 = vmatprep.subr.bf16.mxu1 %v8418_v35  ;;  %v8442_v35 = vld [vmem:[#allocation4 + $0x554] ss:$24 sps:$4 sm:$0xff]  }
 0x16b   : > { %2980 = vmatpush1.bf16.msra.mxu0 %v8413_v41  ;;  %v8437_v41 = vld [vmem:[#allocation4 + $0x250] ss:$24 sps:$4 sm:$0xff]  }
 0x16c   : > { %2981 = vmatprep.subr.bf16.mxu0 %v8421_v46  ;;  %v8445_v46 = vld [vmem:[#allocation4 + $0x224] ss:$24 sps:$4 sm:$0xff]  }
 0x16d   : > { %3093 = vmatpush1.bf16.msra.mxu1 %v8416_v47  ;;  %v8440_v47 = vld [vmem:[#allocation4 + $0x550] ss:$24 sps:$4 sm:$0xff]  }
 0x16e   : > { %2812 = vmatmul.mubr.bf16.gmra.mxu0 %v9462_v45  ;;  %3094 = vmatprep.subr.bf16.mxu1 %v8424_v54  ;;  %v8448_v54 = vld [vmem:[#allocation4 + $0x524] ss:$24 sps:$4 sm:$0xff]  }
 0x16f   : > { %2982 = vmatpush2.bf16.msra.mxu0 %v8419_v57  ;;  %2821 = vmatprep.mubr.bf16.mxu0 %v9464_v48  ;;  %v8443_v57 = vld [vmem:[#allocation4 + $0x220] ss:$24 sps:$4 sm:$0xff]  }
 0x170   : > { %2925 = vmatmul.mubr.bf16.gmra.mxu1 %v9578_v25  ;;  %2983 = vmatprep.subr.bf16.mxu0 %v8427_v63  ;;  %v8451_v63 = vld [vmem:[#allocation4 + $0x1f4] ss:$24 sps:$4 sm:$0xff]  }
 0x171   : > { %3095 = vmatpush2.bf16.msra.mxu1 %v8422_v5  ;;  %2934 = vmatprep.mubr.bf16.mxu1 %v9580_v33  ;;  %v8446_v5 = vld [vmem:[#allocation4 + $0x520] ss:$24 sps:$4 sm:$0xff]  }
 0x172   : > { %3096 = vmatprep.subr.bf16.mxu1 %v8430_v6  ;;  %v8454_v6 = vld [vmem:[#allocation4 + $0x4f4] ss:$24 sps:$4 sm:$0xff]   ;;  %v8506_v33 = vld [vmem:[#allocation4 + $0x8e0] ss:$24 sps:$4 sm:$0xff]  }
 0x173   : > { %2984 = vmatpush2.bf16.msra.mxu0 %v8425_v9  ;;  %v8449_v9 = vld [vmem:[#allocation4 + $0x1f0] ss:$24 sps:$4 sm:$0xff]  }
 0x174   : > { %2985 = vmatprep.subr.bf16.mxu0 %v8433_v11  ;;  %v11743_v11 = vlaneseq }
 0x175   : > { %3097 = vmatpush2.bf16.msra.mxu1 %v8428_v15  ;;  %v8457_v15 = vld [vmem:[#allocation4 + $0x1c4] ss:$24 sps:$4 sm:$0xff]  }
 0x176   : > { %2822 = vmatmul.mubr.bf16.gmra.mxu0 %v9482_v8  ;;  %3098 = vmatprep.subr.bf16.mxu1 %v8436_v23  ;;  %v8452_v23 = vld [vmem:[#allocation4 + $0x4f0] ss:$24 sps:$4 sm:$0xff]  }
 0x177   : > { %2986 = vmatpush2.bf16.msra.mxu0 %v8431_v28  ;;  %2831 = vmatprep.mubr.bf16.mxu0 %v9484_v13  ;;  %v8460_v28 = vld [vmem:[#allocation4 + $0x4c4] ss:$24 sps:$4 sm:$0xff]  }
 0x178   : > { %2935 = vmatmul.mubr.bf16.gmra.mxu1 %v9590_v1  ;;  %2987 = vmatprep.subr.bf16.mxu0 %v8439_v29  ;;  %v8455_v29 = vld [vmem:[#allocation4 + $0x1c0] ss:$24 sps:$4 sm:$0xff]  }
 0x179   : > { %3099 = vmatpush2.bf16.msra.mxu1 %v8434_v32  ;;  %2944 = vmatprep.mubr.bf16.mxu1 %v9592_v10  ;;  %v9647_v32 = vshrl.u32 %v11743_v11, 7  ;;  %v8494_v10 = vld [vmem:[#allocation4 + $0x640] ss:$24 sps:$4 sm:$0xff]  }
 0x17a   : > { %3100 = vmatprep.subr.bf16.mxu1 %v8442_v35  ;;  %v8463_v35 = vld [vmem:[#allocation4 + $0x194] ss:$24 sps:$4 sm:$0xff]  }
 0x17b   : > { %2988 = vmatpush2.bf16.msra.mxu0 %v8437_v41  ;;  %11812 = vst [vmem:[#allocation23_spill] sm:$0xff] %v9647_v32  ;;  %v8458_v41 = vld [vmem:[#allocation4 + $0x4c0] ss:$24 sps:$4 sm:$0xff]  }
 0x17c   : > { %2989 = vmatprep.subr.bf16.mxu0 %v8445_v46  ;;  %v8461_v46 = vld [vmem:[#allocation4 + $0x190] ss:$24 sps:$4 sm:$0xff]  }
 0x17d   : > { %3101 = vmatpush2.bf16.msra.mxu1 %v8440_v47  ;;  %v8466_v47 = vld [vmem:[#allocation4 + $0x494] ss:$24 sps:$4 sm:$0xff]  }
 0x17e   : > { %2832 = vmatmul.mubr.bf16.gmra.mxu0 %v9502_v40  ;;  %3102 = vmatprep.subr.bf16.mxu1 %v8448_v54  ;;  %v815_v54 = vld [vmem:[#allocation6] sm:$0x3f] }
 0x17f   : > { %2990 = vmatpush2.bf16.msra.mxu0 %v8443_v57  ;;  %2841 = vmatprep.mubr.bf16.mxu0 %v9505_v50  ;;  %v9652_v57 = vsub.s32 0, %v9647_v32 }
 0x180   : > { %2945 = vmatmul.mubr.bf16.gmra.mxu1 %v9602_v43  ;;  %2991 = vmatprep.subr.bf16.mxu0 %v8451_v63  ;;  %v8469_v63 = vld [vmem:[#allocation4 + $0x764] ss:$24 sps:$4 sm:$0xff]  }
 0x181   : > { %3103 = vmatpush2.bf16.msra.mxu1 %v8446_v5  ;;  %2954 = vmatprep.mubr.bf16.mxu1 %v9604_v51  ;;  %11813 = vst [vmem:[#allocation24_spill] sm:$0xff] %v9652_v57  ;;  %v8464_v5 = vld [vmem:[#allocation4 + $0x490] ss:$24 sps:$4 sm:$0xff]   ;;  %v8503_v51 = vld [vmem:[#allocation7 + $0x30] ss:$8 sps:$4 sm:$0xff]  }
 0x182   : > { %3104 = vmatprep.subr.bf16.mxu1 %v8454_v6  ;;  %v9657_v6 = vsub.s32 1, %v9647_v32 }
 0x183   : > { %2992 = vmatpush2.bf16.msra.mxu0 %v8449_v9  ;;  %v8481_v9 = vld [vmem:[#allocation7 + $0x74] ss:$8 sps:$4 sm:$0xff]  }
 0x184   : > { %2993 = vmatprep.subr.bf16.mxu0 %v8457_v15  ;;  %11814 = vst [vmem:[#allocation25_spill] sm:$0xff] %v9657_v6  ;;  %v8467_v15 = vld [vmem:[#allocation4 + $0x760] ss:$24 sps:$4 sm:$0xff]  }
 0x185   : > { %3105 = vmatpush2.bf16.msra.mxu1 %v8452_v23  ;;  %v8472_v23 = vld [vmem:[#allocation4 + $0x734] ss:$24 sps:$4 sm:$0xff]  }
 0x186   : > { %2842 = vmatmul.mubr.bf16.gmra.mxu0 %v9520_v4  ;;  %3106 = vmatprep.subr.bf16.mxu1 %v8460_v28  ;;  %v9663_v28 = vrot.slane %v815_v54, %v9657_v6 }
 0x187   : > { %2994 = vmatpush2.bf16.msra.mxu0 %v8455_v29  ;;  %2997 = vmatprep.mubr.bf16.mxu0 %v9362_v49  ;;  %v9660_v49 = vrot.slane %v815_v54, %v9652_v57  ;;  %v8479_v29 = vld [vmem:[#allocation7 + $0x70] ss:$8 sps:$4 sm:$0xff]  }
 0x188   : > { %2955 = vmatmul.mubr.bf16.gmra.mxu1 %v9612_v16  ;;  %2995 = vmatprep.subr.bf16.mxu0 %v8463_v35  ;;  %v8473_v57 = vld [vmem:[#allocation4 + $0x700] ss:$24 sps:$4 sm:$0xff]  }
 0x189   : > { %3107 = vmatpush2.bf16.msra.mxu1 %v8458_v41  ;;  %3110 = vmatprep.mubr.bf16.mxu1 %v9367_v55  ;;  %v8487_v55 = vld [vmem:[#allocation7 + $0x64] ss:$8 sps:$4 sm:$0xff]  }
 0x18a   : > { %3108 = vmatprep.subr.bf16.mxu1 %v8466_v47 }
 0x18b   : > { %2996 = vmatpush2.bf16.msra.mxu0 %v8461_v46  ;;  %v8470_v46 = vld [vmem:[#allocation4 + $0x730] ss:$24 sps:$4 sm:$0xff]  }
 0x18c   : > { %3191 = vmatprep.subr.bf16.mxu0 %v8469_v63  ;;  %v8475_v63 = vld [vmem:[#allocation4 + $0x704] ss:$24 sps:$4 sm:$0xff]  }
 0x18d   : > { %3109 = vmatpush2.bf16.msra.mxu1 %v8464_v5 }
 0x18e   : > { %v2321_v35 = vpop.f32.mrf.mxu0  ;;  %2998 = vmatmul.mubr.bf16.vlgmr.msra.gmra.mxu0 %v9376_v14  ;;  %3940 = vmatprep.subr.bf16.mxu1 %v8481_v9  ;;  %v8485_v14 = vld [vmem:[#allocation7 + $0x60] ss:$8 sps:$4 sm:$0xff]  }
 0x18f   : > { %v2322_v41 = vadd.f32 %v2321_v35, %v9660_v49  ;;  %3192 = vmatpush1.bf16.msra.mxu0 %v8467_v15  ;;  %3007 = vmatprep.mubr.bf16.mxu0 %v9380_v18  ;;  %v8493_v35 = vld [vmem:[#allocation7 + $0x54] ss:$8 sps:$4 sm:$0xff]  }
 0x190   : > { %v2323_v47 = vpop.f32.mrf.mxu0  ;;  %v2434_v11 = vpop.f32.mrf.mxu1  ;;  %3111 = vmatmul.mubr.bf16.vlgmr.msra.gmra.mxu1 %v9382_v19  ;;  %3193 = vmatprep.subr.bf16.mxu0 %v8472_v23 }
 0x191   : > { %v2324_v54 = vadd.f32 %v2323_v47, %v9663_v28  ;;  %v9670_v5 = vadd.f32 %v2434_v11, %v2322_v41  ;;  %3120 = vmatprep.mubr.bf16.mxu1 %v9384_v22  ;;  %3941 = vmatpush1.bf16.msra.mxu1 %v8479_v29  ;;  %v8478_v11 = vld [vmem:[#allocation4 + $0x6d4] ss:$24 sps:$4 sm:$0xff]   ;;  %v8476_v41 = vld [vmem:[#allocation4 + $0x6d0] ss:$24 sps:$4 sm:$0xff]  }
 0x192   : > { %v9673_v9 = vpop.f32.mrf.mxu0  ;;  %v2436_v15 = vpop.f32.mrf.mxu1  ;;  %3942 = vmatprep.subr.bf16.mxu1 %v8487_v55  ;;  %v8491_v22 = vld [vmem:[#allocation7 + $0x50] ss:$8 sps:$4 sm:$0xff]  }
 0x193   : > { %v9675_v18 = vadd.f32 %v2436_v15, %v2324_v54  ;;  %3194 = vmatpush1.bf16.msra.mxu0 %v8470_v46  ;;  %v8484_v55 = vld [vmem:[#allocation4 + $0x6a4] ss:$24 sps:$4 sm:$0xff]   ;;  %v8499_v54 = vld [vmem:[#allocation7 + $0x44] ss:$8 sps:$4 sm:$0xff]  }
 0x194   : > { %v9677_v19 = vpop.f32.mrf.mxu0  ;;  %v9679_v23 = vpop.f32.mrf.mxu1  ;;  %3195 = vmatprep.subr.bf16.mxu0 %v8475_v63  ;;  %v8497_v15 = vld [vmem:[#allocation7 + $0x40] ss:$8 sps:$4 sm:$0xff]  }
 0x195   : > { %3943 = vmatpush1.bf16.msra.mxu1 %v8485_v14  ;;  %v8505_v14 = vld [vmem:[#allocation7 + $0x34] ss:$8 sps:$4 sm:$0xff]  }
 0x196   : > { %v2331_v29 = vpop.f32.mrf.mxu0  ;;  %v9681_v47 = vpop.f32.mrf.mxu1  ;;  %3008 = vmatmul.mubr.bf16.gmra.mxu0 %v9396_v34  ;;  %3944 = vmatprep.subr.bf16.mxu1 %v8493_v35  ;;  %v8482_v34 = vld [vmem:[#allocation4 + $0x6a0] ss:$24 sps:$4 sm:$0xff]  }
 0x197   : > { %v2332_v46 = vadd.f32 %v2331_v29, %v9660_v49  ;;  %3196 = vmatpush1.bf16.msra.mxu0 %v8473_v57  ;;  %3017 = vmatprep.mubr.bf16.mxu0 %v9400_v38  ;;  %v8490_v29 = vld [vmem:[#allocation4 + $0x674] ss:$24 sps:$4 sm:$0xff]  }
 0x198   : > { %v2333_v6 = vpop.f32.mrf.mxu0  ;;  %v2444_v63 = vpop.f32.mrf.mxu1  ;;  %3121 = vmatmul.mubr.bf16.gmra.mxu1 %v9402_v39  ;;  %3197 = vmatprep.subr.bf16.mxu0 %v8478_v11 }
 0x199   : > { %v2334_v32 = vadd.f32 %v2333_v6, %v9663_v28  ;;  %v9688_v16 = vadd.f32 %v2444_v63, %v2332_v46  ;;  %3130 = vmatprep.mubr.bf16.mxu1 %v9404_v42  ;;  %3945 = vmatpush1.bf16.msra.mxu1 %v8491_v22  ;;  %v8511_v6 = vld [vmem:[#allocation7 + $0x24] ss:$8 sps:$4 sm:$0xff]   ;;  %v8496_v22 = vld [vmem:[#allocation4 + $0x644] ss:$24 sps:$4 sm:$0xff]  }
 0x19a   : > { %v9691_v35 = vpop.f32.mrf.mxu0  ;;  %v2446_v57 = vpop.f32.mrf.mxu1  ;;  %3946 = vmatprep.subr.bf16.mxu1 %v8499_v54  ;;  %v8488_v46 = vld [vmem:[#allocation4 + $0x670] ss:$24 sps:$4 sm:$0xff]  }
 0x19b   : > { %v9693_v38 = vadd.f32 %v2446_v57, %v2334_v32  ;;  %3198 = vmatpush1.bf16.msra.mxu0 %v8476_v41  ;;  %v8509_v41 = vld [vmem:[#allocation7 + $0x20] ss:$8 sps:$4 sm:$0xff]  }
 0x19c   : > { %v9695_v39 = vpop.f32.mrf.mxu0  ;;  %v9697_v11 = vpop.f32.mrf.mxu1  ;;  %3199 = vmatprep.subr.bf16.mxu0 %v8484_v55  ;;  %v8517_v55 = vld [vmem:[#allocation7 + $0x14] ss:$8 sps:$4 sm:$0xff]  }
 0x19d   : > { %3947 = vmatpush1.bf16.msra.mxu1 %v8497_v15 }
 0x19e   : > { %v2341_v63 = vpop.f32.mrf.mxu0  ;;  %v9699_v42 = vpop.f32.mrf.mxu1  ;;  %3018 = vmatmul.mubr.bf16.gmra.mxu0 %v9416_v56  ;;  %3948 = vmatprep.subr.bf16.mxu1 %v8505_v14 }
 0x19f   : > { %v2342_v32 = vadd.f32 %v2341_v63, %v9660_v49  ;;  %3200 = vmatpush1.bf16.msra.mxu0 %v8482_v34  ;;  %3027 = vmatprep.mubr.bf16.mxu0 %v9420_v60  ;;  %v8502_v34 = vld [vmem:[#allocation4 + $0x614] ss:$24 sps:$4 sm:$0xff]  }
 0x1a0   : > { %v2343_v54 = vpop.f32.mrf.mxu0  ;;  %v2454_v57 = vpop.f32.mrf.mxu1  ;;  %3131 = vmatmul.mubr.bf16.gmra.mxu1 %v9422_v61  ;;  %3201 = vmatprep.subr.bf16.mxu0 %v8490_v29  ;;  %v8515_v63 = vld [vmem:[#allocation7 + $0x10] ss:$8 sps:$4 sm:$0xff]  }
 0x1a1   : > { %v2344_v15 = vadd.f32 %v2343_v54, %v9663_v28  ;;  %v9706_v43 = vadd.f32 %v2454_v57, %v2342_v32  ;;  %3140 = vmatprep.mubr.bf16.mxu1 %v9424_v0  ;;  %3949 = vmatpush1.bf16.msra.mxu1 %v8503_v51  ;;  %v8523_v32 = vld [vmem:[#allocation7 + $0x4] ss:$8 sps:$4 sm:$0xff]   ;;  %v8508_v51 = vld [vmem:[#allocation4 + $0x8e4] ss:$24 sps:$4 sm:$0xff]  }
 0x1a2   : > { %v9709_v56 = vpop.f32.mrf.mxu0  ;;  %v2456_v14 = vpop.f32.mrf.mxu1  ;;  %3950 = vmatprep.subr.bf16.mxu1 %v8511_v6  ;;  %v8500_v54 = vld [vmem:[#allocation4 + $0x610] ss:$24 sps:$4 sm:$0xff]  }
 0x1a3   : > { %v9711_v60 = vadd.f32 %v2456_v14, %v2344_v15  ;;  %3202 = vmatpush1.bf16.msra.mxu0 %v8488_v46  ;;  %v8521_v46 = vld [vmem:[#allocation7] ss:$8 sps:$4 sm:$0xff]  }
 0x1a4   : > { %v9713_v61 = vpop.f32.mrf.mxu0  ;;  %v9715_v29 = vpop.f32.mrf.mxu1  ;;  %3203 = vmatprep.subr.bf16.mxu0 %v8496_v22  ;;  %v8529_v22 = vld [vmem:[#allocation7 + $0xf4] ss:$8 sps:$4 sm:$0xff]  }
 0x1a5   : > { %3951 = vmatpush1.bf16.msra.mxu1 %v8509_v41 }
 0x1a6   : > { %v2351_v57 = vpop.f32.mrf.mxu0  ;;  %v9717_v0 = vpop.f32.mrf.mxu1  ;;  %3028 = vmatmul.mubr.bf16.gmra.mxu0 %v9436_v12  ;;  %3952 = vmatprep.subr.bf16.mxu1 %v8517_v55 }
 0x1a7   : > { %v2352_v6 = vadd.f32 %v2351_v57, %v9660_v49  ;;  %3204 = vmatpush1.bf16.msra.mxu0 %v8494_v10  ;;  %3037 = vmatprep.mubr.bf16.mxu0 %v9440_v17  ;;  %v8527_v57 = vld [vmem:[#allocation7 + $0xf0] ss:$8 sps:$4 sm:$0xff]  }
 0x1a8   : > { %v2353_v15 = vpop.f32.mrf.mxu0  ;;  %v2464_v14 = vpop.f32.mrf.mxu1  ;;  %3141 = vmatmul.mubr.bf16.gmra.mxu1 %v9442_v20  ;;  %3205 = vmatprep.subr.bf16.mxu0 %v8502_v34  ;;  %v8514_v34 = vld [vmem:[#allocation4 + $0x8b4] ss:$24 sps:$4 sm:$0xff]  }
 0x1a9   : > { %v2354_v41 = vadd.f32 %v2353_v15, %v9663_v28  ;;  %v9724_v1 = vadd.f32 %v2464_v14, %v2352_v6  ;;  %3150 = vmatprep.mubr.bf16.mxu1 %v9444_v24  ;;  %3953 = vmatpush1.bf16.msra.mxu1 %v8515_v63  ;;  %v8535_v24 = vld [vmem:[#allocation7 + $0xe4] ss:$8 sps:$4 sm:$0xff]  }
 0x1aa   : > { %v9727_v12 = vpop.f32.mrf.mxu0  ;;  %v2466_v10 = vpop.f32.mrf.mxu1  ;;  %3954 = vmatprep.subr.bf16.mxu1 %v8523_v32  ;;  %v8512_v32 = vld [vmem:[#allocation4 + $0x8b0] ss:$24 sps:$4 sm:$0xff]  }
 0x1ab   : > { %v9729_v17 = vadd.f32 %v2466_v10, %v2354_v41  ;;  %3206 = vmatpush1.bf16.msra.mxu0 %v8500_v54  ;;  %v8541_v10 = vld [vmem:[#allocation7 + $0xd4] ss:$8 sps:$4 sm:$0xff]  }
 0x1ac   : > { %v9731_v55 = vpop.f32.mrf.mxu0  ;;  %v9733_v20 = vpop.f32.mrf.mxu1  ;;  %3207 = vmatprep.subr.bf16.mxu0 %v8508_v51  ;;  %v8520_v51 = vld [vmem:[#allocation4 + $0x884] ss:$24 sps:$4 sm:$0xff]  }
 0x1ad   : > { %3955 = vmatpush1.bf16.msra.mxu1 %v8521_v46 }
 0x1ae   : > { %v2361_v6 = vpop.f32.mrf.mxu0  ;;  %v9735_v15 = vpop.f32.mrf.mxu1  ;;  %3038 = vmatmul.mubr.bf16.gmra.mxu0 %v9456_v37  ;;  %3956 = vmatprep.subr.bf16.mxu1 %v8529_v22  ;;  %v8533_v37 = vld [vmem:[#allocation7 + $0xe0] ss:$8 sps:$4 sm:$0xff]  }
 0x1af   : > { %v2362_v63 = vadd.f32 %v2361_v6, %v9660_v49  ;;  %3208 = vmatpush2.bf16.msra.mxu0 %v8506_v33  ;;  %3047 = vmatprep.mubr.bf16.mxu0 %v9460_v44  ;;  %v8518_v6 = vld [vmem:[#allocation4 + $0x880] ss:$24 sps:$4 sm:$0xff]  }
 0x1b0   : > { %v2363_v54 = vpop.f32.mrf.mxu0  ;;  %v2474_v14 = vpop.f32.mrf.mxu1  ;;  %3151 = vmatmul.mubr.bf16.gmra.mxu1 %v9462_v45  ;;  %3209 = vmatprep.subr.bf16.mxu0 %v8514_v34 }
 0x1b1   : > { %v2364_v46 = vadd.f32 %v2363_v54, %v9663_v28  ;;  %v9742_v41 = vadd.f32 %v2474_v14, %v2362_v63  ;;  %3160 = vmatprep.mubr.bf16.mxu1 %v9464_v48  ;;  %3957 = vmatpush2.bf16.msra.mxu1 %v8527_v57  ;;  %v8526_v63 = vld [vmem:[#allocation4 + $0x854] ss:$24 sps:$4 sm:$0xff]  }
 0x1b2   : > { %v9745_v22 = vpop.f32.mrf.mxu0  ;;  %v2476_v33 = vpop.f32.mrf.mxu1  ;;  %3958 = vmatprep.subr.bf16.mxu1 %v8535_v24  ;;  %v8539_v54 = vld [vmem:[#allocation7 + $0xd0] ss:$8 sps:$4 sm:$0xff]   ;;  %v8547_v24 = vld [vmem:[#allocation7 + $0xc4] ss:$8 sps:$4 sm:$0xff]  }
 0x1b3   : > { %11815 = vst [vmem:[#allocation26_spill] sm:$0xff] %v9742_v41  ;;  %v9747_v44 = vadd.f32 %v2476_v33, %v2364_v46  ;;  %3210 = vmatpush2.bf16.msra.mxu0 %v8512_v32  ;;  %v8524_v32 = vld [vmem:[#allocation4 + $0x850] ss:$24 sps:$4 sm:$0xff]  }
 0x1b4   : > { %v9749_v45 = vpop.f32.mrf.mxu0  ;;  %v9751_v34 = vpop.f32.mrf.mxu1  ;;  %3211 = vmatprep.subr.bf16.mxu0 %v8520_v51  ;;  %v8532_v51 = vld [vmem:[#allocation4 + $0x824] ss:$24 sps:$4 sm:$0xff]  }
 0x1b5   : > { %11816 = vst [vmem:[#allocation27_spill] sm:$0xff] %v9747_v44  ;;  %3959 = vmatpush2.bf16.msra.mxu1 %v8533_v37  ;;  %v8530_v44 = vld [vmem:[#allocation4 + $0x820] ss:$24 sps:$4 sm:$0xff]  }
 0x1b6   : > { %v2371_v48 = vpop.f32.mrf.mxu0  ;;  %v9753_v57 = vpop.f32.mrf.mxu1  ;;  %3048 = vmatmul.mubr.bf16.gmra.mxu0 %v9476_v2  ;;  %3960 = vmatprep.subr.bf16.mxu1 %v8541_v10  ;;  %v8545_v2 = vld [vmem:[#allocation7 + $0xc0] ss:$8 sps:$4 sm:$0xff]  }
 0x1b7   : > { %v2372_v14 = vadd.f32 %v2371_v48, %v9660_v49  ;;  %3212 = vmatpush2.bf16.msra.mxu0 %v8518_v6  ;;  %3057 = vmatprep.mubr.bf16.mxu0 %v9480_v7  ;;  %v8553_v48 = vld [vmem:[#allocation7 + $0xb4] ss:$8 sps:$4 sm:$0xff]  }
 0x1b8   : > { %v2373_v46 = vpop.f32.mrf.mxu0  ;;  %v2484_v33 = vpop.f32.mrf.mxu1  ;;  %3161 = vmatmul.mubr.bf16.gmra.mxu1 %v9482_v8  ;;  %3213 = vmatprep.subr.bf16.mxu0 %v8526_v63 }
 0x1b9   : > { %v2374_v37 = vadd.f32 %v2373_v46, %v9663_v28  ;;  %v9760_v41 = vadd.f32 %v2484_v33, %v2372_v14  ;;  %3170 = vmatprep.mubr.bf16.mxu1 %v9484_v13  ;;  %3961 = vmatpush2.bf16.msra.mxu1 %v8539_v54  ;;  %v8538_v14 = vld [vmem:[#allocation4 + $0x7f4] ss:$24 sps:$4 sm:$0xff]  }
 0x1ba   : > { %v9763_v10 = vpop.f32.mrf.mxu0  ;;  %v2486_v6 = vpop.f32.mrf.mxu1  ;;  %3962 = vmatprep.subr.bf16.mxu1 %v8547_v24  ;;  %v8551_v46 = vld [vmem:[#allocation7 + $0xb0] ss:$8 sps:$4 sm:$0xff]   ;;  %v8556_v24 = vld [vmem:[#allocation7 + $0xa4] ss:$8 sps:$4 sm:$0xff]  }
 0x1bb   : > { %11817 = vst [vmem:[#allocation28_spill] sm:$0xff] %v9760_v41  ;;  %v9765_v7 = vadd.f32 %v2486_v6, %v2374_v37  ;;  %3214 = vmatpush2.bf16.msra.mxu0 %v8524_v32  ;;  %v8536_v32 = vld [vmem:[#allocation4 + $0x7f0] ss:$24 sps:$4 sm:$0xff]  }
 0x1bc   : > { %v9767_v8 = vpop.f32.mrf.mxu0  ;;  %v9769_v63 = vpop.f32.mrf.mxu1  ;;  %3215 = vmatprep.subr.bf16.mxu0 %v8532_v51  ;;  %v8544_v51 = vld [vmem:[#allocation4 + $0x7c4] ss:$24 sps:$4 sm:$0xff]  }
 0x1bd   : > { %11818 = vst [vmem:[#allocation29_spill] sm:$0xff] %v9765_v7  ;;  %3963 = vmatpush2.bf16.msra.mxu1 %v8545_v2  ;;  %v8542_v7 = vld [vmem:[#allocation4 + $0x7c0] ss:$24 sps:$4 sm:$0xff]  }
 0x1be   : > { %v2381_v13 = vpop.f32.mrf.mxu0  ;;  %v9771_v54 = vpop.f32.mrf.mxu1  ;;  %3058 = vmatmul.mubr.bf16.gmra.mxu0 %v9496_v30  ;;  %3964 = vmatprep.subr.bf16.mxu1 %v8553_v48  ;;  %v8554_v30 = vld [vmem:[#allocation7 + $0xa0] ss:$8 sps:$4 sm:$0xff]  }
 0x1bf   : > { %v2382_v33 = vadd.f32 %v2381_v13, %v9660_v49  ;;  %3216 = vmatpush2.bf16.msra.mxu0 %v8530_v44  ;;  %3067 = vmatprep.mubr.bf16.mxu0 %v9500_v36  ;;  %v8559_v13 = vld [vmem:[#allocation7 + $0x94] ss:$8 sps:$4 sm:$0xff]  }
 0x1c0   : > { %v2383_v37 = vpop.f32.mrf.mxu0  ;;  %v2494_v6 = vpop.f32.mrf.mxu1  ;;  %3171 = vmatmul.mubr.bf16.gmra.mxu1 %v9502_v40  ;;  %3217 = vmatprep.subr.bf16.mxu0 %v8538_v14 }
 0x1c1   : > { %v2384_v2 = vadd.f32 %v2383_v37, %v9663_v28  ;;  %v9778_v41 = vadd.f32 %v2494_v6, %v2382_v33  ;;  %3180 = vmatprep.mubr.bf16.mxu1 %v9505_v50  ;;  %3965 = vmatpush2.bf16.msra.mxu1 %v8551_v46  ;;  %v8550_v33 = vld [vmem:[#allocation4 + $0x794] ss:$24 sps:$4 sm:$0xff]  }
 0x1c2   : > { %v9781_v48 = vpop.f32.mrf.mxu0  ;;  %v2496_v44 = vpop.f32.mrf.mxu1  ;;  %3966 = vmatprep.subr.bf16.mxu1 %v8556_v24  ;;  %v8557_v37 = vld [vmem:[#allocation7 + $0x90] ss:$8 sps:$4 sm:$0xff]   ;;  %v8562_v24 = vld [vmem:[#allocation7 + $0x84] ss:$8 sps:$4 sm:$0xff]  }
 0x1c3   : > { %11819 = vst [vmem:[#allocation30_spill] sm:$0xff] %v9778_v41  ;;  %v9783_v36 = vadd.f32 %v2496_v44, %v2384_v2  ;;  %3218 = vmatpush2.bf16.msra.mxu0 %v8536_v32  ;;  %v8548_v32 = vld [vmem:[#allocation4 + $0x790] ss:$24 sps:$4 sm:$0xff]  }
 0x1c4   : > { %v9785_v40 = vpop.f32.mrf.mxu0  ;;  %v9787_v14 = vpop.f32.mrf.mxu1  ;;  %3219 = vmatprep.subr.bf16.mxu0 %v8544_v51  ;;  %v8565_v51 = vld [vmem:[#allocation7 + $0x174] ss:$8 sps:$4 sm:$0xff]  }
 0x1c5   : > { %11820 = vst [vmem:[#allocation31_spill] sm:$0xff] %v9783_v36  ;;  %3967 = vmatpush2.bf16.msra.mxu1 %v8554_v30 }
 0x1c6   : > { %v2391_v50 = vpop.f32.mrf.mxu0  ;;  %v9789_v46 = vpop.f32.mrf.mxu1  ;;  %3068 = vmatmul.mubr.bf16.gmra.mxu0 %v9516_v62  ;;  %3968 = vmatprep.subr.bf16.mxu1 %v8559_v13  ;;  %v8560_v62 = vld [vmem:[#allocation7 + $0x80] ss:$8 sps:$4 sm:$0xff]  }
 0x1c7   : > { %11821 = vst [vmem:[#allocation32_spill] sm:$0xff] %v9789_v46  ;;  %v2392_v6 = vadd.f32 %v2391_v50, %v9660_v49  ;;  %3220 = vmatpush2.bf16.msra.mxu0 %v8542_v7  ;;  %3223 = vmatprep.mubr.bf16.mxu0 %v9518_v3  ;;  %v8563_v3 = vld [vmem:[#allocation7 + $0x170] ss:$8 sps:$4 sm:$0xff]  }
 0x1c8   : > { %v2393_v2 = vpop.f32.mrf.mxu0  ;;  %v2504_v44 = vpop.f32.mrf.mxu1  ;;  %3181 = vmatmul.mubr.bf16.gmra.mxu1 %v9520_v4  ;;  %3221 = vmatprep.subr.bf16.mxu0 %v8550_v33  ;;  %v8568_v4 = vld [vmem:[#allocation7 + $0x164] ss:$8 sps:$4 sm:$0xff]   ;;  %v2326_v33 = vadd.f32 %v9673_v9, %v9660_v49 }
 0x1c9   : > { %v2394_v30 = vadd.f32 %v2393_v2, %v9663_v28  ;;  %v9796_v41 = vadd.f32 %v2504_v44, %v2392_v6  ;;  %3969 = vmatpush2.bf16.msra.mxu1 %v8557_v37  ;;  %v8571_v44 = vld [vmem:[#allocation7 + $0x154] ss:$8 sps:$4 sm:$0xff]  }
 0x1ca   : > { %v9798_v13 = vpop.f32.mrf.mxu0  ;;  %v2506_v36 = vpop.f32.mrf.mxu1  ;;  %3970 = vmatprep.subr.bf16.mxu1 %v8562_v24  ;;  %v8566_v24 = vld [vmem:[#allocation7 + $0x160] ss:$8 sps:$4 sm:$0xff]  }
 0x1cb   : > { %11822 = vst [vmem:[#allocation33_spill] sm:$0xff] %v9796_v41  ;;  %v9800_v7 = vadd.f32 %v2506_v36, %v2394_v30  ;;  %3222 = vmatpush2.bf16.msra.mxu0 %v8548_v32  ;;  %v2328_v36 = vadd.f32 %v9677_v19, %v9663_v28 }
 0x1cc   : > { %v9802_v50 = vpop.f32.mrf.mxu0  ;;  %v9804_v46 = vpop.f32.mrf.mxu1  ;;  %4053 = vmatprep.subr.bf16.mxu0 %v8565_v51  ;;  %v2439_v51 = vadd.f32 %v9679_v23, %v2326_v33 }
 0x1cd   : > { %11823 = vst [vmem:[#allocation34_spill] sm:$0xff] %v9800_v7  ;;  %3971 = vmatpush2.bf16.msra.mxu1 %v8560_v62  ;;  %v2441_v62 = vadd.f32 %v9681_v47, %v2328_v36  ;;  %v2338_v47 = vadd.f32 %v9695_v39, %v9663_v28  ;;  %v8575_v39 = vld [vmem:[#allocation7 + $0x130] ss:$8 sps:$4 sm:$0xff]  }
 0x1ce   : > { %v9808_v37 = vpop.f32.mrf.mxu1  ;;  %v2547_v6 = vpop.f32.mrf.mxu0  ;;  %3224 = vmatmul.mubr.bf16.vlgmr.msra.gmra.mxu0 %v9530_v26  ;;  %v8569_v26 = vld [vmem:[#allocation7 + $0x150] ss:$8 sps:$4 sm:$0xff]  }
 0x1cf   : > { %3233 = vmatprep.mubr.bf16.mxu0 %v9532_v31  ;;  %4054 = vmatpush1.bf16.msra.mxu0 %v8563_v3  ;;  %v8574_v31 = vld [vmem:[#allocation7 + $0x144] ss:$8 sps:$4 sm:$0xff]   ;;  %v2548_v23 = vadd.f32 %v2547_v6, %v9670_v5  ;;  %v8613_v5 = vld [vmem:[#allocation7 + $0x274] ss:$8 sps:$4 sm:$0xff]   ;;  %v8611_v6 = vld [vmem:[#allocation7 + $0x270] ss:$8 sps:$4 sm:$0xff]  }
 0x1d0   : > { %v2549_v32 = vpop.f32.mrf.mxu0  ;;  %v9814_v2 = vpop.f32.mrf.mxu1  ;;  %4055 = vmatprep.subr.bf16.mxu0 %v8568_v4  ;;  %v2336_v4 = vadd.f32 %v9691_v35, %v9660_v49  ;;  %v8577_v35 = vld [vmem:[#allocation7 + $0x134] ss:$8 sps:$4 sm:$0xff]   ;;  %4166 = vmatprep.subr.bf16.mxu1 %v8613_v5 }
 0x1d1   : > { %11824 = vst [vmem:[#allocation35_spill] sm:$0xff] %v9814_v2  ;;  %v2550_v3 = vadd.f32 %v2549_v32, %v9675_v18 }
 0x1d2   : > { %v2551_v9 = vpop.f32.mrf.mxu0  ;;  %v9817_v30 = vpop.f32.mrf.mxu1 }
 0x1d3   : > { %11825 = vst [vmem:[#allocation36_spill] sm:$0xff] %v9817_v30  ;;  %4056 = vmatpush1.bf16.msra.mxu0 %v8566_v24  ;;  %v2552_v41 = vadd.f32 %v2551_v9, %v2439_v51  ;;  %v8572_v24 = vld [vmem:[#allocation7 + $0x140] ss:$8 sps:$4 sm:$0xff]   ;;  %v2449_v51 = vadd.f32 %v9697_v11, %v2336_v4  ;;  %v2346_v4 = vadd.f32 %v9709_v56, %v9660_v49  ;;  %v8619_v56 = vld [vmem:[#allocation7 + $0x254] ss:$8 sps:$4 sm:$0xff]  }
 0x1d4   : > { %v2553_v19 = vpop.f32.mrf.mxu0  ;;  %v9820_v7 = vpop.f32.mrf.mxu1  ;;  %4057 = vmatprep.subr.bf16.mxu0 %v8571_v44 }
 0x1d5   : > { %v2554_v2 = vadd.f32 %v2553_v19, %v2441_v62  ;;  %v3304_v18 = vpack.c.bf16 %v2552_v41, %v2548_v23  ;;  %v8616_v19 = vld [vmem:[#allocation7 + $0x264] ss:$8 sps:$4 sm:$0xff]  }
 0x1d6   : > { %v2557_v33 = vpop.f32.mrf.mxu0  ;;  %v9826_v30 = vpop.f32.mrf.mxu1  ;;  %3234 = vmatmul.mubr.bf16.gmra.mxu0 %v9542_v53 }
 0x1d7   : > { %v3305_v36 = vpack.c.bf16 %v2554_v2, %v2550_v3  ;;  %3243 = vmatprep.mubr.bf16.mxu0 %v9544_v58  ;;  %4058 = vmatpush1.bf16.msra.mxu0 %v8569_v26  ;;  %v2451_v58 = vadd.f32 %v9699_v42, %v2338_v47  ;;  %v8580_v26 = vld [vmem:[#allocation7 + $0x124] ss:$8 sps:$4 sm:$0xff]   ;;  %v8614_v3 = vld [vmem:[#allocation7 + $0x260] ss:$8 sps:$4 sm:$0xff]   ;;  %v2558_v23 = vadd.f32 %v2557_v33, %v9688_v16  ;;  %v8583_v16 = vld [vmem:[#allocation7 + $0x114] ss:$8 sps:$4 sm:$0xff]  }
 0x1d8   : > { %v2559_v32 = vpop.f32.mrf.mxu0  ;;  %v9832_v44 = vpop.f32.mrf.mxu1  ;;  %4059 = vmatprep.subr.bf16.mxu0 %v8574_v31  ;;  %v8617_v33 = vld [vmem:[#allocation7 + $0x250] ss:$8 sps:$4 sm:$0xff]  }
 0x1d9   : > { %3972 = vmatprep.mubr.bf16.mxu1 %v3305_v36  ;;  %v2560_v31 = vadd.f32 %v2559_v32, %v9693_v38  ;;  %v2348_v36 = vadd.f32 %v9713_v61, %v9663_v28  ;;  %v8578_v38 = vld [vmem:[#allocation7 + $0x120] ss:$8 sps:$4 sm:$0xff]   ;;  %v8581_v61 = vld [vmem:[#allocation7 + $0x110] ss:$8 sps:$4 sm:$0xff]  }
 0x1da   : > { %v2561_v53 = vpop.f32.mrf.mxu0  ;;  %v9835_v9 = vpop.f32.mrf.mxu1  ;;  %3973 = vmatmul.mubr.bf16.vlgmr.msra.gmra.mxu1 %v3304_v18 }
 0x1db   : > { %4060 = vmatpush1.bf16.msra.mxu0 %v8572_v24  ;;  %4167 = vmatpush1.bf16.msra.mxu1 %v8611_v6  ;;  %v2562_v41 = vadd.f32 %v2561_v53, %v2449_v51 }
 0x1dc   : > { %v2563_v2 = vpop.f32.mrf.mxu0  ;;  %v9838_v62 = vpop.f32.mrf.mxu1  ;;  %4061 = vmatprep.subr.bf16.mxu0 %v8577_v35  ;;  %4168 = vmatprep.subr.bf16.mxu1 %v8616_v19  ;;  %v2356_v19 = vadd.f32 %v9727_v12, %v9660_v49  ;;  %v8625_v12 = vld [vmem:[#allocation7 + $0x234] ss:$8 sps:$4 sm:$0xff]  }
 0x1dd   : > { %v2564_v11 = vadd.f32 %v2563_v2, %v2451_v58  ;;  %v3310_v18 = vpack.c.bf16 %v2562_v41, %v2558_v23  ;;  %v8622_v41 = vld [vmem:[#allocation7 + $0x244] ss:$8 sps:$4 sm:$0xff]  }
 0x1de   : > { %v2567_v42 = vpop.f32.mrf.mxu0  ;;  %v9844_v47 = vpop.f32.mrf.mxu1  ;;  %3244 = vmatmul.mubr.bf16.gmra.mxu0 %v9554_v21  ;;  %v2459_v21 = vadd.f32 %v9715_v29, %v2346_v4 }
 0x1df   : > { %v3311_v24 = vpack.c.bf16 %v2564_v11, %v2560_v31  ;;  %3253 = vmatprep.mubr.bf16.mxu0 %v9556_v27  ;;  %4062 = vmatpush1.bf16.msra.mxu0 %v8575_v39  ;;  %v2461_v27 = vadd.f32 %v9717_v0, %v2348_v36  ;;  %v8586_v39 = vld [vmem:[#allocation7 + $0x104] ss:$8 sps:$4 sm:$0xff]   ;;  %v2568_v31 = vadd.f32 %v2567_v42, %v9706_v43  ;;  %v8589_v43 = vld [vmem:[#allocation7 + $0x1f4] ss:$8 sps:$4 sm:$0xff]   ;;  %v8623_v42 = vld [vmem:[#allocation7 + $0x230] ss:$8 sps:$4 sm:$0xff]  }
 0x1e0   : > { %v2569_v32 = vpop.f32.mrf.mxu0  ;;  %v9850_v35 = vpop.f32.mrf.mxu1  ;;  %4063 = vmatprep.subr.bf16.mxu0 %v8580_v26  ;;  %4169 = vmatpush1.bf16.msra.mxu1 %v8614_v3  ;;  %v8620_v26 = vld [vmem:[#allocation7 + $0x240] ss:$8 sps:$4 sm:$0xff]   ;;  %v2358_v3 = vadd.f32 %v9731_v55, %v9663_v28  ;;  %v8587_v55 = vld [vmem:[#allocation7 + $0x1f0] ss:$8 sps:$4 sm:$0xff]  }
 0x1e1   : > { %3982 = vmatprep.mubr.bf16.mxu1 %v3311_v24  ;;  %4170 = vmatprep.subr.bf16.mxu1 %v8619_v56  ;;  %v2570_v2 = vadd.f32 %v2569_v32, %v9711_v60  ;;  %v8584_v60 = vld [vmem:[#allocation7 + $0x100] ss:$8 sps:$4 sm:$0xff]  }
 0x1e2   : > { %v2571_v5 = vpop.f32.mrf.mxu0  ;;  %v9853_v6 = vpop.f32.mrf.mxu1  ;;  %3983 = vmatmul.mubr.bf16.gmra.mxu1 %v3310_v18 }
 0x1e3   : > { %4064 = vmatpush1.bf16.msra.mxu0 %v8578_v38  ;;  %v2572_v51 = vadd.f32 %v2571_v5, %v2459_v21  ;;  %v8628_v21 = vld [vmem:[#allocation7 + $0x224] ss:$8 sps:$4 sm:$0xff]  }
 0x1e4   : > { %v2573_v53 = vpop.f32.mrf.mxu0  ;;  %v9856_v58 = vpop.f32.mrf.mxu1  ;;  %4065 = vmatprep.subr.bf16.mxu0 %v8583_v16  ;;  %4171 = vmatpush1.bf16.msra.mxu1 %v8617_v33  ;;  %v8592_v33 = vld [vmem:[#allocation7 + $0x1e4] ss:$8 sps:$4 sm:$0xff]  }
 0x1e5   : > { %v2574_v29 = vadd.f32 %v2573_v53, %v2461_v27  ;;  %4172 = vmatprep.subr.bf16.mxu1 %v8622_v41  ;;  %v3316_v23 = vpack.c.bf16 %v2572_v51, %v2568_v31  ;;  %v8626_v27 = vld [vmem:[#allocation7 + $0x220] ss:$8 sps:$4 sm:$0xff]   ;;  %v8629_v31 = vld [vmem:[#allocation7 + $0x210] ss:$8 sps:$4 sm:$0xff]  }
 0x1e6   : > { %v2577_v0 = vpop.f32.mrf.mxu0  ;;  %v9862_v11 = vpop.f32.mrf.mxu1  ;;  %3254 = vmatmul.mubr.bf16.gmra.mxu0 %v9566_v52  ;;  %v2469_v52 = vadd.f32 %v9733_v20, %v2356_v19 }
 0x1e7   : > { %v3317_v4 = vpack.c.bf16 %v2574_v29, %v2570_v2  ;;  %3263 = vmatprep.mubr.bf16.mxu0 %v9568_v59  ;;  %4066 = vmatpush1.bf16.msra.mxu0 %v8581_v61  ;;  %v2471_v59 = vadd.f32 %v9735_v15, %v2358_v3  ;;  %v2366_v61 = vadd.f32 %v9745_v22, %v9660_v49  ;;  %v11826_v2 = vld [vmem:[#allocation17_spill] sm:$0xff]  ;;  %v8631_v22 = vld [vmem:[#allocation7 + $0x214] ss:$8 sps:$4 sm:$0xff]  }
 0x1e8   : > { %v2579_v36 = vpop.f32.mrf.mxu0  ;;  %v9868_v24 = vpop.f32.mrf.mxu1  ;;  %4067 = vmatprep.subr.bf16.mxu0 %v8586_v39  ;;  %4173 = vmatpush1.bf16.msra.mxu1 %v8620_v26  ;;  %v2578_v51 = vadd.f32 %v2577_v0, %v9724_v1  ;;  %v2368_v39 = vadd.f32 %v9749_v45, %v9663_v28  ;;  %v8595_v1 = vld [vmem:[#allocation7 + $0x1d4] ss:$8 sps:$4 sm:$0xff]  }
 0x1e9   : > { %3992 = vmatprep.mubr.bf16.mxu1 %v3317_v4  ;;  %4174 = vmatprep.subr.bf16.mxu1 %v8625_v12  ;;  %v2580_v5 = vadd.f32 %v2579_v36, %v9729_v17  ;;  %v8590_v17 = vld [vmem:[#allocation7 + $0x1e0] ss:$8 sps:$4 sm:$0xff]   ;;  %v8593_v4 = vld [vmem:[#allocation7 + $0x1d0] ss:$8 sps:$4 sm:$0xff]   ;;  %v8634_v12 = vld [vmem:[#allocation7 + $0x204] ss:$8 sps:$4 sm:$0xff]  }
 0x1ea   : > { %v2581_v38 = vpop.f32.mrf.mxu0  ;;  %v9871_v18 = vpop.f32.mrf.mxu1  ;;  %3993 = vmatmul.mubr.bf16.gmra.mxu1 %v3316_v23  ;;  %v2481_v45 = vadd.f32 %v9753_v57, %v2368_v39 }
 0x1eb   : > { %4068 = vmatpush1.bf16.msra.mxu0 %v8584_v60  ;;  %v2582_v32 = vadd.f32 %v2581_v38, %v2469_v52  ;;  %v8632_v38 = vld [vmem:[#allocation7 + $0x200] ss:$8 sps:$4 sm:$0xff]  }
 0x1ec   : > { %v2583_v16 = vpop.f32.mrf.mxu0  ;;  %v9874_v56 = vpop.f32.mrf.mxu1  ;;  %4069 = vmatprep.subr.bf16.mxu0 %v8589_v43  ;;  %4175 = vmatpush1.bf16.msra.mxu1 %v8623_v42  ;;  %v8598_v43 = vld [vmem:[#allocation7 + $0x1c4] ss:$8 sps:$4 sm:$0xff]   ;;  %v11827_v42 = vld [vmem:[#allocation27_spill] sm:$0xff] }
 0x1ed   : > { %v2584_v20 = vadd.f32 %v2583_v16, %v2471_v59  ;;  %4176 = vmatprep.subr.bf16.mxu1 %v8628_v21  ;;  %v3322_v29 = vpack.c.bf16 %v2582_v32, %v2578_v51  ;;  %v2376_v59 = vadd.f32 %v9763_v10, %v9660_v49  ;;  %v2378_v21 = vadd.f32 %v9767_v8, %v9663_v28  ;;  %v8601_v10 = vld [vmem:[#allocation7 + $0x1b4] ss:$8 sps:$4 sm:$0xff]  }
 0x1ee   : > { %v2587_v15 = vpop.f32.mrf.mxu0  ;;  %v9880_v53 = vpop.f32.mrf.mxu1  ;;  %3264 = vmatmul.mubr.bf16.gmra.mxu0 %v9578_v25  ;;  %v2479_v25 = vadd.f32 %v9751_v34, %v2366_v61 }
 0x1ef   : > { %v3323_v41 = vpack.c.bf16 %v2584_v20, %v2580_v5  ;;  %3273 = vmatprep.mubr.bf16.mxu0 %v11826_v2  ;;  %4070 = vmatpush2.bf16.msra.mxu0 %v8587_v55  ;;  %v11828_v55 = vld [vmem:[#allocation26_spill] sm:$0xff]  ;;  %v11830_v20 = vld [vmem:[#allocation19_spill] sm:$0xff]  ;;  %v2489_v2 = vadd.f32 %v9769_v63, %v2376_v59  ;;  %v2491_v8 = vadd.f32 %v9771_v54, %v2378_v21  ;;  %v11834_v59 = vld [vmem:[#allocation21_spill] sm:$0xff] }
 0x1f0   : > { %v2589_v26 = vpop.f32.mrf.mxu0  ;;  %v9886_v19 = vpop.f32.mrf.mxu1  ;;  %4071 = vmatprep.subr.bf16.mxu0 %v8592_v33  ;;  %4177 = vmatpush1.bf16.msra.mxu1 %v8626_v27  ;;  %v2588_v32 = vadd.f32 %v2587_v15, %v11828_v55  ;;  %v11829_v33 = vld [vmem:[#allocation18_spill] sm:$0xff]  ;;  %v8596_v27 = vld [vmem:[#allocation7 + $0x1c0] ss:$8 sps:$4 sm:$0xff]   ;;  %v8637_v15 = vld [vmem:[#allocation7 + $0x2f4] ss:$8 sps:$4 sm:$0xff]  }
 0x1f1   : > { %4002 = vmatprep.mubr.bf16.mxu1 %v3323_v41  ;;  %4178 = vmatprep.subr.bf16.mxu1 %v8631_v22  ;;  %v2590_v52 = vadd.f32 %v2589_v26, %v11827_v42  ;;  %v8635_v41 = vld [vmem:[#allocation7 + $0x2f0] ss:$8 sps:$4 sm:$0xff]   ;;  %v8602_v55 = vld [vmem:[#allocation7 + $0x1a0] ss:$8 sps:$4 sm:$0xff]  }
 0x1f2   : > { %v2591_v0 = vpop.f32.mrf.mxu0  ;;  %v9889_v3 = vpop.f32.mrf.mxu1  ;;  %4003 = vmatmul.mubr.bf16.gmra.mxu1 %v3322_v29  ;;  %v8599_v26 = vld [vmem:[#allocation7 + $0x1b0] ss:$8 sps:$4 sm:$0xff]  }
 0x1f3   : > { %4072 = vmatpush2.bf16.msra.mxu0 %v8590_v17  ;;  %v2592_v60 = vadd.f32 %v2591_v0, %v2479_v25  ;;  %v8604_v25 = vld [vmem:[#allocation7 + $0x1a4] ss:$8 sps:$4 sm:$0xff]  }
 0x1f4   : > { %v2593_v23 = vpop.f32.mrf.mxu0  ;;  %v9892_v36 = vpop.f32.mrf.mxu1  ;;  %4073 = vmatprep.subr.bf16.mxu0 %v8595_v1  ;;  %4179 = vmatpush1.bf16.msra.mxu1 %v8629_v31  ;;  %v8640_v0 = vld [vmem:[#allocation7 + $0x2e4] ss:$8 sps:$4 sm:$0xff]  }
 0x1f5   : > { %v2594_v34 = vadd.f32 %v2593_v23, %v2481_v45  ;;  %4180 = vmatprep.subr.bf16.mxu1 %v8634_v12  ;;  %v3328_v61 = vpack.c.bf16 %v2592_v60, %v2588_v32  ;;  %v11831_v45 = vld [vmem:[#allocation29_spill] sm:$0xff]  ;;  %v2386_v23 = vadd.f32 %v9781_v48, %v9660_v49  ;;  %v8607_v48 = vld [vmem:[#allocation7 + $0x194] ss:$8 sps:$4 sm:$0xff]  }
 0x1f6   : > { %v2597_v57 = vpop.f32.mrf.mxu0  ;;  %v9898_v16 = vpop.f32.mrf.mxu1  ;;  %3274 = vmatmul.mubr.bf16.gmra.mxu0 %v11829_v33  ;;  %v8638_v60 = vld [vmem:[#allocation7 + $0x2e0] ss:$8 sps:$4 sm:$0xff]  }
 0x1f7   : > { %v3329_v5 = vpack.c.bf16 %v2594_v34, %v2590_v52  ;;  %3283 = vmatprep.mubr.bf16.mxu0 %v11830_v20  ;;  %4074 = vmatpush2.bf16.msra.mxu0 %v8593_v4  ;;  %v11833_v52 = vld [vmem:[#allocation20_spill] sm:$0xff]  ;;  %v2388_v34 = vadd.f32 %v9785_v40, %v9663_v28  ;;  %v2499_v20 = vadd.f32 %v9787_v14, %v2386_v23 }
 0x1f8   : > { %v2599_v51 = vpop.f32.mrf.mxu0  ;;  %v9904_v39 = vpop.f32.mrf.mxu1  ;;  %4075 = vmatprep.subr.bf16.mxu0 %v8598_v43  ;;  %4181 = vmatpush1.bf16.msra.mxu1 %v8632_v38  ;;  %v11832_v43 = vld [vmem:[#allocation28_spill] sm:$0xff]  ;;  %v2398_v23 = vadd.f32 %v9802_v50, %v9663_v28 }
 0x1f9   : > { %4012 = vmatprep.mubr.bf16.mxu1 %v3329_v5  ;;  %4182 = vmatprep.subr.bf16.mxu1 %v8637_v15  ;;  %v2600_v4 = vadd.f32 %v2599_v51, %v11831_v45  ;;  %v2598_v12 = vadd.f32 %v2597_v57, %v11832_v43  ;;  %v8643_v57 = vld [vmem:[#allocation7 + $0x2d4] ss:$8 sps:$4 sm:$0xff]   ;;  %v8641_v5 = vld [vmem:[#allocation7 + $0x2d0] ss:$8 sps:$4 sm:$0xff]  }
 0x1fa   : > { %v2601_v17 = vpop.f32.mrf.mxu0  ;;  %v9907_v29 = vpop.f32.mrf.mxu1  ;;  %4013 = vmatmul.mubr.bf16.gmra.mxu1 %v3328_v61  ;;  %v11835_v40 = vld [vmem:[#allocation32_spill] sm:$0xff]  ;;  %v2511_v50 = vadd.f32 %v9808_v37, %v2398_v23  ;;  %v11841_v37 = vld [vmem:[#allocation33_spill] sm:$0xff] }
 0x1fb   : > { %4076 = vmatpush2.bf16.msra.mxu0 %v8596_v27  ;;  %v2602_v1 = vadd.f32 %v2601_v17, %v2489_v2  ;;  %v2501_v51 = vadd.f32 %v11835_v40, %v2388_v34  ;;  %v8610_v17 = vld [vmem:[#allocation7 + $0x184] ss:$8 sps:$4 sm:$0xff]   ;;  %v11843_v23 = vld [vmem:[#allocation36_spill] sm:$0xff] }
 0x1fc   : > { %v2603_v22 = vpop.f32.mrf.mxu0  ;;  %v9910_v31 = vpop.f32.mrf.mxu1  ;;  %4077 = vmatprep.subr.bf16.mxu0 %v8601_v10  ;;  %4183 = vmatpush2.bf16.msra.mxu1 %v8635_v41  ;;  %v8605_v10 = vld [vmem:[#allocation7 + $0x190] ss:$8 sps:$4 sm:$0xff]   ;;  %v8652_v40 = vld [vmem:[#allocation7 + $0x2a4] ss:$8 sps:$4 sm:$0xff]  }
 0x1fd   : > { %v2604_v63 = vadd.f32 %v2603_v22, %v2491_v8  ;;  %4184 = vmatprep.subr.bf16.mxu1 %v8640_v0  ;;  %v3334_v32 = vpack.c.bf16 %v2602_v1, %v2598_v12  ;;  %v8646_v8 = vld [vmem:[#allocation7 + $0x2c4] ss:$8 sps:$4 sm:$0xff]   ;;  %v8644_v22 = vld [vmem:[#allocation7 + $0x2c0] ss:$8 sps:$4 sm:$0xff]  }
 0x1fe   : > { %v2607_v54 = vpop.f32.mrf.mxu0  ;;  %v9916_v42 = vpop.f32.mrf.mxu1  ;;  %3284 = vmatmul.mubr.bf16.gmra.mxu0 %v11833_v52  ;;  %v11837_v0 = vld [vmem:[#allocation30_spill] sm:$0xff]  ;;  %v8608_v12 = vld [vmem:[#allocation7 + $0x180] ss:$8 sps:$4 sm:$0xff]   ;;  %v11839_v52 = vld [vmem:[#allocation23_spill] sm:$0xff] }
 0x1ff   : > { %v3335_v38 = vpack.c.bf16 %v2604_v63, %v2600_v4  ;;  %3293 = vmatprep.mubr.bf16.mxu0 %v11834_v59  ;;  %4078 = vmatpush2.bf16.msra.mxu0 %v8599_v26  ;;  %v11836_v26 = vld [vmem:[#allocation31_spill] sm:$0xff]  ;;  %v2608_v45 = vadd.f32 %v2607_v54, %v11837_v0  ;;  %v827_v34 = vsub.s32 2, %v11839_v52 }
 0x200   : > { %v2609_v33 = vpop.f32.mrf.mxu0  ;;  %v9922_v21 = vpop.f32.mrf.mxu1  ;;  %4079 = vmatprep.subr.bf16.mxu0 %v8604_v25  ;;  %4185 = vmatpush2.bf16.msra.mxu1 %v8638_v60  ;;  %v2396_v25 = vadd.f32 %v9798_v13, %v9660_v49  ;;  %v11838_v60 = vld [vmem:[#allocation22_spill] sm:$0xff]  ;;  %v8649_v49 = vld [vmem:[#allocation7 + $0x2b4] ss:$8 sps:$4 sm:$0xff]   ;;  %v831_v13 = vsub.s32 3, %v11839_v52 }
 0x201   : > { %4022 = vmatprep.mubr.bf16.mxu1 %v3335_v38  ;;  %4186 = vmatprep.subr.bf16.mxu1 %v8643_v57  ;;  %v2610_v1 = vadd.f32 %v2609_v33, %v11836_v26  ;;  %v8647_v54 = vld [vmem:[#allocation7 + $0x2b0] ss:$8 sps:$4 sm:$0xff]  }
 0x202   : > { %v2611_v27 = vpop.f32.mrf.mxu0  ;;  %v9925_v61 = vpop.f32.mrf.mxu1  ;;  %4023 = vmatmul.mubr.bf16.gmra.mxu1 %v3334_v32  ;;  %v2509_v32 = vadd.f32 %v9804_v46, %v2396_v25 }
 0x203   : > { %4080 = vmatpush2.bf16.msra.mxu0 %v8602_v55  ;;  %v2612_v15 = vadd.f32 %v2611_v27, %v2499_v20 }
 0x204   : > { %v2613_v41 = vpop.f32.mrf.mxu0  ;;  %v9928_v2 = vpop.f32.mrf.mxu1  ;;  %4081 = vmatprep.subr.bf16.mxu0 %v8607_v48  ;;  %4187 = vmatpush2.bf16.msra.mxu1 %v8641_v5  ;;  %v9947_v48 = vld [vmem:[#allocation6] sm:$0x3f] }
 0x205   : > { %v2614_v14 = vadd.f32 %v2613_v41, %v2501_v51  ;;  %4188 = vmatprep.subr.bf16.mxu1 %v8646_v8  ;;  %v3340_v38 = vpack.c.bf16 %v2612_v15, %v2608_v45  ;;  %v9950_v57 = vrot.slane %v9947_v48, %v827_v34  ;;  %v9955_v46 = vrot.slane %v9947_v48, %v831_v13  ;;  %v11840_v51 = vld [vmem:[#allocation34_spill] sm:$0xff]  ;;  %v8650_v41 = vld [vmem:[#allocation7 + $0x2a0] ss:$8 sps:$4 sm:$0xff]  }
 0x206   : > { %v2617_v4 = vpop.f32.mrf.mxu0  ;;  %v9934_v63 = vpop.f32.mrf.mxu1  ;;  %3294 = vmatmul.mubr.bf16.gmra.mxu0 %v11838_v60  ;;  %v8655_v60 = vld [vmem:[#allocation7 + $0x294] ss:$8 sps:$4 sm:$0xff]  }
 0x207   : > { %v3341_v43 = vpack.c.bf16 %v2614_v14, %v2610_v1  ;;  %4082 = vmatpush2.bf16.msra.mxu0 %v8605_v10  ;;  %v11842_v14 = vld [vmem:[#allocation35_spill] sm:$0xff] }
 0x208   : > { %v2619_v59 = vpop.f32.mrf.mxu0  ;;  %v9940_v55 = vpop.f32.mrf.mxu1  ;;  %4083 = vmatprep.subr.bf16.mxu0 %v8610_v17  ;;  %4189 = vmatpush2.bf16.msra.mxu1 %v8644_v22  ;;  %v2618_v17 = vadd.f32 %v2617_v4, %v11841_v37  ;;  %v2661_v22 = vadd.f32 %v11842_v14, %v9950_v57  ;;  %v8653_v4 = vld [vmem:[#allocation7 + $0x290] ss:$8 sps:$4 sm:$0xff]  }
 0x209   : > { %4032 = vmatprep.mubr.bf16.mxu1 %v3341_v43  ;;  %4190 = vmatprep.subr.bf16.mxu1 %v8649_v49  ;;  %v2620_v10 = vadd.f32 %v2619_v59, %v11840_v51  ;;  %v2663_v43 = vadd.f32 %v11843_v23, %v9955_v46  ;;  %v2667_v59 = vadd.f32 %v9826_v30, %v9955_v46 }
 0x20a   : > { %v2621_v33 = vpop.f32.mrf.mxu0  ;;  %v9944_v28 = vpop.f32.mrf.mxu1  ;;  %4033 = vmatmul.mubr.bf16.gmra.mxu1 %v3340_v38 }
 0x20b   : > { %4084 = vmatpush2.bf16.msra.mxu0 %v8608_v12  ;;  %v2622_v5 = vadd.f32 %v2621_v33, %v2509_v32  ;;  %v2665_v12 = vadd.f32 %v9820_v7, %v9950_v57 }
 0x20c   : > { %v2623_v20 = vpop.f32.mrf.mxu0  ;;  %v9952_v27 = vpop.f32.mrf.mxu1  ;;  %4191 = vmatpush2.bf16.msra.mxu1 %v8647_v54 }
 0x20d   : > { %v2624_v15 = vadd.f32 %v2623_v20, %v2511_v50  ;;  %4192 = vmatprep.subr.bf16.mxu1 %v8652_v40  ;;  %v3346_v25 = vpack.c.bf16 %v2622_v5, %v2618_v17  ;;  %v8658_v50 = vld [vmem:[#allocation7 + $0x284] ss:$8 sps:$4 sm:$0xff]   ;;  %v8656_v20 = vld [vmem:[#allocation7 + $0x280] ss:$8 sps:$4 sm:$0xff]  }
 0x20e   : > { %v9959_v8 = vpop.f32.mrf.mxu1  ;;  %v2773_v26 = vpop.f32.mrf.mxu0 }
 0x20f   : > { %v3347_v1 = vpack.c.bf16 %v2624_v15, %v2620_v10  ;;  %v2774_v54 = vadd.f32 %v2773_v26, %v2661_v22  ;;  %v2673_v26 = vadd.f32 %v9835_v9, %v9955_v46 }
 0x210   : > { %v2775_v0 = vpop.f32.mrf.mxu0  ;;  %v2886_v45 = vpop.f32.mrf.mxu1  ;;  %4193 = vmatpush2.bf16.msra.mxu1 %v8650_v41  ;;  %v2671_v41 = vadd.f32 %v9832_v44, %v9950_v57 }
 0x211   : > { %4042 = vmatprep.mubr.bf16.mxu1 %v3347_v1  ;;  %4194 = vmatprep.subr.bf16.mxu1 %v8655_v60  ;;  %v2776_v49 = vadd.f32 %v2775_v0, %v2663_v43  ;;  %v2887_v37 = vadd.f32 %v2886_v45, %v2774_v54  ;;  %v2675_v1 = vadd.f32 %v9838_v62, %v9950_v57 }
 0x212   : > { %v2777_v34 = vpop.f32.mrf.mxu0  ;;  %v2888_v38 = vpop.f32.mrf.mxu1  ;;  %4043 = vmatmul.mubr.bf16.gmra.mxu1 %v3346_v25  ;;  %v2677_v60 = vadd.f32 %v9844_v47, %v9955_v46  ;;  %v2683_v47 = vadd.f32 %v9853_v6, %v9955_v46 }
 0x213   : > { %v2778_v13 = vadd.f32 %v2777_v34, %v2665_v12  ;;  %v2889_v10 = vadd.f32 %v2888_v38, %v2776_v49  ;;  %v2681_v49 = vadd.f32 %v9850_v35, %v9950_v57 }
 0x214   : > { %v2779_v32 = vpop.f32.mrf.mxu0  ;;  %v2890_v33 = vpop.f32.mrf.mxu1  ;;  %4195 = vmatpush2.bf16.msra.mxu1 %v8653_v4 }
 0x215   : > { %v2780_v5 = vadd.f32 %v2779_v32, %v2667_v59  ;;  %v2891_v40 = vadd.f32 %v2890_v33, %v2778_v13  ;;  %4196 = vmatprep.subr.bf16.mxu1 %v8658_v50  ;;  %v2685_v33 = vadd.f32 %v9856_v58, %v9950_v57 }
 0x216   : > { %v2783_v7 = vpop.f32.mrf.mxu0  ;;  %v2892_v51 = vpop.f32.mrf.mxu1 }
 0x217   : > { %v2893_v15 = vadd.f32 %v2892_v51, %v2780_v5  ;;  %v3306_v22 = vpack.c.bf16 %v2891_v40, %v2887_v37  ;;  %v2784_v44 = vadd.f32 %v2783_v7, %v2671_v41  ;;  %v2687_v7 = vadd.f32 %v9862_v11, %v9955_v46 }
 0x218   : > { %v2785_v30 = vpop.f32.mrf.mxu0  ;;  %v2896_v17 = vpop.f32.mrf.mxu1  ;;  %4197 = vmatpush2.bf16.msra.mxu1 %v8656_v20  ;;  %v2693_v11 = vadd.f32 %v9871_v18, %v9955_v46 }
 0x219   : > { %v3307_v14 = vpack.c.bf16 %v2893_v15, %v2889_v10  ;;  %v2786_v23 = vadd.f32 %v2785_v30, %v2673_v26  ;;  %v2897_v13 = vadd.f32 %v2896_v17, %v2784_v44 }
 0x21a   : > { %v2787_v25 = vpop.f32.mrf.mxu0  ;;  %v2898_v0 = vpop.f32.mrf.mxu1 }
 0x21b   : > { %v2788_v43 = vadd.f32 %v2787_v25, %v2675_v1  ;;  %4085 = vmatprep.mubr.bf16.mxu0 %v3307_v14  ;;  %v2899_v59 = vadd.f32 %v2898_v0, %v2786_v23  ;;  %v2691_v1 = vadd.f32 %v9868_v24, %v9950_v57  ;;  %v2695_v0 = vadd.f32 %v9874_v56, %v9950_v57 }
 0x21c   : > { %v2789_v45 = vpop.f32.mrf.mxu0  ;;  %v2900_v12 = vpop.f32.mrf.mxu1  ;;  %4086 = vmatmul.mubr.bf16.vlgmr.msra.gmra.mxu0 %v3306_v22 }
 0x21d   : > { %v2790_v4 = vadd.f32 %v2789_v45, %v2677_v60  ;;  %v2901_v34 = vadd.f32 %v2900_v12, %v2788_v43  ;;  %v2697_v45 = vadd.f32 %v9880_v53, %v9955_v46  ;;  %v2703_v53 = vadd.f32 %v9889_v3, %v9955_v46 }
 0x21e   : > { %v2793_v9 = vpop.f32.mrf.mxu0  ;;  %v2902_v38 = vpop.f32.mrf.mxu1 }
 0x21f   : > { %v2903_v62 = vadd.f32 %v2902_v38, %v2790_v4  ;;  %v3312_v5 = vpack.c.bf16 %v2901_v34, %v2897_v13  ;;  %v2794_v35 = vadd.f32 %v2793_v9, %v2681_v49  ;;  %v2701_v13 = vadd.f32 %v9886_v19, %v9950_v57 }
 0x220   : > { %v2795_v54 = vpop.f32.mrf.mxu0  ;;  %v2906_v32 = vpop.f32.mrf.mxu1 }
 0x221   : > { %v3313_v50 = vpack.c.bf16 %v2903_v62, %v2899_v59  ;;  %v2796_v51 = vadd.f32 %v2795_v54, %v2683_v47  ;;  %v2907_v14 = vadd.f32 %v2906_v32, %v2794_v35 }
 0x222   : > { %v2797_v20 = vpop.f32.mrf.mxu0  ;;  %v2908_v40 = vpop.f32.mrf.mxu1 }
 0x223   : > { %v2798_v10 = vadd.f32 %v2797_v20, %v2685_v33  ;;  %4095 = vmatprep.mubr.bf16.mxu0 %v3313_v50  ;;  %v2909_v26 = vadd.f32 %v2908_v40, %v2796_v51  ;;  %v2705_v33 = vadd.f32 %v9892_v36, %v9950_v57 }
 0x224   : > { %v2799_v15 = vpop.f32.mrf.mxu0  ;;  %v2910_v41 = vpop.f32.mrf.mxu1  ;;  %4096 = vmatmul.mubr.bf16.gmra.mxu0 %v3312_v5 }
 0x225   : > { %v2800_v37 = vadd.f32 %v2799_v15, %v2687_v7  ;;  %v2911_v30 = vadd.f32 %v2910_v41, %v2798_v10  ;;  %v2707_v7 = vadd.f32 %v9898_v16, %v9955_v46  ;;  %v2713_v16 = vadd.f32 %v9907_v29, %v9955_v46 }
 0x226   : > { %v2803_v6 = vpop.f32.mrf.mxu0  ;;  %v2912_v17 = vpop.f32.mrf.mxu1 }
 0x227   : > { %v2913_v58 = vadd.f32 %v2912_v17, %v2800_v37  ;;  %v3318_v23 = vpack.c.bf16 %v2911_v30, %v2907_v14  ;;  %v2804_v24 = vadd.f32 %v2803_v6, %v2691_v1  ;;  %v2711_v17 = vadd.f32 %v9904_v39, %v9950_v57 }
 0x228   : > { %v2805_v22 = vpop.f32.mrf.mxu0  ;;  %v2916_v25 = vpop.f32.mrf.mxu1  ;;  %v2715_v14 = vadd.f32 %v9910_v31, %v9950_v57 }
 0x229   : > { %v3319_v60 = vpack.c.bf16 %v2913_v58, %v2909_v26  ;;  %v2806_v12 = vadd.f32 %v2805_v22, %v2693_v11  ;;  %v2917_v54 = vadd.f32 %v2916_v25, %v2804_v24 }
 0x22a   : > { %v2807_v43 = vpop.f32.mrf.mxu0  ;;  %v2918_v44 = vpop.f32.mrf.mxu1 }
 0x22b   : > { %v2808_v4 = vadd.f32 %v2807_v43, %v2695_v0  ;;  %4105 = vmatprep.mubr.bf16.mxu0 %v3319_v60  ;;  %v2919_v49 = vadd.f32 %v2918_v44, %v2806_v12  ;;  %v2717_v60 = vadd.f32 %v9916_v42, %v9955_v46  ;;  %v2723_v42 = vadd.f32 %v9925_v61, %v9955_v46 }
 0x22c   : > { %v2809_v34 = vpop.f32.mrf.mxu0  ;;  %v2920_v9 = vpop.f32.mrf.mxu1  ;;  %4106 = vmatmul.mubr.bf16.gmra.mxu0 %v3318_v23 }
 0x22d   : > { %v2810_v38 = vadd.f32 %v2809_v34, %v2697_v45  ;;  %v2921_v59 = vadd.f32 %v2920_v9, %v2808_v4  ;;  %v2721_v9 = vadd.f32 %v9922_v21, %v9950_v57 }
 0x22e   : > { %v2813_v18 = vpop.f32.mrf.mxu0  ;;  %v2922_v62 = vpop.f32.mrf.mxu1 }
 0x22f   : > { %v2923_v56 = vadd.f32 %v2922_v62, %v2810_v38  ;;  %v3324_v5 = vpack.c.bf16 %v2921_v59, %v2917_v54  ;;  %v2814_v19 = vadd.f32 %v2813_v18, %v2701_v13  ;;  %v2725_v62 = vadd.f32 %v9928_v2, %v9950_v57 }
 0x230   : > { %v2815_v32 = vpop.f32.mrf.mxu0  ;;  %v2926_v47 = vpop.f32.mrf.mxu1 }
 0x231   : > { %v3325_v50 = vpack.c.bf16 %v2923_v56, %v2919_v49  ;;  %v2816_v51 = vadd.f32 %v2815_v32, %v2703_v53  ;;  %v2927_v26 = vadd.f32 %v2926_v47, %v2814_v19  ;;  %v2727_v32 = vadd.f32 %v9934_v63, %v9955_v46 }
 0x232   : > { %v2817_v20 = vpop.f32.mrf.mxu0  ;;  %v2928_v40 = vpop.f32.mrf.mxu1  ;;  %v2733_v63 = vadd.f32 %v9944_v28, %v9955_v46 }
 0x233   : > { %v2818_v10 = vadd.f32 %v2817_v20, %v2705_v33  ;;  %4115 = vmatprep.mubr.bf16.mxu0 %v3325_v50  ;;  %v2929_v6 = vadd.f32 %v2928_v40, %v2816_v51  ;;  %v2731_v51 = vadd.f32 %v9940_v55, %v9950_v57 }
 0x234   : > { %v2819_v35 = vpop.f32.mrf.mxu0  ;;  %v2930_v15 = vpop.f32.mrf.mxu1  ;;  %4116 = vmatmul.mubr.bf16.gmra.mxu0 %v3324_v5 }
 0x235   : > { %v2820_v41 = vadd.f32 %v2819_v35, %v2707_v7  ;;  %v2931_v37 = vadd.f32 %v2930_v15, %v2818_v10  ;;  %v2735_v15 = vadd.f32 %v9952_v27, %v9950_v57 }
 0x236   : > { %v2823_v3 = vpop.f32.mrf.mxu0  ;;  %v2932_v30 = vpop.f32.mrf.mxu1 }
 0x237   : > { %v2933_v36 = vadd.f32 %v2932_v30, %v2820_v41  ;;  %v3330_v25 = vpack.c.bf16 %v2931_v37, %v2927_v26  ;;  %v2824_v39 = vadd.f32 %v2823_v3, %v2711_v17 }
 0x238   : > { %v2825_v58 = vpop.f32.mrf.mxu0  ;;  %v2936_v1 = vpop.f32.mrf.mxu1 }
 0x239   : > { %v3331_v22 = vpack.c.bf16 %v2933_v36, %v2929_v6  ;;  %v2826_v23 = vadd.f32 %v2825_v58, %v2713_v16  ;;  %v2937_v38 = vadd.f32 %v2936_v1, %v2824_v39  ;;  %v2737_v6 = vadd.f32 %v9959_v8, %v9955_v46 }
 0x23a   : > { %v2827_v11 = vpop.f32.mrf.mxu0  ;;  %v2938_v0 = vpop.f32.mrf.mxu1 }
 0x23b   : > { %v2828_v43 = vadd.f32 %v2827_v11, %v2715_v14  ;;  %4125 = vmatprep.mubr.bf16.mxu0 %v3331_v22  ;;  %v2939_v34 = vadd.f32 %v2938_v0, %v2826_v23 }
 0x23c   : > { %v2829_v44 = vpop.f32.mrf.mxu0  ;;  %v2940_v45 = vpop.f32.mrf.mxu1  ;;  %4126 = vmatmul.mubr.bf16.gmra.mxu0 %v3330_v25 }
 0x23d   : > { %v2830_v12 = vadd.f32 %v2829_v44, %v2717_v60  ;;  %v2941_v4 = vadd.f32 %v2940_v45, %v2828_v43 }
 0x23e   : > { %v2833_v29 = vpop.f32.mrf.mxu0  ;;  %v2942_v24 = vpop.f32.mrf.mxu1 }
 0x23f   : > { %v2943_v31 = vadd.f32 %v2942_v24, %v2830_v12  ;;  %v3336_v56 = vpack.c.bf16 %v2941_v4, %v2937_v38  ;;  %v2834_v21 = vadd.f32 %v2833_v29, %v2721_v9 }
 0x240   : > { %v2835_v59 = vpop.f32.mrf.mxu0  ;;  %v2946_v18 = vpop.f32.mrf.mxu1 }
 0x241   : > { %v3337_v49 = vpack.c.bf16 %v2943_v31, %v2939_v34  ;;  %v2836_v47 = vadd.f32 %v2835_v59, %v2723_v42  ;;  %v2947_v10 = vadd.f32 %v2946_v18, %v2834_v21 }
 0x242   : > { %v2837_v13 = vpop.f32.mrf.mxu0  ;;  %v2948_v54 = vpop.f32.mrf.mxu1 }
 0x243   : > { %v2838_v53 = vadd.f32 %v2837_v13, %v2725_v62  ;;  %4135 = vmatprep.mubr.bf16.mxu0 %v3337_v49  ;;  %v2949_v7 = vadd.f32 %v2948_v54, %v2836_v47 }
 0x244   : > { %v2839_v33 = vpop.f32.mrf.mxu0  ;;  %v2950_v50 = vpop.f32.mrf.mxu1  ;;  %4136 = vmatmul.mubr.bf16.gmra.mxu0 %v3336_v56 }
 0x245   : > { %v2840_v5 = vadd.f32 %v2839_v33, %v2727_v32  ;;  %v2951_v20 = vadd.f32 %v2950_v50, %v2838_v53 }
 0x246   : > { %v2843_v61 = vpop.f32.mrf.mxu0  ;;  %v2952_v40 = vpop.f32.mrf.mxu1 }
 0x247   : > { %v2953_v2 = vadd.f32 %v2952_v40, %v2840_v5  ;;  %v3342_v37 = vpack.c.bf16 %v2951_v20, %v2947_v10  ;;  %v2844_v55 = vadd.f32 %v2843_v61, %v2731_v51 }
 0x248   : > { %v2845_v19 = vpop.f32.mrf.mxu0  ;;  %v2956_v35 = vpop.f32.mrf.mxu1 }
 0x249   : > { %v3343_v41 = vpack.c.bf16 %v2953_v2, %v2949_v7  ;;  %v2846_v36 = vadd.f32 %v2845_v19, %v2733_v63  ;;  %v2957_v22 = vadd.f32 %v2956_v35, %v2844_v55 }
 0x24a   : > { %v2847_v3 = vpop.f32.mrf.mxu0  ;;  %v2958_v30 = vpop.f32.mrf.mxu1 }
 0x24b   : > { %v2848_v17 = vadd.f32 %v2847_v3, %v2735_v15  ;;  %4145 = vmatprep.mubr.bf16.mxu0 %v3343_v41  ;;  %v2959_v57 = vadd.f32 %v2958_v30, %v2846_v36  ;;  %v839_v41 = vsub.s32 5, %v11839_v52 }
 0x24c   : > { %v2849_v26 = vpop.f32.mrf.mxu0  ;;  %v2960_v58 = vpop.f32.mrf.mxu1  ;;  %4146 = vmatmul.mubr.bf16.gmra.mxu0 %v3342_v37  ;;  %v835_v37 = vsub.s32 4, %v11839_v52 }
 0x24d   : > { %v2850_v1 = vadd.f32 %v2849_v26, %v2737_v6  ;;  %v2961_v16 = vadd.f32 %v2960_v58, %v2848_v17  ;;  %v10106_v36 = vrot.slane %v9947_v48, %v839_v41 }
 0x24e   : > { %v2962_v28 = vpop.f32.mrf.mxu1  ;;  %v10025_v14 = vpop.f32.mrf.mxu0  ;;  %v10109_v17 = vrot.slane %v9947_v48, %v835_v37 }
 0x24f   : > { %v2963_v27 = vadd.f32 %v2962_v28, %v2850_v1  ;;  %v3348_v46 = vpack.c.bf16 %v2961_v16, %v2957_v22 }
 0x250   : > { %v3001_v25 = vpop.f32.mrf.mxu0  ;;  %v10027_v11 = vpop.f32.mrf.mxu1 }
 0x251   : > { %v3349_v0 = vpack.c.bf16 %v2963_v27, %v2959_v57  ;;  %v3002_v16 = vadd.f32 %v3001_v25, %v10106_v36  ;;  %v3000_v57 = vadd.f32 %v10025_v14, %v10109_v17 }
 0x252   : > { %v3003_v8 = vpop.f32.mrf.mxu0  ;;  %v3114_v60 = vpop.f32.mrf.mxu1 }
 0x253   : > { %4155 = vmatprep.mubr.bf16.mxu0 %v3349_v0  ;;  %v3004_v58 = vadd.f32 %v3003_v8, %v10109_v17  ;;  %v3113_v37 = vadd.f32 %v10027_v11, %v3000_v57  ;;  %v8661_v57 = vld [vmem:[#allocation10 + $0x74] ss:$8 sps:$4 sm:$0xff]  }
 0x254   : > { %v3005_v23 = vpop.f32.mrf.mxu0  ;;  %v3116_v43 = vpop.f32.mrf.mxu1  ;;  %4156 = vmatmul.mubr.bf16.gmra.mxu0 %v3348_v46  ;;  %v3115_v46 = vadd.f32 %v3114_v60, %v3002_v16  ;;  %4531 = vmatprep.subr.bf16.mxu0 %v8661_v57  ;;  %v8668_v57 = vld [vmem:[#allocation10 + $0x40] ss:$8 sps:$4 sm:$0xff]  }
 0x255   : > { %v3006_v28 = vadd.f32 %v3005_v23, %v10106_v36  ;;  %v3117_v0 = vadd.f32 %v3116_v43, %v3004_v58 }
 0x256   : > { %v10029_v39 = vpop.f32.mrf.mxu0  ;;  %v3118_v44 = vpop.f32.mrf.mxu1 }
 0x257   : > { %v3119_v41 = vadd.f32 %v3118_v44, %v3006_v28  ;;  %v3010_v60 = vadd.f32 %v10029_v39, %v10109_v17 }
 0x258   : > { %v10031_v45 = vpop.f32.mrf.mxu0  ;;  %v10033_v4 = vpop.f32.mrf.mxu1 }
 0x259   : > { %v3012_v14 = vadd.f32 %v10031_v45, %v10106_v36  ;;  %v8659_v45 = vld [vmem:[#allocation10 + $0x70] ss:$8 sps:$4 sm:$0xff]  }
 0x25a   : > { %v3013_v12 = vpop.f32.mrf.mxu0  ;;  %v10037_v34 = vpop.f32.mrf.mxu1  ;;  %4532 = vmatpush1.bf16.msra.mxu0 %v8659_v45 }
 0x25b   : > { %v3014_v23 = vadd.f32 %v3013_v12, %v10109_v17  ;;  %v3125_v12 = vadd.f32 %v10037_v34, %v3012_v14  ;;  %v8662_v34 = vld [vmem:[#allocation10 + $0x60] ss:$8 sps:$4 sm:$0xff]  }
 0x25c   : > { %v3015_v29 = vpop.f32.mrf.mxu0  ;;  %v10043_v38 = vpop.f32.mrf.mxu1 }
 0x25d   : > { %v3016_v43 = vadd.f32 %v3015_v29, %v10106_v36  ;;  %v3123_v29 = vadd.f32 %v10033_v4, %v3010_v60  ;;  %v8670_v60 = vld [vmem:[#allocation10 + $0x44] ss:$8 sps:$4 sm:$0xff]  }
 0x25e   : > { %v10035_v24 = vpop.f32.mrf.mxu0  ;;  %v10049_v42 = vpop.f32.mrf.mxu1 }
 0x260   : > { %v10039_v31 = vpop.f32.mrf.mxu0  ;;  %v10055_v56 = vpop.f32.mrf.mxu1 }
 0x262   : > { %v10041_v9 = vpop.f32.mrf.mxu0  ;;  %v10061_v32 = vpop.f32.mrf.mxu1 }
 0x264   : > { %v10045_v59 = vpop.f32.mrf.mxu0  ;;  %v10067_v21 = vpop.f32.mrf.mxu1 }
 0x265   : > { %v3026_v4 = vadd.f32 %v10045_v59, %v10106_v36 }
 0x266   : > { %v10047_v18 = vpop.f32.mrf.mxu0  ;;  %v10073_v5 = vpop.f32.mrf.mxu1 }
 0x267   : > { %v3139_v59 = vadd.f32 %v10073_v5, %v3026_v4 }
 0x268   : > { %v10051_v62 = vpop.f32.mrf.mxu0  ;;  %v10079_v40 = vpop.f32.mrf.mxu1 }
 0x26a   : > { %v10053_v49 = vpop.f32.mrf.mxu0  ;;  %v10085_v51 = vpop.f32.mrf.mxu1 }
 0x26c   : > { %v10057_v13 = vpop.f32.mrf.mxu0  ;;  %v10091_v35 = vpop.f32.mrf.mxu1 }
 0x26d   : > { %v3036_v5 = vadd.f32 %v10057_v13, %v10106_v36 }
 0x26e   : > { %v10059_v54 = vpop.f32.mrf.mxu0  ;;  %v10099_v3 = vpop.f32.mrf.mxu1 }
 0x26f   : > { %v3149_v13 = vadd.f32 %v10099_v3, %v3036_v5 }
 0x270   : > { %v10063_v47 = vpop.f32.mrf.mxu0  ;;  %v10111_v55 = vpop.f32.mrf.mxu1 }
 0x272   : > { %v10065_v53 = vpop.f32.mrf.mxu0  ;;  %v10120_v27 = vpop.f32.mrf.mxu1 }
 0x274   : > { %v10069_v33 = vpop.f32.mrf.mxu0  ;;  %v10123_v52 = vpop.f32.mrf.mxu1 }
 0x275   : > { %v3046_v3 = vadd.f32 %v10069_v33, %v10106_v36 }
 0x276   : > { %v10071_v50 = vpop.f32.mrf.mxu0  ;;  %v10131_v11 = vpop.f32.mrf.mxu1 }
 0x277   : > { %v3159_v33 = vadd.f32 %v10131_v11, %v3046_v3  ;;  %v3050_v5 = vadd.f32 %v10071_v50, %v10109_v17 }
 0x278   : > { %v10075_v20 = vpop.f32.mrf.mxu0 }
 0x27a   : > { %v10077_v61 = vpop.f32.mrf.mxu0 }
 0x27c   : > { %v10081_v7 = vpop.f32.mrf.mxu0 }
 0x27d   : > { %v3056_v11 = vadd.f32 %v10081_v7, %v10106_v36 }
 0x27e   : > { %v10083_v2 = vpop.f32.mrf.mxu0 }
 0x280   : > { %v10087_v10 = vpop.f32.mrf.mxu0 }
 0x282   : > { %v10089_v19 = vpop.f32.mrf.mxu0 }
 0x284   : > { %v10093_v63 = vpop.f32.mrf.mxu0 }
 0x286   : > { %v10095_v15 = vpop.f32.mrf.mxu0 }
 0x287   : > { %11844 = vst [vmem:[#allocation17_spill] sm:$0xff] %v10095_v15 }
 0x288   : > { %v10101_v30 = vpop.f32.mrf.mxu0 }
 0x289   : > { %11845 = vst [vmem:[#allocation27_spill] sm:$0xff] %v10101_v30 }
 0x28a   : > { %v10103_v6 = vpop.f32.mrf.mxu0 }
 0x28b   : > { %11846 = vst [vmem:[#allocation26_spill] sm:$0xff] %v10103_v6 }
 0x28c   : > { %v10113_v26 = vpop.f32.mrf.mxu0 }
 0x28d   : > { %11847 = vst [vmem:[#allocation18_spill] sm:$0xff] %v10113_v26 }
 0x28e   : > { %v3225_v1 = vpop.f32.mrf.mxu0 }
 0x28f   : > { %v3226_v30 = vadd.f32 %v3225_v1, %v3113_v37  ;;  %v3129_v1 = vadd.f32 %v10049_v42, %v3016_v43  ;;  %v3022_v42 = vadd.f32 %v10039_v31, %v10106_v36  ;;  %v8665_v31 = vld [vmem:[#allocation10 + $0x50] ss:$8 sps:$4 sm:$0xff]  }
 0x290   : > { %v3227_v22 = vpop.f32.mrf.mxu0 }
 0x291   : > { %v3228_v26 = vadd.f32 %v3227_v22, %v3115_v46 }
 0x292   : > { %v3229_v48 = vpop.f32.mrf.mxu0 }
 0x293   : > { %v3230_v8 = vadd.f32 %v3229_v48, %v3117_v0  ;;  %v8664_v0 = vld [vmem:[#allocation10 + $0x64] ss:$8 sps:$4 sm:$0xff]  }
 0x294   : > { %v3231_v15 = vpop.f32.mrf.mxu0  ;;  %4533 = vmatprep.subr.bf16.mxu0 %v8664_v0 }
 0x295   : > { %v3232_v25 = vadd.f32 %v3231_v15, %v3119_v41  ;;  %v3308_v44 = vpack.c.bf16 %v3230_v8, %v3226_v30  ;;  %v3127_v15 = vadd.f32 %v10043_v38, %v3014_v23  ;;  %v3024_v38 = vadd.f32 %v10041_v9, %v10109_v17  ;;  %v8667_v8 = vld [vmem:[#allocation10 + $0x54] ss:$8 sps:$4 sm:$0xff]   ;;  %4534 = vmatpush1.bf16.msra.mxu0 %v8662_v34 }
 0x296   : > { %v3235_v6 = vpop.f32.mrf.mxu0  ;;  %4535 = vmatprep.subr.bf16.mxu0 %v8667_v8 }
 0x297   : > { %v3309_v58 = vpack.c.bf16 %v3232_v25, %v3228_v26  ;;  %v10137_v26 = vpop.f32.mrf.mxu1  ;;  %v3236_v46 = vadd.f32 %v3235_v6, %v3123_v29  ;;  %v3020_v25 = vadd.f32 %v10035_v24, %v10109_v17  ;;  %v3137_v6 = vadd.f32 %v10067_v21, %v3024_v38  ;;  %v8673_v29 = vld [vmem:[#allocation10 + $0x34] ss:$8 sps:$4 sm:$0xff]  }
 0x298   : > { %v3237_v16 = vpop.f32.mrf.mxu0  ;;  %v3034_v21 = vadd.f32 %v10053_v49, %v10109_v17 }
 0x299   : > { %4198 = vmatprep.mubr.bf16.mxu1 %v3309_v58  ;;  %v3238_v30 = vadd.f32 %v3237_v16, %v3125_v12  ;;  %v10147_v23 = vpop.f32.mrf.mxu1  ;;  %v3135_v58 = vadd.f32 %v10061_v32, %v3022_v42  ;;  %4536 = vmatpush1.bf16.msra.mxu0 %v8665_v31  ;;  %v3032_v32 = vadd.f32 %v10051_v62, %v10106_v36  ;;  %v8671_v62 = vld [vmem:[#allocation10 + $0x30] ss:$8 sps:$4 sm:$0xff]  }
 0x29a   : > { %v3239_v28 = vpop.f32.mrf.mxu0  ;;  %4199 = vmatmul.mubr.bf16.vlgmr.msra.gmra.mxu1 %v3308_v44  ;;  %v3133_v44 = vadd.f32 %v10055_v56, %v3020_v25  ;;  %4537 = vmatprep.subr.bf16.mxu0 %v8670_v60 }
 0x29b   : > { %v3240_v39 = vadd.f32 %v3239_v28, %v3127_v15  ;;  %v10153_v24 = vpop.f32.mrf.mxu1  ;;  %v3145_v38 = vadd.f32 %v10085_v51, %v3032_v32  ;;  %v3042_v51 = vadd.f32 %v10063_v47, %v10106_v36  ;;  %v8677_v47 = vld [vmem:[#allocation10 + $0x10] ss:$8 sps:$4 sm:$0xff]  }
 0x29c   : > { %v3241_v22 = vpop.f32.mrf.mxu0 }
 0x29d   : > { %v3242_v48 = vadd.f32 %v3241_v22, %v3129_v1  ;;  %v3314_v14 = vpack.c.bf16 %v3240_v39, %v3236_v46  ;;  %v3030_v39 = vadd.f32 %v10047_v18, %v10109_v17  ;;  %v10163_v22 = vpop.f32.mrf.mxu1  ;;  %4538 = vmatpush1.bf16.msra.mxu0 %v8668_v57  ;;  %v8676_v46 = vld [vmem:[#allocation10 + $0x24] ss:$8 sps:$4 sm:$0xff]   ;;  %v3155_v60 = vadd.f32 %v10120_v27, %v3042_v51  ;;  %v8680_v57 = vld [vmem:[#allocation10] ss:$8 sps:$4 sm:$0xff]   ;;  %v8689_v51 = vld [vmem:[#allocation10 + $0xd0] ss:$8 sps:$4 sm:$0xff]  }
 0x29e   : > { %v3245_v41 = vpop.f32.mrf.mxu0  ;;  %4539 = vmatprep.subr.bf16.mxu0 %v8673_v29  ;;  %v3052_v27 = vadd.f32 %v10075_v20, %v10106_v36  ;;  %v3169_v7 = vadd.f32 %v10163_v22, %v3056_v11  ;;  %v3066_v22 = vadd.f32 %v10093_v63, %v10106_v36  ;;  %v8694_v63 = vld [vmem:[#allocation10 + $0xc4] ss:$8 sps:$4 sm:$0xff]  }
 0x29f   : > { %v3315_v37 = vpack.c.bf16 %v3242_v48, %v3238_v30  ;;  %v3246_v1 = vadd.f32 %v3245_v41, %v3133_v44  ;;  %v3147_v30 = vadd.f32 %v10091_v35, %v3034_v21  ;;  %v3143_v41 = vadd.f32 %v10079_v40, %v3030_v39  ;;  %v10169_v18 = vpop.f32.mrf.mxu1  ;;  %v8682_v44 = vld [vmem:[#allocation10 + $0x4] ss:$8 sps:$4 sm:$0xff]  }
 0x2a0   : > { %v3247_v9 = vpop.f32.mrf.mxu0  ;;  %v3044_v35 = vadd.f32 %v10065_v53, %v10109_v17  ;;  %v3165_v20 = vadd.f32 %v10147_v23, %v3052_v27  ;;  %v3062_v23 = vadd.f32 %v10087_v10, %v10106_v36  ;;  %v8695_v27 = vld [vmem:[#allocation10 + $0xb0] ss:$8 sps:$4 sm:$0xff]  }
 0x2a1   : > { %4208 = vmatprep.mubr.bf16.mxu1 %v3315_v37  ;;  %v3248_v28 = vadd.f32 %v3247_v9, %v3135_v58  ;;  %4540 = vmatpush1.bf16.msra.mxu0 %v8671_v62  ;;  %v8679_v9 = vld [vmem:[#allocation10 + $0x14] ss:$8 sps:$4 sm:$0xff]  }
 0x2a2   : > { %v3249_v43 = vpop.f32.mrf.mxu0  ;;  %4209 = vmatmul.mubr.bf16.gmra.mxu1 %v3314_v14  ;;  %v8674_v14 = vld [vmem:[#allocation10 + $0x20] ss:$8 sps:$4 sm:$0xff]   ;;  %4541 = vmatprep.subr.bf16.mxu0 %v8676_v46  ;;  %v3157_v58 = vadd.f32 %v10123_v52, %v3044_v35  ;;  %v3054_v52 = vadd.f32 %v10077_v61, %v10109_v17 }
 0x2a3   : > { %v3250_v16 = vadd.f32 %v3249_v43, %v3137_v6  ;;  %v3040_v6 = vadd.f32 %v10059_v54, %v10109_v17  ;;  %v10179_v43 = vpop.f32.mrf.mxu1 }
 0x2a4   : > { %v3251_v15 = vpop.f32.mrf.mxu0  ;;  %v3167_v61 = vadd.f32 %v10153_v24, %v3054_v52  ;;  %v3064_v24 = vadd.f32 %v10089_v19, %v10109_v17  ;;  %v3175_v10 = vadd.f32 %v10179_v43, %v3062_v23 }
 0x2a5   : > { %v3252_v12 = vadd.f32 %v3251_v15, %v3139_v59  ;;  %v3320_v0 = vpack.c.bf16 %v3250_v16, %v3246_v1  ;;  %4542 = vmatpush1.bf16.msra.mxu0 %v8674_v14  ;;  %v3153_v16 = vadd.f32 %v10111_v55, %v3040_v6  ;;  %v3176_v54 = vpop.f32.mrf.mxu1  ;;  %v8685_v55 = vld [vmem:[#allocation10 + $0xf4] ss:$8 sps:$4 sm:$0xff]  }
 0x2a6   : > { %v3255_v45 = vpop.f32.mrf.mxu0  ;;  %4543 = vmatprep.subr.bf16.mxu0 %v8679_v9  ;;  %v3177_v19 = vadd.f32 %v3176_v54, %v3064_v24 }
 0x2a7   : > { %v3321_v56 = vpack.c.bf16 %v3252_v12, %v3248_v28  ;;  %v3256_v8 = vadd.f32 %v3255_v45, %v3143_v41 }
 0x2a8   : > { %v3257_v49 = vpop.f32.mrf.mxu0 }
 0x2a9   : > { %4218 = vmatprep.mubr.bf16.mxu1 %v3321_v56  ;;  %v3258_v4 = vadd.f32 %v3257_v49, %v3145_v38  ;;  %4544 = vmatpush1.bf16.msra.mxu0 %v8677_v47  ;;  %v3178_v56 = vpop.f32.mrf.mxu1  ;;  %v8683_v49 = vld [vmem:[#allocation10 + $0xf0] ss:$8 sps:$4 sm:$0xff]  }
 0x2aa   : > { %v3259_v48 = vpop.f32.mrf.mxu0  ;;  %4219 = vmatmul.mubr.bf16.gmra.mxu1 %v3320_v0  ;;  %4545 = vmatprep.subr.bf16.mxu0 %v8682_v44  ;;  %v3179_v3 = vadd.f32 %v3178_v56, %v3066_v22  ;;  %v11849_v44 = vld [vmem:[#allocation27_spill] sm:$0xff] }
 0x2ab   : > { %v3260_v34 = vadd.f32 %v3259_v48, %v3147_v30  ;;  %v8688_v30 = vld [vmem:[#allocation10 + $0xe4] ss:$8 sps:$4 sm:$0xff]   ;;  %v3163_v48 = vadd.f32 %v10137_v26, %v3050_v5  ;;  %v3182_v62 = vpop.f32.mrf.mxu1  ;;  %v8691_v26 = vld [vmem:[#allocation10 + $0xd4] ss:$8 sps:$4 sm:$0xff]   ;;  %v3072_v43 = vadd.f32 %v11849_v44, %v10106_v36 }
 0x2ac   : > { %v3261_v42 = vpop.f32.mrf.mxu0 }
 0x2ad   : > { %v3262_v37 = vadd.f32 %v3261_v42, %v3149_v13  ;;  %v3326_v31 = vpack.c.bf16 %v3260_v34, %v3256_v8  ;;  %4546 = vmatpush1.bf16.msra.mxu0 %v8680_v57  ;;  %v8686_v42 = vld [vmem:[#allocation10 + $0xe0] ss:$8 sps:$4 sm:$0xff]   ;;  %v3184_v35 = vpop.f32.mrf.mxu1 }
 0x2ae   : > { %v3265_v25 = vpop.f32.mrf.mxu0  ;;  %4547 = vmatprep.subr.bf16.mxu0 %v8685_v55  ;;  %v3185_v11 = vadd.f32 %v3184_v35, %v3072_v43 }
 0x2af   : > { %v3327_v40 = vpack.c.bf16 %v3262_v37, %v3258_v4  ;;  %v3266_v1 = vadd.f32 %v3265_v25, %v3153_v16  ;;  %v3060_v37 = vadd.f32 %v10083_v2, %v10109_v17  ;;  %v3186_v9 = vpop.f32.mrf.mxu1  ;;  %v11850_v16 = vld [vmem:[#allocation18_spill] sm:$0xff] }
 0x2b0   : > { %v3267_v53 = vpop.f32.mrf.mxu0  ;;  %v3076_v54 = vadd.f32 %v11850_v16, %v10106_v36 }
 0x2b1   : > { %4228 = vmatprep.mubr.bf16.mxu1 %v3327_v40  ;;  %v3268_v12 = vadd.f32 %v3267_v53, %v3155_v60  ;;  %4548 = vmatpush2.bf16.msra.mxu0 %v8683_v49  ;;  %v3173_v40 = vadd.f32 %v10169_v18, %v3060_v37  ;;  %v8697_v18 = vld [vmem:[#allocation10 + $0xb4] ss:$8 sps:$4 sm:$0xff]   ;;  %v8698_v49 = vld [vmem:[#allocation10 + $0xa0] ss:$8 sps:$4 sm:$0xff]  }
 0x2b2   : > { %v3269_v59 = vpop.f32.mrf.mxu0  ;;  %4229 = vmatmul.mubr.bf16.gmra.mxu1 %v3326_v31  ;;  %4549 = vmatprep.subr.bf16.mxu0 %v8688_v30  ;;  %v8701_v30 = vld [vmem:[#allocation10 + $0x90] ss:$8 sps:$4 sm:$0xff]  }
 0x2b3   : > { %v3270_v15 = vadd.f32 %v3269_v59, %v3157_v58  ;;  %v11848_v58 = vld [vmem:[#allocation26_spill] sm:$0xff] }
 0x2b4   : > { %v3271_v28 = vpop.f32.mrf.mxu0  ;;  %v3074_v59 = vadd.f32 %v11848_v58, %v10109_v17 }
 0x2b5   : > { %v3272_v21 = vadd.f32 %v3271_v28, %v3159_v33  ;;  %v3332_v29 = vpack.c.bf16 %v3270_v15, %v3266_v1  ;;  %4550 = vmatpush2.bf16.msra.mxu0 %v8686_v42  ;;  %v8692_v33 = vld [vmem:[#allocation10 + $0xc0] ss:$8 sps:$4 sm:$0xff]  }
 0x2b6   : > { %v3275_v45 = vpop.f32.mrf.mxu0  ;;  %4551 = vmatprep.subr.bf16.mxu0 %v8691_v26  ;;  %v11851_v28 = vld [vmem:[#allocation17_spill] sm:$0xff] }
 0x2b7   : > { %v3333_v32 = vpack.c.bf16 %v3272_v21, %v3268_v12  ;;  %v3276_v41 = vadd.f32 %v3275_v45, %v3163_v48  ;;  %v3070_v12 = vadd.f32 %v11851_v28, %v10109_v17  ;;  %v3188_v21 = vpop.f32.mrf.mxu1  ;;  %v3187_v45 = vadd.f32 %v3186_v9, %v3074_v59 }
 0x2b8   : > { %v3277_v39 = vpop.f32.mrf.mxu0 }
 0x2b9   : > { %4238 = vmatprep.mubr.bf16.mxu1 %v3333_v32  ;;  %v3278_v13 = vadd.f32 %v3277_v39, %v3165_v20  ;;  %4552 = vmatpush2.bf16.msra.mxu0 %v8689_v51  ;;  %v3189_v32 = vadd.f32 %v3188_v21, %v3076_v54  ;;  %v3183_v55 = vadd.f32 %v3182_v62, %v3070_v12  ;;  %v10215_v20 = vpop.f32.mrf.mxu1  ;;  %v8706_v62 = vld [vmem:[#allocation10 + $0x84] ss:$8 sps:$4 sm:$0xff]  }
 0x2ba   : > { %v3279_v0 = vpop.f32.mrf.mxu0  ;;  %4239 = vmatmul.mubr.bf16.gmra.mxu1 %v3332_v29  ;;  %4553 = vmatprep.subr.bf16.mxu0 %v8694_v63 }
 0x2bb   : > { %v3280_v50 = vadd.f32 %v3279_v0, %v3167_v61  ;;  %v8700_v0 = vld [vmem:[#allocation10 + $0xa4] ss:$8 sps:$4 sm:$0xff]   ;;  %v3976_v48 = vpop.f32.mrf.mxu1 }
 0x2bc   : > { %v3281_v38 = vpop.f32.mrf.mxu0 }
 0x2bd   : > { %v3282_v46 = vadd.f32 %v3281_v38, %v3169_v7  ;;  %v3338_v8 = vpack.c.bf16 %v3280_v50, %v3276_v41  ;;  %4554 = vmatpush2.bf16.msra.mxu0 %v8692_v33  ;;  %v8703_v7 = vld [vmem:[#allocation10 + $0x94] ss:$8 sps:$4 sm:$0xff]   ;;  %v8704_v50 = vld [vmem:[#allocation10 + $0x80] ss:$8 sps:$4 sm:$0xff]   ;;  %v3978_v38 = vpop.f32.mrf.mxu1 }
 0x2be   : > { %v3285_v34 = vpop.f32.mrf.mxu0  ;;  %4555 = vmatprep.subr.bf16.mxu0 %v8697_v18 }
 0x2bf   : > { %v3339_v4 = vpack.c.bf16 %v3282_v46, %v3278_v13  ;;  %v3286_v47 = vadd.f32 %v3285_v34, %v3173_v40  ;;  %v3980_v13 = vpop.f32.mrf.mxu1 }
 0x2c0   : > { %v3287_v25 = vpop.f32.mrf.mxu0 }
 0x2c1   : > { %4248 = vmatprep.mubr.bf16.mxu1 %v3339_v4  ;;  %v3288_v2 = vadd.f32 %v3287_v25, %v3175_v10  ;;  %4556 = vmatpush2.bf16.msra.mxu0 %v8695_v27  ;;  %v10217_v46 = vpop.f32.mrf.mxu1  ;;  %v3448_v27 = vld [vmem:[#allocation9] sm:$0x3] }
 0x2c2   : > { %v3289_v14 = vpop.f32.mrf.mxu0  ;;  %4249 = vmatmul.mubr.bf16.gmra.mxu1 %v3338_v8  ;;  %4557 = vmatprep.subr.bf16.mxu0 %v8700_v0 }
 0x2c3   : > { %v3290_v6 = vadd.f32 %v3289_v14, %v3177_v19  ;;  %v10219_v24 = vpop.f32.mrf.mxu1 }
 0x2c4   : > { %v3291_v31 = vpop.f32.mrf.mxu0 }
 0x2c5   : > { %v3292_v53 = vadd.f32 %v3291_v31, %v3179_v3  ;;  %v3344_v52 = vpack.c.bf16 %v3290_v6, %v3286_v47  ;;  %4558 = vmatpush2.bf16.msra.mxu0 %v8698_v49  ;;  %v10221_v41 = vpop.f32.mrf.mxu1 }
 0x2c6   : > { %v3295_v60 = vpop.f32.mrf.mxu0  ;;  %4559 = vmatprep.subr.bf16.mxu0 %v8703_v7 }
 0x2c7   : > { %v3345_v15 = vpack.c.bf16 %v3292_v53, %v3288_v2  ;;  %v3296_v39 = vadd.f32 %v3295_v60, %v3183_v55  ;;  %v10223_v34 = vpop.f32.mrf.mxu1  ;;  %v11857_v55 = vld [vmem:[#allocation24_spill] sm:$0xff] }
 0x2c8   : > { %v3297_v1 = vpop.f32.mrf.mxu0 }
 0x2c9   : > { %4258 = vmatprep.mubr.bf16.mxu1 %v3345_v15  ;;  %v3298_v56 = vadd.f32 %v3297_v1, %v3185_v11  ;;  %4560 = vmatpush2.bf16.msra.mxu0 %v8701_v30  ;;  %v10225_v42 = vpop.f32.mrf.mxu1  ;;  %v11856_v11 = vld [vmem:[#allocation25_spill] sm:$0xff] }
 0x2ca   : > { %v3299_v57 = vpop.f32.mrf.mxu0  ;;  %4259 = vmatmul.mubr.bf16.gmra.mxu1 %v3344_v52  ;;  %4561 = vmatprep.subr.bf16.mxu0 %v8706_v62 }
 0x2cb   : > { %v3300_v36 = vadd.f32 %v3299_v57, %v3187_v45  ;;  %v10227_v23 = vpop.f32.mrf.mxu1 }
 0x2cc   : > { %v3301_v5 = vpop.f32.mrf.mxu0 }
 0x2cd   : > { %v3302_v29 = vadd.f32 %v3301_v5, %v3189_v32  ;;  %v3350_v61 = vpack.c.bf16 %v3300_v36, %v3296_v39  ;;  %4562 = vmatpush2.bf16.msra.mxu0 %v8704_v50  ;;  %v10229_v22 = vpop.f32.mrf.mxu1  ;;  %v10288_v32 = vrot.slane %v3448_v27, %v11856_v11  ;;  %v10291_v36 = vrot.slane %v3448_v27, %v11857_v55 }
 0x2cf   : > { %v3351_v17 = vpack.c.bf16 %v3302_v29, %v3298_v56  ;;  %v10231_v4 = vpop.f32.mrf.mxu1  ;;  %v3977_v39 = vadd.f32 %v3976_v48, %v10288_v32  ;;  %v3981_v7 = vadd.f32 %v3980_v13, %v10288_v32  ;;  %v3989_v13 = vadd.f32 %v10221_v41, %v10291_v36 }
 0x2d1   : > { %4268 = vmatprep.mubr.bf16.mxu1 %v3351_v17  ;;  %v10233_v26 = vpop.f32.mrf.mxu1  ;;  %v3979_v17 = vadd.f32 %v3978_v38, %v10291_v36 }
 0x2d2   : > { %4269 = vmatmul.mubr.bf16.gmra.mxu1 %v3350_v61  ;;  %v3975_v61 = vadd.f32 %v10215_v20, %v10291_v36  ;;  %v3987_v20 = vadd.f32 %v10219_v24, %v10288_v32 }
 0x2d3   : > { %v10235_v37 = vpop.f32.mrf.mxu1 }
 0x2d5   : > { %v10237_v35 = vpop.f32.mrf.mxu1 }
 0x2d7   : > { %v10239_v8 = vpop.f32.mrf.mxu1 }
 0x2d9   : > { %v10241_v19 = vpop.f32.mrf.mxu1 }
 0x2db   : > { %v10243_v51 = vpop.f32.mrf.mxu1 }
 0x2dc   : > { %v4087_v25 = vpop.f32.mrf.mxu0 }
 0x2dd   : > { %v10245_v3 = vpop.f32.mrf.mxu1  ;;  %v4088_v50 = vadd.f32 %v4087_v25, %v3975_v61  ;;  %v3985_v25 = vadd.f32 %v10217_v46, %v10291_v36 }
 0x2de   : > { %v4089_v14 = vpop.f32.mrf.mxu0 }
 0x2df   : > { %v10247_v40 = vpop.f32.mrf.mxu1  ;;  %v4090_v30 = vadd.f32 %v4089_v14, %v3977_v39 }
 0x2e0   : > { %v4091_v10 = vpop.f32.mrf.mxu0 }
 0x2e1   : > { %v10249_v6 = vpop.f32.mrf.mxu1  ;;  %v4092_v62 = vadd.f32 %v4091_v10, %v3979_v17 }
 0x2e2   : > { %v4093_v63 = vpop.f32.mrf.mxu0 }
 0x2e3   : > { %v10251_v2 = vpop.f32.mrf.mxu1  ;;  %v4094_v11 = vadd.f32 %v4093_v63, %v3981_v7 }
 0x2e4   : > { %v4097_v9 = vpop.f32.mrf.mxu0 }
 0x2e5   : > { %v10253_v58 = vpop.f32.mrf.mxu1  ;;  %v4098_v61 = vadd.f32 %v4097_v9, %v3985_v25  ;;  %v3999_v9 = vadd.f32 %v10229_v22, %v10291_v36 }
 0x2e6   : > { %v4099_v31 = vpop.f32.mrf.mxu0 }
 0x2e7   : > { %v10255_v47 = vpop.f32.mrf.mxu1 }
 0x2e8   : > { %v4101_v53 = vpop.f32.mrf.mxu0 }
 0x2e9   : > { %v10259_v33 = vpop.f32.mrf.mxu1 }
 0x2ea   : > { %v4103_v59 = vpop.f32.mrf.mxu0 }
 0x2eb   : > { %v10263_v43 = vpop.f32.mrf.mxu1 }
 0x2ec   : > { %v10257_v60 = vpop.f32.mrf.mxu0 }
 0x2ed   : > { %v10267_v54 = vpop.f32.mrf.mxu1 }
 0x2ee   : > { %v10261_v44 = vpop.f32.mrf.mxu0 }
 0x2ef   : > { %v10271_v18 = vpop.f32.mrf.mxu1 }
 0x2f0   : > { %v10265_v16 = vpop.f32.mrf.mxu0  ;;  %11852 = vst [vmem:[#allocation19_spill] sm:$0xff] %v10271_v18 }
 0x2f1   : > { %v10275_v12 = vpop.f32.mrf.mxu1 }
 0x2f2   : > { %v10269_v15 = vpop.f32.mrf.mxu0  ;;  %11853 = vst [vmem:[#allocation29_spill] sm:$0xff] %v10275_v12 }
 0x2f3   : > { %v10279_v52 = vpop.f32.mrf.mxu1 }
 0x2f4   : > { %v10273_v28 = vpop.f32.mrf.mxu0  ;;  %11854 = vst [vmem:[#allocation28_spill] sm:$0xff] %v10279_v52 }
 0x2f5   : > { %v10283_v45 = vpop.f32.mrf.mxu1 }
 0x2f6   : > { %v10277_v21 = vpop.f32.mrf.mxu0  ;;  %11855 = vst [vmem:[#allocation20_spill] sm:$0xff] %v10283_v45 }
 0x2f7   : > { %v10293_v5 = vpop.f32.mrf.mxu1 }
 0x2f8   : > { %v10281_v1 = vpop.f32.mrf.mxu0  ;;  %11858 = vst [vmem:[#allocation21_spill] sm:$0xff] %v10293_v5 }
 0x2fa   : > { %v10285_v57 = vpop.f32.mrf.mxu0 }
 0x2fc   : > { %v10295_v56 = vpop.f32.mrf.mxu0 }
 0x2fe   : > { %v10301_v0 = vpop.f32.mrf.mxu0 }
 0x300   : > { %v10304_v12 = vpop.f32.mrf.mxu0 }
 0x302   : > { %v10312_v63 = vpop.f32.mrf.mxu0 }
 0x35a   : > { %v4200_v29 = vpop.f32.mrf.mxu1 }
 0x35b   : > { %v4201_v48 = vadd.f32 %v4200_v29, %v4088_v50 }
 0x35c   : > { %v4202_v49 = vpop.f32.mrf.mxu1 }
 0x35d   : > { %v4203_v55 = vadd.f32 %v4202_v49, %v4090_v30  ;;  %v4279_v39 = vmax.f32 %v4201_v48, 0.0  ;;  %v10316_v30 = vpop.f32.mrf.mxu0 }
 0x35e   : > { %v4204_v27 = vpop.f32.mrf.mxu1 }
 0x35f   : > { %v4205_v5 = vadd.f32 %v4204_v27, %v4092_v62  ;;  %v4280_v14 = vmax.f32 %v4203_v55, 0.0 }
 0x360   : > { %v4206_v45 = vpop.f32.mrf.mxu1 }
 0x361   : > { %v4207_v38 = vadd.f32 %v4206_v45, %v4094_v11  ;;  %v4281_v52 = vmax.f32 %v4205_v5, 0.0  ;;  %v3991_v45 = vadd.f32 %v10223_v34, %v10288_v32  ;;  %v4100_v11 = vadd.f32 %v4099_v31, %v3987_v20 }
 0x362   : > { %v4210_v18 = vpop.f32.mrf.mxu1  ;;  %v4102_v5 = vadd.f32 %v4101_v53, %v3989_v13  ;;  %v3997_v34 = vadd.f32 %v10227_v23, %v10288_v32  ;;  %v4001_v20 = vadd.f32 %v10231_v4, %v10288_v32 }
 0x363   : > { %v4282_v10 = vmax.f32 %v4207_v38, 0.0  ;;  %v4311_v24 = vpack.c.bf16 %v4281_v52, %v4279_v39  ;;  %v4104_v7 = vadd.f32 %v4103_v59, %v3991_v45  ;;  %v4211_v46 = vadd.f32 %v4210_v18, %v4098_v61  ;;  %v10324_v52 = vpop.f32.mrf.mxu0 }
 0x364   : > { %v4212_v17 = vpop.f32.mrf.mxu1  ;;  %v3995_v59 = vadd.f32 %v10225_v42, %v10291_v36  ;;  %v4110_v13 = vadd.f32 %v10261_v44, %v3997_v34  ;;  %v4114_v39 = vadd.f32 %v10269_v15, %v4001_v20  ;;  %v4005_v15 = vadd.f32 %v10233_v26, %v10291_v36 }
 0x365   : > { %v4312_v29 = vpack.c.bf16 %v4282_v10, %v4280_v14  ;;  %v4213_v41 = vadd.f32 %v4212_v17, %v4100_v11  ;;  %v4283_v38 = vmax.f32 %v4211_v46, 0.0  ;;  %v4112_v14 = vadd.f32 %v10265_v16, %v3999_v9  ;;  %v10332_v45 = vpop.f32.mrf.mxu0 }
 0x366   : > { %v4214_v49 = vpop.f32.mrf.mxu1  ;;  %v4108_v10 = vadd.f32 %v10257_v60, %v3995_v59  ;;  %v4007_v16 = vadd.f32 %v10235_v37, %v10288_v32  ;;  %v4009_v60 = vadd.f32 %v10237_v35, %v10291_v36  ;;  %v4118_v37 = vadd.f32 %v10273_v28, %v4005_v15 }
 0x367   : > { %v4215_v55 = vadd.f32 %v4214_v49, %v4102_v5  ;;  %4563 = vmatprep.mubr.bf16.mxu0 %v4312_v29  ;;  %v4284_v31 = vmax.f32 %v4213_v41, 0.0  ;;  %v4143_v49 = vpop.f32.mrf.mxu0  ;;  %v4019_v28 = vadd.f32 %v10245_v3, %v10291_v36  ;;  %v4031_v15 = vadd.f32 %v10255_v47, %v10288_v32 }
 0x368   : > { %v4216_v62 = vpop.f32.mrf.mxu1  ;;  %4564 = vmatmul.mubr.bf16.vlgmr.msra.gmra.mxu0 %v4311_v24  ;;  %v4120_v46 = vadd.f32 %v10277_v21, %v4007_v16 }
 0x369   : > { %v4217_v50 = vadd.f32 %v4216_v62, %v4104_v7  ;;  %v4285_v27 = vmax.f32 %v4215_v55, 0.0  ;;  %v4011_v55 = vadd.f32 %v10239_v8, %v10288_v32  ;;  %v4122_v62 = vadd.f32 %v10281_v1, %v4009_v60  ;;  %v10346_v26 = vpop.f32.mrf.mxu0 }
 0x36a   : > { %v4220_v48 = vpop.f32.mrf.mxu1  ;;  %v4017_v1 = vadd.f32 %v10243_v51, %v10288_v32 }
 0x36b   : > { %v4286_v53 = vmax.f32 %v4217_v50, 0.0  ;;  %v4313_v22 = vpack.c.bf16 %v4285_v27, %v4283_v38  ;;  %v4221_v11 = vadd.f32 %v4220_v48, %v4108_v10  ;;  %v4124_v48 = vadd.f32 %v10285_v57, %v4011_v55  ;;  %v4149_v20 = vpop.f32.mrf.mxu0 }
 0x36c   : > { %v4222_v18 = vpop.f32.mrf.mxu1  ;;  %v4015_v57 = vadd.f32 %v10241_v19, %v10291_v36  ;;  %v4130_v10 = vadd.f32 %v10301_v0, %v4017_v1 }
 0x36d   : > { %v4314_v23 = vpack.c.bf16 %v4286_v53, %v4284_v31  ;;  %v4223_v17 = vadd.f32 %v4222_v18, %v4110_v13  ;;  %v4287_v7 = vmax.f32 %v4221_v11, 0.0  ;;  %v4151_v19 = vpop.f32.mrf.mxu0 }
 0x36e   : > { %v4224_v25 = vpop.f32.mrf.mxu1  ;;  %v4128_v51 = vadd.f32 %v10295_v56, %v4015_v57  ;;  %v4029_v56 = vadd.f32 %v10253_v58, %v10291_v36 }
 0x36f   : > { %v4225_v42 = vadd.f32 %v4224_v25, %v4112_v14  ;;  %4573 = vmatprep.mubr.bf16.mxu0 %v4314_v23  ;;  %v4288_v61 = vmax.f32 %v4223_v17, 0.0  ;;  %v4021_v23 = vadd.f32 %v10247_v40, %v10288_v32  ;;  %v4153_v60 = vpop.f32.mrf.mxu0 }
 0x370   : > { %v4226_v5 = vpop.f32.mrf.mxu1  ;;  %4574 = vmatmul.mubr.bf16.gmra.mxu0 %v4313_v22  ;;  %v4132_v22 = vadd.f32 %v10304_v12, %v4019_v28  ;;  %v4027_v12 = vadd.f32 %v10251_v2, %v10288_v32 }
 0x371   : > { %v4227_v4 = vadd.f32 %v4226_v5, %v4114_v39  ;;  %v4289_v29 = vmax.f32 %v4225_v42, 0.0  ;;  %v4134_v17 = vadd.f32 %v10312_v63, %v4021_v23  ;;  %v4025_v63 = vadd.f32 %v10249_v6, %v10291_v36  ;;  %v4157_v6 = vpop.f32.mrf.mxu0 }
 0x372   : > { %v4230_v44 = vpop.f32.mrf.mxu1 }
 0x373   : > { %v4290_v24 = vmax.f32 %v4227_v4, 0.0  ;;  %v4315_v27 = vpack.c.bf16 %v4289_v29, %v4287_v7  ;;  %v4231_v31 = vadd.f32 %v4230_v44, %v4118_v37  ;;  %v4140_v7 = vadd.f32 %v10324_v52, %v4027_v12 }
 0x374   : > { %v4232_v41 = vpop.f32.mrf.mxu1  ;;  %v4138_v2 = vadd.f32 %v10316_v30, %v4025_v63  ;;  %v4037_v52 = vadd.f32 %v10263_v43, %v10288_v32 }
 0x375   : > { %v4316_v50 = vpack.c.bf16 %v4290_v24, %v4288_v61  ;;  %v4233_v34 = vadd.f32 %v4232_v41, %v4120_v46  ;;  %v4291_v13 = vmax.f32 %v4231_v31, 0.0  ;;  %v4142_v41 = vadd.f32 %v10332_v45, %v4029_v56  ;;  %v4159_v31 = vpop.f32.mrf.mxu0 }
 0x376   : > { %v4234_v35 = vpop.f32.mrf.mxu1  ;;  %v4039_v45 = vadd.f32 %v10267_v54, %v10291_v36  ;;  %v4150_v1 = vadd.f32 %v4149_v20, %v4037_v52 }
 0x377   : > { %v4235_v9 = vadd.f32 %v4234_v35, %v4122_v62  ;;  %4583 = vmatprep.mubr.bf16.mxu0 %v4316_v50  ;;  %v4292_v38 = vmax.f32 %v4233_v34, 0.0  ;;  %v4144_v62 = vadd.f32 %v4143_v49, %v4031_v15  ;;  %v4035_v49 = vadd.f32 %v10259_v33, %v10291_v36  ;;  %v4161_v23 = vpop.f32.mrf.mxu0 }
 0x378   : > { %v4236_v53 = vpop.f32.mrf.mxu1  ;;  %4584 = vmatmul.mubr.bf16.gmra.mxu0 %v4315_v27  ;;  %v4152_v28 = vadd.f32 %v4151_v19, %v4039_v45 }
 0x379   : > { %v4237_v8 = vadd.f32 %v4236_v53, %v4124_v48  ;;  %v4293_v59 = vmax.f32 %v4235_v9, 0.0 }
 0x37a   : > { %v4240_v21 = vpop.f32.mrf.mxu1 }
 0x37b   : > { %v4294_v18 = vmax.f32 %v4237_v8, 0.0  ;;  %v4317_v39 = vpack.c.bf16 %v4293_v59, %v4291_v13  ;;  %v4241_v5 = vadd.f32 %v4240_v21, %v4128_v51  ;;  %v11859_v59 = vld [vmem:[#allocation19_spill] sm:$0xff] }
 0x37c   : > { %v4242_v14 = vpop.f32.mrf.mxu1  ;;  %v4041_v21 = vadd.f32 %v11859_v59, %v10288_v32 }
 0x37d   : > { %v4318_v25 = vpack.c.bf16 %v4294_v18, %v4292_v38  ;;  %v4243_v42 = vadd.f32 %v4242_v14, %v4130_v10  ;;  %v4295_v61 = vmax.f32 %v4241_v5, 0.0  ;;  %v4148_v18 = vadd.f32 %v10346_v26, %v4035_v49  ;;  %v4163_v5 = vpop.f32.mrf.mxu0 }
 0x37e   : > { %v4244_v3 = vpop.f32.mrf.mxu1  ;;  %v4154_v13 = vadd.f32 %v4153_v60, %v4041_v21 }
 0x37f   : > { %v4245_v11 = vadd.f32 %v4244_v3, %v4132_v22  ;;  %4593 = vmatprep.mubr.bf16.mxu0 %v4318_v25  ;;  %v4296_v0 = vmax.f32 %v4243_v42, 0.0  ;;  %v11861_v3 = vld [vmem:[#allocation20_spill] sm:$0xff] }
 0x380   : > { %v4246_v4 = vpop.f32.mrf.mxu1  ;;  %4594 = vmatmul.mubr.bf16.gmra.mxu0 %v4317_v39  ;;  %v11860_v39 = vld [vmem:[#allocation28_spill] sm:$0xff] }
 0x381   : > { %v4247_v29 = vadd.f32 %v4246_v4, %v4134_v17  ;;  %v4297_v40 = vmax.f32 %v4245_v11, 0.0  ;;  %v4047_v20 = vadd.f32 %v11860_v39, %v10288_v32  ;;  %v4049_v17 = vadd.f32 %v11861_v3, %v10291_v36  ;;  %v11862_v11 = vld [vmem:[#allocation29_spill] sm:$0xff] }
 0x382   : > { %v4250_v44 = vpop.f32.mrf.mxu1  ;;  %v4045_v19 = vadd.f32 %v11862_v11, %v10291_v36 }
 0x383   : > { %v4298_v16 = vmax.f32 %v4247_v29, 0.0  ;;  %v4319_v46 = vpack.c.bf16 %v4297_v40, %v4295_v61  ;;  %v4251_v27 = vadd.f32 %v4250_v44, %v4138_v2  ;;  %v11863_v40 = vld [vmem:[#allocation21_spill] sm:$0xff]  ;;  %v4160_v12 = vadd.f32 %v4159_v31, %v4047_v20 }
 0x384   : > { %v4252_v24 = vpop.f32.mrf.mxu1  ;;  %v4051_v44 = vadd.f32 %v11863_v40, %v10288_v32  ;;  %v4162_v56 = vadd.f32 %v4161_v23, %v4049_v17 }
 0x385   : > { %v4320_v55 = vpack.c.bf16 %v4298_v16, %v4296_v0  ;;  %v4253_v50 = vadd.f32 %v4252_v24, %v4140_v7  ;;  %v4299_v53 = vmax.f32 %v4251_v27, 0.0  ;;  %v4158_v16 = vadd.f32 %v4157_v6, %v4045_v19  ;;  %v11865_v27 = vld [vmem:[#allocation25_spill] sm:$0xff] }
 0x386   : > { %v4254_v58 = vpop.f32.mrf.mxu1  ;;  %v4164_v61 = vadd.f32 %v4163_v5, %v4051_v44 }
 0x387   : > { %v4255_v37 = vadd.f32 %v4254_v58, %v4142_v41  ;;  %4603 = vmatprep.mubr.bf16.mxu0 %v4320_v55  ;;  %v4300_v30 = vmax.f32 %v4253_v50, 0.0  ;;  %v4359_v50 = vld [vmem:[#allocation12] sm:$0x3] }
 0x388   : > { %v4256_v35 = vpop.f32.mrf.mxu1  ;;  %4604 = vmatmul.mubr.bf16.gmra.mxu0 %v4319_v46 }
 0x389   : > { %v4257_v48 = vadd.f32 %v4256_v35, %v4144_v62  ;;  %v4301_v34 = vmax.f32 %v4255_v37, 0.0  ;;  %v11864_v37 = vld [vmem:[#allocation24_spill] sm:$0xff]  ;;  %v10392_v35 = vrot.slane %v4359_v50, %v11865_v27 }
 0x38a   : > { %v4260_v47 = vpop.f32.mrf.mxu1  ;;  %v10389_v6 = vrot.slane %v4359_v50, %v11864_v37 }
 0x38b   : > { %v4302_v9 = vmax.f32 %v4257_v48, 0.0  ;;  %v4321_v43 = vpack.c.bf16 %v4301_v34, %v4299_v53  ;;  %v4261_v10 = vadd.f32 %v4260_v47, %v4148_v18  ;;  %v11866_v34 = vld [vmem:[#allocation23_spill] sm:$0xff] }
 0x38c   : > { %v4262_v8 = vpop.f32.mrf.mxu1  ;;  %vm4647_vm0 = vcmp.lt.s32.totalorder %v11866_v34, 3  ;;  %vm4937_vm1 = vcmp.ge.s32.totalorder %v11866_v34, 3 }
 0x38d   : > { %v4322_v38 = vpack.c.bf16 %v4302_v9, %v4300_v30  ;;  %v4263_v54 = vadd.f32 %v4262_v8, %v4150_v1  ;;  %v4303_v4 = vmax.f32 %v4261_v10, 0.0 }
 0x38e   : > { %v4264_v57 = vpop.f32.mrf.mxu1 }
 0x38f   : > { %v4265_v14 = vadd.f32 %v4264_v57, %v4152_v28  ;;  %4613 = vmatprep.mubr.bf16.mxu0 %v4322_v38  ;;  %v4304_v26 = vmax.f32 %v4263_v54, 0.0 }
 0x390   : > { %v4266_v33 = vpop.f32.mrf.mxu1  ;;  %4614 = vmatmul.mubr.bf16.gmra.mxu0 %v4321_v43 }
 0x391   : > { %v4267_v22 = vadd.f32 %v4266_v33, %v4154_v13  ;;  %v4305_v25 = vmax.f32 %v4265_v14, 0.0 }
 0x392   : > { %v4270_v51 = vpop.f32.mrf.mxu1 }
 0x393   : > { %v4306_v42 = vmax.f32 %v4267_v22, 0.0  ;;  %v4323_v63 = vpack.c.bf16 %v4305_v25, %v4303_v4  ;;  %v4271_v7 = vadd.f32 %v4270_v51, %v4158_v16 }
 0x394   : > { %v4272_v29 = vpop.f32.mrf.mxu1 }
 0x395   : > { %v4324_v0 = vpack.c.bf16 %v4306_v42, %v4304_v26  ;;  %v4273_v24 = vadd.f32 %v4272_v29, %v4160_v12  ;;  %v4307_v58 = vmax.f32 %v4271_v7, 0.0 }
 0x396   : > { %v4274_v60 = vpop.f32.mrf.mxu1 }
 0x397   : > { %v4275_v15 = vadd.f32 %v4274_v60, %v4162_v56  ;;  %4623 = vmatprep.mubr.bf16.mxu0 %v4324_v0  ;;  %v4308_v2 = vmax.f32 %v4273_v24, 0.0 }
 0x398   : > { %v4276_v41 = vpop.f32.mrf.mxu1  ;;  %4624 = vmatmul.mubr.bf16.gmra.mxu0 %v4323_v63 }
 0x399   : > { %v4277_v36 = vadd.f32 %v4276_v41, %v4164_v61  ;;  %v4309_v55 = vmax.f32 %v4275_v15, 0.0 }
 0x39b   : > { %v4310_v46 = vmax.f32 %v4277_v36, 0.0  ;;  %v4325_v32 = vpack.c.bf16 %v4309_v55, %v4307_v58 }
 0x39d   : > { %v4326_v62 = vpack.c.bf16 %v4310_v46, %v4308_v2 }
 0x39f   : > { %4633 = vmatprep.mubr.bf16.mxu0 %v4326_v62 }
 0x3a0   : > { %4634 = vmatmul.mubr.bf16.gmra.mxu0 %v4325_v32 }
 0x428   : > { %v4565_v48 = vpop.f32.mrf.mxu0 }
 0x429   : > { %v10397_v47 = vadd.f32 %v4565_v48, %v10389_v6 }
 0x42a   : > { %v4567_v52 = vpop.f32.mrf.mxu0 }
 0x42b   : > { %11867 = vst [vmem:[#allocation32_spill] sm:$0xff] %v10397_v47  ;;  %v4649_v45 = vsel %vm4647_vm0, %v10397_v47, 0.0  ;;  %v4940_v30 = vsel %vm4937_vm1, %v10397_v47, 0.0  ;;  %v10406_v9 = vadd.f32 %v4567_v52, %v10392_v35  ;;  %v5228_v14 = vmul.f32 %v10397_v47, %v10397_v47 }
 0x42c   : > { %v4681_v49 = vrot.slane %v4649_v45, 4  ;;  %v4972_v31 = vrot.slane %v4940_v30, 4  ;;  %v4569_v53 = vpop.f32.mrf.mxu0 }
 0x42d   : > { %11868 = vst [vmem:[#allocation31_spill] sm:$0xff] %v10406_v9  ;;  %v4650_v8 = vsel %vm4647_vm0, %v10406_v9, 0.0  ;;  %v4941_v59 = vsel %vm4937_vm1, %v10406_v9, 0.0  ;;  %v10415_v21 = vadd.f32 %v4569_v53, %v10389_v6  ;;  %v5229_v43 = vmul.f32 %v10406_v9, %v10406_v9 }
 0x42e   : > { %v4682_v1 = vadd.f32 %v4681_v49, %v4649_v45  ;;  %v4687_v28 = vrot.slane %v4650_v8, 4  ;;  %v4978_v38 = vrot.slane %v4941_v59, 4  ;;  %v4571_v18 = vpop.f32.mrf.mxu0  ;;  %v10430_v10 = vadd.f32 %v4972_v31, %v4940_v30 }
 0x42f   : > { %11869 = vst [vmem:[#allocation30_spill] sm:$0xff] %v10415_v21  ;;  %v4651_v57 = vsel %vm4647_vm0, %v10415_v21, 0.0  ;;  %v4942_v13 = vsel %vm4937_vm1, %v10415_v21, 0.0  ;;  %v10426_v54 = vadd.f32 %v4571_v18, %v10392_v35  ;;  %v10440_v19 = vadd.f32 %v5229_v43, %v5228_v14 }
 0x430   : > { %v4683_v23 = vrot.slane %v4682_v1, 2  ;;  %v4688_v33 = vadd.f32 %v4687_v28, %v4650_v8  ;;  %v10432_v22 = vadd.f32 %v4978_v38, %v4941_v59  ;;  %v4575_v25 = vpop.f32.mrf.mxu0  ;;  %v4693_v51 = vrot.slane %v4651_v57, 4 }
 0x431   : > { %11870 = vst [vmem:[#allocation22_spill] sm:$0xff] %v10426_v54  ;;  %v4984_v39 = vrot.slane %v4942_v13, 4  ;;  %v4652_v20 = vsel %vm4647_vm0, %v10426_v54, 0.0  ;;  %v4943_v3 = vsel %vm4937_vm1, %v10426_v54, 0.0  ;;  %v10447_v29 = vadd.f32 %v4575_v25, %v10389_v6 }
 0x432   : > { %v4689_v17 = vrot.slane %v4688_v33, 2  ;;  %v4699_v26 = vrot.slane %v4652_v20, 4  ;;  %v4990_v42 = vrot.slane %v4943_v3, 4  ;;  %v4577_v11 = vpop.f32.mrf.mxu0  ;;  %v10442_v5 = vadd.f32 %v4693_v51, %v4651_v57 }
 0x433   : > { %v10444_v4 = vadd.f32 %v4984_v39, %v4942_v13  ;;  %11871 = vst [vmem:[#allocation34_spill] sm:$0xff] %v10447_v29  ;;  %v10450_v40 = vadd.f32 %v4577_v11, %v10392_v35  ;;  %v4974_v44 = vrot.slane %v10430_v10, 2  ;;  %v4980_v12 = vrot.slane %v10432_v22, 2 }
 0x434   : > { %v10454_v56 = vadd.f32 %v4699_v26, %v4652_v20  ;;  %v10456_v0 = vadd.f32 %v4990_v42, %v4943_v3  ;;  %v4579_v16 = vpop.f32.mrf.mxu0  ;;  %v4653_v63 = vsel %vm4647_vm0, %v10447_v29, 0.0  ;;  %v4944_v60 = vsel %vm4937_vm1, %v10447_v29, 0.0 }
 0x435   : > { %11872 = vst [vmem:[#allocation33_spill] sm:$0xff] %v10450_v40  ;;  %v10464_v61 = vadd.f32 %v4683_v23, %v4682_v1  ;;  %v10466_v24 = vadd.f32 %v4689_v17, %v4688_v33  ;;  %v4695_v15 = vrot.slane %v10442_v5, 2  ;;  %v4705_v41 = vrot.slane %v4653_v63, 4 }
 0x436   : > { %v4996_v36 = vrot.slane %v4944_v60, 4  ;;  %v4581_v55 = vpop.f32.mrf.mxu0  ;;  %v4654_v2 = vsel %vm4647_vm0, %v10450_v40, 0.0  ;;  %v4945_v46 = vsel %vm4937_vm1, %v10450_v40, 0.0  ;;  %v10477_v58 = vadd.f32 %v4579_v16, %v10389_v6 }
 0x437   : > { %v10480_v62 = vadd.f32 %v4581_v55, %v10392_v35  ;;  %v10482_v32 = vadd.f32 %v4705_v41, %v4653_v63  ;;  %v4711_v37 = vrot.slane %v4654_v2, 4  ;;  %v5002_v27 = vrot.slane %v4945_v46, 4 }
 0x438   : > { %11873 = vst [vmem:[#allocation35_spill] sm:$0xff] %v10477_v58  ;;  %v10484_v50 = vadd.f32 %v4996_v36, %v4944_v60  ;;  %v4585_v48 = vpop.f32.mrf.mxu0  ;;  %v4655_v52 = vsel %vm4647_vm0, %v10477_v58, 0.0  ;;  %v4946_v45 = vsel %vm4937_vm1, %v10477_v58, 0.0  ;;  %v4975_v7 = vadd.f32 %v4974_v44, %v10430_v10 }
 0x439   : > { %11874 = vst [vmem:[#allocation36_spill] sm:$0xff] %v10480_v62  ;;  %v4656_v30 = vsel %vm4647_vm0, %v10480_v62, 0.0  ;;  %v4947_v49 = vsel %vm4937_vm1, %v10480_v62, 0.0  ;;  %v10500_v8 = vadd.f32 %v4711_v37, %v4654_v2  ;;  %v10502_v59 = vadd.f32 %v5002_v27, %v4945_v46 }
 0x43a   : > { %v4587_v1 = vpop.f32.mrf.mxu0  ;;  %v4717_v28 = vrot.slane %v4655_v52, 4  ;;  %v5008_v38 = vrot.slane %v4946_v45, 4  ;;  %v4723_v18 = vrot.slane %v4656_v30, 4  ;;  %v5014_v43 = vrot.slane %v4947_v49, 4 }
 0x43b   : > { %v10507_v14 = vadd.f32 %v4585_v48, %v10389_v6  ;;  %v10510_v23 = vadd.f32 %v4587_v1, %v10392_v35 }
 0x43c   : > { %v4589_v33 = vpop.f32.mrf.mxu0  ;;  %v10512_v25 = vadd.f32 %v4717_v28, %v4655_v52  ;;  %v10514_v51 = vadd.f32 %v5008_v38, %v4946_v45  ;;  %v10516_v39 = vadd.f32 %v4723_v18, %v4656_v30  ;;  %v10518_v20 = vadd.f32 %v5014_v43, %v4947_v49 }
 0x43d   : > { %11875 = vst [vmem:[#allocation26_spill] sm:$0xff] %v10507_v14  ;;  %11876 = vst [vmem:[#allocation27_spill] sm:$0xff] %v10510_v23  ;;  %v4657_v3 = vsel %vm4647_vm0, %v10507_v14, 0.0  ;;  %v4948_v17 = vsel %vm4937_vm1, %v10507_v14, 0.0  ;;  %v4658_v26 = vsel %vm4647_vm0, %v10510_v23, 0.0  ;;  %v4949_v42 = vsel %vm4937_vm1, %v10510_v23, 0.0 }
 0x43e   : > { %v4591_v11 = vpop.f32.mrf.mxu0  ;;  %v4729_v36 = vrot.slane %v4657_v3, 4  ;;  %v5020_v55 = vrot.slane %v4948_v17, 4  ;;  %v4735_v2 = vrot.slane %v4658_v26, 4  ;;  %v5026_v46 = vrot.slane %v4949_v42, 4 }
 0x43f   : > { %v10539_v52 = vadd.f32 %v4589_v33, %v10389_v6  ;;  %v10542_v45 = vadd.f32 %v4591_v11, %v10392_v35  ;;  %v4685_v28 = vrot.slane %v10464_v61, 1 }
 0x440   : > { %v4595_v37 = vpop.f32.mrf.mxu0  ;;  %v10544_v30 = vadd.f32 %v4729_v36, %v4657_v3  ;;  %v10546_v49 = vadd.f32 %v5020_v55, %v4948_v17  ;;  %v10566_v36 = vadd.f32 %v4735_v2, %v4658_v26  ;;  %v10568_v55 = vadd.f32 %v5026_v46, %v4949_v42 }
 0x441   : > { %11877 = vst [vmem:[#allocation18_spill] sm:$0xff] %v10539_v52  ;;  %11878 = vst [vmem:[#allocation17_spill] sm:$0xff] %v10542_v45  ;;  %v10549_v1 = vadd.f32 %v4595_v37, %v10389_v6  ;;  %v4659_v38 = vsel %vm4647_vm0, %v10539_v52, 0.0  ;;  %v4950_v18 = vsel %vm4937_vm1, %v10539_v52, 0.0  ;;  %v4660_v43 = vsel %vm4647_vm0, %v10542_v45, 0.0 }
 0x442   : > { %v4951_v33 = vsel %vm4937_vm1, %v10542_v45, 0.0  ;;  %v4597_v3 = vpop.f32.mrf.mxu0  ;;  %v4741_v37 = vrot.slane %v4659_v38, 4  ;;  %v5032_v48 = vrot.slane %v4950_v18, 4  ;;  %v4747_v41 = vrot.slane %v4660_v43, 4 }
 0x443   : > { %11879 = vst [vmem:[#allocation19_spill] sm:$0xff] %v10549_v1  ;;  %v5038_v27 = vrot.slane %v4951_v33, 4  ;;  %v4661_v60 = vsel %vm4647_vm0, %v10549_v1, 0.0  ;;  %v4952_v63 = vsel %vm4937_vm1, %v10549_v1, 0.0  ;;  %v10577_v17 = vadd.f32 %v4597_v3, %v10392_v35 }
 0x444   : > { %v4686_v26 = vadd.f32 %v4685_v28, %v10464_v61  ;;  %v10580_v2 = vadd.f32 %v4741_v37, %v4659_v38  ;;  %v10582_v42 = vadd.f32 %v5032_v48, %v4950_v18  ;;  %v10584_v46 = vadd.f32 %v4747_v41, %v4660_v43  ;;  %v4599_v13 = vpop.f32.mrf.mxu0 }
 0x445   : > { %11880 = vst [vmem:[#allocation28_spill] sm:$0xff] %v10577_v17  ;;  %v10586_v11 = vadd.f32 %v5038_v27, %v4951_v33  ;;  %v4753_v16 = vrot.slane %v4661_v60, 4  ;;  %v5044_v57 = vrot.slane %v4952_v63, 4  ;;  %v4662_v53 = vsel %vm4647_vm0, %v10577_v17, 0.0 }
 0x446   : > { %v4953_v3 = vsel %vm4937_vm1, %v10577_v17, 0.0  ;;  %v4759_v18 = vrot.slane %v4662_v53, 4  ;;  %v4691_v33 = vrot.slane %v10466_v24, 1  ;;  %v4873_v37 = vmul.f32 0.33333334, %v4686_v26  ;;  %v4601_v41 = vpop.f32.mrf.mxu0 }
 0x447   : > { %v10598_v28 = vadd.f32 %v4753_v16, %v4661_v60  ;;  %v10600_v38 = vadd.f32 %v5044_v57, %v4952_v63  ;;  %v5050_v43 = vrot.slane %v4953_v3, 4  ;;  %v4981_v48 = vadd.f32 %v4980_v12, %v10432_v22 }
 0x448   : > { %v10613_v60 = vadd.f32 %v4759_v18, %v4662_v53  ;;  %v4692_v26 = vadd.f32 %v4691_v33, %v10466_v24  ;;  %v4976_v61 = vrot.slane %v4975_v7, 1  ;;  %v4905_v22 = vsel %vm4647_vm0, %v4873_v37, 0.0 }
 0x449   : > { %v4982_v31 = vrot.slane %v4981_v48, 1  ;;  %v10616_v10 = vadd.f32 %v5050_v43, %v4953_v3  ;;  %v10621_v44 = vadd.f32 %v4599_v13, %v10389_v6  ;;  %v10624_v12 = vadd.f32 %v4601_v41, %v10392_v35 }
 0x44a   : > { %v4874_v57 = vmul.f32 0.33333334, %v4692_v26  ;;  %v4977_v16 = vadd.f32 %v4976_v61, %v4975_v7  ;;  %v4696_v24 = vadd.f32 %v4695_v15, %v10442_v5 }
 0x44b   : > { %11881 = vst [vmem:[#allocation20_spill] sm:$0xff] %v10621_v44  ;;  %11882 = vst [vmem:[#allocation29_spill] sm:$0xff] %v10624_v12  ;;  %v4983_v63 = vadd.f32 %v4982_v31, %v4981_v48  ;;  %v4663_v53 = vsel %vm4647_vm0, %v10621_v44, 0.0  ;;  %v4954_v3 = vsel %vm4937_vm1, %v10621_v44, 0.0  ;;  %v4664_v13 = vsel %vm4647_vm0, %v10624_v12, 0.0  ;;  %v4605_v48 = vpop.f32.mrf.mxu0 }
 0x44c   : > { %v4955_v7 = vsel %vm4937_vm1, %v10624_v12, 0.0  ;;  %v4906_v31 = vsel %vm4647_vm0, %v4874_v57, 0.0  ;;  %v5164_v5 = vmul.f32 0.2, %v4977_v16  ;;  %v4765_v61 = vrot.slane %v4663_v53, 4 }
 0x44d   : > { %v5165_v15 = vmul.f32 0.2, %v4983_v63  ;;  %v5056_v41 = vrot.slane %v4954_v3, 4  ;;  %v4771_v18 = vrot.slane %v4664_v13, 4  ;;  %v5062_v43 = vrot.slane %v4955_v7, 4 }
 0x44e   : > { %v4697_v33 = vrot.slane %v4696_v24, 1  ;;  %v10645_v37 = vsel %vm4937_vm1, %v5164_v5, %v4905_v22  ;;  %v10651_v27 = vadd.f32 %v4765_v61, %v4663_v53  ;;  %v11885_v16 = vrot.slane %v10454_v56, 2  ;;  %v4607_v61 = vpop.f32.mrf.mxu0 }
 0x44f   : > { %11883 = vst [vmem:[#allocation21_spill] sm:$0xff] %v10645_v37  ;;  %v10649_v26 = vsel %vm4937_vm1, %v5165_v15, %v4906_v31  ;;  %v5372_v63 = vmul.f32 %v10645_v37, %v10645_v37  ;;  %v10660_v9 = vadd.f32 %v5056_v41, %v4954_v3  ;;  %v10662_v22 = vadd.f32 %v4771_v18, %v4664_v13 }
 0x450   : > { %11884 = vst [vmem:[#allocation24_spill] sm:$0xff] %v10649_v26  ;;  %v4702_v57 = vadd.f32 %v11885_v16, %v10454_v56  ;;  %v5373_v47 = vmul.f32 %v10649_v26, %v10649_v26  ;;  %v10665_v31 = vadd.f32 %v5062_v43, %v4955_v7  ;;  %v4698_v53 = vadd.f32 %v4697_v33, %v4696_v24 }
 0x451   : > { %v11886_v37 = vrot.slane %v10444_v4, 2  ;;  %v11887_v7 = vrot.slane %v10456_v0, 2  ;;  %v10681_v33 = vadd.f32 %v4607_v61, %v10392_v35  ;;  %v11892_v5 = vrot.slane %v10500_v8, 2 }
 0x452   : > { %v4703_v15 = vrot.slane %v4702_v57, 1  ;;  %v5404_v56 = vadd.f32 %v5373_v47, %v5372_v63  ;;  %v4875_v41 = vmul.f32 0.33333334, %v4698_v53  ;;  %v10678_v47 = vadd.f32 %v4605_v48, %v10389_v6 }
 0x453   : > { %v4987_v26 = vadd.f32 %v11886_v37, %v10444_v4  ;;  %v4993_v18 = vadd.f32 %v11887_v7, %v10456_v0  ;;  %11889 = vst [vmem:[#allocation23_spill] sm:$0xff] %v10681_v33  ;;  %v4609_v7 = vpop.f32.mrf.mxu0  ;;  %v4957_v3 = vsel %vm4937_vm1, %v10681_v33, 0.0 }
 0x454   : > { %v4704_v13 = vadd.f32 %v4703_v15, %v4702_v57  ;;  %5405 = vadd.xlane.f32.xlu0 %v5404_v56  ;;  %11888 = vst [vmem:[#allocation25_spill] sm:$0xff] %v10678_v47  ;;  %v4907_v57 = vsel %vm4647_vm0, %v4875_v41, 0.0  ;;  %v4665_v0 = vsel %vm4647_vm0, %v10678_v47, 0.0  ;;  %v4956_v48 = vsel %vm4937_vm1, %v10678_v47, 0.0 }
 0x455   : > { %v4988_v43 = vrot.slane %v4987_v26, 1  ;;  %v4994_v63 = vrot.slane %v4993_v18, 1  ;;  %v4666_v15 = vsel %vm4647_vm0, %v10681_v33, 0.0  ;;  %v4777_v56 = vrot.slane %v4665_v0, 4 }
 0x456   : > { %v4876_v37 = vmul.f32 0.33333334, %v4704_v13  ;;  %v5068_v13 = vrot.slane %v4956_v48, 4  ;;  %v5231_v41 = vmul.f32 %v10426_v54, %v10426_v54  ;;  %v4783_v4 = vrot.slane %v4666_v15, 4 }
 0x457   : > { %v4989_v53 = vadd.f32 %v4988_v43, %v4987_v26  ;;  %v4995_v61 = vadd.f32 %v4994_v63, %v4993_v18  ;;  %v10703_v16 = vadd.f32 %v4777_v56, %v4665_v0  ;;  %v5230_v63 = vmul.f32 %v10415_v21, %v10415_v21 }
 0x458   : > { %v4908_v26 = vsel %vm4647_vm0, %v4876_v37, 0.0  ;;  %5261 = vadd.xlane.f32.xlu0 %v10440_v19  ;;  %v10705_v18 = vadd.f32 %v5068_v13, %v4956_v48  ;;  %v5074_v37 = vrot.slane %v4957_v3, 4  ;;  %v11891_v19 = vrot.slane %v10482_v32, 2  ;;  %v4611_v13 = vpop.f32.mrf.mxu0 }
 0x459   : > { %v5166_v43 = vmul.f32 0.2, %v4989_v53  ;;  %v5167_v24 = vmul.f32 0.2, %v4995_v61  ;;  %v4714_v61 = vadd.f32 %v11892_v5, %v10500_v8  ;;  %v10725_v56 = vadd.f32 %v4783_v4, %v4666_v15 }
 0x45a   : > { %v4708_v53 = vadd.f32 %v11891_v19, %v10482_v32  ;;  %v11894_v5 = vrot.slane %v10484_v50, 2  ;;  %v10738_v15 = vadd.f32 %v4609_v7, %v10389_v6  ;;  %v10743_v32 = vadd.f32 %v4611_v13, %v10392_v35 }
 0x45b   : > { %v10711_v12 = vsel %vm4937_vm1, %v5166_v43, %v4907_v57  ;;  %v10721_v0 = vsel %vm4937_vm1, %v5167_v24, %v4908_v26  ;;  %v5263_v57 = vadd.f32 %v5231_v41, %v5230_v63  ;;  %v4715_v8 = vrot.slane %v4714_v61, 1 }
 0x45c   : > { %11890 = vst [vmem:[#allocation37_spill] sm:$0xff] %v10711_v12  ;;  %11893 = vst [vmem:[#allocation38_spill] sm:$0xff] %v10721_v0  ;;  %v5374_v48 = vmul.f32 %v10711_v12, %v10711_v12  ;;  %v5375_v43 = vmul.f32 %v10721_v0, %v10721_v0  ;;  %v4709_v21 = vrot.slane %v4708_v53, 1  ;;  %v4999_v24 = vadd.f32 %v11894_v5, %v10484_v50 }
 0x45d   : > { %v11895_v26 = vrot.slane %v10502_v59, 2  ;;  %11896 = vst [vmem:[#allocation39_spill] sm:$0xff] %v10738_v15  ;;  %v10740_v63 = vadd.f32 %v5074_v37, %v4957_v3  ;;  %11897 = vst [vmem:[#allocation40_spill] sm:$0xff] %v10743_v32  ;;  %v4716_v19 = vadd.f32 %v4715_v8, %v4714_v61  ;;  %v4667_v50 = vsel %vm4647_vm0, %v10738_v15, 0.0  ;;  %v4615_v8 = vpop.f32.mrf.mxu0 }
 0x45e   : > { %v5407_v41 = vadd.f32 %v5375_v43, %v5374_v48  ;;  %v4710_v54 = vadd.f32 %v4709_v21, %v4708_v53  ;;  %v5000_v12 = vrot.slane %v4999_v24, 1  ;;  %v4958_v7 = vsel %vm4937_vm1, %v10738_v15, 0.0 }
 0x45f   : > { %v5005_v4 = vadd.f32 %v11895_v26, %v10502_v59  ;;  %v4789_v59 = vrot.slane %v4667_v50, 4  ;;  %v4668_v21 = vsel %vm4647_vm0, %v10743_v32, 0.0  ;;  %v4878_v3 = vmul.f32 0.33333334, %v4716_v19 }
 0x460   : > { %5408 = vadd.xlane.f32.xlu1 %v5407_v41  ;;  %v4877_v5 = vmul.f32 0.33333334, %v4710_v54  ;;  %v5001_v37 = vadd.f32 %v5000_v12, %v4999_v24  ;;  %v5080_v61 = vrot.slane %v4958_v7, 4  ;;  %v4795_v43 = vrot.slane %v4668_v21, 4 }
 0x461   : > { %v5006_v0 = vrot.slane %v5005_v4, 1  ;;  %v10756_v13 = vadd.f32 %v4789_v59, %v4667_v50  ;;  %v4959_v54 = vsel %vm4937_vm1, %v10743_v32, 0.0  ;;  %v4910_v26 = vsel %vm4647_vm0, %v4878_v3, 0.0 }
 0x462   : > { %v4909_v48 = vsel %vm4647_vm0, %v4877_v5, 0.0  ;;  %v5168_v41 = vmul.f32 0.2, %v5001_v37  ;;  %v10763_v19 = vadd.f32 %v5080_v61, %v4958_v7  ;;  %v5232_v59 = vmul.f32 %v10447_v29, %v10447_v29 }
 0x463   : > { %v5007_v53 = vadd.f32 %v5006_v0, %v5005_v4  ;;  %v10768_v4 = vadd.f32 %v4795_v43, %v4668_v21  ;;  %v5233_v7 = vmul.f32 %v10450_v40, %v10450_v40  ;;  %v5086_v37 = vrot.slane %v4959_v54, 4 }
 0x464   : > { %5264 = vadd.xlane.f32.xlu1 %v5263_v57  ;;  %v10772_v50 = vsel %vm4937_vm1, %v5168_v41, %v4909_v48  ;;  %v11901_v43 = vrot.slane %v10516_v39, 2  ;;  %v11902_v41 = vrot.slane %v10514_v51, 2  ;;  %v11903_v3 = vrot.slane %v10518_v20, 2 }
 0x465   : > { %v5169_v15 = vmul.f32 0.2, %v5007_v53  ;;  %11898 = vst [vmem:[#allocation41_spill] sm:$0xff] %v10772_v50  ;;  %v5376_v57 = vmul.f32 %v10772_v50, %v10772_v50  ;;  %v4617_v53 = vpop.f32.mrf.mxu0  ;;  %v5266_v61 = vadd.f32 %v5233_v7, %v5232_v59  ;;  %v10801_v59 = vadd.f32 %v4615_v8, %v10389_v6 }
 0x466   : > { %v5011_v24 = vadd.f32 %v11902_v41, %v10514_v51  ;;  %v5017_v50 = vadd.f32 %v11903_v3, %v10518_v20 }
 0x467   : > { %v10776_v5 = vsel %vm4937_vm1, %v5169_v15, %v4910_v26  ;;  %v11900_v15 = vrot.slane %v10512_v25, 2  ;;  %v4726_v26 = vadd.f32 %v11901_v43, %v10516_v39  ;;  %v10804_v39 = vadd.f32 %v4617_v53, %v10392_v35  ;;  %v4619_v29 = vpop.f32.mrf.mxu0 }
 0x468   : > { %11899 = vst [vmem:[#allocation42_spill] sm:$0xff] %v10776_v5  ;;  %v5377_v21 = vmul.f32 %v10776_v5, %v10776_v5  ;;  %5267 = vadd.xlane.f32.xlu1 %v5266_v61  ;;  %v10806_v43 = vadd.f32 %v5086_v37, %v4959_v54  ;;  %v5018_v51 = vrot.slane %v5017_v50, 1  ;;  %v4960_v20 = vsel %vm4937_vm1, %v10801_v59, 0.0 }
 0x469   : > { %v4720_v48 = vadd.f32 %v11900_v15, %v10512_v25  ;;  %v4727_v7 = vrot.slane %v4726_v26, 1  ;;  %v5012_v15 = vrot.slane %v5011_v24, 1  ;;  %v5092_v12 = vrot.slane %v4960_v20, 4 }
 0x46a   : > { %v5410_v0 = vadd.f32 %v5377_v21, %v5376_v57  ;;  %v4669_v57 = vsel %vm4647_vm0, %v10801_v59, 0.0  ;;  %v5019_v41 = vadd.f32 %v5018_v51, %v5017_v50  ;;  %v4670_v54 = vsel %vm4647_vm0, %v10804_v39, 0.0 }
 0x46b   : > { %v4721_v25 = vrot.slane %v4720_v48, 1  ;;  %v4728_v21 = vadd.f32 %v4727_v7, %v4726_v26  ;;  %v5013_v3 = vadd.f32 %v5012_v15, %v5011_v24  ;;  %v4801_v61 = vrot.slane %v4669_v57, 4 }
 0x46c   : > { %5411 = vadd.xlane.f32.xlu0 %v5410_v0  ;;  %v4961_v0 = vsel %vm4937_vm1, %v10804_v39, 0.0  ;;  %v10822_v26 = vadd.f32 %v5092_v12, %v4960_v20  ;;  %v4807_v24 = vrot.slane %v4670_v54, 4  ;;  %v5234_v50 = vmul.f32 %v10477_v58, %v10477_v58 }
 0x46d   : > { %v4722_v8 = vadd.f32 %v4721_v25, %v4720_v48  ;;  %v4880_v53 = vmul.f32 0.33333334, %v4728_v21  ;;  %v5170_v5 = vmul.f32 0.2, %v5013_v3  ;;  %v10820_v40 = vadd.f32 %v4801_v61, %v4669_v57 }
 0x46e   : > { %v5171_v48 = vmul.f32 0.2, %v5019_v41  ;;  %v5098_v15 = vrot.slane %v4961_v0, 4  ;;  %v5235_v51 = vmul.f32 %v10480_v62, %v10480_v62  ;;  %v10846_v61 = vadd.f32 %v4807_v24, %v4670_v54 }
 0x46f   : > { %v4879_v37 = vmul.f32 0.33333334, %v4722_v8  ;;  %v4912_v7 = vsel %vm4647_vm0, %v4880_v53, 0.0  ;;  %v11908_v8 = vrot.slane %v10546_v49, 2  ;;  %v11909_v54 = vrot.slane %v10568_v55, 2 }
 0x470   : > { %v10839_v20 = vsel %vm4937_vm1, %v5171_v48, %v4912_v7  ;;  %v5269_v41 = vadd.f32 %v5235_v51, %v5234_v50  ;;  %v11907_v48 = vrot.slane %v10566_v36, 2  ;;  %v10864_v50 = vadd.f32 %v4619_v29, %v10389_v6 }
 0x471   : > { %v4911_v25 = vsel %vm4647_vm0, %v4879_v37, 0.0  ;;  %11905 = vst [vmem:[#allocation44_spill] sm:$0xff] %v10839_v20  ;;  %v5379_v3 = vmul.f32 %v10839_v20, %v10839_v20  ;;  %v4621_v37 = vpop.f32.mrf.mxu0  ;;  %v5023_v57 = vadd.f32 %v11908_v8, %v10546_v49  ;;  %v10858_v20 = vadd.f32 %v5098_v15, %v4961_v0 }
 0x472   : > { %v10835_v12 = vsel %vm4937_vm1, %v5170_v5, %v4911_v25  ;;  %v11906_v5 = vrot.slane %v10544_v30, 2  ;;  %v4738_v7 = vadd.f32 %v11907_v48, %v10566_v36  ;;  %5270 = vadd.xlane.f32.xlu1 %v5269_v41  ;;  %v5029_v24 = vadd.f32 %v11909_v54, %v10568_v55 }
 0x473   : > { %11904 = vst [vmem:[#allocation43_spill] sm:$0xff] %v10835_v12  ;;  %v5378_v21 = vmul.f32 %v10835_v12, %v10835_v12  ;;  %v10867_v36 = vadd.f32 %v4621_v37, %v10392_v35  ;;  %v4671_v0 = vsel %vm4647_vm0, %v10864_v50, 0.0  ;;  %v4962_v55 = vsel %vm4937_vm1, %v10864_v50, 0.0  ;;  %v4625_v58 = vpop.f32.mrf.mxu0 }
 0x474   : > { %v4732_v25 = vadd.f32 %v11906_v5, %v10544_v30  ;;  %v4739_v51 = vrot.slane %v4738_v7, 1  ;;  %v5024_v5 = vrot.slane %v5023_v57, 1  ;;  %v5030_v8 = vrot.slane %v5029_v24, 1 }
 0x475   : > { %v5413_v12 = vadd.f32 %v5379_v3, %v5378_v21  ;;  %v4813_v3 = vrot.slane %v4671_v0, 4  ;;  %v5104_v48 = vrot.slane %v4962_v55, 4  ;;  %v4963_v37 = vsel %vm4937_vm1, %v10867_v36, 0.0 }
 0x476   : > { %v4733_v30 = vrot.slane %v4732_v25, 1  ;;  %v4740_v15 = vadd.f32 %v4739_v51, %v4738_v7  ;;  %v5025_v21 = vadd.f32 %v5024_v5, %v5023_v57  ;;  %v5031_v41 = vadd.f32 %v5030_v8, %v5029_v24 }
 0x477   : > { %5414 = vadd.xlane.f32.xlu0 %v5413_v12  ;;  %v4672_v12 = vsel %vm4647_vm0, %v10867_v36, 0.0  ;;  %v10882_v62 = vadd.f32 %v4813_v3, %v4671_v0  ;;  %v10884_v7 = vadd.f32 %v5104_v48, %v4962_v55  ;;  %v5236_v24 = vmul.f32 %v10507_v14, %v10507_v14  ;;  %v4627_v48 = vpop.f32.mrf.mxu0 }
 0x478   : > { %v4734_v29 = vadd.f32 %v4733_v30, %v4732_v25  ;;  %v4882_v53 = vmul.f32 0.33333334, %v4740_v15  ;;  %v5172_v49 = vmul.f32 0.2, %v5025_v21  ;;  %v5173_v25 = vmul.f32 0.2, %v5031_v41 }
 0x479   : > { %v4819_v57 = vrot.slane %v4672_v12, 4  ;;  %v5110_v5 = vrot.slane %v4963_v37, 4  ;;  %v5237_v8 = vmul.f32 %v10510_v23, %v10510_v23  ;;  %v11914_v15 = vrot.slane %v10582_v42, 2  ;;  %v4629_v14 = vpop.f32.mrf.mxu0 }
 0x47a   : > { %v4881_v54 = vmul.f32 0.33333334, %v4734_v29  ;;  %v4914_v51 = vsel %vm4647_vm0, %v4882_v53, 0.0 }
 0x47b   : > { %v10901_v29 = vsel %vm4937_vm1, %v5173_v25, %v4914_v51  ;;  %v10908_v3 = vadd.f32 %v4819_v57, %v4672_v12  ;;  %v5272_v41 = vadd.f32 %v5237_v8, %v5236_v24  ;;  %v11913_v25 = vrot.slane %v10584_v46, 2 }
 0x47c   : > { %v4913_v30 = vsel %vm4647_vm0, %v4881_v54, 0.0  ;;  %11911 = vst [vmem:[#allocation46_spill] sm:$0xff] %v10901_v29  ;;  %v5381_v53 = vmul.f32 %v10901_v29, %v10901_v29  ;;  %v5035_v0 = vadd.f32 %v11914_v15, %v10582_v42  ;;  %v10920_v29 = vadd.f32 %v5110_v5, %v4963_v37 }
 0x47d   : > { %v10897_v55 = vsel %vm4937_vm1, %v5172_v49, %v4913_v30  ;;  %v11912_v49 = vrot.slane %v10580_v2, 2  ;;  %v4750_v51 = vadd.f32 %v11913_v25, %v10584_v46  ;;  %5273 = vadd.xlane.f32.xlu1 %v5272_v41  ;;  %v11915_v12 = vrot.slane %v10586_v11, 2 }
 0x47e   : > { %11910 = vst [vmem:[#allocation45_spill] sm:$0xff] %v10897_v55  ;;  %v5380_v21 = vmul.f32 %v10897_v55, %v10897_v55  ;;  %v10926_v24 = vadd.f32 %v4625_v58, %v10389_v6  ;;  %v10929_v46 = vadd.f32 %v4627_v48, %v10392_v35 }
 0x47f   : > { %v4744_v30 = vadd.f32 %v11912_v49, %v10580_v2  ;;  %v5041_v57 = vadd.f32 %v11915_v12, %v10586_v11  ;;  %v4751_v8 = vrot.slane %v4750_v51, 1  ;;  %v5036_v49 = vrot.slane %v5035_v0, 1 }
 0x480   : > { %v5416_v55 = vadd.f32 %v5381_v53, %v5380_v21  ;;  %v4673_v37 = vsel %vm4647_vm0, %v10926_v24, 0.0  ;;  %v4964_v11 = vsel %vm4937_vm1, %v10926_v24, 0.0  ;;  %v4965_v48 = vsel %vm4937_vm1, %v10929_v46, 0.0 }
 0x481   : > { %v4745_v2 = vrot.slane %v4744_v30, 1  ;;  %v5042_v15 = vrot.slane %v5041_v57, 1  ;;  %v4752_v5 = vadd.f32 %v4751_v8, %v4750_v51  ;;  %v5037_v21 = vadd.f32 %v5036_v49, %v5035_v0 }
 0x482   : > { %5417 = vadd.xlane.f32.xlu0 %v5416_v55  ;;  %v4825_v53 = vrot.slane %v4673_v37, 4  ;;  %v5116_v25 = vrot.slane %v4964_v11, 4  ;;  %v4674_v55 = vsel %vm4647_vm0, %v10929_v46, 0.0  ;;  %v5122_v49 = vrot.slane %v4965_v48, 4 }
 0x483   : > { %v4746_v58 = vadd.f32 %v4745_v2, %v4744_v30  ;;  %v5043_v41 = vadd.f32 %v5042_v15, %v5041_v57  ;;  %v4884_v54 = vmul.f32 0.33333334, %v4752_v5  ;;  %v5174_v42 = vmul.f32 0.2, %v5037_v21 }
 0x484   : > { %v10944_v23 = vadd.f32 %v4825_v53, %v4673_v37  ;;  %v10946_v51 = vadd.f32 %v5116_v25, %v4964_v11  ;;  %v4831_v0 = vrot.slane %v4674_v55, 4  ;;  %v5238_v57 = vmul.f32 %v10539_v52, %v10539_v52  ;;  %v4631_v25 = vpop.f32.mrf.mxu0 }
 0x485   : > { %v4883_v12 = vmul.f32 0.33333334, %v4746_v58  ;;  %v5175_v30 = vmul.f32 0.2, %v5043_v41  ;;  %v4916_v8 = vsel %vm4647_vm0, %v4884_v54, 0.0  ;;  %v5239_v15 = vmul.f32 %v10542_v45, %v10542_v45 }
 0x486   : > { %v10970_v53 = vadd.f32 %v4831_v0, %v4674_v55  ;;  %v11920_v5 = vrot.slane %v10600_v38, 2  ;;  %v11921_v55 = vrot.slane %v10616_v10, 2  ;;  %v4635_v45 = vpop.f32.mrf.mxu0 }
 0x487   : > { %v4915_v2 = vsel %vm4647_vm0, %v4883_v12, 0.0  ;;  %v10963_v58 = vsel %vm4937_vm1, %v5175_v30, %v4916_v8  ;;  %v5275_v41 = vadd.f32 %v5239_v15, %v5238_v57  ;;  %v11919_v30 = vrot.slane %v10613_v60, 2 }
 0x488   : > { %v10959_v11 = vsel %vm4937_vm1, %v5174_v42, %v4915_v2  ;;  %11917 = vst [vmem:[#allocation48_spill] sm:$0xff] %v10963_v58  ;;  %v5383_v54 = vmul.f32 %v10963_v58, %v10963_v58  ;;  %v11918_v42 = vrot.slane %v10598_v28, 2  ;;  %v5047_v37 = vadd.f32 %v11920_v5, %v10600_v38 }
 0x489   : > { %11916 = vst [vmem:[#allocation47_spill] sm:$0xff] %v10959_v11  ;;  %v5382_v21 = vmul.f32 %v10959_v11, %v10959_v11  ;;  %v4762_v8 = vadd.f32 %v11919_v30, %v10613_v60  ;;  %v10982_v58 = vadd.f32 %v5122_v49, %v4965_v48  ;;  %5276 = vadd.xlane.f32.xlu1 %v5275_v41 }
 0x48a   : > { %v4756_v2 = vadd.f32 %v11918_v42, %v10598_v28  ;;  %v5053_v0 = vadd.f32 %v11921_v55, %v10616_v10  ;;  %v10988_v57 = vadd.f32 %v4629_v14, %v10389_v6  ;;  %v5048_v42 = vrot.slane %v5047_v37, 1 }
 0x48b   : > { %v5419_v11 = vadd.f32 %v5383_v54, %v5382_v21  ;;  %v4763_v15 = vrot.slane %v4762_v8, 1  ;;  %v10991_v60 = vadd.f32 %v4631_v25, %v10392_v35 }
 0x48c   : > { %v4757_v28 = vrot.slane %v4756_v2, 1  ;;  %v5054_v5 = vrot.slane %v5053_v0, 1  ;;  %v4675_v48 = vsel %vm4647_vm0, %v10988_v57, 0.0  ;;  %v4966_v10 = vsel %vm4937_vm1, %v10988_v57, 0.0 }
 0x48d   : > { %5420 = vadd.xlane.f32.xlu0 %v5419_v11  ;;  %v4764_v49 = vadd.f32 %v4763_v15, %v4762_v8  ;;  %v5049_v21 = vadd.f32 %v5048_v42, %v5047_v37  ;;  %v4837_v54 = vrot.slane %v4675_v48, 4  ;;  %v5128_v30 = vrot.slane %v4966_v10, 4 }
 0x48e   : > { %v4758_v14 = vadd.f32 %v4757_v28, %v4756_v2  ;;  %v5055_v41 = vadd.f32 %v5054_v5, %v5053_v0  ;;  %v4676_v11 = vsel %vm4647_vm0, %v10991_v60, 0.0  ;;  %v4967_v25 = vsel %vm4937_vm1, %v10991_v60, 0.0 }
 0x48f   : > { %v4886_v12 = vmul.f32 0.33333334, %v4764_v49  ;;  %v5176_v38 = vmul.f32 0.2, %v5049_v21  ;;  %v11006_v52 = vadd.f32 %v4837_v54, %v4675_v48  ;;  %v11008_v8 = vadd.f32 %v5128_v30, %v4966_v10  ;;  %v4637_v30 = vpop.f32.mrf.mxu0 }
 0x490   : > { %v4885_v55 = vmul.f32 0.33333334, %v4758_v14  ;;  %v5177_v2 = vmul.f32 0.2, %v5055_v41  ;;  %v4843_v37 = vrot.slane %v4676_v11, 4  ;;  %v5240_v0 = vmul.f32 %v10549_v1, %v10549_v1 }
 0x491   : > { %v4918_v15 = vsel %vm4647_vm0, %v4886_v12, 0.0  ;;  %v5134_v42 = vrot.slane %v4967_v25, 4  ;;  %v5241_v5 = vmul.f32 %v10577_v17, %v10577_v17  ;;  %v11926_v49 = vrot.slane %v10660_v9, 2  ;;  %v4639_v17 = vpop.f32.mrf.mxu0 }
 0x492   : > { %v4917_v28 = vsel %vm4647_vm0, %v4885_v55, 0.0  ;;  %v11025_v14 = vsel %vm4937_vm1, %v5177_v2, %v4918_v15  ;;  %v11032_v54 = vadd.f32 %v4843_v37, %v4676_v11  ;;  %v11925_v2 = vrot.slane %v10662_v22, 2 }
 0x493   : > { %v11021_v10 = vsel %vm4937_vm1, %v5176_v38, %v4917_v28  ;;  %11923 = vst [vmem:[#allocation50_spill] sm:$0xff] %v11025_v14  ;;  %v5385_v12 = vmul.f32 %v11025_v14, %v11025_v14  ;;  %v5278_v41 = vadd.f32 %v5241_v5, %v5240_v0  ;;  %v11924_v38 = vrot.slane %v10651_v27, 2 }
 0x494   : > { %11922 = vst [vmem:[#allocation49_spill] sm:$0xff] %v11021_v10  ;;  %v5384_v21 = vmul.f32 %v11021_v10, %v11021_v10  ;;  %v4774_v15 = vadd.f32 %v11925_v2, %v10662_v22  ;;  %v5059_v48 = vadd.f32 %v11926_v49, %v10660_v9  ;;  %v11044_v14 = vadd.f32 %v5134_v42, %v4967_v25 }
 0x495   : > { %v4768_v28 = vadd.f32 %v11924_v38, %v10651_v27  ;;  %5279 = vadd.xlane.f32.xlu1 %v5278_v41  ;;  %v11927_v11 = vrot.slane %v10665_v31, 2  ;;  %v11050_v0 = vadd.f32 %v4635_v45, %v10389_v6  ;;  %v11053_v22 = vadd.f32 %v4637_v30, %v10392_v35 }
 0x496   : > { %v5422_v10 = vadd.f32 %v5385_v12, %v5384_v21  ;;  %v4775_v5 = vrot.slane %v4774_v15, 1  ;;  %v5060_v38 = vrot.slane %v5059_v48, 1 }
 0x497   : > { %v5065_v37 = vadd.f32 %v11927_v11, %v10665_v31  ;;  %v4769_v27 = vrot.slane %v4768_v28, 1  ;;  %v4677_v25 = vsel %vm4647_vm0, %v11050_v0, 0.0  ;;  %v4968_v31 = vsel %vm4937_vm1, %v11050_v0, 0.0 }
 0x498   : > { %5423 = vadd.xlane.f32.xlu0 %v5422_v10  ;;  %v4776_v42 = vadd.f32 %v4775_v5, %v4774_v15  ;;  %v5061_v21 = vadd.f32 %v5060_v38, %v5059_v48  ;;  %v4849_v12 = vrot.slane %v4677_v25, 4  ;;  %v5140_v2 = vrot.slane %v4968_v31, 4 }
 0x499   : > { %v5066_v49 = vrot.slane %v5065_v37, 1  ;;  %v4770_v45 = vadd.f32 %v4769_v27, %v4768_v28  ;;  %v4678_v10 = vsel %vm4647_vm0, %v11053_v22, 0.0  ;;  %v4969_v30 = vsel %vm4937_vm1, %v11053_v22, 0.0 }
 0x49a   : > { %v4888_v55 = vmul.f32 0.33333334, %v4776_v42  ;;  %v5178_v9 = vmul.f32 0.2, %v5061_v21  ;;  %v11068_v1 = vadd.f32 %v4849_v12, %v4677_v25  ;;  %v11070_v15 = vadd.f32 %v5140_v2, %v4968_v31 }
 0x49b   : > { %v5067_v41 = vadd.f32 %v5066_v49, %v5065_v37  ;;  %v4887_v11 = vmul.f32 0.33333334, %v4770_v45  ;;  %v4855_v48 = vrot.slane %v4678_v10, 4  ;;  %v5242_v37 = vmul.f32 %v10621_v44, %v10621_v44  ;;  %v11928_v49 = vld [vmem:[#allocation29_spill] sm:$0xff] }
 0x49c   : > { %v4920_v5 = vsel %vm4647_vm0, %v4888_v55, 0.0  ;;  %v5146_v38 = vrot.slane %v4969_v30, 4  ;;  %v5243_v45 = vmul.f32 %v11928_v49, %v11928_v49  ;;  %v11933_v21 = vrot.slane %v10705_v18, 2 }
 0x49d   : > { %v5179_v28 = vmul.f32 0.2, %v5067_v41  ;;  %v4919_v27 = vsel %vm4647_vm0, %v4887_v11, 0.0  ;;  %v4641_v11 = vpop.f32.mrf.mxu0  ;;  %v11095_v25 = vadd.f32 %v4855_v48, %v4678_v10  ;;  %v11934_v10 = vrot.slane %v10740_v63, 2 }
 0x49e   : > { %v11083_v31 = vsel %vm4937_vm1, %v5178_v9, %v4919_v27  ;;  %v5281_v2 = vadd.f32 %v5243_v45, %v5242_v37  ;;  %v11931_v9 = vrot.slane %v10703_v16, 2  ;;  %v11112_v37 = vadd.f32 %v4639_v17, %v10389_v6 }
 0x49f   : > { %11929 = vst [vmem:[#allocation51_spill] sm:$0xff] %v11083_v31  ;;  %v11087_v42 = vsel %vm4937_vm1, %v5179_v28, %v4920_v5  ;;  %v5386_v12 = vmul.f32 %v11083_v31, %v11083_v31  ;;  %v11932_v28 = vrot.slane %v10725_v56, 2  ;;  %v5071_v31 = vadd.f32 %v11933_v21, %v10705_v18 }
 0x4a0   : > { %11930 = vst [vmem:[#allocation52_spill] sm:$0xff] %v11087_v42  ;;  %v5387_v55 = vmul.f32 %v11087_v42, %v11087_v42  ;;  %v4780_v27 = vadd.f32 %v11931_v9, %v10703_v16  ;;  %v11106_v42 = vadd.f32 %v5146_v38, %v4969_v30  ;;  %5282 = vadd.xlane.f32.xlu1 %v5281_v2  ;;  %v4679_v18 = vsel %vm4647_vm0, %v11112_v37, 0.0 }
 0x4a1   : > { %v4786_v5 = vadd.f32 %v11932_v28, %v10725_v56  ;;  %v5077_v48 = vadd.f32 %v11934_v10, %v10740_v63  ;;  %v5072_v9 = vrot.slane %v5071_v31, 1  ;;  %v11115_v56 = vadd.f32 %v4641_v11, %v10392_v35 }
 0x4a2   : > { %v5425_v44 = vadd.f32 %v5387_v55, %v5386_v12  ;;  %v4781_v16 = vrot.slane %v4780_v27, 1  ;;  %v4970_v30 = vsel %vm4937_vm1, %v11112_v37, 0.0  ;;  %v11935_v6 = vrot.slane %v10756_v13, 2 }
 0x4a3   : > { %v4787_v45 = vrot.slane %v4786_v5, 1  ;;  %v5078_v28 = vrot.slane %v5077_v48, 1  ;;  %v5073_v21 = vadd.f32 %v5072_v9, %v5071_v31  ;;  %v4861_v12 = vrot.slane %v4679_v18, 4 }
 0x4a4   : > { %5426 = vadd.xlane.f32.xlu0 %v5425_v44  ;;  %v4792_v17 = vadd.f32 %v11935_v6, %v10756_v13  ;;  %v4782_v63 = vadd.f32 %v4781_v16, %v4780_v27  ;;  %v5152_v55 = vrot.slane %v4970_v30, 4  ;;  %v4680_v44 = vsel %vm4647_vm0, %v11115_v56, 0.0 }
 0x4a5   : > { %v4788_v38 = vadd.f32 %v4787_v45, %v4786_v5  ;;  %v5079_v35 = vadd.f32 %v5078_v28, %v5077_v48  ;;  %v4971_v2 = vsel %vm4937_vm1, %v11115_v56, 0.0  ;;  %v5180_v41 = vmul.f32 0.2, %v5073_v21 }
 0x4a6   : > { %v4889_v11 = vmul.f32 0.33333334, %v4782_v63  ;;  %v11132_v49 = vadd.f32 %v4861_v12, %v4679_v18  ;;  %v4867_v31 = vrot.slane %v4680_v44, 4  ;;  %v5158_v5 = vrot.slane %v4971_v2, 4 }
 0x4a7   : > { %v4890_v10 = vmul.f32 0.33333334, %v4788_v38  ;;  %v5181_v27 = vmul.f32 0.2, %v5079_v35  ;;  %v4793_v9 = vrot.slane %v4792_v17, 1  ;;  %v11148_v6 = vadd.f32 %v5152_v55, %v4970_v30 }
 0x4a8   : > { %v4921_v16 = vsel %vm4647_vm0, %v4889_v11, 0.0  ;;  %v11150_v63 = vadd.f32 %v4867_v31, %v4680_v44  ;;  %v11157_v11 = vadd.f32 %v5158_v5, %v4971_v2  ;;  %v11938_v30 = vrot.slane %v10763_v19, 2 }
 0x4a9   : > { %v4922_v45 = vsel %vm4647_vm0, %v4890_v10, 0.0  ;;  %v11142_v28 = vsel %vm4937_vm1, %v5180_v41, %v4921_v16  ;;  %v4794_v35 = vadd.f32 %v4793_v9, %v4792_v17  ;;  %v11937_v41 = vrot.slane %v10768_v4, 2 }
 0x4aa   : > { %11936 = vst [vmem:[#allocation53_spill] sm:$0xff] %v11142_v28  ;;  %v11146_v18 = vsel %vm4937_vm1, %v5181_v27, %v4922_v45  ;;  %v5388_v38 = vmul.f32 %v11142_v28, %v11142_v28  ;;  %v5083_v55 = vadd.f32 %v11938_v30, %v10763_v19  ;;  %v11939_v44 = vrot.slane %v10806_v43, 2 }
 0x4ab   : > { %v5389_v21 = vmul.f32 %v11146_v18, %v11146_v18  ;;  %v4798_v10 = vadd.f32 %v11937_v41, %v10768_v4  ;;  %v4891_v45 = vmul.f32 0.33333334, %v4794_v35  ;;  %v5244_v17 = vmul.f32 %v10678_v47, %v10678_v47  ;;  %v11940_v41 = vld [vmem:[#allocation39_spill] sm:$0xff] }
 0x4ac   : > { %v5089_v27 = vadd.f32 %v11939_v44, %v10806_v43  ;;  %v5084_v5 = vrot.slane %v5083_v55, 1  ;;  %v5245_v4 = vmul.f32 %v10681_v33, %v10681_v33  ;;  %v5246_v43 = vmul.f32 %v11940_v41, %v11940_v41 }
 0x4ad   : > { %v5428_v31 = vadd.f32 %v5389_v21, %v5388_v38  ;;  %v4799_v2 = vrot.slane %v4798_v10, 1  ;;  %v4923_v19 = vsel %vm4647_vm0, %v4891_v45, 0.0  ;;  %v5247_v38 = vmul.f32 %v10743_v32, %v10743_v32 }
 0x4ae   : > { %v5090_v9 = vrot.slane %v5089_v27, 1  ;;  %v11941_v21 = vrot.slane %v10820_v40, 2  ;;  %v5085_v44 = vadd.f32 %v5084_v5, %v5083_v55  ;;  %v5284_v12 = vadd.f32 %v5245_v4, %v5244_v17 }
 0x4af   : > { %5429 = vadd.xlane.f32.xlu0 %v5428_v31  ;;  %v4800_v30 = vadd.f32 %v4799_v2, %v4798_v10  ;;  %v5287_v48 = vadd.f32 %v5247_v38, %v5246_v43  ;;  %v11942_v31 = vrot.slane %v10846_v61, 2  ;;  %v11943_v41 = vrot.slane %v10822_v26, 2 }
 0x4b0   : > { %v4804_v35 = vadd.f32 %v11941_v21, %v10820_v40  ;;  %v5091_v16 = vadd.f32 %v5090_v9, %v5089_v27  ;;  %v5182_v32 = vmul.f32 0.2, %v5085_v44  ;;  %v11944_v40 = vrot.slane %v10858_v20, 2 }
 0x4b1   : > { %v4810_v45 = vadd.f32 %v11942_v31, %v10846_v61  ;;  %v5095_v47 = vadd.f32 %v11943_v41, %v10822_v26  ;;  %v4892_v33 = vmul.f32 0.33333334, %v4800_v30  ;;  %v11945_v2 = vrot.slane %v10882_v62, 2 }
 0x4b2   : > { %v4805_v13 = vrot.slane %v4804_v35, 1  ;;  %v5183_v28 = vmul.f32 0.2, %v5091_v16  ;;  %v5101_v10 = vadd.f32 %v11944_v40, %v10858_v20  ;;  %v11198_v26 = vsel %vm4937_vm1, %v5182_v32, %v4923_v19 }
 0x4b3   : > { %5285 = vadd.xlane.f32.xlu0 %v5284_v12  ;;  %v4811_v27 = vrot.slane %v4810_v45, 1  ;;  %v5096_v17 = vrot.slane %v5095_v47, 1  ;;  %v4816_v5 = vadd.f32 %v11945_v2, %v10882_v62  ;;  %v4924_v61 = vsel %vm4647_vm0, %v4892_v33, 0.0 }
 0x4b4   : > { %v4806_v55 = vadd.f32 %v4805_v13, %v4804_v35  ;;  %v5102_v16 = vrot.slane %v5101_v10, 1  ;;  %v11946_v9 = vrot.slane %v10908_v3, 2  ;;  %v11205_v13 = vsel %vm4937_vm1, %v5183_v28, %v4924_v61 }
 0x4b5   : > { %v5390_v12 = vmul.f32 %v11198_v26, %v11198_v26  ;;  %v4812_v62 = vadd.f32 %v4811_v27, %v4810_v45  ;;  %v5391_v33 = vmul.f32 %v11205_v13, %v11205_v13  ;;  %v5097_v41 = vadd.f32 %v5096_v17, %v5095_v47 }
 0x4b6   : > { %v4822_v20 = vadd.f32 %v11946_v9, %v10908_v3  ;;  %v4893_v4 = vmul.f32 0.33333334, %v4806_v55  ;;  %v5103_v32 = vadd.f32 %v5102_v16, %v5101_v10  ;;  %v4817_v19 = vrot.slane %v4816_v5, 1 }
 0x4b7   : > { %v4894_v43 = vmul.f32 0.33333334, %v4812_v62  ;;  %v11947_v28 = vrot.slane %v10884_v7, 2  ;;  %v5431_v35 = vadd.f32 %v5391_v33, %v5390_v12  ;;  %v5184_v30 = vmul.f32 0.2, %v5097_v41 }
 0x4b8   : > { %v4925_v38 = vsel %vm4647_vm0, %v4893_v4, 0.0  ;;  %v4823_v3 = vrot.slane %v4822_v20, 1  ;;  %v5185_v44 = vmul.f32 0.2, %v5103_v32  ;;  %v4818_v31 = vadd.f32 %v4817_v19, %v4816_v5 }
 0x4b9   : > { %v5107_v21 = vadd.f32 %v11947_v28, %v10884_v7  ;;  %v4926_v45 = vsel %vm4647_vm0, %v4894_v43, 0.0  ;;  %v11948_v10 = vrot.slane %v10920_v29, 2  ;;  %5432 = vadd.xlane.f32.xlu1 %v5431_v35  ;;  %v11223_v27 = vsel %vm4937_vm1, %v5184_v30, %v4925_v38 }
 0x4ba   : > { %v4824_v40 = vadd.f32 %v4823_v3, %v4822_v20  ;;  %v11227_v7 = vsel %vm4937_vm1, %v5185_v44, %v4926_v45  ;;  %v4895_v17 = vmul.f32 0.33333334, %v4818_v31  ;;  %v5248_v2 = vmul.f32 %v10801_v59, %v10801_v59 }
 0x4bb   : > { %v5108_v47 = vrot.slane %v5107_v21, 1  ;;  %v5113_v55 = vadd.f32 %v11948_v10, %v10920_v29  ;;  %v5392_v5 = vmul.f32 %v11223_v27, %v11223_v27  ;;  %v5393_v61 = vmul.f32 %v11227_v7, %v11227_v7 }
 0x4bc   : > { %v4896_v29 = vmul.f32 0.33333334, %v4824_v40  ;;  %v4927_v9 = vsel %vm4647_vm0, %v4895_v17, 0.0  ;;  %v5249_v12 = vmul.f32 %v10804_v39, %v10804_v39  ;;  %v5250_v62 = vmul.f32 %v10864_v50, %v10864_v50 }
 0x4bd   : > { %v5109_v16 = vadd.f32 %v5108_v47, %v5107_v21  ;;  %v5114_v20 = vrot.slane %v5113_v55, 1  ;;  %v5434_v4 = vadd.f32 %v5393_v61, %v5392_v5  ;;  %v5251_v32 = vmul.f32 %v10867_v36, %v10867_v36  ;;  %5288 = vadd.xlane.f32.xlu1 %v5287_v48 }
 0x4be   : > { %v4928_v33 = vsel %vm4647_vm0, %v4896_v29, 0.0  ;;  %v5290_v43 = vadd.f32 %v5249_v12, %v5248_v2  ;;  %v11949_v38 = vrot.slane %v10944_v23, 2  ;;  %v11950_v28 = vrot.slane %v10970_v53, 2 }
 0x4bf   : > { %v5186_v41 = vmul.f32 0.2, %v5109_v16  ;;  %v5115_v19 = vadd.f32 %v5114_v20, %v5113_v55  ;;  %5435 = vadd.xlane.f32.xlu0 %v5434_v4  ;;  %v5293_v30 = vadd.f32 %v5251_v32, %v5250_v62  ;;  %v11951_v44 = vrot.slane %v10946_v51, 2 }
 0x4c0   : > { %v4828_v3 = vadd.f32 %v11949_v38, %v10944_v23  ;;  %v4834_v21 = vadd.f32 %v11950_v28, %v10970_v53  ;;  %v11952_v31 = vrot.slane %v10982_v58, 2  ;;  %v11953_v17 = vrot.slane %v11006_v52, 2 }
 0x4c1   : > { %v11253_v35 = vsel %vm4937_vm1, %v5186_v41, %v4927_v9  ;;  %v5119_v48 = vadd.f32 %v11951_v44, %v10946_v51  ;;  %v5187_v40 = vmul.f32 0.2, %v5115_v19  ;;  %v11954_v5 = vrot.slane %v11032_v54, 2 }
 0x4c2   : > { %v5125_v45 = vadd.f32 %v11952_v31, %v10982_v58  ;;  %v5394_v23 = vmul.f32 %v11253_v35, %v11253_v35  ;;  %v4829_v47 = vrot.slane %v4828_v3, 1  ;;  %v4835_v53 = vrot.slane %v4834_v21, 1 }
 0x4c3   : > { %v5120_v10 = vrot.slane %v5119_v48, 1  ;;  %v4840_v2 = vadd.f32 %v11953_v17, %v11006_v52  ;;  %v4846_v51 = vadd.f32 %v11954_v5, %v11032_v54  ;;  %v11271_v61 = vsel %vm4937_vm1, %v5187_v40, %v4928_v33  ;;  %5291 = vadd.xlane.f32.xlu0 %v5290_v43 }
 0x4c4   : > { %v5126_v55 = vrot.slane %v5125_v45, 1  ;;  %v4830_v58 = vadd.f32 %v4829_v47, %v4828_v3  ;;  %v4836_v29 = vadd.f32 %v4835_v53, %v4834_v21  ;;  %v11955_v16 = vrot.slane %v11008_v8, 2 }
 0x4c5   : > { %v5395_v20 = vmul.f32 %v11271_v61, %v11271_v61  ;;  %v5121_v12 = vadd.f32 %v5120_v10, %v5119_v48  ;;  %v4841_v62 = vrot.slane %v4840_v2, 1  ;;  %v4847_v54 = vrot.slane %v4846_v51, 1 }
 0x4c6   : > { %v5131_v9 = vadd.f32 %v11955_v16, %v11008_v8  ;;  %v5127_v52 = vadd.f32 %v5126_v55, %v5125_v45  ;;  %v4897_v4 = vmul.f32 0.33333334, %v4830_v58  ;;  %v4898_v41 = vmul.f32 0.33333334, %v4836_v29 }
 0x4c7   : > { %v5437_v19 = vadd.f32 %v5395_v20, %v5394_v23  ;;  %v5188_v33 = vmul.f32 0.2, %v5121_v12  ;;  %v4842_v3 = vadd.f32 %v4841_v62, %v4840_v2  ;;  %v4848_v21 = vadd.f32 %v4847_v54, %v4846_v51 }
 0x4c8   : > { %v5132_v32 = vrot.slane %v5131_v9, 1  ;;  %v5189_v38 = vmul.f32 0.2, %v5127_v52  ;;  %v4929_v28 = vsel %vm4647_vm0, %v4897_v4, 0.0  ;;  %v4930_v8 = vsel %vm4647_vm0, %v4898_v41, 0.0 }
 0x4c9   : > { %5438 = vadd.xlane.f32.xlu1 %v5437_v19  ;;  %v11284_v43 = vsel %vm4937_vm1, %v5188_v33, %v4929_v28  ;;  %v4899_v31 = vmul.f32 0.33333334, %v4842_v3  ;;  %v11956_v45 = vrot.slane %v11044_v14, 2  ;;  %v4900_v53 = vmul.f32 0.33333334, %v4848_v21 }
 0x4ca   : > { %v5133_v44 = vadd.f32 %v5132_v32, %v5131_v9  ;;  %v11288_v48 = vsel %vm4937_vm1, %v5189_v38, %v4930_v8  ;;  %v5396_v23 = vmul.f32 %v11284_v43, %v11284_v43  ;;  %v5252_v2 = vmul.f32 %v10926_v24, %v10926_v24 }
 0x4cb   : > { %v5137_v40 = vadd.f32 %v11956_v45, %v11044_v14  ;;  %v5397_v47 = vmul.f32 %v11288_v48, %v11288_v48  ;;  %v4931_v55 = vsel %vm4647_vm0, %v4899_v31, 0.0  ;;  %v5253_v5 = vmul.f32 %v10929_v46, %v10929_v46 }
 0x4cc   : > { %v5190_v10 = vmul.f32 0.2, %v5133_v44  ;;  %v5154_v14 = vrot.slane %v11148_v6, 2  ;;  %v5160_v51 = vrot.slane %v11157_v11, 2  ;;  %v4932_v16 = vsel %vm4647_vm0, %v4900_v53, 0.0 }
 0x4cd   : > { %v5138_v17 = vrot.slane %v5137_v40, 1  ;;  %v5440_v58 = vadd.f32 %v5397_v47, %v5396_v23  ;;  %5294 = vadd.xlane.f32.xlu1 %v5293_v30  ;;  %v5296_v12 = vadd.f32 %v5253_v5, %v5252_v2  ;;  %v11957_v52 = vrot.slane %v11068_v1, 2 }
 0x4ce   : > { %v11307_v29 = vsel %vm4937_vm1, %v5190_v10, %v4931_v55  ;;  %v11958_v4 = vrot.slane %v11095_v25, 2  ;;  %v11959_v30 = vrot.slane %v11070_v15, 2  ;;  %v11960_v32 = vrot.slane %v11106_v42, 2 }
 0x4cf   : > { %v5139_v9 = vadd.f32 %v5138_v17, %v5137_v40  ;;  %v5398_v20 = vmul.f32 %v11307_v29, %v11307_v29  ;;  %5441 = vadd.xlane.f32.xlu0 %v5440_v58  ;;  %v4852_v62 = vadd.f32 %v11957_v52, %v11068_v1  ;;  %v5255_v38 = vmul.f32 %v10991_v60, %v10991_v60 }
 0x4d0   : > { %v4858_v41 = vadd.f32 %v11958_v4, %v11095_v25  ;;  %v5143_v54 = vadd.f32 %v11959_v30, %v11070_v15  ;;  %v5149_v19 = vadd.f32 %v11960_v32, %v11106_v42  ;;  %v11961_v3 = vrot.slane %v11132_v49, 2 }
 0x4d1   : > { %v5191_v33 = vmul.f32 0.2, %v5139_v9  ;;  %v11962_v28 = vrot.slane %v11150_v63, 2  ;;  %v4853_v8 = vrot.slane %v4852_v62, 1  ;;  %v5155_v40 = vadd.f32 %v5154_v14, %v11148_v6 }
 0x4d2   : > { %v4864_v1 = vadd.f32 %v11961_v3, %v11132_v49  ;;  %v4859_v21 = vrot.slane %v4858_v41, 1  ;;  %v5144_v44 = vrot.slane %v5143_v54, 1  ;;  %v5150_v15 = vrot.slane %v5149_v19, 1 }
 0x4d3   : > { %v4870_v25 = vadd.f32 %v11962_v28, %v11150_v63  ;;  %v11335_v31 = vsel %vm4937_vm1, %v5191_v33, %v4932_v16  ;;  %5297 = vadd.xlane.f32.xlu0 %v5296_v12  ;;  %v4854_v49 = vadd.f32 %v4853_v8, %v4852_v62  ;;  %v5156_v17 = vrot.slane %v5155_v40, 1 }
 0x4d4   : > { %v4865_v42 = vrot.slane %v4864_v1, 1  ;;  %v5399_v23 = vmul.f32 %v11335_v31, %v11335_v31  ;;  %v4860_v47 = vadd.f32 %v4859_v21, %v4858_v41  ;;  %v5145_v53 = vadd.f32 %v5144_v44, %v5143_v54 }
 0x4d5   : > { %v4871_v45 = vrot.slane %v4870_v25, 1  ;;  %v5151_v63 = vadd.f32 %v5150_v15, %v5149_v19  ;;  %v4901_v5 = vmul.f32 0.33333334, %v4854_v49  ;;  %v5254_v9 = vmul.f32 %v10988_v57, %v10988_v57 }
 0x4d6   : > { %v4866_v10 = vadd.f32 %v4865_v42, %v4864_v1  ;;  %v5443_v2 = vadd.f32 %v5399_v23, %v5398_v20  ;;  %v4902_v58 = vmul.f32 0.33333334, %v4860_v47  ;;  %v5192_v16 = vmul.f32 0.2, %v5145_v53 }
 0x4d7   : > { %v4872_v55 = vadd.f32 %v4871_v45, %v4870_v25  ;;  %v5193_v52 = vmul.f32 0.2, %v5151_v63  ;;  %v5157_v14 = vadd.f32 %v5156_v17, %v5155_v40  ;;  %v4933_v12 = vsel %vm4647_vm0, %v4901_v5, 0.0 }
 0x4d8   : > { %v4903_v6 = vmul.f32 0.33333334, %v4866_v10  ;;  %5444 = vadd.xlane.f32.xlu1 %v5443_v2  ;;  %v4934_v62 = vsel %vm4647_vm0, %v4902_v58, 0.0  ;;  %v5161_v4 = vadd.f32 %v5160_v51, %v11157_v11  ;;  %v5299_v41 = vadd.f32 %v5255_v38, %v5254_v9  ;;  %v11963_v9 = vld [vmem:[#allocation24_spill] sm:$0xff] }
 0x4d9   : > { %v11349_v20 = vsel %vm4937_vm1, %v5192_v16, %v4933_v12  ;;  %v11353_v30 = vsel %vm4937_vm1, %v5193_v52, %v4934_v62  ;;  %v4904_v54 = vmul.f32 0.33333334, %v4872_v55  ;;  %v5194_v3 = vmul.f32 0.2, %v5157_v14 }
 0x4da   : > { %v5400_v32 = vmul.f32 %v11349_v20, %v11349_v20  ;;  %v5401_v19 = vmul.f32 %v11353_v30, %v11353_v30  ;;  %v5162_v33 = vrot.slane %v5161_v4, 1  ;;  %v4935_v11 = vsel %vm4647_vm0, %v4903_v6, 0.0  ;;  %v11964_v6 = vld [vmem:[#allocation21_spill] sm:$0xff] }
 0x4db   : > { %v5257_v1 = vmul.f32 %v11053_v22, %v11053_v22  ;;  %v4936_v28 = vsel %vm4647_vm0, %v4904_v54, 0.0  ;;  %v11367_v8 = vsel %vm4937_vm1, %v5194_v3, %v4935_v11  ;;  %v5256_v21 = vmul.f32 %v11050_v0, %v11050_v0  ;;  %v11966_v54 = vld [vmem:[#allocation32_spill] sm:$0xff] }
 0x4dc   : > { %5300 = vadd.xlane.f32.xlu1 %v5299_v41  ;;  %v5446_v51 = vadd.f32 %v5401_v19, %v5400_v32  ;;  %v5163_v38 = vadd.f32 %v5162_v33, %v5161_v4  ;;  %v5402_v42 = vmul.f32 %v11367_v8, %v11367_v8  ;;  %v5259_v23 = vmul.f32 %v11115_v56, %v11115_v56  ;;  %v11965_v4 = vld [vmem:[#allocation31_spill] sm:$0xff] }
 0x4dd   : > { %v5302_v15 = vadd.f32 %v5257_v1, %v5256_v21  ;;  %v5406_v49 = vpop.xlane.xlu0 %5405  ;;  %v5258_v47 = vmul.f32 %v11112_v37, %v11112_v37  ;;  %v11968_v21 = vld [vmem:[#allocation37_spill] sm:$0xff] }
 0x4de   : > { %5447 = vadd.xlane.f32.xlu0 %v5446_v51  ;;  %v5195_v25 = vmul.f32 0.2, %v5163_v38  ;;  %v5452_v53 = vmax.f32 %v5406_v49, 1e-24  ;;  %v11969_v49 = vld [vmem:[#allocation22_spill] sm:$0xff] }
 0x4df   : > { %v5305_v63 = vadd.f32 %v5259_v23, %v5258_v47 }
 0x4e0   : > { %v11373_v44 = vsel %vm4937_vm1, %v5195_v25, %v4936_v28  ;;  %8707 = vrsqrt.f32 %v5452_v53  ;;  %v11967_v28 = vld [vmem:[#allocation38_spill] sm:$0xff] }
 0x4e1   : > { %v5403_v45 = vmul.f32 %v11373_v44, %v11373_v44  ;;  %v5262_v10 = vpop.xlane.xlu0 %5261  ;;  %v11970_v53 = vld [vmem:[#allocation30_spill] sm:$0xff] }
 0x4e2   : > { %5303 = vadd.xlane.f32.xlu0 %v5302_v15  ;;  %v5308_v55 = vmax.f32 %v5262_v10, 1e-24 }
 0x4e3   : > { %v5449_v40 = vadd.f32 %v5403_v45, %v5402_v42 }
 0x4e4   : > { %8709 = vrsqrt.f32 %v5308_v55 }
 0x4e5   : > { %5450 = vadd.xlane.f32.xlu1 %v5449_v40 }
 0x4e9   : > { %5306 = vadd.xlane.f32.xlu1 %v5305_v63  ;;  %v5409_v17 = vpop.xlane.xlu1 %5408 }
 0x4ea   : > { %v5453_v2 = vmax.f32 %v5409_v17, 1e-24 }
 0x4ec   : > { %8711 = vrsqrt.f32 %v5453_v2 }
 0x4ed   : > { %v8708_v5 = vpop.eup %8707  ;;  %v5265_v58 = vpop.xlane.xlu1 %5264 }
 0x4ee   : > { %v5309_v16 = vmax.f32 %v5265_v58, 1e-24  ;;  %v5485_v52 = vmul.f32 %v8708_v5, %v11963_v9  ;;  %v5484_v14 = vmul.f32 %v8708_v5, %v11964_v6 }
 0x4f0   : > { %8713 = vrsqrt.f32 %v5309_v16  ;;  %5544 = vmatprep.subr.mxu1 %v5485_v52  ;;  %v11971_v16 = vld [vmem:[#allocation34_spill] sm:$0xff] }
 0x4f1   : > { %v8710_v12 = vpop.eup %8709  ;;  %5545 = vmatpush1.xpose.msra.mxu1 %v5484_v14  ;;  %v5268_v62 = vpop.xlane.xlu1 %5267 }
 0x4f2   : > { %v5341_v41 = vmul.f32 %v8710_v12, %v11965_v4  ;;  %v5340_v32 = vmul.f32 %v8710_v12, %v11966_v54  ;;  %v5310_v33 = vmax.f32 %v5268_v62, 1e-24  ;;  %v11974_v62 = vld [vmem:[#allocation41_spill] sm:$0xff] }
 0x4f4   : > { %5546 = vmatprep.subr.mxu1 %v5341_v41  ;;  %5580 = vmatprep.mubr.f32.mxu1 %v5341_v41  ;;  %v6716_v11 = vmul.f32 %v5484_v14, %v5340_v32  ;;  %v6717_v51 = vmul.f32 %v5485_v52, %v5341_v41  ;;  %8715 = vrsqrt.f32 %v5310_v33 }
 0x4f5   : > { %v5412_v19 = vpop.xlane.xlu0 %5411  ;;  %5547 = vmatpush1.xpose.msra.mxu1 %v5340_v32 }
 0x4f6   : > { %v5454_v3 = vmax.f32 %v5412_v19, 1e-24  ;;  %v6748_v38 = vadd.f32 %v6717_v51, %v6716_v11 }
 0x4f8   : > { %8717 = vrsqrt.f32 %v5454_v3  ;;  %6749 = vadd.xlane.f32.xlu0 %v6748_v38  ;;  %5581 = vmatmul.mubr.f32.vlgmr.msra.gmra.mxu1 %v5340_v32  ;;  %v11975_v38 = vld [vmem:[#allocation35_spill] sm:$0xff] }
 0x4f9   : > { %v8712_v1 = vpop.eup %8711  ;;  %5585 = vmatprep.mubr.f32.mxu1 %v5485_v52  ;;  %v11972_v52 = vld [vmem:[#allocation33_spill] sm:$0xff] }
 0x4fa   : > { %v5487_v25 = vmul.f32 %v8712_v1, %v11967_v28  ;;  %v5486_v15 = vmul.f32 %v8712_v1, %v11968_v21  ;;  %v11976_v28 = vld [vmem:[#allocation36_spill] sm:$0xff] }
 0x4fb   : > { %v5271_v42 = vpop.xlane.xlu1 %5270 }
 0x4fc   : > { %5619 = vmatprep.subr.mxu1 %v5487_v25  ;;  %5586 = vmatmul.mubr.f32.gmra.mxu1 %v5484_v14  ;;  %v5311_v40 = vmax.f32 %v5271_v42, 1e-24  ;;  %v11973_v14 = vld [vmem:[#allocation42_spill] sm:$0xff]  ;;  %v11977_v42 = vld [vmem:[#allocation43_spill] sm:$0xff] }
 0x4fd   : > { %v8714_v45 = vpop.eup %8713  ;;  %5620 = vmatpush1.xpose.msra.mxu1 %v5486_v15 }
 0x4fe   : > { %v5343_v47 = vmul.f32 %v8714_v45, %v11969_v49  ;;  %v5342_v63 = vmul.f32 %v8714_v45, %v11970_v53  ;;  %8719 = vrsqrt.f32 %v5311_v40  ;;  %v11978_v40 = vld [vmem:[#allocation44_spill] sm:$0xff] }
 0x500   : > { %v5415_v23 = vpop.xlane.xlu0 %5414  ;;  %5621 = vmatprep.subr.mxu1 %v5343_v47  ;;  %v6718_v55 = vmul.f32 %v5486_v15, %v5342_v63  ;;  %v6719_v17 = vmul.f32 %v5487_v25, %v5343_v47  ;;  %5655 = vmatprep.mubr.f32.mxu1 %v5343_v47 }
 0x501   : > { %v5455_v10 = vmax.f32 %v5415_v23, 1e-24  ;;  %5622 = vmatpush1.xpose.msra.mxu1 %v5342_v63  ;;  %v8716_v2 = vpop.eup %8715 }
 0x502   : > { %v6751_v5 = vadd.f32 %v6719_v17, %v6718_v55  ;;  %v5344_v9 = vmul.f32 %v8716_v2, %v11971_v16  ;;  %v5345_v6 = vmul.f32 %v8716_v2, %v11972_v52  ;;  %v11979_v2 = vld [vmem:[#allocation26_spill] sm:$0xff]  ;;  %v11981_v52 = vld [vmem:[#allocation45_spill] sm:$0xff] }
 0x503   : > { %8721 = vrsqrt.f32 %v5455_v10 }
 0x504   : > { %6752 = vadd.xlane.f32.xlu1 %v6751_v5  ;;  %5656 = vmatmul.mubr.f32.vlgmr.msra.gmra.mxu1 %v5342_v63 }
 0x505   : > { %v8718_v58 = vpop.eup %8717  ;;  %5660 = vmatprep.mubr.f32.mxu1 %v5487_v25 }
 0x506   : > { %v5489_v12 = vmul.f32 %v8718_v58, %v11973_v14  ;;  %v5488_v4 = vmul.f32 %v8718_v58, %v11974_v62  ;;  %v5274_v32 = vpop.xlane.xlu1 %5273  ;;  %v11980_v58 = vld [vmem:[#allocation27_spill] sm:$0xff]  ;;  %v11982_v14 = vld [vmem:[#allocation46_spill] sm:$0xff] }
 0x507   : > { %v5312_v19 = vmax.f32 %v5274_v32, 1e-24 }
 0x508   : > { %5694 = vmatprep.subr.mxu1 %v5489_v12  ;;  %v6720_v41 = vmul.f32 %v5488_v4, %v5344_v9  ;;  %v6721_v54 = vmul.f32 %v5489_v12, %v5345_v6  ;;  %5661 = vmatmul.mubr.f32.gmra.mxu1 %v5486_v15 }
 0x509   : > { %5695 = vmatpush1.xpose.msra.mxu1 %v5488_v4  ;;  %5730 = vmatprep.mubr.f32.mxu1 %v5345_v6  ;;  %8723 = vrsqrt.f32 %v5312_v19 }
 0x50a   : > { %v6754_v33 = vadd.f32 %v6721_v54, %v6720_v41  ;;  %5696 = vmatprep.subr.mxu1 %v5345_v6 }
 0x50b   : > { %v5418_v3 = vpop.xlane.xlu0 %5417  ;;  %v8720_v51 = vpop.eup %8719 }
 0x50c   : > { %v5456_v11 = vmax.f32 %v5418_v3, 1e-24  ;;  %6755 = vadd.xlane.f32.xlu0 %v6754_v33  ;;  %v5346_v1 = vmul.f32 %v8720_v51, %v11975_v38  ;;  %v5347_v25 = vmul.f32 %v8720_v51, %v11976_v28  ;;  %v11984_v38 = vld [vmem:[#allocation18_spill] sm:$0xff] }
 0x50d   : > { %5697 = vmatpush1.xpose.msra.mxu1 %v5344_v9 }
 0x50e   : > { %8725 = vrsqrt.f32 %v5456_v11  ;;  %v11983_v11 = vld [vmem:[#allocation17_spill] sm:$0xff] }
 0x510   : > { %v8722_v21 = vpop.eup %8721  ;;  %5731 = vmatmul.mubr.f32.vlgmr.msra.gmra.mxu1 %v5344_v9 }
 0x511   : > { %v5490_v45 = vmul.f32 %v8722_v21, %v11977_v42  ;;  %v5491_v23 = vmul.f32 %v8722_v21, %v11978_v40  ;;  %5735 = vmatprep.mubr.f32.mxu1 %v5489_v12  ;;  %v11986_v42 = vld [vmem:[#allocation47_spill] sm:$0xff] }
 0x512   : > { %v5277_v47 = vpop.xlane.xlu1 %5276 }
 0x513   : > { %v6722_v15 = vmul.f32 %v5490_v45, %v5346_v1  ;;  %v6723_v49 = vmul.f32 %v5491_v23, %v5347_v25  ;;  %5769 = vmatprep.subr.mxu1 %v5491_v23  ;;  %v5313_v53 = vmax.f32 %v5277_v47, 1e-24 }
 0x514   : > { %5770 = vmatpush1.xpose.msra.mxu1 %v5490_v45 }
 0x515   : > { %v6757_v63 = vadd.f32 %v6723_v49, %v6722_v15  ;;  %5771 = vmatprep.subr.mxu1 %v5347_v25  ;;  %5736 = vmatmul.mubr.f32.gmra.mxu1 %v5488_v4  ;;  %8727 = vrsqrt.f32 %v5313_v53 }
 0x516   : > { %v5421_v10 = vpop.xlane.xlu0 %5420  ;;  %5805 = vmatprep.mubr.f32.mxu1 %v5347_v25  ;;  %v8724_v17 = vpop.eup %8723  ;;  %v11985_v25 = vld [vmem:[#allocation48_spill] sm:$0xff] }
 0x517   : > { %v5457_v55 = vmax.f32 %v5421_v10, 1e-24  ;;  %6758 = vadd.xlane.f32.xlu1 %v6757_v63  ;;  %v5348_v5 = vmul.f32 %v8724_v17, %v11979_v2  ;;  %v5349_v16 = vmul.f32 %v8724_v17, %v11980_v58  ;;  %v11988_v2 = vld [vmem:[#allocation19_spill] sm:$0xff] }
 0x518   : > { %5772 = vmatpush1.xpose.msra.mxu1 %v5346_v1 }
 0x519   : > { %8729 = vrsqrt.f32 %v5457_v55  ;;  %v11987_v55 = vld [vmem:[#allocation28_spill] sm:$0xff] }
 0x51b   : > { %v8726_v9 = vpop.eup %8725  ;;  %5806 = vmatmul.mubr.f32.vlgmr.msra.gmra.mxu1 %v5346_v1 }
 0x51c   : > { %v5492_v6 = vmul.f32 %v8726_v9, %v11981_v52  ;;  %v5493_v12 = vmul.f32 %v8726_v9, %v11982_v14  ;;  %5810 = vmatprep.mubr.f32.mxu1 %v5491_v23  ;;  %v11990_v52 = vld [vmem:[#allocation49_spill] sm:$0xff] }
 0x51e   : > { %v6724_v62 = vmul.f32 %v5492_v6, %v5348_v5  ;;  %v6725_v4 = vmul.f32 %v5493_v12, %v5349_v16  ;;  %5844 = vmatprep.subr.mxu1 %v5493_v12  ;;  %v5280_v41 = vpop.xlane.xlu1 %5279 }
 0x51f   : > { %5845 = vmatpush1.xpose.msra.mxu1 %v5492_v6  ;;  %v5314_v54 = vmax.f32 %v5280_v41, 1e-24 }
 0x520   : > { %v6760_v32 = vadd.f32 %v6725_v4, %v6724_v62  ;;  %5846 = vmatprep.subr.mxu1 %v5349_v16  ;;  %5811 = vmatmul.mubr.f32.gmra.mxu1 %v5490_v45 }
 0x521   : > { %v5424_v19 = vpop.xlane.xlu0 %5423  ;;  %5880 = vmatprep.mubr.f32.mxu1 %v5349_v16  ;;  %8731 = vrsqrt.f32 %v5314_v54  ;;  %v11989_v16 = vld [vmem:[#allocation50_spill] sm:$0xff] }
 0x522   : > { %v5458_v33 = vmax.f32 %v5424_v19, 1e-24  ;;  %6761 = vadd.xlane.f32.xlu1 %v6760_v32  ;;  %v8728_v3 = vpop.eup %8727  ;;  %v11991_v19 = vld [vmem:[#allocation29_spill] sm:$0xff] }
 0x523   : > { %5847 = vmatpush1.xpose.msra.mxu1 %v5348_v5  ;;  %v5351_v51 = vmul.f32 %v8728_v3, %v11983_v11  ;;  %v5350_v1 = vmul.f32 %v8728_v3, %v11984_v38  ;;  %v11992_v3 = vld [vmem:[#allocation20_spill] sm:$0xff] }
 0x524   : > { %8733 = vrsqrt.f32 %v5458_v33 }
 0x526   : > { %v8730_v28 = vpop.eup %8729  ;;  %5881 = vmatmul.mubr.f32.vlgmr.msra.gmra.mxu1 %v5348_v5 }
 0x527   : > { %v5495_v21 = vmul.f32 %v8730_v28, %v11985_v25  ;;  %5885 = vmatprep.mubr.f32.mxu1 %v5493_v12  ;;  %v5494_v40 = vmul.f32 %v8730_v28, %v11986_v42  ;;  %v11994_v25 = vld [vmem:[#allocation51_spill] sm:$0xff] }
 0x529   : > { %5919 = vmatprep.subr.mxu1 %v5495_v21  ;;  %v6726_v45 = vmul.f32 %v5494_v40, %v5350_v1  ;;  %v6727_v23 = vmul.f32 %v5495_v21, %v5351_v51  ;;  %v5283_v15 = vpop.xlane.xlu1 %5282 }
 0x52a   : > { %5920 = vmatpush1.xpose.msra.mxu1 %v5494_v40  ;;  %v5315_v49 = vmax.f32 %v5283_v15, 1e-24 }
 0x52b   : > { %5921 = vmatprep.subr.mxu1 %v5351_v51  ;;  %5886 = vmatmul.mubr.f32.gmra.mxu1 %v5492_v6  ;;  %v11407_v47 = vadd.f32 %v6727_v23, %v6726_v45 }
 0x52c   : > { %5955 = vmatprep.mubr.f32.mxu1 %v5351_v51  ;;  %8735 = vrsqrt.f32 %v5315_v49 }
 0x52d   : > { %v5427_v53 = vpop.xlane.xlu0 %5426 }
 0x52e   : > { %v5459_v63 = vmax.f32 %v5427_v53, 1e-24  ;;  %5922 = vmatpush1.xpose.msra.mxu1 %v5350_v1  ;;  %v8732_v10 = vpop.eup %8731 }
 0x52f   : > { %v5353_v17 = vmul.f32 %v8732_v10, %v11987_v55  ;;  %v5352_v5 = vmul.f32 %v8732_v10, %v11988_v2  ;;  %v11995_v2 = vld [vmem:[#allocation53_spill] sm:$0xff] }
 0x530   : > { %8737 = vrsqrt.f32 %v5459_v63 }
 0x531   : > { %v8734_v58 = vpop.eup %8733  ;;  %5956 = vmatmul.mubr.f32.vlgmr.msra.gmra.mxu1 %v5350_v1  ;;  %v11993_v1 = vld [vmem:[#allocation52_spill] sm:$0xff] }
 0x532   : > { %v5497_v9 = vmul.f32 %v8734_v58, %v11989_v16  ;;  %5960 = vmatprep.mubr.f32.mxu1 %v5495_v21  ;;  %v5496_v6 = vmul.f32 %v8734_v58, %v11990_v52  ;;  %v11996_v52 = vld [vmem:[#allocation23_spill] sm:$0xff] }
 0x534   : > { %5994 = vmatprep.subr.mxu1 %v5497_v9  ;;  %v6728_v14 = vmul.f32 %v5496_v6, %v5352_v5  ;;  %v6729_v12 = vmul.f32 %v5497_v9, %v5353_v17 }
 0x535   : > { %5995 = vmatpush1.xpose.msra.mxu1 %v5496_v6 }
 0x536   : > { %5996 = vmatprep.subr.mxu1 %v5353_v17  ;;  %5961 = vmatmul.mubr.f32.gmra.mxu1 %v5494_v40  ;;  %v11413_v62 = vadd.f32 %v6729_v12, %v6728_v14  ;;  %v11997_v14 = vld [vmem:[#allocation25_spill] sm:$0xff] }
 0x537   : > { %6030 = vmatprep.mubr.f32.mxu1 %v5353_v17 }
 0x538   : > { %v5430_v4 = vpop.xlane.xlu0 %5429 }
 0x539   : > { %v5460_v41 = vmax.f32 %v5430_v4, 1e-24  ;;  %5997 = vmatpush1.xpose.msra.mxu1 %v5352_v5  ;;  %v8736_v54 = vpop.eup %8735 }
 0x53a   : > { %v5355_v33 = vmul.f32 %v8736_v54, %v11991_v19  ;;  %v5354_v11 = vmul.f32 %v8736_v54, %v11992_v3 }
 0x53b   : > { %8739 = vrsqrt.f32 %v5460_v41 }
 0x53c   : > { %v5286_v32 = vpop.xlane.xlu0 %5285  ;;  %6031 = vmatmul.mubr.f32.vlgmr.msra.gmra.mxu1 %v5352_v5 }
 0x53d   : > { %v8738_v51 = vpop.eup %8737  ;;  %v5316_v38 = vmax.f32 %v5286_v32, 1e-24  ;;  %6035 = vmatprep.mubr.f32.mxu1 %v5497_v9 }
 0x53e   : > { %v5499_v28 = vmul.f32 %v8738_v51, %v11993_v1  ;;  %v5498_v21 = vmul.f32 %v8738_v51, %v11994_v25 }
 0x53f   : > { %8741 = vrsqrt.f32 %v5316_v38 }
 0x540   : > { %6069 = vmatprep.subr.mxu1 %v5499_v28  ;;  %v6730_v42 = vmul.f32 %v5498_v21, %v5354_v11  ;;  %v6731_v40 = vmul.f32 %v5499_v28, %v5355_v33  ;;  %6036 = vmatmul.mubr.f32.gmra.mxu1 %v5496_v6 }
 0x541   : > { %6070 = vmatpush1.xpose.msra.mxu1 %v5498_v21  ;;  %6105 = vmatprep.mubr.f32.mxu1 %v5355_v33 }
 0x542   : > { %6071 = vmatprep.subr.mxu1 %v5355_v33  ;;  %v11419_v45 = vadd.f32 %v6731_v40, %v6730_v42  ;;  %v5433_v23 = vpop.xlane.xlu1 %5432  ;;  %v11999_v40 = vld [vmem:[#allocation40_spill] sm:$0xff] }
 0x543   : > { %v5461_v15 = vmax.f32 %v5433_v23, 1e-24 }
 0x545   : > { %6072 = vmatpush1.xpose.msra.mxu1 %v5354_v11  ;;  %8743 = vrsqrt.f32 %v5461_v15 }
 0x546   : > { %v5289_v49 = vpop.xlane.xlu1 %5288 }
 0x547   : > { %v5317_v63 = vmax.f32 %v5289_v49, 1e-24 }
 0x548   : > { %v8740_v53 = vpop.eup %8739  ;;  %v5436_v10 = vpop.xlane.xlu0 %5435  ;;  %6106 = vmatmul.mubr.f32.vlgmr.msra.gmra.mxu1 %v5354_v11 }
 0x549   : > { %v5462_v55 = vmax.f32 %v5436_v10, 1e-24  ;;  %v5501_v17 = vmul.f32 %v8740_v53, %v11146_v18  ;;  %v5500_v5 = vmul.f32 %v8740_v53, %v11995_v2  ;;  %6110 = vmatprep.mubr.f32.mxu1 %v5499_v28  ;;  %8745 = vrsqrt.f32 %v5317_v63 }
 0x54b   : > { %8747 = vrsqrt.f32 %v5462_v55  ;;  %6144 = vmatprep.subr.mxu0 %v5501_v17 }
 0x54c   : > { %v8742_v58 = vpop.eup %8741  ;;  %v5292_v16 = vpop.xlane.xlu0 %5291  ;;  %6145 = vmatpush1.xpose.msra.mxu0 %v5500_v5  ;;  %6111 = vmatmul.mubr.f32.gmra.mxu1 %v5498_v21  ;;  %v11998_v21 = vld [vmem:[#allocation39_spill] sm:$0xff] }
 0x54d   : > { %v5318_v9 = vmax.f32 %v5292_v16, 1e-24  ;;  %v5357_v6 = vmul.f32 %v8742_v58, %v11996_v52  ;;  %v5356_v12 = vmul.f32 %v8742_v58, %v11997_v14 }
 0x54f   : > { %8749 = vrsqrt.f32 %v5318_v9  ;;  %6146 = vmatprep.subr.mxu0 %v5357_v6  ;;  %6180 = vmatprep.mubr.f32.mxu0 %v5357_v6  ;;  %v6732_v4 = vmul.f32 %v5500_v5, %v5356_v12  ;;  %v6733_v18 = vmul.f32 %v5501_v17, %v5357_v6 }
 0x550   : > { %6147 = vmatpush1.xpose.msra.mxu0 %v5356_v12 }
 0x551   : > { %v6772_v32 = vadd.f32 %v6733_v18, %v6732_v4 }
 0x552   : > { %v5439_v41 = vpop.xlane.xlu1 %5438  ;;  %v8744_v19 = vpop.eup %8743 }
 0x553   : > { %v5463_v54 = vmax.f32 %v5439_v41, 1e-24  ;;  %6773 = vadd.xlane.f32.xlu1 %v6772_v32  ;;  %6181 = vmatmul.mubr.f32.vlgmr.msra.gmra.mxu0 %v5356_v12  ;;  %v5503_v3 = vmul.f32 %v8744_v19, %v11205_v13  ;;  %v5502_v38 = vmul.f32 %v8744_v19, %v11198_v26 }
 0x554   : > { %6185 = vmatprep.mubr.f32.mxu0 %v5501_v17 }
 0x555   : > { %8751 = vrsqrt.f32 %v5463_v54  ;;  %6219 = vmatprep.subr.mxu1 %v5503_v3 }
 0x556   : > { %v5295_v33 = vpop.xlane.xlu1 %5294  ;;  %v8746_v28 = vpop.eup %8745  ;;  %6220 = vmatpush1.xpose.msra.mxu1 %v5502_v38 }
 0x557   : > { %v5319_v11 = vmax.f32 %v5295_v33, 1e-24  ;;  %6186 = vmatmul.mubr.f32.gmra.mxu0 %v5500_v5  ;;  %v5358_v42 = vmul.f32 %v8746_v28, %v11998_v21  ;;  %v5359_v23 = vmul.f32 %v8746_v28, %v11999_v40 }
 0x558   : > { %v5442_v51 = vpop.xlane.xlu0 %5441  ;;  %v8748_v25 = vpop.eup %8747 }
 0x559   : > { %v5464_v1 = vmax.f32 %v5442_v51, 1e-24  ;;  %8753 = vrsqrt.f32 %v5319_v11  ;;  %v5505_v49 = vmul.f32 %v8748_v25, %v11227_v7  ;;  %v5504_v13 = vmul.f32 %v8748_v25, %v11223_v27  ;;  %6221 = vmatprep.subr.mxu1 %v5359_v23  ;;  %6255 = vmatprep.mubr.f32.mxu1 %v5359_v23 }
 0x55a   : > { %v6734_v63 = vmul.f32 %v5502_v38, %v5358_v42  ;;  %v6735_v26 = vmul.f32 %v5503_v3, %v5359_v23  ;;  %6222 = vmatpush1.xpose.msra.mxu1 %v5358_v42 }
 0x55b   : > { %8755 = vrsqrt.f32 %v5464_v1  ;;  %6294 = vmatprep.subr.mxu0 %v5505_v49 }
 0x55c   : > { %v5298_v15 = vpop.xlane.xlu0 %5297  ;;  %v8750_v10 = vpop.eup %8749  ;;  %6295 = vmatpush1.xpose.msra.mxu0 %v5504_v13  ;;  %v6775_v55 = vadd.f32 %v6735_v26, %v6734_v63 }
 0x55d   : > { %v5320_v53 = vmax.f32 %v5298_v15, 1e-24  ;;  %v5361_v2 = vmul.f32 %v8750_v10, %v10804_v39  ;;  %v5360_v5 = vmul.f32 %v8750_v10, %v10801_v59  ;;  %6256 = vmatmul.mubr.f32.vlgmr.msra.gmra.mxu1 %v5358_v42 }
 0x55e   : > { %6776 = vadd.xlane.f32.xlu0 %v6775_v55  ;;  %6260 = vmatprep.mubr.f32.mxu1 %v5503_v3 }
 0x55f   : > { %8757 = vrsqrt.f32 %v5320_v53  ;;  %6296 = vmatprep.subr.mxu0 %v5361_v2  ;;  %6330 = vmatprep.mubr.f32.mxu0 %v5361_v2  ;;  %v6736_v27 = vmul.f32 %v5504_v13, %v5360_v5  ;;  %v6737_v7 = vmul.f32 %v5505_v49, %v5361_v2 }
 0x560   : > { %6297 = vmatpush1.xpose.msra.mxu0 %v5360_v5 }
 0x561   : > { %v5445_v17 = vpop.xlane.xlu1 %5444  ;;  %v6778_v52 = vadd.f32 %v6737_v7, %v6736_v27  ;;  %6261 = vmatmul.mubr.f32.gmra.mxu1 %v5502_v38 }
 0x562   : > { %v5465_v58 = vmax.f32 %v5445_v17, 1e-24  ;;  %v8752_v16 = vpop.eup %8751 }
 0x563   : > { %v5507_v14 = vmul.f32 %v8752_v16, %v11271_v61  ;;  %6779 = vadd.xlane.f32.xlu0 %v6778_v52  ;;  %6331 = vmatmul.mubr.f32.vlgmr.msra.gmra.mxu0 %v5360_v5  ;;  %v5506_v59 = vmul.f32 %v8752_v16, %v11253_v35 }
 0x564   : > { %8759 = vrsqrt.f32 %v5465_v58  ;;  %6335 = vmatprep.mubr.f32.mxu0 %v5505_v49 }
 0x565   : > { %v5301_v9 = vpop.xlane.xlu1 %5300  ;;  %6369 = vmatprep.subr.mxu1 %v5507_v14 }
 0x566   : > { %v5321_v6 = vmax.f32 %v5301_v9, 1e-24  ;;  %v8754_v12 = vpop.eup %8753  ;;  %6370 = vmatpush1.xpose.msra.mxu1 %v5506_v59 }
 0x567   : > { %v5448_v39 = vpop.xlane.xlu0 %5447  ;;  %v5363_v41 = vmul.f32 %v8754_v12, %v10867_v36  ;;  %v5362_v54 = vmul.f32 %v8754_v12, %v10864_v50  ;;  %6336 = vmatmul.mubr.f32.gmra.mxu0 %v5504_v13 }
 0x568   : > { %8761 = vrsqrt.f32 %v5321_v6  ;;  %v5466_v4 = vmax.f32 %v5448_v39, 1e-24  ;;  %v8756_v18 = vpop.eup %8755 }
 0x569   : > { %v5509_v61 = vmul.f32 %v8756_v18, %v11288_v48  ;;  %v5508_v32 = vmul.f32 %v8756_v18, %v11284_v43  ;;  %6371 = vmatprep.subr.mxu1 %v5363_v41  ;;  %v6738_v35 = vmul.f32 %v5506_v59, %v5362_v54  ;;  %v6739_v33 = vmul.f32 %v5507_v14, %v5363_v41 }
 0x56a   : > { %8763 = vrsqrt.f32 %v5466_v4  ;;  %6405 = vmatprep.mubr.f32.mxu1 %v5363_v41  ;;  %6372 = vmatpush1.xpose.msra.mxu1 %v5362_v54 }
 0x56b   : > { %v5304_v19 = vpop.xlane.xlu0 %5303  ;;  %6444 = vmatprep.subr.mxu0 %v5509_v61  ;;  %v11439_v51 = vadd.f32 %v6739_v33, %v6738_v35 }
 0x56c   : > { %v5322_v3 = vmax.f32 %v5304_v19, 1e-24  ;;  %v8758_v11 = vpop.eup %8757  ;;  %6445 = vmatpush1.xpose.msra.mxu0 %v5508_v32 }
 0x56d   : > { %v5365_v50 = vmul.f32 %v8758_v11, %v10929_v46  ;;  %v5364_v48 = vmul.f32 %v8758_v11, %v10926_v24  ;;  %6406 = vmatmul.mubr.f32.vlgmr.msra.gmra.mxu1 %v5362_v54 }
 0x56e   : > { %v5451_v36 = vpop.xlane.xlu1 %5450  ;;  %8765 = vrsqrt.f32 %v5322_v3  ;;  %6410 = vmatprep.mubr.f32.mxu1 %v5507_v14 }
 0x56f   : > { %v5467_v43 = vmax.f32 %v5451_v36, 1e-24  ;;  %6446 = vmatprep.subr.mxu0 %v5365_v50  ;;  %6480 = vmatprep.mubr.f32.mxu0 %v5365_v50  ;;  %v6740_v38 = vmul.f32 %v5508_v32, %v5364_v48  ;;  %v6741_v1 = vmul.f32 %v5509_v61, %v5365_v50 }
 0x570   : > { %6447 = vmatpush1.xpose.msra.mxu0 %v5364_v48 }
 0x571   : > { %v8760_v28 = vpop.eup %8759  ;;  %8767 = vrsqrt.f32 %v5467_v43  ;;  %v11444_v42 = vadd.f32 %v6741_v1, %v6740_v38  ;;  %6411 = vmatmul.mubr.f32.gmra.mxu1 %v5506_v59 }
 0x572   : > { %v5307_v25 = vpop.xlane.xlu1 %5306  ;;  %v5511_v21 = vmul.f32 %v8760_v28, %v11335_v31  ;;  %v5510_v46 = vmul.f32 %v8760_v28, %v11307_v29 }
 0x573   : > { %v5323_v40 = vmax.f32 %v5307_v25, 1e-24  ;;  %6481 = vmatmul.mubr.f32.vlgmr.msra.gmra.mxu0 %v5364_v48 }
 0x574   : > { %6519 = vmatprep.subr.mxu1 %v5511_v21  ;;  %6485 = vmatprep.mubr.f32.mxu0 %v5509_v61 }
 0x575   : > { %v8762_v24 = vpop.eup %8761  ;;  %8769 = vrsqrt.f32 %v5323_v40  ;;  %6520 = vmatpush1.xpose.msra.mxu1 %v5510_v46 }
 0x576   : > { %v5367_v23 = vmul.f32 %v8762_v24, %v10991_v60  ;;  %v5366_v15 = vmul.f32 %v8762_v24, %v10988_v57 }
 0x577   : > { %v8764_v49 = vpop.eup %8763  ;;  %6486 = vmatmul.mubr.f32.gmra.mxu0 %v5508_v32 }
 0x578   : > { %v5513_v31 = vmul.f32 %v8764_v49, %v11353_v30  ;;  %v5512_v13 = vmul.f32 %v8764_v49, %v11349_v20  ;;  %6521 = vmatprep.subr.mxu1 %v5367_v23  ;;  %v6742_v53 = vmul.f32 %v5510_v46, %v5366_v15  ;;  %6555 = vmatprep.mubr.f32.mxu1 %v5367_v23 }
 0x579   : > { %6522 = vmatpush1.xpose.msra.mxu1 %v5366_v15  ;;  %v6743_v29 = vmul.f32 %v5511_v21, %v5367_v23 }
 0x57a   : > { %6594 = vmatprep.subr.mxu0 %v5513_v31 }
 0x57b   : > { %v8766_v63 = vpop.eup %8765  ;;  %6595 = vmatpush1.xpose.msra.mxu0 %v5512_v13  ;;  %v11451_v26 = vadd.f32 %v6743_v29, %v6742_v53 }
 0x57c   : > { %v5369_v60 = vmul.f32 %v8766_v63, %v11053_v22  ;;  %v5368_v57 = vmul.f32 %v8766_v63, %v11050_v0  ;;  %6556 = vmatmul.mubr.f32.vlgmr.msra.gmra.mxu1 %v5366_v15 }
 0x57d   : > { %6560 = vmatprep.mubr.f32.mxu1 %v5511_v21  ;;  %v6796_v21 = vadd.s32 8, %v11866_v34 }
 0x57e   : > { %v8768_v30 = vpop.eup %8767  ;;  %6596 = vmatprep.subr.mxu0 %v5369_v60  ;;  %6630 = vmatprep.mubr.f32.mxu0 %v5369_v60  ;;  %v6744_v20 = vmul.f32 %v5512_v13, %v5368_v57  ;;  %v6745_v10 = vmul.f32 %v5513_v31, %v5369_v60 }
 0x57f   : > { %6597 = vmatpush1.xpose.msra.mxu0 %v5368_v57  ;;  %v5515_v55 = vmul.f32 %v8768_v30, %v11373_v44  ;;  %v5514_v17 = vmul.f32 %v8768_v30, %v11367_v8  ;;  %v12000_v8 = vlaneseq }
 0x580   : > { %6561 = vmatmul.mubr.f32.gmra.mxu1 %v5510_v46  ;;  %v11457_v2 = vadd.f32 %v6745_v10, %v6744_v20 }
 0x581   : > { %6669 = vmatprep.subr.mxu1 %v5515_v55  ;;  %v11464_v7 = vand.u32 127, %v12000_v8 }
 0x582   : > { %v8770_v5 = vpop.eup %8769  ;;  %6631 = vmatmul.mubr.f32.vlgmr.msra.gmra.mxu0 %v5368_v57  ;;  %6670 = vmatpush1.xpose.msra.mxu1 %v5514_v17 }
 0x583   : > { %6635 = vmatprep.mubr.f32.mxu0 %v5513_v31  ;;  %v5371_v0 = vmul.f32 %v8770_v5, %v11115_v56  ;;  %v5370_v22 = vmul.f32 %v8770_v5, %v11112_v37  ;;  %v11468_v16 = vsub.s32 %v11464_v7, %v11866_v34  ;;  %v6750_v56 = vpop.xlane.xlu0 %6749  ;;  %vm11483_vm6 = vcmp.ne.s32.totalorder %v11866_v34, %v11464_v7 }
 0x584   : > { %vm11492_vm8 = vcmp.ne.s32.totalorder %v6796_v21, %v11464_v7 }
 0x585   : > { %6671 = vmatprep.subr.mxu1 %v5371_v0  ;;  %6705 = vmatprep.mubr.f32.mxu1 %v5371_v0  ;;  %v6746_v58 = vmul.f32 %v5514_v17, %v5370_v22  ;;  %v6747_v27 = vmul.f32 %v5515_v55, %v5371_v0  ;;  %v7316_v9 = vrot.slane %v6750_v56, %v11468_v16 }
 0x586   : > { %6636 = vmatmul.mubr.f32.gmra.mxu0 %v5512_v13  ;;  %6672 = vmatpush1.xpose.msra.mxu1 %v5370_v22 }
 0x587   : > { %v11461_v44 = vadd.f32 %v6747_v27, %v6746_v58 }
 0x589   : > { %6706 = vmatmul.mubr.f32.vlgmr.msra.gmra.mxu1 %v5370_v22 }
 0x58a   : > { %6710 = vmatprep.mubr.f32.mxu1 %v5515_v55 }
 0x58d   : > { %6711 = vmatmul.mubr.f32.gmra.mxu1 %v5514_v17  ;;  %v6753_v37 = vpop.xlane.xlu1 %6752 }
 0x58e   : > { %v7320_v52 = vrot.slane %v6753_v37, %v11468_v16 }
 0x590   : > { %v7377_v6 = vsel %vm7268_vm2, %v7320_v52, %v7316_v9 }
 0x595   : > { %v6756_v14 = vpop.xlane.xlu0 %6755 }
 0x596   : > { %v7324_v39 = vrot.slane %v6756_v14, %v11468_v16 }
 0x598   : > { %v7378_v4 = vsel %vm7270_vm3, %v7324_v39, %v7377_v6 }
 0x5a0   : > { %v6759_v59 = vpop.xlane.xlu1 %6758 }
 0x5a1   : > { %v7328_v12 = vrot.slane %v6759_v59, %v11468_v16 }
 0x5a3   : > { %v7379_v18 = vsel %vm7272_vm4, %v7328_v12, %v7378_v4 }
 0x5ab   : > { %v6762_v41 = vpop.xlane.xlu1 %6761 }
 0x5ac   : > { %v7332_v54 = vrot.slane %v6762_v41, %v11468_v16 }
 0x5ae   : > { %v11479_v61 = vsel %vm7274_vm5, %v7332_v54, %v7379_v18 }
 0x5b8   : > { %v5582_v32 = vpop.f32.mrf.mxu1 }
 0x5b9   : > { %v6801_v19 = vmul.f32 10.0, %v5582_v32 }
 0x5ba   : > { %v5584_v35 = vpop.f32.mrf.mxu1 }
 0x5bb   : > { %v6833_v33 = vmul.f32 1.442695, %v6801_v19 }
 0x5bc   : > { %v5587_v3 = vpop.f32.mrf.mxu1 }
 0x5bd   : > { %8771 = vpow2.f32 %v6833_v33  ;;  %v6802_v11 = vmul.f32 10.0, %v5587_v3 }
 0x5be   : > { %v5589_v36 = vpop.f32.mrf.mxu1 }
 0x5bf   : > { %v6835_v50 = vmul.f32 1.442695, %v6802_v11 }
 0x5c1   : > { %8773 = vpow2.f32 %v6835_v50 }
 0x5c4   : > { %v5657_v48 = vpop.f32.mrf.mxu1 }
 0x5c5   : > { %v6803_v43 = vmul.f32 10.0, %v5657_v48 }
 0x5c6   : > { %v5659_v38 = vpop.f32.mrf.mxu1 }
 0x5c7   : > { %v6837_v1 = vmul.f32 1.442695, %v6803_v43 }
 0x5c8   : > { %v5662_v28 = vpop.f32.mrf.mxu1 }
 0x5c9   : > { %8775 = vpow2.f32 %v6837_v1  ;;  %v6804_v40 = vmul.f32 10.0, %v5662_v28 }
 0x5ca   : > { %v8772_v46 = vpop.eup %8771  ;;  %v5664_v24 = vpop.f32.mrf.mxu1 }
 0x5cb   : > { %v6839_v23 = vmul.f32 1.442695, %v6804_v40  ;;  %v6897_v15 = vsel %vm11483_vm6, %v8772_v46, 0.0 }
 0x5cc   : > { %v6930_v49 = vsel %vm6929_vm7, %v6897_v15, 0.0 }
 0x5cd   : > { %8777 = vpow2.f32 %v6839_v23  ;;  %6931 = vadd.xlane.f32.xlu0 %v6930_v49 }
 0x5ce   : > { %v8774_v13 = vpop.eup %8773 }
 0x5cf   : > { %v6898_v63 = vsel %vm11492_vm8, %v8774_v13, 0.0 }
 0x5d0   : > { %v5732_v53 = vpop.f32.mrf.mxu1  ;;  %v6933_v57 = vsel %vm6929_vm7, %v6898_v63, 0.0 }
 0x5d1   : > { %v6805_v29 = vmul.f32 10.0, %v5732_v53  ;;  %6934 = vadd.xlane.f32.xlu1 %v6933_v57 }
 0x5d2   : > { %v5734_v60 = vpop.f32.mrf.mxu1 }
 0x5d3   : > { %v6841_v30 = vmul.f32 1.442695, %v6805_v29 }
 0x5d5   : > { %8779 = vpow2.f32 %v6841_v30  ;;  %v5737_v20 = vpop.f32.mrf.mxu1 }
 0x5d6   : > { %v6806_v10 = vmul.f32 10.0, %v5737_v20  ;;  %v8776_v17 = vpop.eup %8775 }
 0x5d7   : > { %v5739_v55 = vpop.f32.mrf.mxu1  ;;  %v6899_v0 = vsel %vm11483_vm6, %v8776_v17, 0.0 }
 0x5d8   : > { %v6843_v5 = vmul.f32 1.442695, %v6806_v10  ;;  %v6936_v22 = vsel %vm6929_vm7, %v6899_v0, 0.0 }
 0x5d9   : > { %6937 = vadd.xlane.f32.xlu0 %v6936_v22 }
 0x5da   : > { %8781 = vpow2.f32 %v6843_v5  ;;  %v8778_v27 = vpop.eup %8777 }
 0x5db   : > { %v5807_v58 = vpop.f32.mrf.mxu1  ;;  %v6900_v37 = vsel %vm11492_vm8, %v8778_v27, 0.0 }
 0x5dc   : > { %v6807_v8 = vmul.f32 10.0, %v5807_v58  ;;  %v6939_v52 = vsel %vm6929_vm7, %v6900_v37, 0.0 }
 0x5dd   : > { %v5809_v56 = vpop.f32.mrf.mxu1  ;;  %6940 = vadd.xlane.f32.xlu1 %v6939_v52 }
 0x5de   : > { %v6845_v9 = vmul.f32 1.442695, %v6807_v8 }
 0x5e0   : > { %8783 = vpow2.f32 %v6845_v9  ;;  %v5812_v6 = vpop.f32.mrf.mxu1 }
 0x5e1   : > { %v6808_v14 = vmul.f32 10.0, %v5812_v6 }
 0x5e2   : > { %v8780_v39 = vpop.eup %8779  ;;  %v5814_v59 = vpop.f32.mrf.mxu1 }
 0x5e3   : > { %v6847_v12 = vmul.f32 1.442695, %v6808_v14  ;;  %v6901_v4 = vsel %vm11483_vm6, %v8780_v39, 0.0 }
 0x5e4   : > { %v6942_v18 = vsel %vm6929_vm7, %v6901_v4, 0.0 }
 0x5e5   : > { %8785 = vpow2.f32 %v6847_v12  ;;  %6943 = vadd.xlane.f32.xlu0 %v6942_v18 }
 0x5e6   : > { %v5882_v41 = vpop.f32.mrf.mxu1 }
 0x5e7   : > { %v8782_v54 = vpop.eup %8781  ;;  %v6809_v63 = vmul.f32 10.0, %v5882_v41  ;;  %v11606_v25 = vpop.xlane.xlu0 %6776 }
 0x5e8   : > { %v5884_v32 = vpop.f32.mrf.mxu1  ;;  %v6902_v19 = vsel %vm11492_vm8, %v8782_v54, 0.0 }
 0x5e9   : > { %v6945_v35 = vsel %vm6929_vm7, %v6902_v19, 0.0  ;;  %v6849_v60 = vmul.f32 1.442695, %v6809_v63 }
 0x5ea   : > { %6946 = vadd.xlane.f32.xlu1 %v6945_v35 }
 0x5eb   : > { %v5887_v33 = vpop.f32.mrf.mxu1  ;;  %8787 = vpow2.f32 %v6849_v60 }
 0x5ec   : > { %v6810_v30 = vmul.f32 10.0, %v5887_v33  ;;  %v11608_v31 = vpop.xlane.xlu0 %6779 }
 0x5ed   : > { %v8784_v3 = vpop.eup %8783  ;;  %v5889_v11 = vpop.f32.mrf.mxu1 }
 0x5ee   : > { %v6903_v36 = vsel %vm11483_vm6, %v8784_v3, 0.0  ;;  %v6851_v17 = vmul.f32 1.442695, %v6810_v30 }
 0x5ef   : > { %v6948_v50 = vsel %vm6929_vm7, %v6903_v36, 0.0 }
 0x5f0   : > { %6949 = vadd.xlane.f32.xlu0 %v6948_v50 }
 0x5f1   : > { %v5957_v48 = vpop.f32.mrf.mxu1 }
 0x5f2   : > { %v8786_v43 = vpop.eup %8785  ;;  %v6811_v8 = vmul.f32 10.0, %v5957_v48 }
 0x5f3   : > { %v5959_v38 = vpop.f32.mrf.mxu1  ;;  %v6904_v1 = vsel %vm11492_vm8, %v8786_v43, 0.0 }
 0x5f4   : > { %v6951_v28 = vsel %vm6929_vm7, %v6904_v1, 0.0  ;;  %v6853_v9 = vmul.f32 1.442695, %v6811_v8 }
 0x5f5   : > { %6952 = vadd.xlane.f32.xlu1 %v6951_v28 }
 0x5f6   : > { %v5962_v21 = vpop.f32.mrf.mxu1 }
 0x5f7   : > { %v6812_v6 = vmul.f32 10.0, %v5962_v21 }
 0x5f8   : > { %v5964_v40 = vpop.f32.mrf.mxu1  ;;  %v8788_v14 = vpop.eup %8787 }
 0x5f9   : > { %v6855_v54 = vmul.f32 1.442695, %v6812_v6  ;;  %v6905_v3 = vsel %vm11483_vm6, %v8788_v14, 0.0 }
 0x5fa   : > { %v6954_v38 = vsel %vm6929_vm7, %v6905_v3, 0.0 }
 0x5fc   : > { %v6032_v46 = vpop.f32.mrf.mxu1 }
 0x5fd   : > { %v6813_v1 = vmul.f32 10.0, %v6032_v46 }
 0x5fe   : > { %v6034_v24 = vpop.f32.mrf.mxu1 }
 0x600   : > { %v6037_v23 = vpop.f32.mrf.mxu1 }
 0x601   : > { %v6814_v63 = vmul.f32 10.0, %v6037_v23 }
 0x602   : > { %v6039_v15 = vpop.f32.mrf.mxu1 }
 0x608   : > { %v6107_v49 = vpop.f32.mrf.mxu1 }
 0x609   : > { %v6815_v40 = vmul.f32 10.0, %v6107_v49 }
 0x60a   : > { %v6109_v13 = vpop.f32.mrf.mxu1 }
 0x60b   : > { %v6857_v13 = vmul.f32 1.442695, %v6813_v1 }
 0x60c   : > { %v11517_v53 = vpop.f32.mrf.mxu1 }
 0x60d   : > { %v6816_v46 = vmul.f32 10.0, %v11517_v53 }
 0x60e   : > { %v6114_v29 = vpop.f32.mrf.mxu1 }
 0x613   : > { %v6182_v57 = vpop.f32.mrf.mxu0 }
 0x614   : > { %v6817_v20 = vmul.f32 10.0, %v6182_v57 }
 0x615   : > { %v6184_v10 = vpop.f32.mrf.mxu0 }
 0x616   : > { %v6865_v55 = vmul.f32 1.442695, %v6817_v20  ;;  %v6861_v10 = vmul.f32 1.442695, %v6815_v40 }
 0x617   : > { %v6187_v5 = vpop.f32.mrf.mxu0 }
 0x618   : > { %8789 = vpow2.f32 %v6865_v55  ;;  %v6818_v0 = vmul.f32 10.0, %v6187_v5 }
 0x619   : > { %v6189_v22 = vpop.f32.mrf.mxu0  ;;  %8791 = vpow2.f32 %v6851_v17  ;;  %v6859_v17 = vmul.f32 1.442695, %v6814_v63 }
 0x61a   : > { %v6867_v58 = vmul.f32 1.442695, %v6818_v0 }
 0x61c   : > { %8793 = vpow2.f32 %v6867_v58 }
 0x61d   : > { %v11519_v27 = vpop.f32.mrf.mxu1  ;;  %8795 = vpow2.f32 %v6853_v9 }
 0x61f   : > { %v6259_v56 = vpop.f32.mrf.mxu1 }
 0x620   : > { %v6863_v56 = vmul.f32 1.442695, %v6816_v46 }
 0x621   : > { %v11521_v37 = vpop.f32.mrf.mxu1 }
 0x623   : > { %v6332_v52 = vpop.f32.mrf.mxu0  ;;  %v6264_v59 = vpop.f32.mrf.mxu1 }
 0x624   : > { %v6821_v39 = vmul.f32 10.0, %v6332_v52 }
 0x625   : > { %v8790_v12 = vpop.eup %8789  ;;  %v6334_v4 = vpop.f32.mrf.mxu0 }
 0x626   : > { %v6873_v18 = vmul.f32 1.442695, %v6821_v39  ;;  %v6913_v41 = vsel %vm11483_vm6, %v8790_v12, 0.0  ;;  %v8792_v35 = vpop.eup %8791  ;;  %v6819_v39 = vmul.f32 10.0, %v11519_v27 }
 0x627   : > { %v6337_v32 = vpop.f32.mrf.mxu0  ;;  %v6978_v19 = vsel %vm6929_vm7, %v6913_v41, 0.0  ;;  %v6906_v28 = vsel %vm11492_vm8, %v8792_v35, 0.0  ;;  %v6820_v41 = vmul.f32 10.0, %v11521_v37 }
 0x628   : > { %8797 = vpow2.f32 %v6873_v18  ;;  %v6822_v33 = vmul.f32 10.0, %v6337_v32  ;;  %6979 = vadd.xlane.f32.xlu0 %v6978_v19  ;;  %v6957_v24 = vsel %vm6929_vm7, %v6906_v28, 0.0  ;;  %v6869_v19 = vmul.f32 1.442695, %v6819_v39 }
 0x629   : > { %v8794_v11 = vpop.eup %8793  ;;  %v6339_v36 = vpop.f32.mrf.mxu0  ;;  %8799 = vpow2.f32 %v6855_v54 }
 0x62a   : > { %v6875_v50 = vmul.f32 1.442695, %v6822_v33  ;;  %v6914_v48 = vsel %vm11492_vm8, %v8794_v11, 0.0  ;;  %v8796_v55 = vpop.eup %8795 }
 0x62b   : > { %v6981_v43 = vsel %vm6929_vm7, %v6914_v48, 0.0  ;;  %v6907_v53 = vsel %vm11483_vm6, %v8796_v55, 0.0 }
 0x62c   : > { %8801 = vpow2.f32 %v6875_v50  ;;  %6982 = vadd.xlane.f32.xlu1 %v6981_v43  ;;  %6955 = vadd.xlane.f32.xlu0 %v6954_v38  ;;  %v6960_v4 = vsel %vm6929_vm7, %v6907_v53, 0.0  ;;  %v6871_v50 = vmul.f32 1.442695, %v6820_v41 }
 0x62d   : > { %v6407_v21 = vpop.f32.mrf.mxu1  ;;  %8803 = vpow2.f32 %v6857_v13 }
 0x62e   : > { %v6823_v35 = vmul.f32 10.0, %v6407_v21 }
 0x62f   : > { %v6409_v15 = vpop.f32.mrf.mxu1 }
 0x630   : > { %6958 = vadd.xlane.f32.xlu1 %v6957_v24  ;;  %v6877_v1 = vmul.f32 1.442695, %v6823_v35 }
 0x631   : > { %v6412_v30 = vpop.f32.mrf.mxu1 }
 0x632   : > { %v6824_v48 = vmul.f32 10.0, %v6412_v30 }
 0x633   : > { %v6482_v29 = vpop.f32.mrf.mxu0  ;;  %v6414_v0 = vpop.f32.mrf.mxu1 }
 0x634   : > { %v6825_v60 = vmul.f32 10.0, %v6482_v29  ;;  %v6879_v63 = vmul.f32 1.442695, %v6824_v48 }
 0x635   : > { %v6484_v57 = vpop.f32.mrf.mxu0  ;;  %v8798_v49 = vpop.eup %8797 }
 0x636   : > { %v6881_v20 = vmul.f32 1.442695, %v6825_v60  ;;  %v6917_v23 = vsel %vm11483_vm6, %v8798_v49, 0.0  ;;  %v8800_v52 = vpop.eup %8799 }
 0x637   : > { %v6487_v5 = vpop.f32.mrf.mxu0  ;;  %v6990_v9 = vsel %vm6929_vm7, %v6917_v23, 0.0  ;;  %v6908_v54 = vsel %vm11492_vm8, %v8800_v52, 0.0 }
 0x638   : > { %8805 = vpow2.f32 %v6881_v20  ;;  %v6826_v22 = vmul.f32 10.0, %v6487_v5  ;;  %6991 = vadd.xlane.f32.xlu0 %v6990_v9  ;;  %v6963_v11 = vsel %vm6929_vm7, %v6908_v54, 0.0 }
 0x639   : > { %v6489_v58 = vpop.f32.mrf.mxu0  ;;  %8807 = vpow2.f32 %v6861_v10  ;;  %v8802_v14 = vpop.eup %8801 }
 0x63a   : > { %v6883_v8 = vmul.f32 1.442695, %v6826_v22  ;;  %8809 = vpow2.f32 %v6859_v17  ;;  %v6918_v59 = vsel %vm11492_vm8, %v8802_v14, 0.0  ;;  %v8804_v43 = vpop.eup %8803 }
 0x63b   : > { %v6993_v18 = vsel %vm6929_vm7, %v6918_v59, 0.0  ;;  %v6909_v20 = vsel %vm11483_vm6, %v8804_v43, 0.0 }
 0x63c   : > { %v6557_v6 = vpop.f32.mrf.mxu1  ;;  %8811 = vpow2.f32 %v6883_v8  ;;  %6961 = vadd.xlane.f32.xlu0 %v6960_v4  ;;  %6994 = vadd.xlane.f32.xlu1 %v6993_v18  ;;  %v6966_v58 = vsel %vm6929_vm7, %v6909_v20, 0.0 }
 0x63d   : > { %8813 = vpow2.f32 %v6863_v56  ;;  %v6827_v37 = vmul.f32 10.0, %v6557_v6 }
 0x63e   : > { %v6559_v12 = vpop.f32.mrf.mxu1  ;;  %8815 = vpow2.f32 %v6869_v19 }
 0x63f   : > { %v6885_v10 = vmul.f32 1.442695, %v6827_v37 }
 0x640   : > { %v6562_v32 = vpop.f32.mrf.mxu1  ;;  %6964 = vadd.xlane.f32.xlu1 %v6963_v11 }
 0x641   : > { %v6828_v60 = vmul.f32 10.0, %v6562_v32 }
 0x642   : > { %v6632_v27 = vpop.f32.mrf.mxu0  ;;  %v6564_v33 = vpop.f32.mrf.mxu1 }
 0x643   : > { %v6829_v3 = vmul.f32 10.0, %v6632_v27  ;;  %v6887_v8 = vmul.f32 1.442695, %v6828_v60 }
 0x644   : > { %v6634_v36 = vpop.f32.mrf.mxu0 }
 0x645   : > { %v6889_v38 = vmul.f32 1.442695, %v6829_v3  ;;  %v8806_v28 = vpop.eup %8805 }
 0x646   : > { %v6637_v40 = vpop.f32.mrf.mxu0  ;;  %v6921_v21 = vsel %vm11483_vm6, %v8806_v28, 0.0  ;;  %v8808_v15 = vpop.eup %8807 }
 0x647   : > { %8817 = vpow2.f32 %v6889_v38  ;;  %v6830_v24 = vmul.f32 10.0, %v6637_v40  ;;  %v7002_v29 = vsel %vm6929_vm7, %v6921_v21, 0.0  ;;  %v8810_v57 = vpop.eup %8809  ;;  %v6911_v0 = vsel %vm11483_vm6, %v8808_v15, 0.0 }
 0x648   : > { %v6639_v13 = vpop.f32.mrf.mxu0  ;;  %8819 = vpow2.f32 %v6871_v50  ;;  %7003 = vadd.xlane.f32.xlu0 %v7002_v29  ;;  %v6910_v56 = vsel %vm11492_vm8, %v8810_v57, 0.0  ;;  %v6972_v53 = vsel %vm6929_vm7, %v6911_v0, 0.0 }
 0x649   : > { %v6891_v30 = vmul.f32 1.442695, %v6830_v24  ;;  %8821 = vpow2.f32 %v6877_v1  ;;  %v6707_v46 = vpop.f32.mrf.mxu1  ;;  %v8812_v55 = vpop.eup %8811  ;;  %v6969_v59 = vsel %vm6929_vm7, %v6910_v56, 0.0 }
 0x64a   : > { %v6831_v17 = vmul.f32 10.0, %v6707_v46  ;;  %v6922_v5 = vsel %vm11492_vm8, %v8812_v55, 0.0  ;;  %v8814_v22 = vpop.eup %8813 }
 0x64b   : > { %8823 = vpow2.f32 %v6891_v30  ;;  %v6709_v49 = vpop.f32.mrf.mxu1  ;;  %v7005_v23 = vsel %vm6929_vm7, %v6922_v5, 0.0  ;;  %v6912_v14 = vsel %vm11492_vm8, %v8814_v22, 0.0  ;;  %v8816_v4 = vpop.eup %8815 }
 0x64c   : > { %8825 = vpow2.f32 %v6879_v63  ;;  %6967 = vadd.xlane.f32.xlu0 %v6966_v58  ;;  %7006 = vadd.xlane.f32.xlu1 %v7005_v23  ;;  %v6893_v9 = vmul.f32 1.442695, %v6831_v17  ;;  %v6975_v18 = vsel %vm6929_vm7, %v6912_v14, 0.0  ;;  %v6915_v19 = vsel %vm11483_vm6, %v8816_v4, 0.0 }
 0x64d   : > { %8827 = vpow2.f32 %v6885_v10  ;;  %v6712_v52 = vpop.f32.mrf.mxu1  ;;  %v6984_v3 = vsel %vm6929_vm7, %v6915_v19, 0.0 }
 0x64e   : > { %v6832_v6 = vmul.f32 10.0, %v6712_v52  ;;  %8829 = vpow2.f32 %v6887_v8 }
 0x64f   : > { %v6714_v39 = vpop.f32.mrf.mxu1  ;;  %8831 = vpow2.f32 %v6893_v9 }
 0x650   : > { %6973 = vadd.xlane.f32.xlu0 %v6972_v53  ;;  %6970 = vadd.xlane.f32.xlu1 %v6969_v59  ;;  %v6895_v12 = vmul.f32 1.442695, %v6832_v6 }
 0x652   : > { %8833 = vpow2.f32 %v6895_v12 }
 0x654   : > { %v8818_v41 = vpop.eup %8817  ;;  %6976 = vadd.xlane.f32.xlu1 %v6975_v18 }
 0x655   : > { %v8820_v54 = vpop.eup %8819  ;;  %v6925_v32 = vsel %vm11483_vm6, %v8818_v41, 0.0  ;;  %v7126_v41 = vadd.s32 4294967288, %v11464_v7 }
 0x656   : > { %v8822_v35 = vpop.eup %8821  ;;  %v7014_v27 = vsel %vm6929_vm7, %v6925_v32, 0.0  ;;  %v6916_v50 = vsel %vm11492_vm8, %v8820_v54, 0.0  ;;  %v6932_v46 = vpop.xlane.xlu0 %6931 }
 0x657   : > { %7015 = vadd.xlane.f32.xlu0 %v7014_v27  ;;  %v6919_v48 = vsel %vm11483_vm6, %v8822_v35, 0.0  ;;  %v6987_v1 = vsel %vm6929_vm7, %v6916_v50, 0.0  ;;  %8835 = vlog2.f32 %v6932_v46  ;;  %v7352_v50 = vrot.slane %v11606_v25, %v11468_v16 }
 0x658   : > { %v8824_v33 = vpop.eup %8823  ;;  %v6996_v37 = vsel %vm6929_vm7, %v6919_v48, 0.0 }
 0x659   : > { %v8826_v11 = vpop.eup %8825  ;;  %v6926_v36 = vsel %vm11492_vm8, %v8824_v33, 0.0 }
 0x65a   : > { %v8828_v43 = vpop.eup %8827  ;;  %v7017_v38 = vsel %vm6929_vm7, %v6926_v36, 0.0  ;;  %v6920_v40 = vsel %vm11492_vm8, %v8826_v11, 0.0  ;;  %v11614_v11 = vsub.s32 %v7126_v41, %v11866_v34 }
 0x65b   : > { %6985 = vadd.xlane.f32.xlu0 %v6984_v3  ;;  %7018 = vadd.xlane.f32.xlu1 %v7017_v38  ;;  %v8830_v28 = vpop.eup %8829  ;;  %v6923_v24 = vsel %vm11483_vm6, %v8828_v43, 0.0  ;;  %v6999_v15 = vsel %vm6929_vm7, %v6920_v40, 0.0 }
 0x65c   : > { %v8832_v21 = vpop.eup %8831  ;;  %v7008_v13 = vsel %vm6929_vm7, %v6923_v24, 0.0  ;;  %v6924_v29 = vsel %vm11492_vm8, %v8830_v28, 0.0 }
 0x65d   : > { %v6927_v63 = vsel %vm11483_vm6, %v8832_v21, 0.0  ;;  %v7011_v57 = vsel %vm6929_vm7, %v6924_v29, 0.0 }
 0x65e   : > { %v7020_v30 = vsel %vm6929_vm7, %v6927_v63, 0.0 }
 0x65f   : > { %6988 = vadd.xlane.f32.xlu1 %v6987_v1  ;;  %6997 = vadd.xlane.f32.xlu0 %v6996_v37  ;;  %v8834_v60 = vpop.eup %8833 }
 0x660   : > { %v6928_v20 = vsel %vm11492_vm8, %v8834_v60, 0.0 }
 0x661   : > { %v7023_v10 = vsel %vm6929_vm7, %v6928_v20, 0.0 }
 0x662   : > { %v6938_v55 = vpop.xlane.xlu0 %6937 }
 0x663   : > { %7000 = vadd.xlane.f32.xlu1 %v6999_v15  ;;  %7009 = vadd.xlane.f32.xlu0 %v7008_v13  ;;  %v7356_v13 = vrot.slane %v11608_v31, %v11468_v16 }
 0x664   : > { %v8836_v6 = vpop.eup %8835 }
 0x665   : > { %v7027_v38 = vmul.f32 0.6931472, %v8836_v6 }
 0x667   : > { %7012 = vadd.xlane.f32.xlu1 %v7011_v57  ;;  %7021 = vadd.xlane.f32.xlu0 %v7020_v30  ;;  %v7125_v25 = vrot.slane %v7027_v38, %v11468_v16 }
 0x66b   : > { %6782 = vadd.xlane.f32.xlu0 %v11439_v51  ;;  %7024 = vadd.xlane.f32.xlu1 %v7023_v10  ;;  %v11610_v51 = vpop.xlane.xlu1 %6773 }
 0x66c   : > { %v7348_v24 = vrot.slane %v11610_v51, %v11468_v16 }
 0x66e   : > { %v6944_v17 = vpop.xlane.xlu0 %6943  ;;  %v7384_v60 = vsel %vm7268_vm2, %v7352_v50, %v7348_v24 }
 0x66f   : > { %6785 = vadd.xlane.f32.xlu0 %v11444_v42  ;;  %6764 = vadd.xlane.f32.xlu1 %v11407_v47  ;;  %v6935_v42 = vpop.xlane.xlu1 %6934 }
 0x670   : > { %8837 = vlog2.f32 %v6935_v42 }
 0x671   : > { %8839 = vlog2.f32 %v6938_v55 }
 0x673   : > { %6788 = vadd.xlane.f32.xlu0 %v11451_v26  ;;  %6767 = vadd.xlane.f32.xlu1 %v11413_v62  ;;  %v6941_v47 = vpop.xlane.xlu1 %6940 }
 0x674   : > { %8841 = vlog2.f32 %v6941_v47 }
 0x675   : > { %8843 = vlog2.f32 %v6944_v17 }
 0x677   : > { %6791 = vadd.xlane.f32.xlu0 %v11457_v2  ;;  %6770 = vadd.xlane.f32.xlu1 %v11419_v45  ;;  %v6947_v26 = vpop.xlane.xlu1 %6946 }
 0x678   : > { %8845 = vlog2.f32 %v6947_v26 }
 0x679   : > { %v6950_v5 = vpop.xlane.xlu0 %6949 }
 0x67a   : > { %8847 = vlog2.f32 %v6950_v5  ;;  %v11631_v5 = vsel %vm7270_vm3, %v7356_v13, %v7384_v60 }
 0x67b   : > { %6794 = vadd.xlane.f32.xlu1 %v11461_v44 }
 0x67d   : > { %v8838_v39 = vpop.eup %8837 }
 0x67e   : > { %v6953_v62 = vpop.xlane.xlu1 %6952  ;;  %v8840_v59 = vpop.eup %8839  ;;  %v7029_v7 = vmul.f32 0.6931472, %v8838_v39 }
 0x67f   : > { %8849 = vlog2.f32 %v6953_v62  ;;  %v7031_v48 = vmul.f32 0.6931472, %v8840_v59 }
 0x680   : > { %v7130_v57 = vrot.slane %v7029_v7, %v11614_v11 }
 0x681   : > { %v8842_v4 = vpop.eup %8841  ;;  %v7136_v30 = vrot.slane %v7031_v48, %v11468_v16 }
 0x682   : > { %v8844_v18 = vpop.eup %8843  ;;  %v7033_v33 = vmul.f32 0.6931472, %v8842_v4 }
 0x683   : > { %v7035_v29 = vmul.f32 0.6931472, %v8844_v18 }
 0x684   : > { %v7140_v34 = vrot.slane %v7033_v33, %v11614_v11 }
 0x685   : > { %v8846_v54 = vpop.eup %8845  ;;  %v7145_v62 = vrot.slane %v7035_v29, %v11468_v16 }
 0x686   : > { %v7037_v1 = vmul.f32 0.6931472, %v8846_v54  ;;  %v7141_v55 = vsel %vm7131_vm9, %v7140_v34, %v7136_v30 }
 0x687   : > { %v8848_v32 = vpop.eup %8847 }
 0x688   : > { %v7039_v20 = vmul.f32 0.6931472, %v8848_v32  ;;  %v7149_v51 = vrot.slane %v7037_v1, %v11614_v11 }
 0x68c   : > { %v8850_v27 = vpop.eup %8849 }
 0x68d   : > { %v7041_v21 = vmul.f32 0.6931472, %v8850_v27 }
 0x68f   : > { %v7158_v47 = vrot.slane %v7041_v21, %v11614_v11 }
 0x6b1   : > { %v6980_v0 = vpop.xlane.xlu0 %6979 }
 0x6b2   : > { %8851 = vlog2.f32 %v6980_v0 }
 0x6b5   : > { %v6983_v2 = vpop.xlane.xlu1 %6982  ;;  %v6956_v49 = vpop.xlane.xlu0 %6955 }
 0x6b6   : > { %8853 = vlog2.f32 %v6983_v2  ;;  %v7132_v2 = vsel %vm7131_vm9, %v7130_v57, %v7125_v25 }
 0x6b7   : > { %8855 = vlog2.f32 %v6956_v49  ;;  %v7154_v49 = vrot.slane %v7039_v20, %v11468_v16 }
 0x6b9   : > { %v6959_v45 = vpop.xlane.xlu1 %6958 }
 0x6ba   : > { %8857 = vlog2.f32 %v6959_v45 }
 0x6bf   : > { %v8852_v3 = vpop.eup %8851 }
 0x6c0   : > { %v7059_v6 = vmul.f32 0.6931472, %v8852_v3 }
 0x6c1   : > { %v6992_v22 = vpop.xlane.xlu0 %6991 }
 0x6c2   : > { %8859 = vlog2.f32 %v6992_v22 }
 0x6c3   : > { %v8854_v36 = vpop.eup %8853 }
 0x6c4   : > { %v8856_v43 = vpop.eup %8855  ;;  %v7061_v45 = vmul.f32 0.6931472, %v8854_v36 }
 0x6c5   : > { %v6995_v44 = vpop.xlane.xlu1 %6994  ;;  %v6962_v58 = vpop.xlane.xlu0 %6961  ;;  %v7043_v22 = vmul.f32 0.6931472, %v8856_v43  ;;  %v7199_v43 = vrot.slane %v7059_v6, %v11468_v16 }
 0x6c6   : > { %8861 = vlog2.f32 %v6995_v44  ;;  %v7203_v41 = vrot.slane %v7061_v45, %v11614_v11 }
 0x6c7   : > { %8863 = vlog2.f32 %v6962_v58  ;;  %v8858_v40 = vpop.eup %8857  ;;  %v7269_v58 = vsel %vm7268_vm2, %v7141_v55, %v7132_v2  ;;  %v7163_v54 = vrot.slane %v7043_v22, %v11468_v16 }
 0x6c8   : > { %v7045_v17 = vmul.f32 0.6931472, %v8858_v40 }
 0x6c9   : > { %v6965_v23 = vpop.xlane.xlu1 %6964 }
 0x6ca   : > { %8865 = vlog2.f32 %v6965_v23  ;;  %v7150_v23 = vsel %vm7131_vm9, %v7149_v51, %v7145_v62 }
 0x6cf   : > { %v8860_v15 = vpop.eup %8859 }
 0x6d0   : > { %v7067_v32 = vmul.f32 0.6931472, %v8860_v15  ;;  %v7204_v15 = vsel %vm7131_vm9, %v7203_v41, %v7199_v43 }
 0x6d1   : > { %v7004_v8 = vpop.xlane.xlu0 %7003 }
 0x6d2   : > { %8867 = vlog2.f32 %v7004_v8  ;;  %v7217_v13 = vrot.slane %v7067_v32, %v11468_v16 }
 0x6d3   : > { %v8862_v63 = vpop.eup %8861 }
 0x6d4   : > { %v8864_v10 = vpop.eup %8863  ;;  %v7069_v59 = vmul.f32 0.6931472, %v8862_v63 }
 0x6d5   : > { %v7007_v56 = vpop.xlane.xlu1 %7006  ;;  %v6968_v9 = vpop.xlane.xlu0 %6967 }
 0x6d7   : > { %v8866_v31 = vpop.eup %8865 }
 0x6d8   : > { %v7049_v8 = vmul.f32 0.6931472, %v8866_v31 }
 0x6d9   : > { %v6971_v52 = vpop.xlane.xlu1 %6970  ;;  %v6974_v53 = vpop.xlane.xlu0 %6973 }
 0x6da   : > { %8869 = vlog2.f32 %v6971_v52  ;;  %v7176_v27 = vrot.slane %v7049_v8, %v11614_v11 }
 0x6db   : > { %8871 = vlog2.f32 %v7007_v56 }
 0x6dc   : > { %8873 = vlog2.f32 %v6968_v9 }
 0x6dd   : > { %v6977_v14 = vpop.xlane.xlu1 %6976  ;;  %8875 = vlog2.f32 %v6974_v53  ;;  %v7159_v53 = vsel %vm7131_vm9, %v7158_v47, %v7154_v49 }
 0x6df   : > { %v8868_v26 = vpop.eup %8867 }
 0x6e0   : > { %v7016_v12 = vpop.xlane.xlu0 %7015  ;;  %v7075_v24 = vmul.f32 0.6931472, %v8868_v26 }
 0x6e2   : > { %v7235_v26 = vrot.slane %v7075_v24, %v11468_v16 }
 0x6e4   : > { %v7019_v19 = vpop.xlane.xlu1 %7018  ;;  %v6986_v35 = vpop.xlane.xlu0 %6985 }
 0x6e5   : > { %8877 = vlog2.f32 %v6986_v35 }
 0x6e6   : > { %8879 = vlog2.f32 %v6977_v14  ;;  %v7167_v14 = vrot.slane %v7045_v17, %v11614_v11 }
 0x6e7   : > { %8881 = vlog2.f32 %v7016_v12  ;;  %v8870_v0 = vpop.eup %8869  ;;  %v7047_v12 = vmul.f32 0.6931472, %v8864_v10 }
 0x6e8   : > { %v6989_v37 = vpop.xlane.xlu1 %6988  ;;  %v6998_v28 = vpop.xlane.xlu0 %6997  ;;  %v7053_v4 = vmul.f32 0.6931472, %v8870_v0  ;;  %v7168_v1 = vsel %vm7131_vm9, %v7167_v14, %v7163_v54 }
 0x6e9   : > { %8883 = vlog2.f32 %v6989_v37  ;;  %v8872_v44 = vpop.eup %8871  ;;  %v7172_v40 = vrot.slane %v7047_v12, %v11468_v16 }
 0x6ea   : > { %8885 = vlog2.f32 %v6998_v28  ;;  %v8874_v52 = vpop.eup %8873  ;;  %v7077_v33 = vmul.f32 0.6931472, %v8872_v44  ;;  %v7221_v28 = vrot.slane %v7069_v59, %v11614_v11  ;;  %v7185_v34 = vrot.slane %v7053_v4, %v11614_v11 }
 0x6eb   : > { %8887 = vlog2.f32 %v7019_v19  ;;  %v8876_v39 = vpop.eup %8875  ;;  %v7271_v19 = vsel %vm7270_vm3, %v7150_v23, %v7269_v58  ;;  %v7051_v3 = vmul.f32 0.6931472, %v8874_v52  ;;  %v7177_v25 = vsel %vm7131_vm9, %v7176_v27, %v7172_v40 }
 0x6ec   : > { %v7001_v46 = vpop.xlane.xlu1 %7000  ;;  %v7010_v42 = vpop.xlane.xlu0 %7009  ;;  %v7273_v7 = vsel %vm7272_vm4, %v7159_v53, %v7271_v19  ;;  %v7239_v60 = vrot.slane %v7077_v33, %v11614_v11  ;;  %v7055_v30 = vmul.f32 0.6931472, %v8876_v39  ;;  %v7222_v17 = vsel %vm7131_vm9, %v7221_v28, %v7217_v13 }
 0x6ed   : > { %8889 = vlog2.f32 %v7001_v46  ;;  %v7181_v57 = vrot.slane %v7051_v3, %v11468_v16  ;;  %v7275_v55 = vsel %vm7274_vm5, %v7168_v1, %v7273_v7 }
 0x6ee   : > { %8891 = vlog2.f32 %v7010_v42  ;;  %v7277_v44 = vsel %vm7276_vm10, %v7177_v25, %v7275_v55  ;;  %v7190_v58 = vrot.slane %v7055_v30, %v11468_v16  ;;  %v7240_v52 = vsel %vm7131_vm9, %v7239_v60, %v7235_v26 }
 0x6ef   : > { %v7186_v0 = vsel %vm7131_vm9, %v7185_v34, %v7181_v57 }
 0x6f0   : > { %v7013_v56 = vpop.xlane.xlu1 %7012  ;;  %v7022_v9 = vpop.xlane.xlu0 %7021  ;;  %v7279_v39 = vsel %vm7278_vm11, %v7186_v0, %v7277_v44 }
 0x6f1   : > { %8893 = vlog2.f32 %v7013_v56 }
 0x6f2   : > { %8895 = vlog2.f32 %v7022_v9  ;;  %v8878_v18 = vpop.eup %8877 }
 0x6f3   : > { %v8880_v35 = vpop.eup %8879  ;;  %v7063_v38 = vmul.f32 0.6931472, %v8878_v18 }
 0x6f4   : > { %v7025_v36 = vpop.xlane.xlu1 %7024  ;;  %v11644_v50 = vpop.xlane.xlu0 %6782  ;;  %v7057_v29 = vmul.f32 0.6931472, %v8880_v35 }
 0x6f5   : > { %v8882_v48 = vpop.eup %8881  ;;  %8897 = vlog2.f32 %v7025_v36  ;;  %v7208_v46 = vrot.slane %v7063_v38, %v11468_v16  ;;  %v7360_v18 = vrot.slane %v11644_v50, %v11468_v16 }
 0x6f6   : > { %v8884_v37 = vpop.eup %8883  ;;  %v7083_v62 = vmul.f32 0.6931472, %v8882_v48  ;;  %v7194_v49 = vrot.slane %v7057_v29, %v11614_v11 }
 0x6f7   : > { %v8886_v21 = vpop.eup %8885  ;;  %v7065_v63 = vmul.f32 0.6931472, %v8884_v37  ;;  %v7386_v24 = vsel %vm7272_vm4, %v7360_v18, %v11631_v5 }
 0x6f8   : > { %v6765_v20 = vpop.xlane.xlu1 %6764  ;;  %v6786_v10 = vpop.xlane.xlu0 %6785  ;;  %v7071_v31 = vmul.f32 0.6931472, %v8886_v21  ;;  %v7253_v12 = vrot.slane %v7083_v62, %v11468_v16  ;;  %v7195_v27 = vsel %vm7131_vm9, %v7194_v49, %v7190_v58 }
 0x6f9   : > { %v8888_v51 = vpop.eup %8887  ;;  %v7212_v42 = vrot.slane %v7065_v63, %v11614_v11  ;;  %v7336_v8 = vrot.slane %v6765_v20, %v11468_v16  ;;  %v7364_v35 = vrot.slane %v6786_v10, %v11468_v16  ;;  %v7281_v30 = vsel %vm7280_vm12, %v7195_v27, %v7279_v39 }
 0x6fa   : > { %v8890_v47 = vpop.eup %8889  ;;  %v7226_v6 = vrot.slane %v7071_v31, %v11468_v16  ;;  %v7085_v4 = vmul.f32 0.6931472, %v8888_v51 }
 0x6fb   : > { %v8892_v2 = vpop.eup %8891  ;;  %v7213_v45 = vsel %vm7131_vm9, %v7212_v42, %v7208_v46  ;;  %v7073_v22 = vmul.f32 0.6931472, %v8890_v47  ;;  %v7381_v3 = vsel %vm7276_vm10, %v7336_v8, %v11479_v61  ;;  %v7291_v47 = vsel %vm6929_vm7, %v7281_v30, 0.0 }
 0x6fc   : > { %v7079_v23 = vmul.f32 0.6931472, %v8892_v2  ;;  %v6768_v56 = vpop.xlane.xlu1 %6767  ;;  %v6789_v9 = vpop.xlane.xlu0 %6788  ;;  %v7282_v53 = vsel %vm7268_vm2, %v7213_v45, %v7204_v15  ;;  %v7257_v40 = vrot.slane %v7085_v4, %v11614_v11  ;;  %v7387_v15 = vsel %vm7274_vm5, %v7364_v35, %v7386_v24 }
 0x6fd   : > { %v7230_v14 = vrot.slane %v7073_v22, %v11614_v11  ;;  %v7340_v41 = vrot.slane %v6768_v56, %v11468_v16  ;;  %v7368_v36 = vrot.slane %v6789_v9, %v11468_v16  ;;  %v7283_v50 = vsel %vm7270_vm3, %v7222_v17, %v7282_v53 }
 0x6fe   : > { %v8894_v59 = vpop.eup %8893  ;;  %v7244_v33 = vrot.slane %v7079_v23, %v11468_v16  ;;  %v7258_v31 = vsel %vm7131_vm9, %v7257_v40, %v7253_v12 }
 0x6ff   : > { %v8896_v54 = vpop.eup %8895  ;;  %v7231_v32 = vsel %vm7131_vm9, %v7230_v14, %v7226_v6  ;;  %v7081_v19 = vmul.f32 0.6931472, %v8894_v59  ;;  %v7382_v34 = vsel %vm7278_vm11, %v7340_v41, %v7381_v3  ;;  %v7388_v63 = vsel %vm7276_vm10, %v7368_v36, %v7387_v15 }
 0x700   : > { %v6771_v7 = vpop.xlane.xlu1 %6770  ;;  %v6792_v48 = vpop.xlane.xlu0 %6791  ;;  %v7087_v38 = vmul.f32 0.6931472, %v8896_v54  ;;  %v7284_v37 = vsel %vm7272_vm4, %v7231_v32, %v7283_v50 }
 0x701   : > { %v7248_v43 = vrot.slane %v7081_v19, %v11614_v11  ;;  %v7344_v1 = vrot.slane %v6771_v7, %v11468_v16  ;;  %v7372_v61 = vrot.slane %v6792_v48, %v11468_v16  ;;  %v7285_v5 = vsel %vm7274_vm5, %v7240_v52, %v7284_v37 }
 0x702   : > { %v8898_v28 = vpop.eup %8897  ;;  %v7262_v20 = vrot.slane %v7087_v38, %v11468_v16 }
 0x703   : > { %v7089_v21 = vmul.f32 0.6931472, %v8898_v28  ;;  %v7383_v13 = vsel %vm7280_vm12, %v7344_v1, %v7382_v34  ;;  %v7249_v29 = vsel %vm7131_vm9, %v7248_v43, %v7244_v33  ;;  %v7389_v46 = vsel %vm7278_vm11, %v7372_v61, %v7388_v63 }
 0x704   : > { %v6795_v60 = vpop.xlane.xlu1 %6794  ;;  %v7394_v57 = vsel %vm7393_vm13, %v7383_v13, 0.0  ;;  %v7286_v51 = vsel %vm7276_vm10, %v7249_v29, %v7285_v5 }
 0x705   : > { %v7266_v10 = vrot.slane %v7089_v21, %v11614_v11  ;;  %v7376_v25 = vrot.slane %v6795_v60, %v11468_v16  ;;  %7395 = vadd.xlane.f32.xlu0 %v7394_v57  ;;  %v7287_v11 = vsel %vm7278_vm11, %v7258_v31, %v7286_v51 }
 0x707   : > { %v7390_v42 = vsel %vm7280_vm12, %v7376_v25, %v7389_v46  ;;  %v7267_v55 = vsel %vm7131_vm9, %v7266_v10, %v7262_v20 }
 0x708   : > { %v7397_v17 = vsel %vm7393_vm13, %v7390_v42, 0.0  ;;  %v7288_v16 = vsel %vm7280_vm12, %v7267_v55, %v7287_v11 }
 0x709   : > { %7292 = vadd.xlane.f32.xlu0 %v7291_v47  ;;  %7398 = vadd.xlane.f32.xlu1 %v7397_v17  ;;  %v7294_v26 = vsel %vm6929_vm7, %v7288_v16, 0.0 }
 0x70d   : > { %7295 = vadd.xlane.f32.xlu1 %v7294_v26 }
 0x78e   : > { %v7396_v62 = vpop.xlane.xlu0 %7395 }
 0x78f   : > { %v7400_v0 = vmul.f32 20.0, %v7396_v62 }
 0x792   : > { %v7399_v2 = vpop.xlane.xlu1 %7398  ;;  %v7293_v49 = vpop.xlane.xlu0 %7292 }
 0x793   : > { %v7402_v45 = vsub.f32 %v7293_v49, %v7400_v0  ;;  %v7401_v22 = vmul.f32 20.0, %v7399_v2 }
 0x795   : > { %v7405_v44 = vmul.f32 0.0625, %v7402_v45 }
 0x796   : > { %v7296_v58 = vpop.xlane.xlu1 %7295 }
 0x797   : > { %7408 = vst.msk [vmem:[%s381_s24] sm:$0xff] %vm7407_vm14, %v7405_v44  ;;  %v7403_v23 = vsub.f32 %v7296_v58, %v7401_v22 }
 0x799   : > { %v7406_v8 = vmul.f32 0.0625, %v7403_v23 }
 0x79b   : > { %7409 = vst.msk [vmem:[%s381_s24 + $0x8] sm:$0xff] %vm7407_vm14, %v7406_v8 }
 0x79c PF: > { %p20_p3 = scmp.ge.s32.totalorder %s9285_s15, 4   ;;  %s12005_s24 = smov %s9122_s25 }
 0x79d   : > { %s12006_s25 = smov %s9126_s26  ;;  %s12007_s26 = smov %s9297_s18 }
 0x79e   : > { %s12008_s27 = smov %s9285_s15  ;;  %22 = sbr.rel (!%p20_p3) target bundleno = 6 (0x6), region = 112 }
 0x7a3   :  { %7432 = vsyncpa [#allocation3], 1 }
 0x7a4   :  { %7434 = vsyncpa [#allocation3 + $0x1], 1 }
 0x7a5   :  { %7435 = vsyncpa [#allocation5], 1 }
 0x7a6   :  { %7436 = vsyncpa [#allocation8], 1 }
 0x7a7   :  { %7437 = vsyncpa [#allocation11], 1 }

</bundles_post_ra>
